<compile_context>
chip_gen: v5e
topology: v5e:2x2
jax: 0.10.0
libtpu: 0.0.40
codegen_flags: <defaults>
</compile_context>

<pallas_src>
import functools

import jax
import jax.numpy as jnp
from jax.experimental import pallas as pl
from jax.experimental.pallas import tpu as pltpu

_N_LAYERS = 15  # 3 RDBs x 5 convs


# -----------------------------------------------------------------------------
# Fused RRDB kernel: one grid step == one batch element, everything in VMEM.
# -----------------------------------------------------------------------------
def _rrdb_kernel(x_ref, mpos_ref, mneg_ref, *args, nf, gc, H, W):
    # x_ref    : (nf, S)   RRDB input, S = H*W (lane-dense spatial)
    # mpos_ref : (1, S)    0/1 mask of valid lanes for a dx=+1 tap
    # mneg_ref : (1, S)    0/1 mask of valid lanes for a dx=-1 tap
    # args     : 15 weights (Cout_k, 9*Cin_k)  im2col-packed
    #            15 biases  (Cout_k, 1)
    #            o_ref (nf, S)
    #            col_ref (9*(nf+4*gc), S) scratch  -- shared im2col buffer
    #            pad_ref (max(nf,gc), ml+S+W+1) scratch -- zero-margined rows
    S = H * W
    w_refs = args[0:_N_LAYERS]
    b_refs = args[_N_LAYERS:2 * _N_LAYERS]
    o_ref = args[2 * _N_LAYERS]
    col_ref = args[2 * _N_LAYERS + 1]
    pad_ref = args[2 * _N_LAYERS + 2]

    cdt = col_ref.dtype
    c_pad, w_pad = pad_ref.shape
    ml = w_pad - S - (W + 1)          # lane-aligned left halo margin

    # Zero the halo margins once; vertical (dy) zero padding then comes for
    # free from tap reads that land in the margins.
    pad_ref[:, 0:ml] = jnp.zeros((c_pad, ml), cdt)
    pad_ref[:, ml + S:w_pad] = jnp.zeros((c_pad, W + 1), cdt)

    mpos = mpos_ref[...].astype(cdt)   # (1, S)
    mneg = mneg_ref[...].astype(cdt)   # (1, S)

    def write_im2col(row_off, a):
        # Write the 9 shifted 3x3 taps of `a` (C, S) into col_ref rows
        # [row_off, row_off + 9*C)  (row order: tap-major, channel-minor).
        a = a.astype(cdt)
        c = a.shape[0]
        pad_ref[0:c, ml:ml + S] = a
        for ky in range(3):            # dy = ky - 1
            for kx in range(3):        # dx = kx - 1
                off = (ky - 1) * W + (kx - 1)
                tap = pad_ref[0:c, ml + off:ml + off + S]
                if kx == 2:            # dx = +1: kill row-wrapped right column
                    tap = tap * mpos
                elif kx == 0:          # dx = -1: kill row-wrapped left column
                    tap = tap * mneg
                t = 3 * ky + kx
                col_ref[row_off + t * c:row_off + (t + 1) * c, :] = tap

    x_in = x_ref[...].astype(jnp.float32)   # (nf, S)
    cur = x_in                              # current RDB input
    for r in range(3):                      # 3 dense blocks
        write_im2col(0, cur)                # concat chunk 0 = RDB input
        rows = 9 * nf
        for layer in range(5):
            li = r * 5 + layer
            wm = w_refs[li][...]            # (Cout, 9*Cin_layer)
            acc = jnp.dot(wm, col_ref[0:rows, :],
                          preferred_element_type=jnp.float32)
            acc = acc + b_refs[li][...].astype(jnp.float32)   # (Cout,1) bcast
            if layer < 4:
                acc = jnp.maximum(acc, 0.2 * acc)   # LeakyReLU(0.2)
                write_im2col(rows, acc)             # becomes next concat chunk
                rows += 9 * gc
            else:
                cur = acc * 0.2 + cur               # RDB residual (folded)
    o_ref[...] = (cur * 0.2 + x_in).astype(o_ref.dtype)       # outer residual


# -----------------------------------------------------------------------------
# Wrapper: NCHW API, weight packing, BlockSpecs / grid.
# -----------------------------------------------------------------------------
def _pack_conv_weight(w_oihw, chunk_sizes, dtype):
    """(Cout, Cin, 3, 3) PyTorch weight -> (Cout, 9*Cin) matrix whose K axis
    matches the kernel's im2col row order: [chunk][tap(ky,kx)][channel]."""
    cout = w_oihw.shape[0]
    blocks, base = [], 0
    for cj in chunk_sizes:
        blk = w_oihw[:, base:base + cj, :, :]                 # (Cout, cj, 3, 3)
        blk = jnp.transpose(blk, (0, 2, 3, 1)).reshape(cout, 9 * cj)
        blocks.append(blk)
        base += cj
    return jnp.concatenate(blocks, axis=1).astype(dtype)


def rrdb_forward(x_nchw, params, *, matmul_dtype=jnp.float32):
    """RRDB forward. x_nchw: (N, nf, H, W); params: 3 x 5 x (w_OIHW, bias)."""
    N, nf, H, W = x_nchw.shape
    gc = params[0][0][0].shape[0]     # conv1 Cout
    S = H * W

    # Pack weights once into im2col-ordered (Cout, 9*Cin) matrices; biases 2-D.
    w_list, b_list = [], []
    for rdb in params:
        for i, (w, b) in enumerate(rdb):
            chunk_sizes = [nf] + [gc] * i
            w_list.append(_pack_conv_weight(w, chunk_sizes, matmul_dtype))
            b_list.append(b.reshape(-1, 1).astype(jnp.float32))

    # 0/1 lane masks for the horizontal (dx = +/-1) taps.
    w_pos = jnp.arange(S, dtype=jnp.int32) % W
    mask_pos = (w_pos < (W - 1)).astype(matmul_dtype).reshape(1, S)
    mask_neg = (w_pos >= 1).astype(matmul_dtype).reshape(1, S)

    x_flat = x_nchw.reshape(N, nf, S)   # lane-dense (C, H*W); no transpose

    cin_max = nf + 4 * gc
    c_pad = max(nf, gc)
    ml = ((W + 1 + 127) // 128) * 128   # lane-aligned left halo margin
    pad_w = ml + S + (W + 1)

    kernel = functools.partial(_rrdb_kernel, nf=nf, gc=gc, H=H, W=W)

    const_spec = lambda shape: pl.BlockSpec(shape, lambda n: (0, 0))
    in_specs = (
        [pl.BlockSpec((None, nf, S), lambda n: (n, 0, 0)),
         const_spec((1, S)), const_spec((1, S))]
        + [const_spec(wm.shape) for wm in w_list]
        + [const_spec(bm.shape) for bm in b_list]
    )

    out_flat = pl.pallas_call(
        kernel,
        out_shape=jax.ShapeDtypeStruct((N, nf, S), x_nchw.dtype),
        grid_spec=pltpu.PrefetchScalarGridSpec(
            num_scalar_prefetch=0,
            grid=(N,),
            in_specs=in_specs,
            out_specs=pl.BlockSpec((None, nf, S), lambda n: (n, 0, 0)),
            scratch_shapes=[
                pltpu.VMEM((9 * cin_max, S), matmul_dtype),   # shared im2col
                pltpu.VMEM((c_pad, pad_w), matmul_dtype),     # halo row buffer
            ],
        ),
        compiler_params=pltpu.CompilerParams(
            dimension_semantics=("parallel",)),
    )(x_flat, mask_pos, mask_neg, *w_list, *b_list)

    # TODO(synk): for production sizes (nf=64, gc=32, large H*W) add a spatial
    # tile grid axis with a 1-pixel halo, size tiles per-generation (v7x has
    # only 64 MiB VMEM), and switch matmul_dtype to bfloat16 for 2x MXU rate.
    return out_flat.reshape(N, nf, H, W)


# -----------------------------------------------------------------------------
# Parameter init (mimics mutil.initialize_weights: Kaiming-normal * 0.1, b=0).
# Weights stored in PyTorch OIHW layout.
# -----------------------------------------------------------------------------
def _init_conv(key, cin, cout, scale=0.1):
    std = (2.0 / (cin * 9)) ** 0.5
    w = jax.random.normal(key, (cout, cin, 3, 3), dtype=jnp.float32) * std * scale
    b = jnp.zeros((cout,), dtype=jnp.float32)
    return w, b


def init_rdb_params(key, nf, gc):
    ks = jax.random.split(key, 5)
    return [_init_conv(ks[0], nf, gc),
            _init_conv(ks[1], nf + gc, gc),
            _init_conv(ks[2], nf + 2 * gc, gc),
            _init_conv(ks[3], nf + 3 * gc, gc),
            _init_conv(ks[4], nf + 4 * gc, nf)]


def init_rrdb_params(key, nf, gc):
    k1, k2, k3 = jax.random.split(key, 3)
    return [init_rdb_params(k1, nf, gc),
            init_rdb_params(k2, nf, gc),
            init_rdb_params(k3, nf, gc)]


# -----------------------------------------------------------------------------
# Pure-JAX reference (used only for the in-script correctness check).
# -----------------------------------------------------------------------------
def _conv_ref(x, w, b, lrelu):
    y = jax.lax.conv_general_dilated(
        x, w, window_strides=(1, 1), padding=((1, 1), (1, 1)),
        dimension_numbers=("NCHW", "OIHW", "NCHW"),
        precision=jax.lax.Precision.HIGHEST)
    y = y + b[None, :, None, None]
    return jnp.where(y >= 0, y, 0.2 * y) if lrelu else y


def rrdb_reference(x, params):
    def rdb(x, p):
        (w1, b1), (w2, b2), (w3, b3), (w4, b4), (w5, b5) = p
        x1 = _conv_ref(x, w1, b1, True)
        x2 = _conv_ref(jnp.concatenate((x, x1), 1), w2, b2, True)
        x3 = _conv_ref(jnp.concatenate((x, x1, x2), 1), w3, b3, True)
        x4 = _conv_ref(jnp.concatenate((x, x1, x2, x3), 1), w4, b4, True)
        x5 = _conv_ref(jnp.concatenate((x, x1, x2, x3, x4), 1), w5, b5, False)
        return x5 * 0.2 + x
    out = rdb(x, params[0])
    out = rdb(out, params[1])
    out = rdb(out, params[2])
    return out * 0.2 + x


# -----------------------------------------------------------------------------
if __name__ == "__main__":
    nf, gc = 8, 8
    N, H, W = 2, 16, 16

    key = jax.random.PRNGKey(0)
    kx, kp = jax.random.split(key)
    x = jax.random.normal(kx, (N, nf, H, W), dtype=jnp.float32)   # NCHW input
    params = init_rrdb_params(kp, nf, gc)

    out = jax.block_until_ready(jax.jit(rrdb_forward)(x, params))
    assert out.shape == (N, nf, H, W)

    ref = jax.block_until_ready(jax.jit(rrdb_reference)(x, params))
    err = float(jnp.max(jnp.abs(out - ref)))
    assert err < 1e-2, f"mismatch vs reference: max |diff| = {err}"

    print("KERNEL_OK")
</pallas_src>

<mosaic_0001>
module attributes {stable_mosaic.version = 11 : i64} {
  func.func @_rrdb_kernel(%arg0: i32, %arg1: memref<1x8x256xf32, #tpu.memory_space<vmem>>, %arg2: memref<1x256xf32, #tpu.memory_space<vmem>>, %arg3: memref<1x256xf32, #tpu.memory_space<vmem>>, %arg4: memref<8x72xf32, #tpu.memory_space<vmem>>, %arg5: memref<8x144xf32, #tpu.memory_space<vmem>>, %arg6: memref<8x216xf32, #tpu.memory_space<vmem>>, %arg7: memref<8x288xf32, #tpu.memory_space<vmem>>, %arg8: memref<8x360xf32, #tpu.memory_space<vmem>>, %arg9: memref<8x72xf32, #tpu.memory_space<vmem>>, %arg10: memref<8x144xf32, #tpu.memory_space<vmem>>, %arg11: memref<8x216xf32, #tpu.memory_space<vmem>>, %arg12: memref<8x288xf32, #tpu.memory_space<vmem>>, %arg13: memref<8x360xf32, #tpu.memory_space<vmem>>, %arg14: memref<8x72xf32, #tpu.memory_space<vmem>>, %arg15: memref<8x144xf32, #tpu.memory_space<vmem>>, %arg16: memref<8x216xf32, #tpu.memory_space<vmem>>, %arg17: memref<8x288xf32, #tpu.memory_space<vmem>>, %arg18: memref<8x360xf32, #tpu.memory_space<vmem>>, %arg19: memref<8x1xf32, #tpu.memory_space<vmem>>, %arg20: memref<8x1xf32, #tpu.memory_space<vmem>>, %arg21: memref<8x1xf32, #tpu.memory_space<vmem>>, %arg22: memref<8x1xf32, #tpu.memory_space<vmem>>, %arg23: memref<8x1xf32, #tpu.memory_space<vmem>>, %arg24: memref<8x1xf32, #tpu.memory_space<vmem>>, %arg25: memref<8x1xf32, #tpu.memory_space<vmem>>, %arg26: memref<8x1xf32, #tpu.memory_space<vmem>>, %arg27: memref<8x1xf32, #tpu.memory_space<vmem>>, %arg28: memref<8x1xf32, #tpu.memory_space<vmem>>, %arg29: memref<8x1xf32, #tpu.memory_space<vmem>>, %arg30: memref<8x1xf32, #tpu.memory_space<vmem>>, %arg31: memref<8x1xf32, #tpu.memory_space<vmem>>, %arg32: memref<8x1xf32, #tpu.memory_space<vmem>>, %arg33: memref<8x1xf32, #tpu.memory_space<vmem>>, %arg34: memref<1x8x256xf32, #tpu.memory_space<vmem>>, %arg35: memref<360x256xf32, #tpu.memory_space<vmem>>, %arg36: memref<8x401xf32, #tpu.memory_space<vmem>>) attributes {dimension_semantics = [#tpu.dimension_semantics<parallel>], iteration_bounds = array<i64: 2>, scalar_prefetch = 0 : i64, scratch_operands = 2 : i64, tpu.core_type = #tpu.core_type<tc>, window_params = [{transform_indices = @transform_0, window_bounds = array<i64: 1, 8, 256>}, {pipeline_mode = #tpu.pipeline_mode<synchronous>, transform_indices = @transform_1, window_bounds = array<i64: 1, 256>}, {pipeline_mode = #tpu.pipeline_mode<synchronous>, transform_indices = @transform_2, window_bounds = array<i64: 1, 256>}, {pipeline_mode = #tpu.pipeline_mode<synchronous>, transform_indices = @transform_3, window_bounds = array<i64: 8, 72>}, {pipeline_mode = #tpu.pipeline_mode<synchronous>, transform_indices = @transform_4, window_bounds = array<i64: 8, 144>}, {pipeline_mode = #tpu.pipeline_mode<synchronous>, transform_indices = @transform_5, window_bounds = array<i64: 8, 216>}, {pipeline_mode = #tpu.pipeline_mode<synchronous>, transform_indices = @transform_6, window_bounds = array<i64: 8, 288>}, {pipeline_mode = #tpu.pipeline_mode<synchronous>, transform_indices = @transform_7, window_bounds = array<i64: 8, 360>}, {pipeline_mode = #tpu.pipeline_mode<synchronous>, transform_indices = @transform_8, window_bounds = array<i64: 8, 72>}, {pipeline_mode = #tpu.pipeline_mode<synchronous>, transform_indices = @transform_9, window_bounds = array<i64: 8, 144>}, {pipeline_mode = #tpu.pipeline_mode<synchronous>, transform_indices = @transform_10, window_bounds = array<i64: 8, 216>}, {pipeline_mode = #tpu.pipeline_mode<synchronous>, transform_indices = @transform_11, window_bounds = array<i64: 8, 288>}, {pipeline_mode = #tpu.pipeline_mode<synchronous>, transform_indices = @transform_12, window_bounds = array<i64: 8, 360>}, {pipeline_mode = #tpu.pipeline_mode<synchronous>, transform_indices = @transform_13, window_bounds = array<i64: 8, 72>}, {pipeline_mode = #tpu.pipeline_mode<synchronous>, transform_indices = @transform_14, window_bounds = array<i64: 8, 144>}, {pipeline_mode = #tpu.pipeline_mode<synchronous>, transform_indices = @transform_15, window_bounds = array<i64: 8, 216>}, {pipeline_mode = #tpu.pipeline_mode<synchronous>, transform_indices = @transform_16, window_bounds = array<i64: 8, 288>}, {pipeline_mode = #tpu.pipeline_mode<synchronous>, transform_indices = @transform_17, window_bounds = array<i64: 8, 360>}, {pipeline_mode = #tpu.pipeline_mode<synchronous>, transform_indices = @transform_18, window_bounds = array<i64: 8, 1>}, {pipeline_mode = #tpu.pipeline_mode<synchronous>, transform_indices = @transform_19, window_bounds = array<i64: 8, 1>}, {pipeline_mode = #tpu.pipeline_mode<synchronous>, transform_indices = @transform_20, window_bounds = array<i64: 8, 1>}, {pipeline_mode = #tpu.pipeline_mode<synchronous>, transform_indices = @transform_21, window_bounds = array<i64: 8, 1>}, {pipeline_mode = #tpu.pipeline_mode<synchronous>, transform_indices = @transform_22, window_bounds = array<i64: 8, 1>}, {pipeline_mode = #tpu.pipeline_mode<synchronous>, transform_indices = @transform_23, window_bounds = array<i64: 8, 1>}, {pipeline_mode = #tpu.pipeline_mode<synchronous>, transform_indices = @transform_24, window_bounds = array<i64: 8, 1>}, {pipeline_mode = #tpu.pipeline_mode<synchronous>, transform_indices = @transform_25, window_bounds = array<i64: 8, 1>}, {pipeline_mode = #tpu.pipeline_mode<synchronous>, transform_indices = @transform_26, window_bounds = array<i64: 8, 1>}, {pipeline_mode = #tpu.pipeline_mode<synchronous>, transform_indices = @transform_27, window_bounds = array<i64: 8, 1>}, {pipeline_mode = #tpu.pipeline_mode<synchronous>, transform_indices = @transform_28, window_bounds = array<i64: 8, 1>}, {pipeline_mode = #tpu.pipeline_mode<synchronous>, transform_indices = @transform_29, window_bounds = array<i64: 8, 1>}, {pipeline_mode = #tpu.pipeline_mode<synchronous>, transform_indices = @transform_30, window_bounds = array<i64: 8, 1>}, {pipeline_mode = #tpu.pipeline_mode<synchronous>, transform_indices = @transform_31, window_bounds = array<i64: 8, 1>}, {pipeline_mode = #tpu.pipeline_mode<synchronous>, transform_indices = @transform_32, window_bounds = array<i64: 8, 1>}, {transform_indices = @transform_33, window_bounds = array<i64: 1, 8, 256>}]} {
    %cst = arith.constant 0.000000e+00 : f32
    %0 = vector.broadcast %cst : f32 to vector<8x128xf32>
    %c0 = arith.constant 0 : index
    %c0_0 = arith.constant 0 : index
    %1 = vector.load %arg36[%c0, %c0_0] : memref<8x401xf32, #tpu.memory_space<vmem>>, vector<8x128xf32>
    tpu.vector_store %arg36[%c0, %c0_0], %0 {strides = array<i32>} : memref<8x401xf32, #tpu.memory_space<vmem>>, vector<8x128xf32>,
    %cst_1 = arith.constant 0.000000e+00 : f32
    %2 = vector.broadcast %cst_1 : f32 to vector<8x17xf32>
    %c0_2 = arith.constant 0 : index
    %c384 = arith.constant 384 : index
    %3 = vector.load %arg36[%c0_2, %c384] : memref<8x401xf32, #tpu.memory_space<vmem>>, vector<8x17xf32>
    tpu.vector_store %arg36[%c0_2, %c384], %2 {strides = array<i32>} : memref<8x401xf32, #tpu.memory_space<vmem>>, vector<8x17xf32>,
    %c0_3 = arith.constant 0 : index
    %c0_4 = arith.constant 0 : index
    %4 = vector.load %arg2[%c0_3, %c0_4] : memref<1x256xf32, #tpu.memory_space<vmem>>, vector<1x256xf32>
    %c0_5 = arith.constant 0 : index
    %c0_6 = arith.constant 0 : index
    %5 = vector.load %arg3[%c0_5, %c0_6] : memref<1x256xf32, #tpu.memory_space<vmem>>, vector<1x256xf32>
    %c0_7 = arith.constant 0 : index
    %c0_8 = arith.constant 0 : index
    %c0_9 = arith.constant 0 : index
    %6 = vector.load %arg1[%c0_7, %c0_8, %c0_9] : memref<1x8x256xf32, #tpu.memory_space<vmem>>, vector<1x8x256xf32>
    %7 = vector.shape_cast %6 : vector<1x8x256xf32> to vector<8x256xf32>
    %c0_10 = arith.constant 0 : index
    %c128 = arith.constant 128 : index
    %8 = vector.load %arg36[%c0_10, %c128] : memref<8x401xf32, #tpu.memory_space<vmem>>, vector<8x256xf32>
    tpu.vector_store %arg36[%c0_10, %c128], %7 {strides = array<i32>} : memref<8x401xf32, #tpu.memory_space<vmem>>, vector<8x256xf32>,
    %c0_11 = arith.constant 0 : index
    %c111 = arith.constant 111 : index
    %9 = vector.load %arg36[%c0_11, %c111] : memref<8x401xf32, #tpu.memory_space<vmem>>, vector<8x256xf32>
    %10 = vector.broadcast %5 : vector<1x256xf32> to vector<8x256xf32>
    %11 = arith.mulf %9, %10 : vector<8x256xf32>
    %c0_12 = arith.constant 0 : index
    %c0_13 = arith.constant 0 : index
    %12 = vector.load %arg35[%c0_12, %c0_13] : memref<360x256xf32, #tpu.memory_space<vmem>>, vector<8x256xf32>
    tpu.vector_store %arg35[%c0_12, %c0_13], %11 {strides = array<i32>} : memref<360x256xf32, #tpu.memory_space<vmem>>, vector<8x256xf32>,
    %c0_14 = arith.constant 0 : index
    %c112 = arith.constant 112 : index
    %13 = vector.load %arg36[%c0_14, %c112] : memref<8x401xf32, #tpu.memory_space<vmem>>, vector<8x256xf32>
    %c8 = arith.constant 8 : index
    %c0_15 = arith.constant 0 : index
    %14 = vector.load %arg35[%c8, %c0_15] : memref<360x256xf32, #tpu.memory_space<vmem>>, vector<8x256xf32>
    tpu.vector_store %arg35[%c8, %c0_15], %13 {strides = array<i32>} : memref<360x256xf32, #tpu.memory_space<vmem>>, vector<8x256xf32>,
    %c0_16 = arith.constant 0 : index
    %c113 = arith.constant 113 : index
    %15 = vector.load %arg36[%c0_16, %c113] : memref<8x401xf32, #tpu.memory_space<vmem>>, vector<8x256xf32>
    %16 = vector.broadcast %4 : vector<1x256xf32> to vector<8x256xf32>
    %17 = arith.mulf %15, %16 : vector<8x256xf32>
    %c16 = arith.constant 16 : index
    %c0_17 = arith.constant 0 : index
    %18 = vector.load %arg35[%c16, %c0_17] : memref<360x256xf32, #tpu.memory_space<vmem>>, vector<8x256xf32>
    tpu.vector_store %arg35[%c16, %c0_17], %17 {strides = array<i32>} : memref<360x256xf32, #tpu.memory_space<vmem>>, vector<8x256xf32>,
    %c0_18 = arith.constant 0 : index
    %c127 = arith.constant 127 : index
    %19 = vector.load %arg36[%c0_18, %c127] : memref<8x401xf32, #tpu.memory_space<vmem>>, vector<8x256xf32>
    %20 = vector.broadcast %5 : vector<1x256xf32> to vector<8x256xf32>
    %21 = arith.mulf %19, %20 : vector<8x256xf32>
    %c24 = arith.constant 24 : index
    %c0_19 = arith.constant 0 : index
    %22 = vector.load %arg35[%c24, %c0_19] : memref<360x256xf32, #tpu.memory_space<vmem>>, vector<8x256xf32>
    tpu.vector_store %arg35[%c24, %c0_19], %21 {strides = array<i32>} : memref<360x256xf32, #tpu.memory_space<vmem>>, vector<8x256xf32>,
    %c0_20 = arith.constant 0 : index
    %c128_21 = arith.constant 128 : index
    %23 = vector.load %arg36[%c0_20, %c128_21] : memref<8x401xf32, #tpu.memory_space<vmem>>, vector<8x256xf32>
    %c32 = arith.constant 32 : index
    %c0_22 = arith.constant 0 : index
    %24 = vector.load %arg35[%c32, %c0_22] : memref<360x256xf32, #tpu.memory_space<vmem>>, vector<8x256xf32>
    tpu.vector_store %arg35[%c32, %c0_22], %23 {strides = array<i32>} : memref<360x256xf32, #tpu.memory_space<vmem>>, vector<8x256xf32>,
    %c0_23 = arith.constant 0 : index
    %c129 = arith.constant 129 : index
    %25 = vector.load %arg36[%c0_23, %c129] : memref<8x401xf32, #tpu.memory_space<vmem>>, vector<8x256xf32>
    %26 = vector.broadcast %4 : vector<1x256xf32> to vector<8x256xf32>
    %27 = arith.mulf %25, %26 : vector<8x256xf32>
    %c40 = arith.constant 40 : index
    %c0_24 = arith.constant 0 : index
    %28 = vector.load %arg35[%c40, %c0_24] : memref<360x256xf32, #tpu.memory_space<vmem>>, vector<8x256xf32>
    tpu.vector_store %arg35[%c40, %c0_24], %27 {strides = array<i32>} : memref<360x256xf32, #tpu.memory_space<vmem>>, vector<8x256xf32>,
    %c0_25 = arith.constant 0 : index
    %c143 = arith.constant 143 : index
    %29 = vector.load %arg36[%c0_25, %c143] : memref<8x401xf32, #tpu.memory_space<vmem>>, vector<8x256xf32>
    %30 = vector.broadcast %5 : vector<1x256xf32> to vector<8x256xf32>
    %31 = arith.mulf %29, %30 : vector<8x256xf32>
    %c48 = arith.constant 48 : index
    %c0_26 = arith.constant 0 : index
    %32 = vector.load %arg35[%c48, %c0_26] : memref<360x256xf32, #tpu.memory_space<vmem>>, vector<8x256xf32>
    tpu.vector_store %arg35[%c48, %c0_26], %31 {strides = array<i32>} : memref<360x256xf32, #tpu.memory_space<vmem>>, vector<8x256xf32>,
    %c0_27 = arith.constant 0 : index
    %c144 = arith.constant 144 : index
    %33 = vector.load %arg36[%c0_27, %c144] : memref<8x401xf32, #tpu.memory_space<vmem>>, vector<8x256xf32>
    %c56 = arith.constant 56 : index
    %c0_28 = arith.constant 0 : index
    %34 = vector.load %arg35[%c56, %c0_28] : memref<360x256xf32, #tpu.memory_space<vmem>>, vector<8x256xf32>
    tpu.vector_store %arg35[%c56, %c0_28], %33 {strides = array<i32>} : memref<360x256xf32, #tpu.memory_space<vmem>>, vector<8x256xf32>,
    %c0_29 = arith.constant 0 : index
    %c145 = arith.constant 145 : index
    %35 = vector.load %arg36[%c0_29, %c145] : memref<8x401xf32, #tpu.memory_space<vmem>>, vector<8x256xf32>
    %36 = vector.broadcast %4 : vector<1x256xf32> to vector<8x256xf32>
    %37 = arith.mulf %35, %36 : vector<8x256xf32>
    %c64 = arith.constant 64 : index
    %c0_30 = arith.constant 0 : index
    %38 = vector.load %arg35[%c64, %c0_30] : memref<360x256xf32, #tpu.memory_space<vmem>>, vector<8x256xf32>
    tpu.vector_store %arg35[%c64, %c0_30], %37 {strides = array<i32>} : memref<360x256xf32, #tpu.memory_space<vmem>>, vector<8x256xf32>,
    %c0_31 = arith.constant 0 : index
    %c0_32 = arith.constant 0 : index
    %39 = vector.load %arg4[%c0_31, %c0_32] : memref<8x72xf32, #tpu.memory_space<vmem>>, vector<8x72xf32>
    %c0_33 = arith.constant 0 : index
    %c0_34 = arith.constant 0 : index
    %40 = vector.load %arg35[%c0_33, %c0_34] : memref<360x256xf32, #tpu.memory_space<vmem>>, vector<72x256xf32>
    %cst_35 = arith.constant dense<0.000000e+00> : vector<8x256xf32>
    %41 = tpu.matmul %39, %40, %cst_35 {dimension_numbers = #tpu.dot_dimension_numbers<[1], [0], [0], [1], [0, 0, 1, 1], [], []>} : vector<8x72xf32>, vector<72x256xf32>, vector<8x256xf32> -> vector<8x256xf32>
    %c0_36 = arith.constant 0 : index
    %c0_37 = arith.constant 0 : index
    %42 = vector.load %arg19[%c0_36, %c0_37] : memref<8x1xf32, #tpu.memory_space<vmem>>, vector<8x1xf32>
    %43 = vector.broadcast %42 : vector<8x1xf32> to vector<8x256xf32>
    %44 = arith.addf %41, %43 : vector<8x256xf32>
    %cst_38 = arith.constant 2.000000e-01 : f32
    %45 = vector.broadcast %cst_38 : f32 to vector<8x256xf32>
    %46 = arith.mulf %45, %44 : vector<8x256xf32>
    %47 = arith.maximumf %44, %46 : vector<8x256xf32>
    %c0_39 = arith.constant 0 : index
    %c128_40 = arith.constant 128 : index
    %48 = vector.load %arg36[%c0_39, %c128_40] : memref<8x401xf32, #tpu.memory_space<vmem>>, vector<8x256xf32>
    tpu.vector_store %arg36[%c0_39, %c128_40], %47 {strides = array<i32>} : memref<8x401xf32, #tpu.memory_space<vmem>>, vector<8x256xf32>,
    %c0_41 = arith.constant 0 : index
    %c111_42 = arith.constant 111 : index
    %49 = vector.load %arg36[%c0_41, %c111_42] : memref<8x401xf32, #tpu.memory_space<vmem>>, vector<8x256xf32>
    %50 = vector.broadcast %5 : vector<1x256xf32> to vector<8x256xf32>
    %51 = arith.mulf %49, %50 : vector<8x256xf32>
    %c72 = arith.constant 72 : index
    %c0_43 = arith.constant 0 : index
    %52 = vector.load %arg35[%c72, %c0_43] : memref<360x256xf32, #tpu.memory_space<vmem>>, vector<8x256xf32>
    tpu.vector_store %arg35[%c72, %c0_43], %51 {strides = array<i32>} : memref<360x256xf32, #tpu.memory_space<vmem>>, vector<8x256xf32>,
    %c0_44 = arith.constant 0 : index
    %c112_45 = arith.constant 112 : index
    %53 = vector.load %arg36[%c0_44, %c112_45] : memref<8x401xf32, #tpu.memory_space<vmem>>, vector<8x256xf32>
    %c80 = arith.constant 80 : index
    %c0_46 = arith.constant 0 : index
    %54 = vector.load %arg35[%c80, %c0_46] : memref<360x256xf32, #tpu.memory_space<vmem>>, vector<8x256xf32>
    tpu.vector_store %arg35[%c80, %c0_46], %53 {strides = array<i32>} : memref<360x256xf32, #tpu.memory_space<vmem>>, vector<8x256xf32>,
    %c0_47 = arith.constant 0 : index
    %c113_48 = arith.constant 113 : index
    %55 = vector.load %arg36[%c0_47, %c113_48] : memref<8x401xf32, #tpu.memory_space<vmem>>, vector<8x256xf32>
    %56 = vector.broadcast %4 : vector<1x256xf32> to vector<8x256xf32>
    %57 = arith.mulf %55, %56 : vector<8x256xf32>
    %c88 = arith.constant 88 : index
    %c0_49 = arith.constant 0 : index
    %58 = vector.load %arg35[%c88, %c0_49] : memref<360x256xf32, #tpu.memory_space<vmem>>, vector<8x256xf32>
    tpu.vector_store %arg35[%c88, %c0_49], %57 {strides = array<i32>} : memref<360x256xf32, #tpu.memory_space<vmem>>, vector<8x256xf32>,
    %c0_50 = arith.constant 0 : index
    %c127_51 = arith.constant 127 : index
    %59 = vector.load %arg36[%c0_50, %c127_51] : memref<8x401xf32, #tpu.memory_space<vmem>>, vector<8x256xf32>
    %60 = vector.broadcast %5 : vector<1x256xf32> to vector<8x256xf32>
    %61 = arith.mulf %59, %60 : vector<8x256xf32>
    %c96 = arith.constant 96 : index
    %c0_52 = arith.constant 0 : index
    %62 = vector.load %arg35[%c96, %c0_52] : memref<360x256xf32, #tpu.memory_space<vmem>>, vector<8x256xf32>
    tpu.vector_store %arg35[%c96, %c0_52], %61 {strides = array<i32>} : memref<360x256xf32, #tpu.memory_space<vmem>>, vector<8x256xf32>,
    %c0_53 = arith.constant 0 : index
    %c128_54 = arith.constant 128 : index
    %63 = vector.load %arg36[%c0_53, %c128_54] : memref<8x401xf32, #tpu.memory_space<vmem>>, vector<8x256xf32>
    %c104 = arith.constant 104 : index
    %c0_55 = arith.constant 0 : index
    %64 = vector.load %arg35[%c104, %c0_55] : memref<360x256xf32, #tpu.memory_space<vmem>>, vector<8x256xf32>
    tpu.vector_store %arg35[%c104, %c0_55], %63 {strides = array<i32>} : memref<360x256xf32, #tpu.memory_space<vmem>>, vector<8x256xf32>,
    %c0_56 = arith.constant 0 : index
    %c129_57 = arith.constant 129 : index
    %65 = vector.load %arg36[%c0_56, %c129_57] : memref<8x401xf32, #tpu.memory_space<vmem>>, vector<8x256xf32>
    %66 = vector.broadcast %4 : vector<1x256xf32> to vector<8x256xf32>
    %67 = arith.mulf %65, %66 : vector<8x256xf32>
    %c112_58 = arith.constant 112 : index
    %c0_59 = arith.constant 0 : index
    %68 = vector.load %arg35[%c112_58, %c0_59] : memref<360x256xf32, #tpu.memory_space<vmem>>, vector<8x256xf32>
    tpu.vector_store %arg35[%c112_58, %c0_59], %67 {strides = array<i32>} : memref<360x256xf32, #tpu.memory_space<vmem>>, vector<8x256xf32>,
    %c0_60 = arith.constant 0 : index
    %c143_61 = arith.constant 143 : index
    %69 = vector.load %arg36[%c0_60, %c143_61] : memref<8x401xf32, #tpu.memory_space<vmem>>, vector<8x256xf32>
    %70 = vector.broadcast %5 : vector<1x256xf32> to vector<8x256xf32>
    %71 = arith.mulf %69, %70 : vector<8x256xf32>
    %c120 = arith.constant 120 : index
    %c0_62 = arith.constant 0 : index
    %72 = vector.load %arg35[%c120, %c0_62] : memref<360x256xf32, #tpu.memory_space<vmem>>, vector<8x256xf32>
    tpu.vector_store %arg35[%c120, %c0_62], %71 {strides = array<i32>} : memref<360x256xf32, #tpu.memory_space<vmem>>, vector<8x256xf32>,
    %c0_63 = arith.constant 0 : index
    %c144_64 = arith.constant 144 : index
    %73 = vector.load %arg36[%c0_63, %c144_64] : memref<8x401xf32, #tpu.memory_space<vmem>>, vector<8x256xf32>
    %c128_65 = arith.constant 128 : index
    %c0_66 = arith.constant 0 : index
    %74 = vector.load %arg35[%c128_65, %c0_66] : memref<360x256xf32, #tpu.memory_space<vmem>>, vector<8x256xf32>
    tpu.vector_store %arg35[%c128_65, %c0_66], %73 {strides = array<i32>} : memref<360x256xf32, #tpu.memory_space<vmem>>, vector<8x256xf32>,
    %c0_67 = arith.constant 0 : index
    %c145_68 = arith.constant 145 : index
    %75 = vector.load %arg36[%c0_67, %c145_68] : memref<8x401xf32, #tpu.memory_space<vmem>>, vector<8x256xf32>
    %76 = vector.broadcast %4 : vector<1x256xf32> to vector<8x256xf32>
    %77 = arith.mulf %75, %76 : vector<8x256xf32>
    %c136 = arith.constant 136 : index
    %c0_69 = arith.constant 0 : index
    %78 = vector.load %arg35[%c136, %c0_69] : memref<360x256xf32, #tpu.memory_space<vmem>>, vector<8x256xf32>
    tpu.vector_store %arg35[%c136, %c0_69], %77 {strides = array<i32>} : memref<360x256xf32, #tpu.memory_space<vmem>>, vector<8x256xf32>,
    %c0_70 = arith.constant 0 : index
    %c0_71 = arith.constant 0 : index
    %79 = vector.load %arg5[%c0_70, %c0_71] : memref<8x144xf32, #tpu.memory_space<vmem>>, vector<8x144xf32>
    %c0_72 = arith.constant 0 : index
    %c0_73 = arith.constant 0 : index
    %80 = vector.load %arg35[%c0_72, %c0_73] : memref<360x256xf32, #tpu.memory_space<vmem>>, vector<144x256xf32>
    %cst_74 = arith.constant dense<0.000000e+00> : vector<8x256xf32>
    %81 = tpu.matmul %79, %80, %cst_74 {dimension_numbers = #tpu.dot_dimension_numbers<[1], [0], [0], [1], [0, 0, 1, 1], [], []>} : vector<8x144xf32>, vector<144x256xf32>, vector<8x256xf32> -> vector<8x256xf32>
    %c0_75 = arith.constant 0 : index
    %c0_76 = arith.constant 0 : index
    %82 = vector.load %arg20[%c0_75, %c0_76] : memref<8x1xf32, #tpu.memory_space<vmem>>, vector<8x1xf32>
    %83 = vector.broadcast %82 : vector<8x1xf32> to vector<8x256xf32>
    %84 = arith.addf %81, %83 : vector<8x256xf32>
    %cst_77 = arith.constant 2.000000e-01 : f32
    %85 = vector.broadcast %cst_77 : f32 to vector<8x256xf32>
    %86 = arith.mulf %85, %84 : vector<8x256xf32>
    %87 = arith.maximumf %84, %86 : vector<8x256xf32>
    %c0_78 = arith.constant 0 : index
    %c128_79 = arith.constant 128 : index
    %88 = vector.load %arg36[%c0_78, %c128_79] : memref<8x401xf32, #tpu.memory_space<vmem>>, vector<8x256xf32>
    tpu.vector_store %arg36[%c0_78, %c128_79], %87 {strides = array<i32>} : memref<8x401xf32, #tpu.memory_space<vmem>>, vector<8x256xf32>,
    %c0_80 = arith.constant 0 : index
    %c111_81 = arith.constant 111 : index
    %89 = vector.load %arg36[%c0_80, %c111_81] : memref<8x401xf32, #tpu.memory_space<vmem>>, vector<8x256xf32>
    %90 = vector.broadcast %5 : vector<1x256xf32> to vector<8x256xf32>
    %91 = arith.mulf %89, %90 : vector<8x256xf32>
    %c144_82 = arith.constant 144 : index
    %c0_83 = arith.constant 0 : index
    %92 = vector.load %arg35[%c144_82, %c0_83] : memref<360x256xf32, #tpu.memory_space<vmem>>, vector<8x256xf32>
    tpu.vector_store %arg35[%c144_82, %c0_83], %91 {strides = array<i32>} : memref<360x256xf32, #tpu.memory_space<vmem>>, vector<8x256xf32>,
    %c0_84 = arith.constant 0 : index
    %c112_85 = arith.constant 112 : index
    %93 = vector.load %arg36[%c0_84, %c112_85] : memref<8x401xf32, #tpu.memory_space<vmem>>, vector<8x256xf32>
    %c152 = arith.constant 152 : index
    %c0_86 = arith.constant 0 : index
    %94 = vector.load %arg35[%c152, %c0_86] : memref<360x256xf32, #tpu.memory_space<vmem>>, vector<8x256xf32>
    tpu.vector_store %arg35[%c152, %c0_86], %93 {strides = array<i32>} : memref<360x256xf32, #tpu.memory_space<vmem>>, vector<8x256xf32>,
    %c0_87 = arith.constant 0 : index
    %c113_88 = arith.constant 113 : index
    %95 = vector.load %arg36[%c0_87, %c113_88] : memref<8x401xf32, #tpu.memory_space<vmem>>, vector<8x256xf32>
    %96 = vector.broadcast %4 : vector<1x256xf32> to vector<8x256xf32>
    %97 = arith.mulf %95, %96 : vector<8x256xf32>
    %c160 = arith.constant 160 : index
    %c0_89 = arith.constant 0 : index
    %98 = vector.load %arg35[%c160, %c0_89] : memref<360x256xf32, #tpu.memory_space<vmem>>, vector<8x256xf32>
    tpu.vector_store %arg35[%c160, %c0_89], %97 {strides = array<i32>} : memref<360x256xf32, #tpu.memory_space<vmem>>, vector<8x256xf32>,
    %c0_90 = arith.constant 0 : index
    %c127_91 = arith.constant 127 : index
    %99 = vector.load %arg36[%c0_90, %c127_91] : memref<8x401xf32, #tpu.memory_space<vmem>>, vector<8x256xf32>
    %100 = vector.broadcast %5 : vector<1x256xf32> to vector<8x256xf32>
    %101 = arith.mulf %99, %100 : vector<8x256xf32>
    %c168 = arith.constant 168 : index
    %c0_92 = arith.constant 0 : index
    %102 = vector.load %arg35[%c168, %c0_92] : memref<360x256xf32, #tpu.memory_space<vmem>>, vector<8x256xf32>
    tpu.vector_store %arg35[%c168, %c0_92], %101 {strides = array<i32>} : memref<360x256xf32, #tpu.memory_space<vmem>>, vector<8x256xf32>,
    %c0_93 = arith.constant 0 : index
    %c128_94 = arith.constant 128 : index
    %103 = vector.load %arg36[%c0_93, %c128_94] : memref<8x401xf32, #tpu.memory_space<vmem>>, vector<8x256xf32>
    %c176 = arith.constant 176 : index
    %c0_95 = arith.constant 0 : index
    %104 = vector.load %arg35[%c176, %c0_95] : memref<360x256xf32, #tpu.memory_space<vmem>>, vector<8x256xf32>
    tpu.vector_store %arg35[%c176, %c0_95], %103 {strides = array<i32>} : memref<360x256xf32, #tpu.memory_space<vmem>>, vector<8x256xf32>,
    %c0_96 = arith.constant 0 : index
    %c129_97 = arith.constant 129 : index
    %105 = vector.load %arg36[%c0_96, %c129_97] : memref<8x401xf32, #tpu.memory_space<vmem>>, vector<8x256xf32>
    %106 = vector.broadcast %4 : vector<1x256xf32> to vector<8x256xf32>
    %107 = arith.mulf %105, %106 : vector<8x256xf32>
    %c184 = arith.constant 184 : index
    %c0_98 = arith.constant 0 : index
    %108 = vector.load %arg35[%c184, %c0_98] : memref<360x256xf32, #tpu.memory_space<vmem>>, vector<8x256xf32>
    tpu.vector_store %arg35[%c184, %c0_98], %107 {strides = array<i32>} : memref<360x256xf32, #tpu.memory_space<vmem>>, vector<8x256xf32>,
    %c0_99 = arith.constant 0 : index
    %c143_100 = arith.constant 143 : index
    %109 = vector.load %arg36[%c0_99, %c143_100] : memref<8x401xf32, #tpu.memory_space<vmem>>, vector<8x256xf32>
    %110 = vector.broadcast %5 : vector<1x256xf32> to vector<8x256xf32>
    %111 = arith.mulf %109, %110 : vector<8x256xf32>
    %c192 = arith.constant 192 : index
    %c0_101 = arith.constant 0 : index
    %112 = vector.load %arg35[%c192, %c0_101] : memref<360x256xf32, #tpu.memory_space<vmem>>, vector<8x256xf32>
    tpu.vector_store %arg35[%c192, %c0_101], %111 {strides = array<i32>} : memref<360x256xf32, #tpu.memory_space<vmem>>, vector<8x256xf32>,
    %c0_102 = arith.constant 0 : index
    %c144_103 = arith.constant 144 : index
    %113 = vector.load %arg36[%c0_102, %c144_103] : memref<8x401xf32, #tpu.memory_space<vmem>>, vector<8x256xf32>
    %c200 = arith.constant 200 : index
    %c0_104 = arith.constant 0 : index
    %114 = vector.load %arg35[%c200, %c0_104] : memref<360x256xf32, #tpu.memory_space<vmem>>, vector<8x256xf32>
    tpu.vector_store %arg35[%c200, %c0_104], %113 {strides = array<i32>} : memref<360x256xf32, #tpu.memory_space<vmem>>, vector<8x256xf32>,
    %c0_105 = arith.constant 0 : index
    %c145_106 = arith.constant 145 : index
    %115 = vector.load %arg36[%c0_105, %c145_106] : memref<8x401xf32, #tpu.memory_space<vmem>>, vector<8x256xf32>
    %116 = vector.broadcast %4 : vector<1x256xf32> to vector<8x256xf32>
    %117 = arith.mulf %115, %116 : vector<8x256xf32>
    %c208 = arith.constant 208 : index
    %c0_107 = arith.constant 0 : index
    %118 = vector.load %arg35[%c208, %c0_107] : memref<360x256xf32, #tpu.memory_space<vmem>>, vector<8x256xf32>
    tpu.vector_store %arg35[%c208, %c0_107], %117 {strides = array<i32>} : memref<360x256xf32, #tpu.memory_space<vmem>>, vector<8x256xf32>,
    %c0_108 = arith.constant 0 : index
    %c0_109 = arith.constant 0 : index
    %119 = vector.load %arg6[%c0_108, %c0_109] : memref<8x216xf32, #tpu.memory_space<vmem>>, vector<8x216xf32>
    %c0_110 = arith.constant 0 : index
    %c0_111 = arith.constant 0 : index
    %120 = vector.load %arg35[%c0_110, %c0_111] : memref<360x256xf32, #tpu.memory_space<vmem>>, vector<216x256xf32>
    %cst_112 = arith.constant dense<0.000000e+00> : vector<8x256xf32>
    %121 = tpu.matmul %119, %120, %cst_112 {dimension_numbers = #tpu.dot_dimension_numbers<[1], [0], [0], [1], [0, 0, 1, 1], [], []>} : vector<8x216xf32>, vector<216x256xf32>, vector<8x256xf32> -> vector<8x256xf32>
    %c0_113 = arith.constant 0 : index
    %c0_114 = arith.constant 0 : index
    %122 = vector.load %arg21[%c0_113, %c0_114] : memref<8x1xf32, #tpu.memory_space<vmem>>, vector<8x1xf32>
    %123 = vector.broadcast %122 : vector<8x1xf32> to vector<8x256xf32>
    %124 = arith.addf %121, %123 : vector<8x256xf32>
    %cst_115 = arith.constant 2.000000e-01 : f32
    %125 = vector.broadcast %cst_115 : f32 to vector<8x256xf32>
    %126 = arith.mulf %125, %124 : vector<8x256xf32>
    %127 = arith.maximumf %124, %126 : vector<8x256xf32>
    %c0_116 = arith.constant 0 : index
    %c128_117 = arith.constant 128 : index
    %128 = vector.load %arg36[%c0_116, %c128_117] : memref<8x401xf32, #tpu.memory_space<vmem>>, vector<8x256xf32>
    tpu.vector_store %arg36[%c0_116, %c128_117], %127 {strides = array<i32>} : memref<8x401xf32, #tpu.memory_space<vmem>>, vector<8x256xf32>,
    %c0_118 = arith.constant 0 : index
    %c111_119 = arith.constant 111 : index
    %129 = vector.load %arg36[%c0_118, %c111_119] : memref<8x401xf32, #tpu.memory_space<vmem>>, vector<8x256xf32>
    %130 = vector.broadcast %5 : vector<1x256xf32> to vector<8x256xf32>
    %131 = arith.mulf %129, %130 : vector<8x256xf32>
    %c216 = arith.constant 216 : index
    %c0_120 = arith.constant 0 : index
    %132 = vector.load %arg35[%c216, %c0_120] : memref<360x256xf32, #tpu.memory_space<vmem>>, vector<8x256xf32>
    tpu.vector_store %arg35[%c216, %c0_120], %131 {strides = array<i32>} : memref<360x256xf32, #tpu.memory_space<vmem>>, vector<8x256xf32>,
    %c0_121 = arith.constant 0 : index
    %c112_122 = arith.constant 112 : index
    %133 = vector.load %arg36[%c0_121, %c112_122] : memref<8x401xf32, #tpu.memory_space<vmem>>, vector<8x256xf32>
    %c224 = arith.constant 224 : index
    %c0_123 = arith.constant 0 : index
    %134 = vector.load %arg35[%c224, %c0_123] : memref<360x256xf32, #tpu.memory_space<vmem>>, vector<8x256xf32>
    tpu.vector_store %arg35[%c224, %c0_123], %133 {strides = array<i32>} : memref<360x256xf32, #tpu.memory_space<vmem>>, vector<8x256xf32>,
    %c0_124 = arith.constant 0 : index
    %c113_125 = arith.constant 113 : index
    %135 = vector.load %arg36[%c0_124, %c113_125] : memref<8x401xf32, #tpu.memory_space<vmem>>, vector<8x256xf32>
    %136 = vector.broadcast %4 : vector<1x256xf32> to vector<8x256xf32>
    %137 = arith.mulf %135, %136 : vector<8x256xf32>
    %c232 = arith.constant 232 : index
    %c0_126 = arith.constant 0 : index
    %138 = vector.load %arg35[%c232, %c0_126] : memref<360x256xf32, #tpu.memory_space<vmem>>, vector<8x256xf32>
    tpu.vector_store %arg35[%c232, %c0_126], %137 {strides = array<i32>} : memref<360x256xf32, #tpu.memory_space<vmem>>, vector<8x256xf32>,
    %c0_127 = arith.constant 0 : index
    %c127_128 = arith.constant 127 : index
    %139 = vector.load %arg36[%c0_127, %c127_128] : memref<8x401xf32, #tpu.memory_space<vmem>>, vector<8x256xf32>
    %140 = vector.broadcast %5 : vector<1x256xf32> to vector<8x256xf32>
    %141 = arith.mulf %139, %140 : vector<8x256xf32>
    %c240 = arith.constant 240 : index
    %c0_129 = arith.constant 0 : index
    %142 = vector.load %arg35[%c240, %c0_129] : memref<360x256xf32, #tpu.memory_space<vmem>>, vector<8x256xf32>
    tpu.vector_store %arg35[%c240, %c0_129], %141 {strides = array<i32>} : memref<360x256xf32, #tpu.memory_space<vmem>>, vector<8x256xf32>,
    %c0_130 = arith.constant 0 : index
    %c128_131 = arith.constant 128 : index
    %143 = vector.load %arg36[%c0_130, %c128_131] : memref<8x401xf32, #tpu.memory_space<vmem>>, vector<8x256xf32>
    %c248 = arith.constant 248 : index
    %c0_132 = arith.constant 0 : index
    %144 = vector.load %arg35[%c248, %c0_132] : memref<360x256xf32, #tpu.memory_space<vmem>>, vector<8x256xf32>
    tpu.vector_store %arg35[%c248, %c0_132], %143 {strides = array<i32>} : memref<360x256xf32, #tpu.memory_space<vmem>>, vector<8x256xf32>,
    %c0_133 = arith.constant 0 : index
    %c129_134 = arith.constant 129 : index
    %145 = vector.load %arg36[%c0_133, %c129_134] : memref<8x401xf32, #tpu.memory_space<vmem>>, vector<8x256xf32>
    %146 = vector.broadcast %4 : vector<1x256xf32> to vector<8x256xf32>
    %147 = arith.mulf %145, %146 : vector<8x256xf32>
    %c256 = arith.constant 256 : index
    %c0_135 = arith.constant 0 : index
    %148 = vector.load %arg35[%c256, %c0_135] : memref<360x256xf32, #tpu.memory_space<vmem>>, vector<8x256xf32>
    tpu.vector_store %arg35[%c256, %c0_135], %147 {strides = array<i32>} : memref<360x256xf32, #tpu.memory_space<vmem>>, vector<8x256xf32>,
    %c0_136 = arith.constant 0 : index
    %c143_137 = arith.constant 143 : index
    %149 = vector.load %arg36[%c0_136, %c143_137] : memref<8x401xf32, #tpu.memory_space<vmem>>, vector<8x256xf32>
    %150 = vector.broadcast %5 : vector<1x256xf32> to vector<8x256xf32>
    %151 = arith.mulf %149, %150 : vector<8x256xf32>
    %c264 = arith.constant 264 : index
    %c0_138 = arith.constant 0 : index
    %152 = vector.load %arg35[%c264, %c0_138] : memref<360x256xf32, #tpu.memory_space<vmem>>, vector<8x256xf32>
    tpu.vector_store %arg35[%c264, %c0_138], %151 {strides = array<i32>} : memref<360x256xf32, #tpu.memory_space<vmem>>, vector<8x256xf32>,
    %c0_139 = arith.constant 0 : index
    %c144_140 = arith.constant 144 : index
    %153 = vector.load %arg36[%c0_139, %c144_140] : memref<8x401xf32, #tpu.memory_space<vmem>>, vector<8x256xf32>
    %c272 = arith.constant 272 : index
    %c0_141 = arith.constant 0 : index
    %154 = vector.load %arg35[%c272, %c0_141] : memref<360x256xf32, #tpu.memory_space<vmem>>, vector<8x256xf32>
    tpu.vector_store %arg35[%c272, %c0_141], %153 {strides = array<i32>} : memref<360x256xf32, #tpu.memory_space<vmem>>, vector<8x256xf32>,
    %c0_142 = arith.constant 0 : index
    %c145_143 = arith.constant 145 : index
    %155 = vector.load %arg36[%c0_142, %c145_143] : memref<8x401xf32, #tpu.memory_space<vmem>>, vector<8x256xf32>
    %156 = vector.broadcast %4 : vector<1x256xf32> to vector<8x256xf32>
    %157 = arith.mulf %155, %156 : vector<8x256xf32>
    %c280 = arith.constant 280 : index
    %c0_144 = arith.constant 0 : index
    %158 = vector.load %arg35[%c280, %c0_144] : memref<360x256xf32, #tpu.memory_space<vmem>>, vector<8x256xf32>
    tpu.vector_store %arg35[%c280, %c0_144], %157 {strides = array<i32>} : memref<360x256xf32, #tpu.memory_space<vmem>>, vector<8x256xf32>,
    %c0_145 = arith.constant 0 : index
    %c0_146 = arith.constant 0 : index
    %159 = vector.load %arg7[%c0_145, %c0_146] : memref<8x288xf32, #tpu.memory_space<vmem>>, vector<8x288xf32>
    %c0_147 = arith.constant 0 : index
    %c0_148 = arith.constant 0 : index
    %160 = vector.load %arg35[%c0_147, %c0_148] : memref<360x256xf32, #tpu.memory_space<vmem>>, vector<288x256xf32>
    %cst_149 = arith.constant dense<0.000000e+00> : vector<8x256xf32>
    %161 = tpu.matmul %159, %160, %cst_149 {dimension_numbers = #tpu.dot_dimension_numbers<[1], [0], [0], [1], [0, 0, 1, 1], [], []>} : vector<8x288xf32>, vector<288x256xf32>, vector<8x256xf32> -> vector<8x256xf32>
    %c0_150 = arith.constant 0 : index
    %c0_151 = arith.constant 0 : index
    %162 = vector.load %arg22[%c0_150, %c0_151] : memref<8x1xf32, #tpu.memory_space<vmem>>, vector<8x1xf32>
    %163 = vector.broadcast %162 : vector<8x1xf32> to vector<8x256xf32>
    %164 = arith.addf %161, %163 : vector<8x256xf32>
    %cst_152 = arith.constant 2.000000e-01 : f32
    %165 = vector.broadcast %cst_152 : f32 to vector<8x256xf32>
    %166 = arith.mulf %165, %164 : vector<8x256xf32>
    %167 = arith.maximumf %164, %166 : vector<8x256xf32>
    %c0_153 = arith.constant 0 : index
    %c128_154 = arith.constant 128 : index
    %168 = vector.load %arg36[%c0_153, %c128_154] : memref<8x401xf32, #tpu.memory_space<vmem>>, vector<8x256xf32>
    tpu.vector_store %arg36[%c0_153, %c128_154], %167 {strides = array<i32>} : memref<8x401xf32, #tpu.memory_space<vmem>>, vector<8x256xf32>,
    %c0_155 = arith.constant 0 : index
    %c111_156 = arith.constant 111 : index
    %169 = vector.load %arg36[%c0_155, %c111_156] : memref<8x401xf32, #tpu.memory_space<vmem>>, vector<8x256xf32>
    %170 = vector.broadcast %5 : vector<1x256xf32> to vector<8x256xf32>
    %171 = arith.mulf %169, %170 : vector<8x256xf32>
    %c288 = arith.constant 288 : index
    %c0_157 = arith.constant 0 : index
    %172 = vector.load %arg35[%c288, %c0_157] : memref<360x256xf32, #tpu.memory_space<vmem>>, vector<8x256xf32>
    tpu.vector_store %arg35[%c288, %c0_157], %171 {strides = array<i32>} : memref<360x256xf32, #tpu.memory_space<vmem>>, vector<8x256xf32>,
    %c0_158 = arith.constant 0 : index
    %c112_159 = arith.constant 112 : index
    %173 = vector.load %arg36[%c0_158, %c112_159] : memref<8x401xf32, #tpu.memory_space<vmem>>, vector<8x256xf32>
    %c296 = arith.constant 296 : index
    %c0_160 = arith.constant 0 : index
    %174 = vector.load %arg35[%c296, %c0_160] : memref<360x256xf32, #tpu.memory_space<vmem>>, vector<8x256xf32>
    tpu.vector_store %arg35[%c296, %c0_160], %173 {strides = array<i32>} : memref<360x256xf32, #tpu.memory_space<vmem>>, vector<8x256xf32>,
    %c0_161 = arith.constant 0 : index
    %c113_162 = arith.constant 113 : index
    %175 = vector.load %arg36[%c0_161, %c113_162] : memref<8x401xf32, #tpu.memory_space<vmem>>, vector<8x256xf32>
    %176 = vector.broadcast %4 : vector<1x256xf32> to vector<8x256xf32>
    %177 = arith.mulf %175, %176 : vector<8x256xf32>
    %c304 = arith.constant 304 : index
    %c0_163 = arith.constant 0 : index
    %178 = vector.load %arg35[%c304, %c0_163] : memref<360x256xf32, #tpu.memory_space<vmem>>, vector<8x256xf32>
    tpu.vector_store %arg35[%c304, %c0_163], %177 {strides = array<i32>} : memref<360x256xf32, #tpu.memory_space<vmem>>, vector<8x256xf32>,
    %c0_164 = arith.constant 0 : index
    %c127_165 = arith.constant 127 : index
    %179 = vector.load %arg36[%c0_164, %c127_165] : memref<8x401xf32, #tpu.memory_space<vmem>>, vector<8x256xf32>
    %180 = vector.broadcast %5 : vector<1x256xf32> to vector<8x256xf32>
    %181 = arith.mulf %179, %180 : vector<8x256xf32>
    %c312 = arith.constant 312 : index
    %c0_166 = arith.constant 0 : index
    %182 = vector.load %arg35[%c312, %c0_166] : memref<360x256xf32, #tpu.memory_space<vmem>>, vector<8x256xf32>
    tpu.vector_store %arg35[%c312, %c0_166], %181 {strides = array<i32>} : memref<360x256xf32, #tpu.memory_space<vmem>>, vector<8x256xf32>,
    %c0_167 = arith.constant 0 : index
    %c128_168 = arith.constant 128 : index
    %183 = vector.load %arg36[%c0_167, %c128_168] : memref<8x401xf32, #tpu.memory_space<vmem>>, vector<8x256xf32>
    %c320 = arith.constant 320 : index
    %c0_169 = arith.constant 0 : index
    %184 = vector.load %arg35[%c320, %c0_169] : memref<360x256xf32, #tpu.memory_space<vmem>>, vector<8x256xf32>
    tpu.vector_store %arg35[%c320, %c0_169], %183 {strides = array<i32>} : memref<360x256xf32, #tpu.memory_space<vmem>>, vector<8x256xf32>,
    %c0_170 = arith.constant 0 : index
    %c129_171 = arith.constant 129 : index
    %185 = vector.load %arg36[%c0_170, %c129_171] : memref<8x401xf32, #tpu.memory_space<vmem>>, vector<8x256xf32>
    %186 = vector.broadcast %4 : vector<1x256xf32> to vector<8x256xf32>
    %187 = arith.mulf %185, %186 : vector<8x256xf32>
    %c328 = arith.constant 328 : index
    %c0_172 = arith.constant 0 : index
    %188 = vector.load %arg35[%c328, %c0_172] : memref<360x256xf32, #tpu.memory_space<vmem>>, vector<8x256xf32>
    tpu.vector_store %arg35[%c328, %c0_172], %187 {strides = array<i32>} : memref<360x256xf32, #tpu.memory_space<vmem>>, vector<8x256xf32>,
    %c0_173 = arith.constant 0 : index
    %c143_174 = arith.constant 143 : index
    %189 = vector.load %arg36[%c0_173, %c143_174] : memref<8x401xf32, #tpu.memory_space<vmem>>, vector<8x256xf32>
    %190 = vector.broadcast %5 : vector<1x256xf32> to vector<8x256xf32>
    %191 = arith.mulf %189, %190 : vector<8x256xf32>
    %c336 = arith.constant 336 : index
    %c0_175 = arith.constant 0 : index
    %192 = vector.load %arg35[%c336, %c0_175] : memref<360x256xf32, #tpu.memory_space<vmem>>, vector<8x256xf32>
    tpu.vector_store %arg35[%c336, %c0_175], %191 {strides = array<i32>} : memref<360x256xf32, #tpu.memory_space<vmem>>, vector<8x256xf32>,
    %c0_176 = arith.constant 0 : index
    %c144_177 = arith.constant 144 : index
    %193 = vector.load %arg36[%c0_176, %c144_177] : memref<8x401xf32, #tpu.memory_space<vmem>>, vector<8x256xf32>
    %c344 = arith.constant 344 : index
    %c0_178 = arith.constant 0 : index
    %194 = vector.load %arg35[%c344, %c0_178] : memref<360x256xf32, #tpu.memory_space<vmem>>, vector<8x256xf32>
    tpu.vector_store %arg35[%c344, %c0_178], %193 {strides = array<i32>} : memref<360x256xf32, #tpu.memory_space<vmem>>, vector<8x256xf32>,
    %c0_179 = arith.constant 0 : index
    %c145_180 = arith.constant 145 : index
    %195 = vector.load %arg36[%c0_179, %c145_180] : memref<8x401xf32, #tpu.memory_space<vmem>>, vector<8x256xf32>
    %196 = vector.broadcast %4 : vector<1x256xf32> to vector<8x256xf32>
    %197 = arith.mulf %195, %196 : vector<8x256xf32>
    %c352 = arith.constant 352 : index
    %c0_181 = arith.constant 0 : index
    %198 = vector.load %arg35[%c352, %c0_181] : memref<360x256xf32, #tpu.memory_space<vmem>>, vector<8x256xf32>
    tpu.vector_store %arg35[%c352, %c0_181], %197 {strides = array<i32>} : memref<360x256xf32, #tpu.memory_space<vmem>>, vector<8x256xf32>,
    %c0_182 = arith.constant 0 : index
    %c0_183 = arith.constant 0 : index
    %199 = vector.load %arg8[%c0_182, %c0_183] : memref<8x360xf32, #tpu.memory_space<vmem>>, vector<8x360xf32>
    %c0_184 = arith.constant 0 : index
    %c0_185 = arith.constant 0 : index
    %200 = vector.load %arg35[%c0_184, %c0_185] : memref<360x256xf32, #tpu.memory_space<vmem>>, vector<360x256xf32>
    %cst_186 = arith.constant dense<0.000000e+00> : vector<8x256xf32>
    %201 = tpu.matmul %199, %200, %cst_186 {dimension_numbers = #tpu.dot_dimension_numbers<[1], [0], [0], [1], [0, 0, 1, 1], [], []>} : vector<8x360xf32>, vector<360x256xf32>, vector<8x256xf32> -> vector<8x256xf32>
    %c0_187 = arith.constant 0 : index
    %c0_188 = arith.constant 0 : index
    %202 = vector.load %arg23[%c0_187, %c0_188] : memref<8x1xf32, #tpu.memory_space<vmem>>, vector<8x1xf32>
    %203 = vector.broadcast %202 : vector<8x1xf32> to vector<8x256xf32>
    %204 = arith.addf %201, %203 : vector<8x256xf32>
    %cst_189 = arith.constant 2.000000e-01 : f32
    %205 = vector.broadcast %cst_189 : f32 to vector<8x256xf32>
    %206 = arith.mulf %204, %205 : vector<8x256xf32>
    %207 = arith.addf %206, %7 : vector<8x256xf32>
    %c0_190 = arith.constant 0 : index
    %c128_191 = arith.constant 128 : index
    %208 = vector.load %arg36[%c0_190, %c128_191] : memref<8x401xf32, #tpu.memory_space<vmem>>, vector<8x256xf32>
    tpu.vector_store %arg36[%c0_190, %c128_191], %207 {strides = array<i32>} : memref<8x401xf32, #tpu.memory_space<vmem>>, vector<8x256xf32>,
    %c0_192 = arith.constant 0 : index
    %c111_193 = arith.constant 111 : index
    %209 = vector.load %arg36[%c0_192, %c111_193] : memref<8x401xf32, #tpu.memory_space<vmem>>, vector<8x256xf32>
    %210 = vector.broadcast %5 : vector<1x256xf32> to vector<8x256xf32>
    %211 = arith.mulf %209, %210 : vector<8x256xf32>
    %c0_194 = arith.constant 0 : index
    %c0_195 = arith.constant 0 : index
    %212 = vector.load %arg35[%c0_194, %c0_195] : memref<360x256xf32, #tpu.memory_space<vmem>>, vector<8x256xf32>
    tpu.vector_store %arg35[%c0_194, %c0_195], %211 {strides = array<i32>} : memref<360x256xf32, #tpu.memory_space<vmem>>, vector<8x256xf32>,
    %c0_196 = arith.constant 0 : index
    %c112_197 = arith.constant 112 : index
    %213 = vector.load %arg36[%c0_196, %c112_197] : memref<8x401xf32, #tpu.memory_space<vmem>>, vector<8x256xf32>
    %c8_198 = arith.constant 8 : index
    %c0_199 = arith.constant 0 : index
    %214 = vector.load %arg35[%c8_198, %c0_199] : memref<360x256xf32, #tpu.memory_space<vmem>>, vector<8x256xf32>
    tpu.vector_store %arg35[%c8_198, %c0_199], %213 {strides = array<i32>} : memref<360x256xf32, #tpu.memory_space<vmem>>, vector<8x256xf32>,
    %c0_200 = arith.constant 0 : index
    %c113_201 = arith.constant 113 : index
    %215 = vector.load %arg36[%c0_200, %c113_201] : memref<8x401xf32, #tpu.memory_space<vmem>>, vector<8x256xf32>
    %216 = vector.broadcast %4 : vector<1x256xf32> to vector<8x256xf32>
    %217 = arith.mulf %215, %216 : vector<8x256xf32>
    %c16_202 = arith.constant 16 : index
    %c0_203 = arith.constant 0 : index
    %218 = vector.load %arg35[%c16_202, %c0_203] : memref<360x256xf32, #tpu.memory_space<vmem>>, vector<8x256xf32>
    tpu.vector_store %arg35[%c16_202, %c0_203], %217 {strides = array<i32>} : memref<360x256xf32, #tpu.memory_space<vmem>>, vector<8x256xf32>,
    %c0_204 = arith.constant 0 : index
    %c127_205 = arith.constant 127 : index
    %219 = vector.load %arg36[%c0_204, %c127_205] : memref<8x401xf32, #tpu.memory_space<vmem>>, vector<8x256xf32>
    %220 = vector.broadcast %5 : vector<1x256xf32> to vector<8x256xf32>
    %221 = arith.mulf %219, %220 : vector<8x256xf32>
    %c24_206 = arith.constant 24 : index
    %c0_207 = arith.constant 0 : index
    %222 = vector.load %arg35[%c24_206, %c0_207] : memref<360x256xf32, #tpu.memory_space<vmem>>, vector<8x256xf32>
    tpu.vector_store %arg35[%c24_206, %c0_207], %221 {strides = array<i32>} : memref<360x256xf32, #tpu.memory_space<vmem>>, vector<8x256xf32>,
    %c0_208 = arith.constant 0 : index
    %c128_209 = arith.constant 128 : index
    %223 = vector.load %arg36[%c0_208, %c128_209] : memref<8x401xf32, #tpu.memory_space<vmem>>, vector<8x256xf32>
    %c32_210 = arith.constant 32 : index
    %c0_211 = arith.constant 0 : index
    %224 = vector.load %arg35[%c32_210, %c0_211] : memref<360x256xf32, #tpu.memory_space<vmem>>, vector<8x256xf32>
    tpu.vector_store %arg35[%c32_210, %c0_211], %223 {strides = array<i32>} : memref<360x256xf32, #tpu.memory_space<vmem>>, vector<8x256xf32>,
    %c0_212 = arith.constant 0 : index
    %c129_213 = arith.constant 129 : index
    %225 = vector.load %arg36[%c0_212, %c129_213] : memref<8x401xf32, #tpu.memory_space<vmem>>, vector<8x256xf32>
    %226 = vector.broadcast %4 : vector<1x256xf32> to vector<8x256xf32>
    %227 = arith.mulf %225, %226 : vector<8x256xf32>
    %c40_214 = arith.constant 40 : index
    %c0_215 = arith.constant 0 : index
    %228 = vector.load %arg35[%c40_214, %c0_215] : memref<360x256xf32, #tpu.memory_space<vmem>>, vector<8x256xf32>
    tpu.vector_store %arg35[%c40_214, %c0_215], %227 {strides = array<i32>} : memref<360x256xf32, #tpu.memory_space<vmem>>, vector<8x256xf32>,
    %c0_216 = arith.constant 0 : index
    %c143_217 = arith.constant 143 : index
    %229 = vector.load %arg36[%c0_216, %c143_217] : memref<8x401xf32, #tpu.memory_space<vmem>>, vector<8x256xf32>
    %230 = vector.broadcast %5 : vector<1x256xf32> to vector<8x256xf32>
    %231 = arith.mulf %229, %230 : vector<8x256xf32>
    %c48_218 = arith.constant 48 : index
    %c0_219 = arith.constant 0 : index
    %232 = vector.load %arg35[%c48_218, %c0_219] : memref<360x256xf32, #tpu.memory_space<vmem>>, vector<8x256xf32>
    tpu.vector_store %arg35[%c48_218, %c0_219], %231 {strides = array<i32>} : memref<360x256xf32, #tpu.memory_space<vmem>>, vector<8x256xf32>,
    %c0_220 = arith.constant 0 : index
    %c144_221 = arith.constant 144 : index
    %233 = vector.load %arg36[%c0_220, %c144_221] : memref<8x401xf32, #tpu.memory_space<vmem>>, vector<8x256xf32>
    %c56_222 = arith.constant 56 : index
    %c0_223 = arith.constant 0 : index
    %234 = vector.load %arg35[%c56_222, %c0_223] : memref<360x256xf32, #tpu.memory_space<vmem>>, vector<8x256xf32>
    tpu.vector_store %arg35[%c56_222, %c0_223], %233 {strides = array<i32>} : memref<360x256xf32, #tpu.memory_space<vmem>>, vector<8x256xf32>,
    %c0_224 = arith.constant 0 : index
    %c145_225 = arith.constant 145 : index
    %235 = vector.load %arg36[%c0_224, %c145_225] : memref<8x401xf32, #tpu.memory_space<vmem>>, vector<8x256xf32>
    %236 = vector.broadcast %4 : vector<1x256xf32> to vector<8x256xf32>
    %237 = arith.mulf %235, %236 : vector<8x256xf32>
    %c64_226 = arith.constant 64 : index
    %c0_227 = arith.constant 0 : index
    %238 = vector.load %arg35[%c64_226, %c0_227] : memref<360x256xf32, #tpu.memory_space<vmem>>, vector<8x256xf32>
    tpu.vector_store %arg35[%c64_226, %c0_227], %237 {strides = array<i32>} : memref<360x256xf32, #tpu.memory_space<vmem>>, vector<8x256xf32>,
    %c0_228 = arith.constant 0 : index
    %c0_229 = arith.constant 0 : index
    %239 = vector.load %arg9[%c0_228, %c0_229] : memref<8x72xf32, #tpu.memory_space<vmem>>, vector<8x72xf32>
    %c0_230 = arith.constant 0 : index
    %c0_231 = arith.constant 0 : index
    %240 = vector.load %arg35[%c0_230, %c0_231] : memref<360x256xf32, #tpu.memory_space<vmem>>, vector<72x256xf32>
    %cst_232 = arith.constant dense<0.000000e+00> : vector<8x256xf32>
    %241 = tpu.matmul %239, %240, %cst_232 {dimension_numbers = #tpu.dot_dimension_numbers<[1], [0], [0], [1], [0, 0, 1, 1], [], []>} : vector<8x72xf32>, vector<72x256xf32>, vector<8x256xf32> -> vector<8x256xf32>
    %c0_233 = arith.constant 0 : index
    %c0_234 = arith.constant 0 : index
    %242 = vector.load %arg24[%c0_233, %c0_234] : memref<8x1xf32, #tpu.memory_space<vmem>>, vector<8x1xf32>
    %243 = vector.broadcast %242 : vector<8x1xf32> to vector<8x256xf32>
    %244 = arith.addf %241, %243 : vector<8x256xf32>
    %cst_235 = arith.constant 2.000000e-01 : f32
    %245 = vector.broadcast %cst_235 : f32 to vector<8x256xf32>
    %246 = arith.mulf %245, %244 : vector<8x256xf32>
    %247 = arith.maximumf %244, %246 : vector<8x256xf32>
    %c0_236 = arith.constant 0 : index
    %c128_237 = arith.constant 128 : index
    %248 = vector.load %arg36[%c0_236, %c128_237] : memref<8x401xf32, #tpu.memory_space<vmem>>, vector<8x256xf32>
    tpu.vector_store %arg36[%c0_236, %c128_237], %247 {strides = array<i32>} : memref<8x401xf32, #tpu.memory_space<vmem>>, vector<8x256xf32>,
    %c0_238 = arith.constant 0 : index
    %c111_239 = arith.constant 111 : index
    %249 = vector.load %arg36[%c0_238, %c111_239] : memref<8x401xf32, #tpu.memory_space<vmem>>, vector<8x256xf32>
    %250 = vector.broadcast %5 : vector<1x256xf32> to vector<8x256xf32>
    %251 = arith.mulf %249, %250 : vector<8x256xf32>
    %c72_240 = arith.constant 72 : index
    %c0_241 = arith.constant 0 : index
    %252 = vector.load %arg35[%c72_240, %c0_241] : memref<360x256xf32, #tpu.memory_space<vmem>>, vector<8x256xf32>
    tpu.vector_store %arg35[%c72_240, %c0_241], %251 {strides = array<i32>} : memref<360x256xf32, #tpu.memory_space<vmem>>, vector<8x256xf32>,
    %c0_242 = arith.constant 0 : index
    %c112_243 = arith.constant 112 : index
    %253 = vector.load %arg36[%c0_242, %c112_243] : memref<8x401xf32, #tpu.memory_space<vmem>>, vector<8x256xf32>
    %c80_244 = arith.constant 80 : index
    %c0_245 = arith.constant 0 : index
    %254 = vector.load %arg35[%c80_244, %c0_245] : memref<360x256xf32, #tpu.memory_space<vmem>>, vector<8x256xf32>
    tpu.vector_store %arg35[%c80_244, %c0_245], %253 {strides = array<i32>} : memref<360x256xf32, #tpu.memory_space<vmem>>, vector<8x256xf32>,
    %c0_246 = arith.constant 0 : index
    %c113_247 = arith.constant 113 : index
    %255 = vector.load %arg36[%c0_246, %c113_247] : memref<8x401xf32, #tpu.memory_space<vmem>>, vector<8x256xf32>
    %256 = vector.broadcast %4 : vector<1x256xf32> to vector<8x256xf32>
    %257 = arith.mulf %255, %256 : vector<8x256xf32>
    %c88_248 = arith.constant 88 : index
    %c0_249 = arith.constant 0 : index
    %258 = vector.load %arg35[%c88_248, %c0_249] : memref<360x256xf32, #tpu.memory_space<vmem>>, vector<8x256xf32>
    tpu.vector_store %arg35[%c88_248, %c0_249], %257 {strides = array<i32>} : memref<360x256xf32, #tpu.memory_space<vmem>>, vector<8x256xf32>,
    %c0_250 = arith.constant 0 : index
    %c127_251 = arith.constant 127 : index
    %259 = vector.load %arg36[%c0_250, %c127_251] : memref<8x401xf32, #tpu.memory_space<vmem>>, vector<8x256xf32>
    %260 = vector.broadcast %5 : vector<1x256xf32> to vector<8x256xf32>
    %261 = arith.mulf %259, %260 : vector<8x256xf32>
    %c96_252 = arith.constant 96 : index
    %c0_253 = arith.constant 0 : index
    %262 = vector.load %arg35[%c96_252, %c0_253] : memref<360x256xf32, #tpu.memory_space<vmem>>, vector<8x256xf32>
    tpu.vector_store %arg35[%c96_252, %c0_253], %261 {strides = array<i32>} : memref<360x256xf32, #tpu.memory_space<vmem>>, vector<8x256xf32>,
    %c0_254 = arith.constant 0 : index
    %c128_255 = arith.constant 128 : index
    %263 = vector.load %arg36[%c0_254, %c128_255] : memref<8x401xf32, #tpu.memory_space<vmem>>, vector<8x256xf32>
    %c104_256 = arith.constant 104 : index
    %c0_257 = arith.constant 0 : index
    %264 = vector.load %arg35[%c104_256, %c0_257] : memref<360x256xf32, #tpu.memory_space<vmem>>, vector<8x256xf32>
    tpu.vector_store %arg35[%c104_256, %c0_257], %263 {strides = array<i32>} : memref<360x256xf32, #tpu.memory_space<vmem>>, vector<8x256xf32>,
    %c0_258 = arith.constant 0 : index
    %c129_259 = arith.constant 129 : index
    %265 = vector.load %arg36[%c0_258, %c129_259] : memref<8x401xf32, #tpu.memory_space<vmem>>, vector<8x256xf32>
    %266 = vector.broadcast %4 : vector<1x256xf32> to vector<8x256xf32>
    %267 = arith.mulf %265, %266 : vector<8x256xf32>
    %c112_260 = arith.constant 112 : index
    %c0_261 = arith.constant 0 : index
    %268 = vector.load %arg35[%c112_260, %c0_261] : memref<360x256xf32, #tpu.memory_space<vmem>>, vector<8x256xf32>
    tpu.vector_store %arg35[%c112_260, %c0_261], %267 {strides = array<i32>} : memref<360x256xf32, #tpu.memory_space<vmem>>, vector<8x256xf32>,
    %c0_262 = arith.constant 0 : index
    %c143_263 = arith.constant 143 : index
    %269 = vector.load %arg36[%c0_262, %c143_263] : memref<8x401xf32, #tpu.memory_space<vmem>>, vector<8x256xf32>
    %270 = vector.broadcast %5 : vector<1x256xf32> to vector<8x256xf32>
    %271 = arith.mulf %269, %270 : vector<8x256xf32>
    %c120_264 = arith.constant 120 : index
    %c0_265 = arith.constant 0 : index
    %272 = vector.load %arg35[%c120_264, %c0_265] : memref<360x256xf32, #tpu.memory_space<vmem>>, vector<8x256xf32>
    tpu.vector_store %arg35[%c120_264, %c0_265], %271 {strides = array<i32>} : memref<360x256xf32, #tpu.memory_space<vmem>>, vector<8x256xf32>,
    %c0_266 = arith.constant 0 : index
    %c144_267 = arith.constant 144 : index
    %273 = vector.load %arg36[%c0_266, %c144_267] : memref<8x401xf32, #tpu.memory_space<vmem>>, vector<8x256xf32>
    %c128_268 = arith.constant 128 : index
    %c0_269 = arith.constant 0 : index
    %274 = vector.load %arg35[%c128_268, %c0_269] : memref<360x256xf32, #tpu.memory_space<vmem>>, vector<8x256xf32>
    tpu.vector_store %arg35[%c128_268, %c0_269], %273 {strides = array<i32>} : memref<360x256xf32, #tpu.memory_space<vmem>>, vector<8x256xf32>,
    %c0_270 = arith.constant 0 : index
    %c145_271 = arith.constant 145 : index
    %275 = vector.load %arg36[%c0_270, %c145_271] : memref<8x401xf32, #tpu.memory_space<vmem>>, vector<8x256xf32>
    %276 = vector.broadcast %4 : vector<1x256xf32> to vector<8x256xf32>
    %277 = arith.mulf %275, %276 : vector<8x256xf32>
    %c136_272 = arith.constant 136 : index
    %c0_273 = arith.constant 0 : index
    %278 = vector.load %arg35[%c136_272, %c0_273] : memref<360x256xf32, #tpu.memory_space<vmem>>, vector<8x256xf32>
    tpu.vector_store %arg35[%c136_272, %c0_273], %277 {strides = array<i32>} : memref<360x256xf32, #tpu.memory_space<vmem>>, vector<8x256xf32>,
    %c0_274 = arith.constant 0 : index
    %c0_275 = arith.constant 0 : index
    %279 = vector.load %arg10[%c0_274, %c0_275] : memref<8x144xf32, #tpu.memory_space<vmem>>, vector<8x144xf32>
    %c0_276 = arith.constant 0 : index
    %c0_277 = arith.constant 0 : index
    %280 = vector.load %arg35[%c0_276, %c0_277] : memref<360x256xf32, #tpu.memory_space<vmem>>, vector<144x256xf32>
    %cst_278 = arith.constant dense<0.000000e+00> : vector<8x256xf32>
    %281 = tpu.matmul %279, %280, %cst_278 {dimension_numbers = #tpu.dot_dimension_numbers<[1], [0], [0], [1], [0, 0, 1, 1], [], []>} : vector<8x144xf32>, vector<144x256xf32>, vector<8x256xf32> -> vector<8x256xf32>
    %c0_279 = arith.constant 0 : index
    %c0_280 = arith.constant 0 : index
    %282 = vector.load %arg25[%c0_279, %c0_280] : memref<8x1xf32, #tpu.memory_space<vmem>>, vector<8x1xf32>
    %283 = vector.broadcast %282 : vector<8x1xf32> to vector<8x256xf32>
    %284 = arith.addf %281, %283 : vector<8x256xf32>
    %cst_281 = arith.constant 2.000000e-01 : f32
    %285 = vector.broadcast %cst_281 : f32 to vector<8x256xf32>
    %286 = arith.mulf %285, %284 : vector<8x256xf32>
    %287 = arith.maximumf %284, %286 : vector<8x256xf32>
    %c0_282 = arith.constant 0 : index
    %c128_283 = arith.constant 128 : index
    %288 = vector.load %arg36[%c0_282, %c128_283] : memref<8x401xf32, #tpu.memory_space<vmem>>, vector<8x256xf32>
    tpu.vector_store %arg36[%c0_282, %c128_283], %287 {strides = array<i32>} : memref<8x401xf32, #tpu.memory_space<vmem>>, vector<8x256xf32>,
    %c0_284 = arith.constant 0 : index
    %c111_285 = arith.constant 111 : index
    %289 = vector.load %arg36[%c0_284, %c111_285] : memref<8x401xf32, #tpu.memory_space<vmem>>, vector<8x256xf32>
    %290 = vector.broadcast %5 : vector<1x256xf32> to vector<8x256xf32>
    %291 = arith.mulf %289, %290 : vector<8x256xf32>
    %c144_286 = arith.constant 144 : index
    %c0_287 = arith.constant 0 : index
    %292 = vector.load %arg35[%c144_286, %c0_287] : memref<360x256xf32, #tpu.memory_space<vmem>>, vector<8x256xf32>
    tpu.vector_store %arg35[%c144_286, %c0_287], %291 {strides = array<i32>} : memref<360x256xf32, #tpu.memory_space<vmem>>, vector<8x256xf32>,
    %c0_288 = arith.constant 0 : index
    %c112_289 = arith.constant 112 : index
    %293 = vector.load %arg36[%c0_288, %c112_289] : memref<8x401xf32, #tpu.memory_space<vmem>>, vector<8x256xf32>
    %c152_290 = arith.constant 152 : index
    %c0_291 = arith.constant 0 : index
    %294 = vector.load %arg35[%c152_290, %c0_291] : memref<360x256xf32, #tpu.memory_space<vmem>>, vector<8x256xf32>
    tpu.vector_store %arg35[%c152_290, %c0_291], %293 {strides = array<i32>} : memref<360x256xf32, #tpu.memory_space<vmem>>, vector<8x256xf32>,
    %c0_292 = arith.constant 0 : index
    %c113_293 = arith.constant 113 : index
    %295 = vector.load %arg36[%c0_292, %c113_293] : memref<8x401xf32, #tpu.memory_space<vmem>>, vector<8x256xf32>
    %296 = vector.broadcast %4 : vector<1x256xf32> to vector<8x256xf32>
    %297 = arith.mulf %295, %296 : vector<8x256xf32>
    %c160_294 = arith.constant 160 : index
    %c0_295 = arith.constant 0 : index
    %298 = vector.load %arg35[%c160_294, %c0_295] : memref<360x256xf32, #tpu.memory_space<vmem>>, vector<8x256xf32>
    tpu.vector_store %arg35[%c160_294, %c0_295], %297 {strides = array<i32>} : memref<360x256xf32, #tpu.memory_space<vmem>>, vector<8x256xf32>,
    %c0_296 = arith.constant 0 : index
    %c127_297 = arith.constant 127 : index
    %299 = vector.load %arg36[%c0_296, %c127_297] : memref<8x401xf32, #tpu.memory_space<vmem>>, vector<8x256xf32>
    %300 = vector.broadcast %5 : vector<1x256xf32> to vector<8x256xf32>
    %301 = arith.mulf %299, %300 : vector<8x256xf32>
    %c168_298 = arith.constant 168 : index
    %c0_299 = arith.constant 0 : index
    %302 = vector.load %arg35[%c168_298, %c0_299] : memref<360x256xf32, #tpu.memory_space<vmem>>, vector<8x256xf32>
    tpu.vector_store %arg35[%c168_298, %c0_299], %301 {strides = array<i32>} : memref<360x256xf32, #tpu.memory_space<vmem>>, vector<8x256xf32>,
    %c0_300 = arith.constant 0 : index
    %c128_301 = arith.constant 128 : index
    %303 = vector.load %arg36[%c0_300, %c128_301] : memref<8x401xf32, #tpu.memory_space<vmem>>, vector<8x256xf32>
    %c176_302 = arith.constant 176 : index
    %c0_303 = arith.constant 0 : index
    %304 = vector.load %arg35[%c176_302, %c0_303] : memref<360x256xf32, #tpu.memory_space<vmem>>, vector<8x256xf32>
    tpu.vector_store %arg35[%c176_302, %c0_303], %303 {strides = array<i32>} : memref<360x256xf32, #tpu.memory_space<vmem>>, vector<8x256xf32>,
    %c0_304 = arith.constant 0 : index
    %c129_305 = arith.constant 129 : index
    %305 = vector.load %arg36[%c0_304, %c129_305] : memref<8x401xf32, #tpu.memory_space<vmem>>, vector<8x256xf32>
    %306 = vector.broadcast %4 : vector<1x256xf32> to vector<8x256xf32>
    %307 = arith.mulf %305, %306 : vector<8x256xf32>
    %c184_306 = arith.constant 184 : index
    %c0_307 = arith.constant 0 : index
    %308 = vector.load %arg35[%c184_306, %c0_307] : memref<360x256xf32, #tpu.memory_space<vmem>>, vector<8x256xf32>
    tpu.vector_store %arg35[%c184_306, %c0_307], %307 {strides = array<i32>} : memref<360x256xf32, #tpu.memory_space<vmem>>, vector<8x256xf32>,
    %c0_308 = arith.constant 0 : index
    %c143_309 = arith.constant 143 : index
    %309 = vector.load %arg36[%c0_308, %c143_309] : memref<8x401xf32, #tpu.memory_space<vmem>>, vector<8x256xf32>
    %310 = vector.broadcast %5 : vector<1x256xf32> to vector<8x256xf32>
    %311 = arith.mulf %309, %310 : vector<8x256xf32>
    %c192_310 = arith.constant 192 : index
    %c0_311 = arith.constant 0 : index
    %312 = vector.load %arg35[%c192_310, %c0_311] : memref<360x256xf32, #tpu.memory_space<vmem>>, vector<8x256xf32>
    tpu.vector_store %arg35[%c192_310, %c0_311], %311 {strides = array<i32>} : memref<360x256xf32, #tpu.memory_space<vmem>>, vector<8x256xf32>,
    %c0_312 = arith.constant 0 : index
    %c144_313 = arith.constant 144 : index
    %313 = vector.load %arg36[%c0_312, %c144_313] : memref<8x401xf32, #tpu.memory_space<vmem>>, vector<8x256xf32>
    %c200_314 = arith.constant 200 : index
    %c0_315 = arith.constant 0 : index
    %314 = vector.load %arg35[%c200_314, %c0_315] : memref<360x256xf32, #tpu.memory_space<vmem>>, vector<8x256xf32>
    tpu.vector_store %arg35[%c200_314, %c0_315], %313 {strides = array<i32>} : memref<360x256xf32, #tpu.memory_space<vmem>>, vector<8x256xf32>,
    %c0_316 = arith.constant 0 : index
    %c145_317 = arith.constant 145 : index
    %315 = vector.load %arg36[%c0_316, %c145_317] : memref<8x401xf32, #tpu.memory_space<vmem>>, vector<8x256xf32>
    %316 = vector.broadcast %4 : vector<1x256xf32> to vector<8x256xf32>
    %317 = arith.mulf %315, %316 : vector<8x256xf32>
    %c208_318 = arith.constant 208 : index
    %c0_319 = arith.constant 0 : index
    %318 = vector.load %arg35[%c208_318, %c0_319] : memref<360x256xf32, #tpu.memory_space<vmem>>, vector<8x256xf32>
    tpu.vector_store %arg35[%c208_318, %c0_319], %317 {strides = array<i32>} : memref<360x256xf32, #tpu.memory_space<vmem>>, vector<8x256xf32>,
    %c0_320 = arith.constant 0 : index
    %c0_321 = arith.constant 0 : index
    %319 = vector.load %arg11[%c0_320, %c0_321] : memref<8x216xf32, #tpu.memory_space<vmem>>, vector<8x216xf32>
    %c0_322 = arith.constant 0 : index
    %c0_323 = arith.constant 0 : index
    %320 = vector.load %arg35[%c0_322, %c0_323] : memref<360x256xf32, #tpu.memory_space<vmem>>, vector<216x256xf32>
    %cst_324 = arith.constant dense<0.000000e+00> : vector<8x256xf32>
    %321 = tpu.matmul %319, %320, %cst_324 {dimension_numbers = #tpu.dot_dimension_numbers<[1], [0], [0], [1], [0, 0, 1, 1], [], []>} : vector<8x216xf32>, vector<216x256xf32>, vector<8x256xf32> -> vector<8x256xf32>
    %c0_325 = arith.constant 0 : index
    %c0_326 = arith.constant 0 : index
    %322 = vector.load %arg26[%c0_325, %c0_326] : memref<8x1xf32, #tpu.memory_space<vmem>>, vector<8x1xf32>
    %323 = vector.broadcast %322 : vector<8x1xf32> to vector<8x256xf32>
    %324 = arith.addf %321, %323 : vector<8x256xf32>
    %cst_327 = arith.constant 2.000000e-01 : f32
    %325 = vector.broadcast %cst_327 : f32 to vector<8x256xf32>
    %326 = arith.mulf %325, %324 : vector<8x256xf32>
    %327 = arith.maximumf %324, %326 : vector<8x256xf32>
    %c0_328 = arith.constant 0 : index
    %c128_329 = arith.constant 128 : index
    %328 = vector.load %arg36[%c0_328, %c128_329] : memref<8x401xf32, #tpu.memory_space<vmem>>, vector<8x256xf32>
    tpu.vector_store %arg36[%c0_328, %c128_329], %327 {strides = array<i32>} : memref<8x401xf32, #tpu.memory_space<vmem>>, vector<8x256xf32>,
    %c0_330 = arith.constant 0 : index
    %c111_331 = arith.constant 111 : index
    %329 = vector.load %arg36[%c0_330, %c111_331] : memref<8x401xf32, #tpu.memory_space<vmem>>, vector<8x256xf32>
    %330 = vector.broadcast %5 : vector<1x256xf32> to vector<8x256xf32>
    %331 = arith.mulf %329, %330 : vector<8x256xf32>
    %c216_332 = arith.constant 216 : index
    %c0_333 = arith.constant 0 : index
    %332 = vector.load %arg35[%c216_332, %c0_333] : memref<360x256xf32, #tpu.memory_space<vmem>>, vector<8x256xf32>
    tpu.vector_store %arg35[%c216_332, %c0_333], %331 {strides = array<i32>} : memref<360x256xf32, #tpu.memory_space<vmem>>, vector<8x256xf32>,
    %c0_334 = arith.constant 0 : index
    %c112_335 = arith.constant 112 : index
    %333 = vector.load %arg36[%c0_334, %c112_335] : memref<8x401xf32, #tpu.memory_space<vmem>>, vector<8x256xf32>
    %c224_336 = arith.constant 224 : index
    %c0_337 = arith.constant 0 : index
    %334 = vector.load %arg35[%c224_336, %c0_337] : memref<360x256xf32, #tpu.memory_space<vmem>>, vector<8x256xf32>
    tpu.vector_store %arg35[%c224_336, %c0_337], %333 {strides = array<i32>} : memref<360x256xf32, #tpu.memory_space<vmem>>, vector<8x256xf32>,
    %c0_338 = arith.constant 0 : index
    %c113_339 = arith.constant 113 : index
    %335 = vector.load %arg36[%c0_338, %c113_339] : memref<8x401xf32, #tpu.memory_space<vmem>>, vector<8x256xf32>
    %336 = vector.broadcast %4 : vector<1x256xf32> to vector<8x256xf32>
    %337 = arith.mulf %335, %336 : vector<8x256xf32>
    %c232_340 = arith.constant 232 : index
    %c0_341 = arith.constant 0 : index
    %338 = vector.load %arg35[%c232_340, %c0_341] : memref<360x256xf32, #tpu.memory_space<vmem>>, vector<8x256xf32>
    tpu.vector_store %arg35[%c232_340, %c0_341], %337 {strides = array<i32>} : memref<360x256xf32, #tpu.memory_space<vmem>>, vector<8x256xf32>,
    %c0_342 = arith.constant 0 : index
    %c127_343 = arith.constant 127 : index
    %339 = vector.load %arg36[%c0_342, %c127_343] : memref<8x401xf32, #tpu.memory_space<vmem>>, vector<8x256xf32>
    %340 = vector.broadcast %5 : vector<1x256xf32> to vector<8x256xf32>
    %341 = arith.mulf %339, %340 : vector<8x256xf32>
    %c240_344 = arith.constant 240 : index
    %c0_345 = arith.constant 0 : index
    %342 = vector.load %arg35[%c240_344, %c0_345] : memref<360x256xf32, #tpu.memory_space<vmem>>, vector<8x256xf32>
    tpu.vector_store %arg35[%c240_344, %c0_345], %341 {strides = array<i32>} : memref<360x256xf32, #tpu.memory_space<vmem>>, vector<8x256xf32>,
    %c0_346 = arith.constant 0 : index
    %c128_347 = arith.constant 128 : index
    %343 = vector.load %arg36[%c0_346, %c128_347] : memref<8x401xf32, #tpu.memory_space<vmem>>, vector<8x256xf32>
    %c248_348 = arith.constant 248 : index
    %c0_349 = arith.constant 0 : index
    %344 = vector.load %arg35[%c248_348, %c0_349] : memref<360x256xf32, #tpu.memory_space<vmem>>, vector<8x256xf32>
    tpu.vector_store %arg35[%c248_348, %c0_349], %343 {strides = array<i32>} : memref<360x256xf32, #tpu.memory_space<vmem>>, vector<8x256xf32>,
    %c0_350 = arith.constant 0 : index
    %c129_351 = arith.constant 129 : index
    %345 = vector.load %arg36[%c0_350, %c129_351] : memref<8x401xf32, #tpu.memory_space<vmem>>, vector<8x256xf32>
    %346 = vector.broadcast %4 : vector<1x256xf32> to vector<8x256xf32>
    %347 = arith.mulf %345, %346 : vector<8x256xf32>
    %c256_352 = arith.constant 256 : index
    %c0_353 = arith.constant 0 : index
    %348 = vector.load %arg35[%c256_352, %c0_353] : memref<360x256xf32, #tpu.memory_space<vmem>>, vector<8x256xf32>
    tpu.vector_store %arg35[%c256_352, %c0_353], %347 {strides = array<i32>} : memref<360x256xf32, #tpu.memory_space<vmem>>, vector<8x256xf32>,
    %c0_354 = arith.constant 0 : index
    %c143_355 = arith.constant 143 : index
    %349 = vector.load %arg36[%c0_354, %c143_355] : memref<8x401xf32, #tpu.memory_space<vmem>>, vector<8x256xf32>
    %350 = vector.broadcast %5 : vector<1x256xf32> to vector<8x256xf32>
    %351 = arith.mulf %349, %350 : vector<8x256xf32>
    %c264_356 = arith.constant 264 : index
    %c0_357 = arith.constant 0 : index
    %352 = vector.load %arg35[%c264_356, %c0_357] : memref<360x256xf32, #tpu.memory_space<vmem>>, vector<8x256xf32>
    tpu.vector_store %arg35[%c264_356, %c0_357], %351 {strides = array<i32>} : memref<360x256xf32, #tpu.memory_space<vmem>>, vector<8x256xf32>,
    %c0_358 = arith.constant 0 : index
    %c144_359 = arith.constant 144 : index
    %353 = vector.load %arg36[%c0_358, %c144_359] : memref<8x401xf32, #tpu.memory_space<vmem>>, vector<8x256xf32>
    %c272_360 = arith.constant 272 : index
    %c0_361 = arith.constant 0 : index
    %354 = vector.load %arg35[%c272_360, %c0_361] : memref<360x256xf32, #tpu.memory_space<vmem>>, vector<8x256xf32>
    tpu.vector_store %arg35[%c272_360, %c0_361], %353 {strides = array<i32>} : memref<360x256xf32, #tpu.memory_space<vmem>>, vector<8x256xf32>,
    %c0_362 = arith.constant 0 : index
    %c145_363 = arith.constant 145 : index
    %355 = vector.load %arg36[%c0_362, %c145_363] : memref<8x401xf32, #tpu.memory_space<vmem>>, vector<8x256xf32>
    %356 = vector.broadcast %4 : vector<1x256xf32> to vector<8x256xf32>
    %357 = arith.mulf %355, %356 : vector<8x256xf32>
    %c280_364 = arith.constant 280 : index
    %c0_365 = arith.constant 0 : index
    %358 = vector.load %arg35[%c280_364, %c0_365] : memref<360x256xf32, #tpu.memory_space<vmem>>, vector<8x256xf32>
    tpu.vector_store %arg35[%c280_364, %c0_365], %357 {strides = array<i32>} : memref<360x256xf32, #tpu.memory_space<vmem>>, vector<8x256xf32>,
    %c0_366 = arith.constant 0 : index
    %c0_367 = arith.constant 0 : index
    %359 = vector.load %arg12[%c0_366, %c0_367] : memref<8x288xf32, #tpu.memory_space<vmem>>, vector<8x288xf32>
    %c0_368 = arith.constant 0 : index
    %c0_369 = arith.constant 0 : index
    %360 = vector.load %arg35[%c0_368, %c0_369] : memref<360x256xf32, #tpu.memory_space<vmem>>, vector<288x256xf32>
    %cst_370 = arith.constant dense<0.000000e+00> : vector<8x256xf32>
    %361 = tpu.matmul %359, %360, %cst_370 {dimension_numbers = #tpu.dot_dimension_numbers<[1], [0], [0], [1], [0, 0, 1, 1], [], []>} : vector<8x288xf32>, vector<288x256xf32>, vector<8x256xf32> -> vector<8x256xf32>
    %c0_371 = arith.constant 0 : index
    %c0_372 = arith.constant 0 : index
    %362 = vector.load %arg27[%c0_371, %c0_372] : memref<8x1xf32, #tpu.memory_space<vmem>>, vector<8x1xf32>
    %363 = vector.broadcast %362 : vector<8x1xf32> to vector<8x256xf32>
    %364 = arith.addf %361, %363 : vector<8x256xf32>
    %cst_373 = arith.constant 2.000000e-01 : f32
    %365 = vector.broadcast %cst_373 : f32 to vector<8x256xf32>
    %366 = arith.mulf %365, %364 : vector<8x256xf32>
    %367 = arith.maximumf %364, %366 : vector<8x256xf32>
    %c0_374 = arith.constant 0 : index
    %c128_375 = arith.constant 128 : index
    %368 = vector.load %arg36[%c0_374, %c128_375] : memref<8x401xf32, #tpu.memory_space<vmem>>, vector<8x256xf32>
    tpu.vector_store %arg36[%c0_374, %c128_375], %367 {strides = array<i32>} : memref<8x401xf32, #tpu.memory_space<vmem>>, vector<8x256xf32>,
    %c0_376 = arith.constant 0 : index
    %c111_377 = arith.constant 111 : index
    %369 = vector.load %arg36[%c0_376, %c111_377] : memref<8x401xf32, #tpu.memory_space<vmem>>, vector<8x256xf32>
    %370 = vector.broadcast %5 : vector<1x256xf32> to vector<8x256xf32>
    %371 = arith.mulf %369, %370 : vector<8x256xf32>
    %c288_378 = arith.constant 288 : index
    %c0_379 = arith.constant 0 : index
    %372 = vector.load %arg35[%c288_378, %c0_379] : memref<360x256xf32, #tpu.memory_space<vmem>>, vector<8x256xf32>
    tpu.vector_store %arg35[%c288_378, %c0_379], %371 {strides = array<i32>} : memref<360x256xf32, #tpu.memory_space<vmem>>, vector<8x256xf32>,
    %c0_380 = arith.constant 0 : index
    %c112_381 = arith.constant 112 : index
    %373 = vector.load %arg36[%c0_380, %c112_381] : memref<8x401xf32, #tpu.memory_space<vmem>>, vector<8x256xf32>
    %c296_382 = arith.constant 296 : index
    %c0_383 = arith.constant 0 : index
    %374 = vector.load %arg35[%c296_382, %c0_383] : memref<360x256xf32, #tpu.memory_space<vmem>>, vector<8x256xf32>
    tpu.vector_store %arg35[%c296_382, %c0_383], %373 {strides = array<i32>} : memref<360x256xf32, #tpu.memory_space<vmem>>, vector<8x256xf32>,
    %c0_384 = arith.constant 0 : index
    %c113_385 = arith.constant 113 : index
    %375 = vector.load %arg36[%c0_384, %c113_385] : memref<8x401xf32, #tpu.memory_space<vmem>>, vector<8x256xf32>
    %376 = vector.broadcast %4 : vector<1x256xf32> to vector<8x256xf32>
    %377 = arith.mulf %375, %376 : vector<8x256xf32>
    %c304_386 = arith.constant 304 : index
    %c0_387 = arith.constant 0 : index
    %378 = vector.load %arg35[%c304_386, %c0_387] : memref<360x256xf32, #tpu.memory_space<vmem>>, vector<8x256xf32>
    tpu.vector_store %arg35[%c304_386, %c0_387], %377 {strides = array<i32>} : memref<360x256xf32, #tpu.memory_space<vmem>>, vector<8x256xf32>,
    %c0_388 = arith.constant 0 : index
    %c127_389 = arith.constant 127 : index
    %379 = vector.load %arg36[%c0_388, %c127_389] : memref<8x401xf32, #tpu.memory_space<vmem>>, vector<8x256xf32>
    %380 = vector.broadcast %5 : vector<1x256xf32> to vector<8x256xf32>
    %381 = arith.mulf %379, %380 : vector<8x256xf32>
    %c312_390 = arith.constant 312 : index
    %c0_391 = arith.constant 0 : index
    %382 = vector.load %arg35[%c312_390, %c0_391] : memref<360x256xf32, #tpu.memory_space<vmem>>, vector<8x256xf32>
    tpu.vector_store %arg35[%c312_390, %c0_391], %381 {strides = array<i32>} : memref<360x256xf32, #tpu.memory_space<vmem>>, vector<8x256xf32>,
    %c0_392 = arith.constant 0 : index
    %c128_393 = arith.constant 128 : index
    %383 = vector.load %arg36[%c0_392, %c128_393] : memref<8x401xf32, #tpu.memory_space<vmem>>, vector<8x256xf32>
    %c320_394 = arith.constant 320 : index
    %c0_395 = arith.constant 0 : index
    %384 = vector.load %arg35[%c320_394, %c0_395] : memref<360x256xf32, #tpu.memory_space<vmem>>, vector<8x256xf32>
    tpu.vector_store %arg35[%c320_394, %c0_395], %383 {strides = array<i32>} : memref<360x256xf32, #tpu.memory_space<vmem>>, vector<8x256xf32>,
    %c0_396 = arith.constant 0 : index
    %c129_397 = arith.constant 129 : index
    %385 = vector.load %arg36[%c0_396, %c129_397] : memref<8x401xf32, #tpu.memory_space<vmem>>, vector<8x256xf32>
    %386 = vector.broadcast %4 : vector<1x256xf32> to vector<8x256xf32>
    %387 = arith.mulf %385, %386 : vector<8x256xf32>
    %c328_398 = arith.constant 328 : index
    %c0_399 = arith.constant 0 : index
    %388 = vector.load %arg35[%c328_398, %c0_399] : memref<360x256xf32, #tpu.memory_space<vmem>>, vector<8x256xf32>
    tpu.vector_store %arg35[%c328_398, %c0_399], %387 {strides = array<i32>} : memref<360x256xf32, #tpu.memory_space<vmem>>, vector<8x256xf32>,
    %c0_400 = arith.constant 0 : index
    %c143_401 = arith.constant 143 : index
    %389 = vector.load %arg36[%c0_400, %c143_401] : memref<8x401xf32, #tpu.memory_space<vmem>>, vector<8x256xf32>
    %390 = vector.broadcast %5 : vector<1x256xf32> to vector<8x256xf32>
    %391 = arith.mulf %389, %390 : vector<8x256xf32>
    %c336_402 = arith.constant 336 : index
    %c0_403 = arith.constant 0 : index
    %392 = vector.load %arg35[%c336_402, %c0_403] : memref<360x256xf32, #tpu.memory_space<vmem>>, vector<8x256xf32>
    tpu.vector_store %arg35[%c336_402, %c0_403], %391 {strides = array<i32>} : memref<360x256xf32, #tpu.memory_space<vmem>>, vector<8x256xf32>,
    %c0_404 = arith.constant 0 : index
    %c144_405 = arith.constant 144 : index
    %393 = vector.load %arg36[%c0_404, %c144_405] : memref<8x401xf32, #tpu.memory_space<vmem>>, vector<8x256xf32>
    %c344_406 = arith.constant 344 : index
    %c0_407 = arith.constant 0 : index
    %394 = vector.load %arg35[%c344_406, %c0_407] : memref<360x256xf32, #tpu.memory_space<vmem>>, vector<8x256xf32>
    tpu.vector_store %arg35[%c344_406, %c0_407], %393 {strides = array<i32>} : memref<360x256xf32, #tpu.memory_space<vmem>>, vector<8x256xf32>,
    %c0_408 = arith.constant 0 : index
    %c145_409 = arith.constant 145 : index
    %395 = vector.load %arg36[%c0_408, %c145_409] : memref<8x401xf32, #tpu.memory_space<vmem>>, vector<8x256xf32>
    %396 = vector.broadcast %4 : vector<1x256xf32> to vector<8x256xf32>
    %397 = arith.mulf %395, %396 : vector<8x256xf32>
    %c352_410 = arith.constant 352 : index
    %c0_411 = arith.constant 0 : index
    %398 = vector.load %arg35[%c352_410, %c0_411] : memref<360x256xf32, #tpu.memory_space<vmem>>, vector<8x256xf32>
    tpu.vector_store %arg35[%c352_410, %c0_411], %397 {strides = array<i32>} : memref<360x256xf32, #tpu.memory_space<vmem>>, vector<8x256xf32>,
    %c0_412 = arith.constant 0 : index
    %c0_413 = arith.constant 0 : index
    %399 = vector.load %arg13[%c0_412, %c0_413] : memref<8x360xf32, #tpu.memory_space<vmem>>, vector<8x360xf32>
    %c0_414 = arith.constant 0 : index
    %c0_415 = arith.constant 0 : index
    %400 = vector.load %arg35[%c0_414, %c0_415] : memref<360x256xf32, #tpu.memory_space<vmem>>, vector<360x256xf32>
    %cst_416 = arith.constant dense<0.000000e+00> : vector<8x256xf32>
    %401 = tpu.matmul %399, %400, %cst_416 {dimension_numbers = #tpu.dot_dimension_numbers<[1], [0], [0], [1], [0, 0, 1, 1], [], []>} : vector<8x360xf32>, vector<360x256xf32>, vector<8x256xf32> -> vector<8x256xf32>
    %c0_417 = arith.constant 0 : index
    %c0_418 = arith.constant 0 : index
    %402 = vector.load %arg28[%c0_417, %c0_418] : memref<8x1xf32, #tpu.memory_space<vmem>>, vector<8x1xf32>
    %403 = vector.broadcast %402 : vector<8x1xf32> to vector<8x256xf32>
    %404 = arith.addf %401, %403 : vector<8x256xf32>
    %cst_419 = arith.constant 2.000000e-01 : f32
    %405 = vector.broadcast %cst_419 : f32 to vector<8x256xf32>
    %406 = arith.mulf %404, %405 : vector<8x256xf32>
    %407 = arith.addf %406, %207 : vector<8x256xf32>
    %c0_420 = arith.constant 0 : index
    %c128_421 = arith.constant 128 : index
    %408 = vector.load %arg36[%c0_420, %c128_421] : memref<8x401xf32, #tpu.memory_space<vmem>>, vector<8x256xf32>
    tpu.vector_store %arg36[%c0_420, %c128_421], %407 {strides = array<i32>} : memref<8x401xf32, #tpu.memory_space<vmem>>, vector<8x256xf32>,
    %c0_422 = arith.constant 0 : index
    %c111_423 = arith.constant 111 : index
    %409 = vector.load %arg36[%c0_422, %c111_423] : memref<8x401xf32, #tpu.memory_space<vmem>>, vector<8x256xf32>
    %410 = vector.broadcast %5 : vector<1x256xf32> to vector<8x256xf32>
    %411 = arith.mulf %409, %410 : vector<8x256xf32>
    %c0_424 = arith.constant 0 : index
    %c0_425 = arith.constant 0 : index
    %412 = vector.load %arg35[%c0_424, %c0_425] : memref<360x256xf32, #tpu.memory_space<vmem>>, vector<8x256xf32>
    tpu.vector_store %arg35[%c0_424, %c0_425], %411 {strides = array<i32>} : memref<360x256xf32, #tpu.memory_space<vmem>>, vector<8x256xf32>,
    %c0_426 = arith.constant 0 : index
    %c112_427 = arith.constant 112 : index
    %413 = vector.load %arg36[%c0_426, %c112_427] : memref<8x401xf32, #tpu.memory_space<vmem>>, vector<8x256xf32>
    %c8_428 = arith.constant 8 : index
    %c0_429 = arith.constant 0 : index
    %414 = vector.load %arg35[%c8_428, %c0_429] : memref<360x256xf32, #tpu.memory_space<vmem>>, vector<8x256xf32>
    tpu.vector_store %arg35[%c8_428, %c0_429], %413 {strides = array<i32>} : memref<360x256xf32, #tpu.memory_space<vmem>>, vector<8x256xf32>,
    %c0_430 = arith.constant 0 : index
    %c113_431 = arith.constant 113 : index
    %415 = vector.load %arg36[%c0_430, %c113_431] : memref<8x401xf32, #tpu.memory_space<vmem>>, vector<8x256xf32>
    %416 = vector.broadcast %4 : vector<1x256xf32> to vector<8x256xf32>
    %417 = arith.mulf %415, %416 : vector<8x256xf32>
    %c16_432 = arith.constant 16 : index
    %c0_433 = arith.constant 0 : index
    %418 = vector.load %arg35[%c16_432, %c0_433] : memref<360x256xf32, #tpu.memory_space<vmem>>, vector<8x256xf32>
    tpu.vector_store %arg35[%c16_432, %c0_433], %417 {strides = array<i32>} : memref<360x256xf32, #tpu.memory_space<vmem>>, vector<8x256xf32>,
    %c0_434 = arith.constant 0 : index
    %c127_435 = arith.constant 127 : index
    %419 = vector.load %arg36[%c0_434, %c127_435] : memref<8x401xf32, #tpu.memory_space<vmem>>, vector<8x256xf32>
    %420 = vector.broadcast %5 : vector<1x256xf32> to vector<8x256xf32>
    %421 = arith.mulf %419, %420 : vector<8x256xf32>
    %c24_436 = arith.constant 24 : index
    %c0_437 = arith.constant 0 : index
    %422 = vector.load %arg35[%c24_436, %c0_437] : memref<360x256xf32, #tpu.memory_space<vmem>>, vector<8x256xf32>
    tpu.vector_store %arg35[%c24_436, %c0_437], %421 {strides = array<i32>} : memref<360x256xf32, #tpu.memory_space<vmem>>, vector<8x256xf32>,
    %c0_438 = arith.constant 0 : index
    %c128_439 = arith.constant 128 : index
    %423 = vector.load %arg36[%c0_438, %c128_439] : memref<8x401xf32, #tpu.memory_space<vmem>>, vector<8x256xf32>
    %c32_440 = arith.constant 32 : index
    %c0_441 = arith.constant 0 : index
    %424 = vector.load %arg35[%c32_440, %c0_441] : memref<360x256xf32, #tpu.memory_space<vmem>>, vector<8x256xf32>
    tpu.vector_store %arg35[%c32_440, %c0_441], %423 {strides = array<i32>} : memref<360x256xf32, #tpu.memory_space<vmem>>, vector<8x256xf32>,
    %c0_442 = arith.constant 0 : index
    %c129_443 = arith.constant 129 : index
    %425 = vector.load %arg36[%c0_442, %c129_443] : memref<8x401xf32, #tpu.memory_space<vmem>>, vector<8x256xf32>
    %426 = vector.broadcast %4 : vector<1x256xf32> to vector<8x256xf32>
    %427 = arith.mulf %425, %426 : vector<8x256xf32>
    %c40_444 = arith.constant 40 : index
    %c0_445 = arith.constant 0 : index
    %428 = vector.load %arg35[%c40_444, %c0_445] : memref<360x256xf32, #tpu.memory_space<vmem>>, vector<8x256xf32>
    tpu.vector_store %arg35[%c40_444, %c0_445], %427 {strides = array<i32>} : memref<360x256xf32, #tpu.memory_space<vmem>>, vector<8x256xf32>,
    %c0_446 = arith.constant 0 : index
    %c143_447 = arith.constant 143 : index
    %429 = vector.load %arg36[%c0_446, %c143_447] : memref<8x401xf32, #tpu.memory_space<vmem>>, vector<8x256xf32>
    %430 = vector.broadcast %5 : vector<1x256xf32> to vector<8x256xf32>
    %431 = arith.mulf %429, %430 : vector<8x256xf32>
    %c48_448 = arith.constant 48 : index
    %c0_449 = arith.constant 0 : index
    %432 = vector.load %arg35[%c48_448, %c0_449] : memref<360x256xf32, #tpu.memory_space<vmem>>, vector<8x256xf32>
    tpu.vector_store %arg35[%c48_448, %c0_449], %431 {strides = array<i32>} : memref<360x256xf32, #tpu.memory_space<vmem>>, vector<8x256xf32>,
    %c0_450 = arith.constant 0 : index
    %c144_451 = arith.constant 144 : index
    %433 = vector.load %arg36[%c0_450, %c144_451] : memref<8x401xf32, #tpu.memory_space<vmem>>, vector<8x256xf32>
    %c56_452 = arith.constant 56 : index
    %c0_453 = arith.constant 0 : index
    %434 = vector.load %arg35[%c56_452, %c0_453] : memref<360x256xf32, #tpu.memory_space<vmem>>, vector<8x256xf32>
    tpu.vector_store %arg35[%c56_452, %c0_453], %433 {strides = array<i32>} : memref<360x256xf32, #tpu.memory_space<vmem>>, vector<8x256xf32>,
    %c0_454 = arith.constant 0 : index
    %c145_455 = arith.constant 145 : index
    %435 = vector.load %arg36[%c0_454, %c145_455] : memref<8x401xf32, #tpu.memory_space<vmem>>, vector<8x256xf32>
    %436 = vector.broadcast %4 : vector<1x256xf32> to vector<8x256xf32>
    %437 = arith.mulf %435, %436 : vector<8x256xf32>
    %c64_456 = arith.constant 64 : index
    %c0_457 = arith.constant 0 : index
    %438 = vector.load %arg35[%c64_456, %c0_457] : memref<360x256xf32, #tpu.memory_space<vmem>>, vector<8x256xf32>
    tpu.vector_store %arg35[%c64_456, %c0_457], %437 {strides = array<i32>} : memref<360x256xf32, #tpu.memory_space<vmem>>, vector<8x256xf32>,
    %c0_458 = arith.constant 0 : index
    %c0_459 = arith.constant 0 : index
    %439 = vector.load %arg14[%c0_458, %c0_459] : memref<8x72xf32, #tpu.memory_space<vmem>>, vector<8x72xf32>
    %c0_460 = arith.constant 0 : index
    %c0_461 = arith.constant 0 : index
    %440 = vector.load %arg35[%c0_460, %c0_461] : memref<360x256xf32, #tpu.memory_space<vmem>>, vector<72x256xf32>
    %cst_462 = arith.constant dense<0.000000e+00> : vector<8x256xf32>
    %441 = tpu.matmul %439, %440, %cst_462 {dimension_numbers = #tpu.dot_dimension_numbers<[1], [0], [0], [1], [0, 0, 1, 1], [], []>} : vector<8x72xf32>, vector<72x256xf32>, vector<8x256xf32> -> vector<8x256xf32>
    %c0_463 = arith.constant 0 : index
    %c0_464 = arith.constant 0 : index
    %442 = vector.load %arg29[%c0_463, %c0_464] : memref<8x1xf32, #tpu.memory_space<vmem>>, vector<8x1xf32>
    %443 = vector.broadcast %442 : vector<8x1xf32> to vector<8x256xf32>
    %444 = arith.addf %441, %443 : vector<8x256xf32>
    %cst_465 = arith.constant 2.000000e-01 : f32
    %445 = vector.broadcast %cst_465 : f32 to vector<8x256xf32>
    %446 = arith.mulf %445, %444 : vector<8x256xf32>
    %447 = arith.maximumf %444, %446 : vector<8x256xf32>
    %c0_466 = arith.constant 0 : index
    %c128_467 = arith.constant 128 : index
    %448 = vector.load %arg36[%c0_466, %c128_467] : memref<8x401xf32, #tpu.memory_space<vmem>>, vector<8x256xf32>
    tpu.vector_store %arg36[%c0_466, %c128_467], %447 {strides = array<i32>} : memref<8x401xf32, #tpu.memory_space<vmem>>, vector<8x256xf32>,
    %c0_468 = arith.constant 0 : index
    %c111_469 = arith.constant 111 : index
    %449 = vector.load %arg36[%c0_468, %c111_469] : memref<8x401xf32, #tpu.memory_space<vmem>>, vector<8x256xf32>
    %450 = vector.broadcast %5 : vector<1x256xf32> to vector<8x256xf32>
    %451 = arith.mulf %449, %450 : vector<8x256xf32>
    %c72_470 = arith.constant 72 : index
    %c0_471 = arith.constant 0 : index
    %452 = vector.load %arg35[%c72_470, %c0_471] : memref<360x256xf32, #tpu.memory_space<vmem>>, vector<8x256xf32>
    tpu.vector_store %arg35[%c72_470, %c0_471], %451 {strides = array<i32>} : memref<360x256xf32, #tpu.memory_space<vmem>>, vector<8x256xf32>,
    %c0_472 = arith.constant 0 : index
    %c112_473 = arith.constant 112 : index
    %453 = vector.load %arg36[%c0_472, %c112_473] : memref<8x401xf32, #tpu.memory_space<vmem>>, vector<8x256xf32>
    %c80_474 = arith.constant 80 : index
    %c0_475 = arith.constant 0 : index
    %454 = vector.load %arg35[%c80_474, %c0_475] : memref<360x256xf32, #tpu.memory_space<vmem>>, vector<8x256xf32>
    tpu.vector_store %arg35[%c80_474, %c0_475], %453 {strides = array<i32>} : memref<360x256xf32, #tpu.memory_space<vmem>>, vector<8x256xf32>,
    %c0_476 = arith.constant 0 : index
    %c113_477 = arith.constant 113 : index
    %455 = vector.load %arg36[%c0_476, %c113_477] : memref<8x401xf32, #tpu.memory_space<vmem>>, vector<8x256xf32>
    %456 = vector.broadcast %4 : vector<1x256xf32> to vector<8x256xf32>
    %457 = arith.mulf %455, %456 : vector<8x256xf32>
    %c88_478 = arith.constant 88 : index
    %c0_479 = arith.constant 0 : index
    %458 = vector.load %arg35[%c88_478, %c0_479] : memref<360x256xf32, #tpu.memory_space<vmem>>, vector<8x256xf32>
    tpu.vector_store %arg35[%c88_478, %c0_479], %457 {strides = array<i32>} : memref<360x256xf32, #tpu.memory_space<vmem>>, vector<8x256xf32>,
    %c0_480 = arith.constant 0 : index
    %c127_481 = arith.constant 127 : index
    %459 = vector.load %arg36[%c0_480, %c127_481] : memref<8x401xf32, #tpu.memory_space<vmem>>, vector<8x256xf32>
    %460 = vector.broadcast %5 : vector<1x256xf32> to vector<8x256xf32>
    %461 = arith.mulf %459, %460 : vector<8x256xf32>
    %c96_482 = arith.constant 96 : index
    %c0_483 = arith.constant 0 : index
    %462 = vector.load %arg35[%c96_482, %c0_483] : memref<360x256xf32, #tpu.memory_space<vmem>>, vector<8x256xf32>
    tpu.vector_store %arg35[%c96_482, %c0_483], %461 {strides = array<i32>} : memref<360x256xf32, #tpu.memory_space<vmem>>, vector<8x256xf32>,
    %c0_484 = arith.constant 0 : index
    %c128_485 = arith.constant 128 : index
    %463 = vector.load %arg36[%c0_484, %c128_485] : memref<8x401xf32, #tpu.memory_space<vmem>>, vector<8x256xf32>
    %c104_486 = arith.constant 104 : index
    %c0_487 = arith.constant 0 : index
    %464 = vector.load %arg35[%c104_486, %c0_487] : memref<360x256xf32, #tpu.memory_space<vmem>>, vector<8x256xf32>
    tpu.vector_store %arg35[%c104_486, %c0_487], %463 {strides = array<i32>} : memref<360x256xf32, #tpu.memory_space<vmem>>, vector<8x256xf32>,
    %c0_488 = arith.constant 0 : index
    %c129_489 = arith.constant 129 : index
    %465 = vector.load %arg36[%c0_488, %c129_489] : memref<8x401xf32, #tpu.memory_space<vmem>>, vector<8x256xf32>
    %466 = vector.broadcast %4 : vector<1x256xf32> to vector<8x256xf32>
    %467 = arith.mulf %465, %466 : vector<8x256xf32>
    %c112_490 = arith.constant 112 : index
    %c0_491 = arith.constant 0 : index
    %468 = vector.load %arg35[%c112_490, %c0_491] : memref<360x256xf32, #tpu.memory_space<vmem>>, vector<8x256xf32>
    tpu.vector_store %arg35[%c112_490, %c0_491], %467 {strides = array<i32>} : memref<360x256xf32, #tpu.memory_space<vmem>>, vector<8x256xf32>,
    %c0_492 = arith.constant 0 : index
    %c143_493 = arith.constant 143 : index
    %469 = vector.load %arg36[%c0_492, %c143_493] : memref<8x401xf32, #tpu.memory_space<vmem>>, vector<8x256xf32>
    %470 = vector.broadcast %5 : vector<1x256xf32> to vector<8x256xf32>
    %471 = arith.mulf %469, %470 : vector<8x256xf32>
    %c120_494 = arith.constant 120 : index
    %c0_495 = arith.constant 0 : index
    %472 = vector.load %arg35[%c120_494, %c0_495] : memref<360x256xf32, #tpu.memory_space<vmem>>, vector<8x256xf32>
    tpu.vector_store %arg35[%c120_494, %c0_495], %471 {strides = array<i32>} : memref<360x256xf32, #tpu.memory_space<vmem>>, vector<8x256xf32>,
    %c0_496 = arith.constant 0 : index
    %c144_497 = arith.constant 144 : index
    %473 = vector.load %arg36[%c0_496, %c144_497] : memref<8x401xf32, #tpu.memory_space<vmem>>, vector<8x256xf32>
    %c128_498 = arith.constant 128 : index
    %c0_499 = arith.constant 0 : index
    %474 = vector.load %arg35[%c128_498, %c0_499] : memref<360x256xf32, #tpu.memory_space<vmem>>, vector<8x256xf32>
    tpu.vector_store %arg35[%c128_498, %c0_499], %473 {strides = array<i32>} : memref<360x256xf32, #tpu.memory_space<vmem>>, vector<8x256xf32>,
    %c0_500 = arith.constant 0 : index
    %c145_501 = arith.constant 145 : index
    %475 = vector.load %arg36[%c0_500, %c145_501] : memref<8x401xf32, #tpu.memory_space<vmem>>, vector<8x256xf32>
    %476 = vector.broadcast %4 : vector<1x256xf32> to vector<8x256xf32>
    %477 = arith.mulf %475, %476 : vector<8x256xf32>
    %c136_502 = arith.constant 136 : index
    %c0_503 = arith.constant 0 : index
    %478 = vector.load %arg35[%c136_502, %c0_503] : memref<360x256xf32, #tpu.memory_space<vmem>>, vector<8x256xf32>
    tpu.vector_store %arg35[%c136_502, %c0_503], %477 {strides = array<i32>} : memref<360x256xf32, #tpu.memory_space<vmem>>, vector<8x256xf32>,
    %c0_504 = arith.constant 0 : index
    %c0_505 = arith.constant 0 : index
    %479 = vector.load %arg15[%c0_504, %c0_505] : memref<8x144xf32, #tpu.memory_space<vmem>>, vector<8x144xf32>
    %c0_506 = arith.constant 0 : index
    %c0_507 = arith.constant 0 : index
    %480 = vector.load %arg35[%c0_506, %c0_507] : memref<360x256xf32, #tpu.memory_space<vmem>>, vector<144x256xf32>
    %cst_508 = arith.constant dense<0.000000e+00> : vector<8x256xf32>
    %481 = tpu.matmul %479, %480, %cst_508 {dimension_numbers = #tpu.dot_dimension_numbers<[1], [0], [0], [1], [0, 0, 1, 1], [], []>} : vector<8x144xf32>, vector<144x256xf32>, vector<8x256xf32> -> vector<8x256xf32>
    %c0_509 = arith.constant 0 : index
    %c0_510 = arith.constant 0 : index
    %482 = vector.load %arg30[%c0_509, %c0_510] : memref<8x1xf32, #tpu.memory_space<vmem>>, vector<8x1xf32>
    %483 = vector.broadcast %482 : vector<8x1xf32> to vector<8x256xf32>
    %484 = arith.addf %481, %483 : vector<8x256xf32>
    %cst_511 = arith.constant 2.000000e-01 : f32
    %485 = vector.broadcast %cst_511 : f32 to vector<8x256xf32>
    %486 = arith.mulf %485, %484 : vector<8x256xf32>
    %487 = arith.maximumf %484, %486 : vector<8x256xf32>
    %c0_512 = arith.constant 0 : index
    %c128_513 = arith.constant 128 : index
    %488 = vector.load %arg36[%c0_512, %c128_513] : memref<8x401xf32, #tpu.memory_space<vmem>>, vector<8x256xf32>
    tpu.vector_store %arg36[%c0_512, %c128_513], %487 {strides = array<i32>} : memref<8x401xf32, #tpu.memory_space<vmem>>, vector<8x256xf32>,
    %c0_514 = arith.constant 0 : index
    %c111_515 = arith.constant 111 : index
    %489 = vector.load %arg36[%c0_514, %c111_515] : memref<8x401xf32, #tpu.memory_space<vmem>>, vector<8x256xf32>
    %490 = vector.broadcast %5 : vector<1x256xf32> to vector<8x256xf32>
    %491 = arith.mulf %489, %490 : vector<8x256xf32>
    %c144_516 = arith.constant 144 : index
    %c0_517 = arith.constant 0 : index
    %492 = vector.load %arg35[%c144_516, %c0_517] : memref<360x256xf32, #tpu.memory_space<vmem>>, vector<8x256xf32>
    tpu.vector_store %arg35[%c144_516, %c0_517], %491 {strides = array<i32>} : memref<360x256xf32, #tpu.memory_space<vmem>>, vector<8x256xf32>,
    %c0_518 = arith.constant 0 : index
    %c112_519 = arith.constant 112 : index
    %493 = vector.load %arg36[%c0_518, %c112_519] : memref<8x401xf32, #tpu.memory_space<vmem>>, vector<8x256xf32>
    %c152_520 = arith.constant 152 : index
    %c0_521 = arith.constant 0 : index
    %494 = vector.load %arg35[%c152_520, %c0_521] : memref<360x256xf32, #tpu.memory_space<vmem>>, vector<8x256xf32>
    tpu.vector_store %arg35[%c152_520, %c0_521], %493 {strides = array<i32>} : memref<360x256xf32, #tpu.memory_space<vmem>>, vector<8x256xf32>,
    %c0_522 = arith.constant 0 : index
    %c113_523 = arith.constant 113 : index
    %495 = vector.load %arg36[%c0_522, %c113_523] : memref<8x401xf32, #tpu.memory_space<vmem>>, vector<8x256xf32>
    %496 = vector.broadcast %4 : vector<1x256xf32> to vector<8x256xf32>
    %497 = arith.mulf %495, %496 : vector<8x256xf32>
    %c160_524 = arith.constant 160 : index
    %c0_525 = arith.constant 0 : index
    %498 = vector.load %arg35[%c160_524, %c0_525] : memref<360x256xf32, #tpu.memory_space<vmem>>, vector<8x256xf32>
    tpu.vector_store %arg35[%c160_524, %c0_525], %497 {strides = array<i32>} : memref<360x256xf32, #tpu.memory_space<vmem>>, vector<8x256xf32>,
    %c0_526 = arith.constant 0 : index
    %c127_527 = arith.constant 127 : index
    %499 = vector.load %arg36[%c0_526, %c127_527] : memref<8x401xf32, #tpu.memory_space<vmem>>, vector<8x256xf32>
    %500 = vector.broadcast %5 : vector<1x256xf32> to vector<8x256xf32>
    %501 = arith.mulf %499, %500 : vector<8x256xf32>
    %c168_528 = arith.constant 168 : index
    %c0_529 = arith.constant 0 : index
    %502 = vector.load %arg35[%c168_528, %c0_529] : memref<360x256xf32, #tpu.memory_space<vmem>>, vector<8x256xf32>
    tpu.vector_store %arg35[%c168_528, %c0_529], %501 {strides = array<i32>} : memref<360x256xf32, #tpu.memory_space<vmem>>, vector<8x256xf32>,
    %c0_530 = arith.constant 0 : index
    %c128_531 = arith.constant 128 : index
    %503 = vector.load %arg36[%c0_530, %c128_531] : memref<8x401xf32, #tpu.memory_space<vmem>>, vector<8x256xf32>
    %c176_532 = arith.constant 176 : index
    %c0_533 = arith.constant 0 : index
    %504 = vector.load %arg35[%c176_532, %c0_533] : memref<360x256xf32, #tpu.memory_space<vmem>>, vector<8x256xf32>
    tpu.vector_store %arg35[%c176_532, %c0_533], %503 {strides = array<i32>} : memref<360x256xf32, #tpu.memory_space<vmem>>, vector<8x256xf32>,
    %c0_534 = arith.constant 0 : index
    %c129_535 = arith.constant 129 : index
    %505 = vector.load %arg36[%c0_534, %c129_535] : memref<8x401xf32, #tpu.memory_space<vmem>>, vector<8x256xf32>
    %506 = vector.broadcast %4 : vector<1x256xf32> to vector<8x256xf32>
    %507 = arith.mulf %505, %506 : vector<8x256xf32>
    %c184_536 = arith.constant 184 : index
    %c0_537 = arith.constant 0 : index
    %508 = vector.load %arg35[%c184_536, %c0_537] : memref<360x256xf32, #tpu.memory_space<vmem>>, vector<8x256xf32>
    tpu.vector_store %arg35[%c184_536, %c0_537], %507 {strides = array<i32>} : memref<360x256xf32, #tpu.memory_space<vmem>>, vector<8x256xf32>,
    %c0_538 = arith.constant 0 : index
    %c143_539 = arith.constant 143 : index
    %509 = vector.load %arg36[%c0_538, %c143_539] : memref<8x401xf32, #tpu.memory_space<vmem>>, vector<8x256xf32>
    %510 = vector.broadcast %5 : vector<1x256xf32> to vector<8x256xf32>
    %511 = arith.mulf %509, %510 : vector<8x256xf32>
    %c192_540 = arith.constant 192 : index
    %c0_541 = arith.constant 0 : index
    %512 = vector.load %arg35[%c192_540, %c0_541] : memref<360x256xf32, #tpu.memory_space<vmem>>, vector<8x256xf32>
    tpu.vector_store %arg35[%c192_540, %c0_541], %511 {strides = array<i32>} : memref<360x256xf32, #tpu.memory_space<vmem>>, vector<8x256xf32>,
    %c0_542 = arith.constant 0 : index
    %c144_543 = arith.constant 144 : index
    %513 = vector.load %arg36[%c0_542, %c144_543] : memref<8x401xf32, #tpu.memory_space<vmem>>, vector<8x256xf32>
    %c200_544 = arith.constant 200 : index
    %c0_545 = arith.constant 0 : index
    %514 = vector.load %arg35[%c200_544, %c0_545] : memref<360x256xf32, #tpu.memory_space<vmem>>, vector<8x256xf32>
    tpu.vector_store %arg35[%c200_544, %c0_545], %513 {strides = array<i32>} : memref<360x256xf32, #tpu.memory_space<vmem>>, vector<8x256xf32>,
    %c0_546 = arith.constant 0 : index
    %c145_547 = arith.constant 145 : index
    %515 = vector.load %arg36[%c0_546, %c145_547] : memref<8x401xf32, #tpu.memory_space<vmem>>, vector<8x256xf32>
    %516 = vector.broadcast %4 : vector<1x256xf32> to vector<8x256xf32>
    %517 = arith.mulf %515, %516 : vector<8x256xf32>
    %c208_548 = arith.constant 208 : index
    %c0_549 = arith.constant 0 : index
    %518 = vector.load %arg35[%c208_548, %c0_549] : memref<360x256xf32, #tpu.memory_space<vmem>>, vector<8x256xf32>
    tpu.vector_store %arg35[%c208_548, %c0_549], %517 {strides = array<i32>} : memref<360x256xf32, #tpu.memory_space<vmem>>, vector<8x256xf32>,
    %c0_550 = arith.constant 0 : index
    %c0_551 = arith.constant 0 : index
    %519 = vector.load %arg16[%c0_550, %c0_551] : memref<8x216xf32, #tpu.memory_space<vmem>>, vector<8x216xf32>
    %c0_552 = arith.constant 0 : index
    %c0_553 = arith.constant 0 : index
    %520 = vector.load %arg35[%c0_552, %c0_553] : memref<360x256xf32, #tpu.memory_space<vmem>>, vector<216x256xf32>
    %cst_554 = arith.constant dense<0.000000e+00> : vector<8x256xf32>
    %521 = tpu.matmul %519, %520, %cst_554 {dimension_numbers = #tpu.dot_dimension_numbers<[1], [0], [0], [1], [0, 0, 1, 1], [], []>} : vector<8x216xf32>, vector<216x256xf32>, vector<8x256xf32> -> vector<8x256xf32>
    %c0_555 = arith.constant 0 : index
    %c0_556 = arith.constant 0 : index
    %522 = vector.load %arg31[%c0_555, %c0_556] : memref<8x1xf32, #tpu.memory_space<vmem>>, vector<8x1xf32>
    %523 = vector.broadcast %522 : vector<8x1xf32> to vector<8x256xf32>
    %524 = arith.addf %521, %523 : vector<8x256xf32>
    %cst_557 = arith.constant 2.000000e-01 : f32
    %525 = vector.broadcast %cst_557 : f32 to vector<8x256xf32>
    %526 = arith.mulf %525, %524 : vector<8x256xf32>
    %527 = arith.maximumf %524, %526 : vector<8x256xf32>
    %c0_558 = arith.constant 0 : index
    %c128_559 = arith.constant 128 : index
    %528 = vector.load %arg36[%c0_558, %c128_559] : memref<8x401xf32, #tpu.memory_space<vmem>>, vector<8x256xf32>
    tpu.vector_store %arg36[%c0_558, %c128_559], %527 {strides = array<i32>} : memref<8x401xf32, #tpu.memory_space<vmem>>, vector<8x256xf32>,
    %c0_560 = arith.constant 0 : index
    %c111_561 = arith.constant 111 : index
    %529 = vector.load %arg36[%c0_560, %c111_561] : memref<8x401xf32, #tpu.memory_space<vmem>>, vector<8x256xf32>
    %530 = vector.broadcast %5 : vector<1x256xf32> to vector<8x256xf32>
    %531 = arith.mulf %529, %530 : vector<8x256xf32>
    %c216_562 = arith.constant 216 : index
    %c0_563 = arith.constant 0 : index
    %532 = vector.load %arg35[%c216_562, %c0_563] : memref<360x256xf32, #tpu.memory_space<vmem>>, vector<8x256xf32>
    tpu.vector_store %arg35[%c216_562, %c0_563], %531 {strides = array<i32>} : memref<360x256xf32, #tpu.memory_space<vmem>>, vector<8x256xf32>,
    %c0_564 = arith.constant 0 : index
    %c112_565 = arith.constant 112 : index
    %533 = vector.load %arg36[%c0_564, %c112_565] : memref<8x401xf32, #tpu.memory_space<vmem>>, vector<8x256xf32>
    %c224_566 = arith.constant 224 : index
    %c0_567 = arith.constant 0 : index
    %534 = vector.load %arg35[%c224_566, %c0_567] : memref<360x256xf32, #tpu.memory_space<vmem>>, vector<8x256xf32>
    tpu.vector_store %arg35[%c224_566, %c0_567], %533 {strides = array<i32>} : memref<360x256xf32, #tpu.memory_space<vmem>>, vector<8x256xf32>,
    %c0_568 = arith.constant 0 : index
    %c113_569 = arith.constant 113 : index
    %535 = vector.load %arg36[%c0_568, %c113_569] : memref<8x401xf32, #tpu.memory_space<vmem>>, vector<8x256xf32>
    %536 = vector.broadcast %4 : vector<1x256xf32> to vector<8x256xf32>
    %537 = arith.mulf %535, %536 : vector<8x256xf32>
    %c232_570 = arith.constant 232 : index
    %c0_571 = arith.constant 0 : index
    %538 = vector.load %arg35[%c232_570, %c0_571] : memref<360x256xf32, #tpu.memory_space<vmem>>, vector<8x256xf32>
    tpu.vector_store %arg35[%c232_570, %c0_571], %537 {strides = array<i32>} : memref<360x256xf32, #tpu.memory_space<vmem>>, vector<8x256xf32>,
    %c0_572 = arith.constant 0 : index
    %c127_573 = arith.constant 127 : index
    %539 = vector.load %arg36[%c0_572, %c127_573] : memref<8x401xf32, #tpu.memory_space<vmem>>, vector<8x256xf32>
    %540 = vector.broadcast %5 : vector<1x256xf32> to vector<8x256xf32>
    %541 = arith.mulf %539, %540 : vector<8x256xf32>
    %c240_574 = arith.constant 240 : index
    %c0_575 = arith.constant 0 : index
    %542 = vector.load %arg35[%c240_574, %c0_575] : memref<360x256xf32, #tpu.memory_space<vmem>>, vector<8x256xf32>
    tpu.vector_store %arg35[%c240_574, %c0_575], %541 {strides = array<i32>} : memref<360x256xf32, #tpu.memory_space<vmem>>, vector<8x256xf32>,
    %c0_576 = arith.constant 0 : index
    %c128_577 = arith.constant 128 : index
    %543 = vector.load %arg36[%c0_576, %c128_577] : memref<8x401xf32, #tpu.memory_space<vmem>>, vector<8x256xf32>
    %c248_578 = arith.constant 248 : index
    %c0_579 = arith.constant 0 : index
    %544 = vector.load %arg35[%c248_578, %c0_579] : memref<360x256xf32, #tpu.memory_space<vmem>>, vector<8x256xf32>
    tpu.vector_store %arg35[%c248_578, %c0_579], %543 {strides = array<i32>} : memref<360x256xf32, #tpu.memory_space<vmem>>, vector<8x256xf32>,
    %c0_580 = arith.constant 0 : index
    %c129_581 = arith.constant 129 : index
    %545 = vector.load %arg36[%c0_580, %c129_581] : memref<8x401xf32, #tpu.memory_space<vmem>>, vector<8x256xf32>
    %546 = vector.broadcast %4 : vector<1x256xf32> to vector<8x256xf32>
    %547 = arith.mulf %545, %546 : vector<8x256xf32>
    %c256_582 = arith.constant 256 : index
    %c0_583 = arith.constant 0 : index
    %548 = vector.load %arg35[%c256_582, %c0_583] : memref<360x256xf32, #tpu.memory_space<vmem>>, vector<8x256xf32>
    tpu.vector_store %arg35[%c256_582, %c0_583], %547 {strides = array<i32>} : memref<360x256xf32, #tpu.memory_space<vmem>>, vector<8x256xf32>,
    %c0_584 = arith.constant 0 : index
    %c143_585 = arith.constant 143 : index
    %549 = vector.load %arg36[%c0_584, %c143_585] : memref<8x401xf32, #tpu.memory_space<vmem>>, vector<8x256xf32>
    %550 = vector.broadcast %5 : vector<1x256xf32> to vector<8x256xf32>
    %551 = arith.mulf %549, %550 : vector<8x256xf32>
    %c264_586 = arith.constant 264 : index
    %c0_587 = arith.constant 0 : index
    %552 = vector.load %arg35[%c264_586, %c0_587] : memref<360x256xf32, #tpu.memory_space<vmem>>, vector<8x256xf32>
    tpu.vector_store %arg35[%c264_586, %c0_587], %551 {strides = array<i32>} : memref<360x256xf32, #tpu.memory_space<vmem>>, vector<8x256xf32>,
    %c0_588 = arith.constant 0 : index
    %c144_589 = arith.constant 144 : index
    %553 = vector.load %arg36[%c0_588, %c144_589] : memref<8x401xf32, #tpu.memory_space<vmem>>, vector<8x256xf32>
    %c272_590 = arith.constant 272 : index
    %c0_591 = arith.constant 0 : index
    %554 = vector.load %arg35[%c272_590, %c0_591] : memref<360x256xf32, #tpu.memory_space<vmem>>, vector<8x256xf32>
    tpu.vector_store %arg35[%c272_590, %c0_591], %553 {strides = array<i32>} : memref<360x256xf32, #tpu.memory_space<vmem>>, vector<8x256xf32>,
    %c0_592 = arith.constant 0 : index
    %c145_593 = arith.constant 145 : index
    %555 = vector.load %arg36[%c0_592, %c145_593] : memref<8x401xf32, #tpu.memory_space<vmem>>, vector<8x256xf32>
    %556 = vector.broadcast %4 : vector<1x256xf32> to vector<8x256xf32>
    %557 = arith.mulf %555, %556 : vector<8x256xf32>
    %c280_594 = arith.constant 280 : index
    %c0_595 = arith.constant 0 : index
    %558 = vector.load %arg35[%c280_594, %c0_595] : memref<360x256xf32, #tpu.memory_space<vmem>>, vector<8x256xf32>
    tpu.vector_store %arg35[%c280_594, %c0_595], %557 {strides = array<i32>} : memref<360x256xf32, #tpu.memory_space<vmem>>, vector<8x256xf32>,
    %c0_596 = arith.constant 0 : index
    %c0_597 = arith.constant 0 : index
    %559 = vector.load %arg17[%c0_596, %c0_597] : memref<8x288xf32, #tpu.memory_space<vmem>>, vector<8x288xf32>
    %c0_598 = arith.constant 0 : index
    %c0_599 = arith.constant 0 : index
    %560 = vector.load %arg35[%c0_598, %c0_599] : memref<360x256xf32, #tpu.memory_space<vmem>>, vector<288x256xf32>
    %cst_600 = arith.constant dense<0.000000e+00> : vector<8x256xf32>
    %561 = tpu.matmul %559, %560, %cst_600 {dimension_numbers = #tpu.dot_dimension_numbers<[1], [0], [0], [1], [0, 0, 1, 1], [], []>} : vector<8x288xf32>, vector<288x256xf32>, vector<8x256xf32> -> vector<8x256xf32>
    %c0_601 = arith.constant 0 : index
    %c0_602 = arith.constant 0 : index
    %562 = vector.load %arg32[%c0_601, %c0_602] : memref<8x1xf32, #tpu.memory_space<vmem>>, vector<8x1xf32>
    %563 = vector.broadcast %562 : vector<8x1xf32> to vector<8x256xf32>
    %564 = arith.addf %561, %563 : vector<8x256xf32>
    %cst_603 = arith.constant 2.000000e-01 : f32
    %565 = vector.broadcast %cst_603 : f32 to vector<8x256xf32>
    %566 = arith.mulf %565, %564 : vector<8x256xf32>
    %567 = arith.maximumf %564, %566 : vector<8x256xf32>
    %c0_604 = arith.constant 0 : index
    %c128_605 = arith.constant 128 : index
    %568 = vector.load %arg36[%c0_604, %c128_605] : memref<8x401xf32, #tpu.memory_space<vmem>>, vector<8x256xf32>
    tpu.vector_store %arg36[%c0_604, %c128_605], %567 {strides = array<i32>} : memref<8x401xf32, #tpu.memory_space<vmem>>, vector<8x256xf32>,
    %c0_606 = arith.constant 0 : index
    %c111_607 = arith.constant 111 : index
    %569 = vector.load %arg36[%c0_606, %c111_607] : memref<8x401xf32, #tpu.memory_space<vmem>>, vector<8x256xf32>
    %570 = vector.broadcast %5 : vector<1x256xf32> to vector<8x256xf32>
    %571 = arith.mulf %569, %570 : vector<8x256xf32>
    %c288_608 = arith.constant 288 : index
    %c0_609 = arith.constant 0 : index
    %572 = vector.load %arg35[%c288_608, %c0_609] : memref<360x256xf32, #tpu.memory_space<vmem>>, vector<8x256xf32>
    tpu.vector_store %arg35[%c288_608, %c0_609], %571 {strides = array<i32>} : memref<360x256xf32, #tpu.memory_space<vmem>>, vector<8x256xf32>,
    %c0_610 = arith.constant 0 : index
    %c112_611 = arith.constant 112 : index
    %573 = vector.load %arg36[%c0_610, %c112_611] : memref<8x401xf32, #tpu.memory_space<vmem>>, vector<8x256xf32>
    %c296_612 = arith.constant 296 : index
    %c0_613 = arith.constant 0 : index
    %574 = vector.load %arg35[%c296_612, %c0_613] : memref<360x256xf32, #tpu.memory_space<vmem>>, vector<8x256xf32>
    tpu.vector_store %arg35[%c296_612, %c0_613], %573 {strides = array<i32>} : memref<360x256xf32, #tpu.memory_space<vmem>>, vector<8x256xf32>,
    %c0_614 = arith.constant 0 : index
    %c113_615 = arith.constant 113 : index
    %575 = vector.load %arg36[%c0_614, %c113_615] : memref<8x401xf32, #tpu.memory_space<vmem>>, vector<8x256xf32>
    %576 = vector.broadcast %4 : vector<1x256xf32> to vector<8x256xf32>
    %577 = arith.mulf %575, %576 : vector<8x256xf32>
    %c304_616 = arith.constant 304 : index
    %c0_617 = arith.constant 0 : index
    %578 = vector.load %arg35[%c304_616, %c0_617] : memref<360x256xf32, #tpu.memory_space<vmem>>, vector<8x256xf32>
    tpu.vector_store %arg35[%c304_616, %c0_617], %577 {strides = array<i32>} : memref<360x256xf32, #tpu.memory_space<vmem>>, vector<8x256xf32>,
    %c0_618 = arith.constant 0 : index
    %c127_619 = arith.constant 127 : index
    %579 = vector.load %arg36[%c0_618, %c127_619] : memref<8x401xf32, #tpu.memory_space<vmem>>, vector<8x256xf32>
    %580 = vector.broadcast %5 : vector<1x256xf32> to vector<8x256xf32>
    %581 = arith.mulf %579, %580 : vector<8x256xf32>
    %c312_620 = arith.constant 312 : index
    %c0_621 = arith.constant 0 : index
    %582 = vector.load %arg35[%c312_620, %c0_621] : memref<360x256xf32, #tpu.memory_space<vmem>>, vector<8x256xf32>
    tpu.vector_store %arg35[%c312_620, %c0_621], %581 {strides = array<i32>} : memref<360x256xf32, #tpu.memory_space<vmem>>, vector<8x256xf32>,
    %c0_622 = arith.constant 0 : index
    %c128_623 = arith.constant 128 : index
    %583 = vector.load %arg36[%c0_622, %c128_623] : memref<8x401xf32, #tpu.memory_space<vmem>>, vector<8x256xf32>
    %c320_624 = arith.constant 320 : index
    %c0_625 = arith.constant 0 : index
    %584 = vector.load %arg35[%c320_624, %c0_625] : memref<360x256xf32, #tpu.memory_space<vmem>>, vector<8x256xf32>
    tpu.vector_store %arg35[%c320_624, %c0_625], %583 {strides = array<i32>} : memref<360x256xf32, #tpu.memory_space<vmem>>, vector<8x256xf32>,
    %c0_626 = arith.constant 0 : index
    %c129_627 = arith.constant 129 : index
    %585 = vector.load %arg36[%c0_626, %c129_627] : memref<8x401xf32, #tpu.memory_space<vmem>>, vector<8x256xf32>
    %586 = vector.broadcast %4 : vector<1x256xf32> to vector<8x256xf32>
    %587 = arith.mulf %585, %586 : vector<8x256xf32>
    %c328_628 = arith.constant 328 : index
    %c0_629 = arith.constant 0 : index
    %588 = vector.load %arg35[%c328_628, %c0_629] : memref<360x256xf32, #tpu.memory_space<vmem>>, vector<8x256xf32>
    tpu.vector_store %arg35[%c328_628, %c0_629], %587 {strides = array<i32>} : memref<360x256xf32, #tpu.memory_space<vmem>>, vector<8x256xf32>,
    %c0_630 = arith.constant 0 : index
    %c143_631 = arith.constant 143 : index
    %589 = vector.load %arg36[%c0_630, %c143_631] : memref<8x401xf32, #tpu.memory_space<vmem>>, vector<8x256xf32>
    %590 = vector.broadcast %5 : vector<1x256xf32> to vector<8x256xf32>
    %591 = arith.mulf %589, %590 : vector<8x256xf32>
    %c336_632 = arith.constant 336 : index
    %c0_633 = arith.constant 0 : index
    %592 = vector.load %arg35[%c336_632, %c0_633] : memref<360x256xf32, #tpu.memory_space<vmem>>, vector<8x256xf32>
    tpu.vector_store %arg35[%c336_632, %c0_633], %591 {strides = array<i32>} : memref<360x256xf32, #tpu.memory_space<vmem>>, vector<8x256xf32>,
    %c0_634 = arith.constant 0 : index
    %c144_635 = arith.constant 144 : index
    %593 = vector.load %arg36[%c0_634, %c144_635] : memref<8x401xf32, #tpu.memory_space<vmem>>, vector<8x256xf32>
    %c344_636 = arith.constant 344 : index
    %c0_637 = arith.constant 0 : index
    %594 = vector.load %arg35[%c344_636, %c0_637] : memref<360x256xf32, #tpu.memory_space<vmem>>, vector<8x256xf32>
    tpu.vector_store %arg35[%c344_636, %c0_637], %593 {strides = array<i32>} : memref<360x256xf32, #tpu.memory_space<vmem>>, vector<8x256xf32>,
    %c0_638 = arith.constant 0 : index
    %c145_639 = arith.constant 145 : index
    %595 = vector.load %arg36[%c0_638, %c145_639] : memref<8x401xf32, #tpu.memory_space<vmem>>, vector<8x256xf32>
    %596 = vector.broadcast %4 : vector<1x256xf32> to vector<8x256xf32>
    %597 = arith.mulf %595, %596 : vector<8x256xf32>
    %c352_640 = arith.constant 352 : index
    %c0_641 = arith.constant 0 : index
    %598 = vector.load %arg35[%c352_640, %c0_641] : memref<360x256xf32, #tpu.memory_space<vmem>>, vector<8x256xf32>
    tpu.vector_store %arg35[%c352_640, %c0_641], %597 {strides = array<i32>} : memref<360x256xf32, #tpu.memory_space<vmem>>, vector<8x256xf32>,
    %c0_642 = arith.constant 0 : index
    %c0_643 = arith.constant 0 : index
    %599 = vector.load %arg18[%c0_642, %c0_643] : memref<8x360xf32, #tpu.memory_space<vmem>>, vector<8x360xf32>
    %c0_644 = arith.constant 0 : index
    %c0_645 = arith.constant 0 : index
    %600 = vector.load %arg35[%c0_644, %c0_645] : memref<360x256xf32, #tpu.memory_space<vmem>>, vector<360x256xf32>
    %cst_646 = arith.constant dense<0.000000e+00> : vector<8x256xf32>
    %601 = tpu.matmul %599, %600, %cst_646 {dimension_numbers = #tpu.dot_dimension_numbers<[1], [0], [0], [1], [0, 0, 1, 1], [], []>} : vector<8x360xf32>, vector<360x256xf32>, vector<8x256xf32> -> vector<8x256xf32>
    %c0_647 = arith.constant 0 : index
    %c0_648 = arith.constant 0 : index
    %602 = vector.load %arg33[%c0_647, %c0_648] : memref<8x1xf32, #tpu.memory_space<vmem>>, vector<8x1xf32>
    %603 = vector.broadcast %602 : vector<8x1xf32> to vector<8x256xf32>
    %604 = arith.addf %601, %603 : vector<8x256xf32>
    %cst_649 = arith.constant 2.000000e-01 : f32
    %605 = vector.broadcast %cst_649 : f32 to vector<8x256xf32>
    %606 = arith.mulf %604, %605 : vector<8x256xf32>
    %607 = arith.addf %606, %407 : vector<8x256xf32>
    %cst_650 = arith.constant 2.000000e-01 : f32
    %608 = vector.broadcast %cst_650 : f32 to vector<8x256xf32>
    %609 = arith.mulf %607, %608 : vector<8x256xf32>
    %610 = arith.addf %609, %7 : vector<8x256xf32>
    %c0_651 = arith.constant 0 : index
    %c0_652 = arith.constant 0 : index
    %c0_653 = arith.constant 0 : index
    %611 = vector.load %arg34[%c0_651, %c0_652, %c0_653] : memref<1x8x256xf32, #tpu.memory_space<vmem>>, vector<1x8x256xf32>
    %612 = vector.shape_cast %611 : vector<1x8x256xf32> to vector<8x256xf32>
    %613 = vector.shape_cast %610 : vector<8x256xf32> to vector<1x8x256xf32>
    tpu.vector_store %arg34[%c0_651, %c0_652, %c0_653], %613 {strides = array<i32>} : memref<1x8x256xf32, #tpu.memory_space<vmem>>, vector<1x8x256xf32>,
    return
  }
  func.func @transform_0(%arg0: i32) -> (i32, i32, i32) {
    %c0_i32 = arith.constant 0 : i32
    %c0_i32_0 = arith.constant 0 : i32
    %c0_i32_1 = arith.constant 0 : i32
    return %arg0, %c0_i32, %c0_i32_0 : i32, i32, i32
  }
  func.func @transform_1(%arg0: i32) -> (i32, i32) {
    %c0_i32 = arith.constant 0 : i32
    %c0_i32_0 = arith.constant 0 : i32
    %c0_i32_1 = arith.constant 0 : i32
    return %c0_i32, %c0_i32_0 : i32, i32
  }
  func.func @transform_2(%arg0: i32) -> (i32, i32) {
    %c0_i32 = arith.constant 0 : i32
    %c0_i32_0 = arith.constant 0 : i32
    %c0_i32_1 = arith.constant 0 : i32
    return %c0_i32, %c0_i32_0 : i32, i32
  }
  func.func @transform_3(%arg0: i32) -> (i32, i32) {
    %c0_i32 = arith.constant 0 : i32
    %c0_i32_0 = arith.constant 0 : i32
    %c0_i32_1 = arith.constant 0 : i32
    return %c0_i32, %c0_i32_0 : i32, i32
  }
  func.func @transform_4(%arg0: i32) -> (i32, i32) {
    %c0_i32 = arith.constant 0 : i32
    %c0_i32_0 = arith.constant 0 : i32
    %c0_i32_1 = arith.constant 0 : i32
    return %c0_i32, %c0_i32_0 : i32, i32
  }
  func.func @transform_5(%arg0: i32) -> (i32, i32) {
    %c0_i32 = arith.constant 0 : i32
    %c0_i32_0 = arith.constant 0 : i32
    %c0_i32_1 = arith.constant 0 : i32
    return %c0_i32, %c0_i32_0 : i32, i32
  }
  func.func @transform_6(%arg0: i32) -> (i32, i32) {
    %c0_i32 = arith.constant 0 : i32
    %c0_i32_0 = arith.constant 0 : i32
    %c0_i32_1 = arith.constant 0 : i32
    return %c0_i32, %c0_i32_0 : i32, i32
  }
  func.func @transform_7(%arg0: i32) -> (i32, i32) {
    %c0_i32 = arith.constant 0 : i32
    %c0_i32_0 = arith.constant 0 : i32
    %c0_i32_1 = arith.constant 0 : i32
    return %c0_i32, %c0_i32_0 : i32, i32
  }
  func.func @transform_8(%arg0: i32) -> (i32, i32) {
    %c0_i32 = arith.constant 0 : i32
    %c0_i32_0 = arith.constant 0 : i32
    %c0_i32_1 = arith.constant 0 : i32
    return %c0_i32, %c0_i32_0 : i32, i32
  }
  func.func @transform_9(%arg0: i32) -> (i32, i32) {
    %c0_i32 = arith.constant 0 : i32
    %c0_i32_0 = arith.constant 0 : i32
    %c0_i32_1 = arith.constant 0 : i32
    return %c0_i32, %c0_i32_0 : i32, i32
  }
  func.func @transform_10(%arg0: i32) -> (i32, i32) {
    %c0_i32 = arith.constant 0 : i32
    %c0_i32_0 = arith.constant 0 : i32
    %c0_i32_1 = arith.constant 0 : i32
    return %c0_i32, %c0_i32_0 : i32, i32
  }
  func.func @transform_11(%arg0: i32) -> (i32, i32) {
    %c0_i32 = arith.constant 0 : i32
    %c0_i32_0 = arith.constant 0 : i32
    %c0_i32_1 = arith.constant 0 : i32
    return %c0_i32, %c0_i32_0 : i32, i32
  }
  func.func @transform_12(%arg0: i32) -> (i32, i32) {
    %c0_i32 = arith.constant 0 : i32
    %c0_i32_0 = arith.constant 0 : i32
    %c0_i32_1 = arith.constant 0 : i32
    return %c0_i32, %c0_i32_0 : i32, i32
  }
  func.func @transform_13(%arg0: i32) -> (i32, i32) {
    %c0_i32 = arith.constant 0 : i32
    %c0_i32_0 = arith.constant 0 : i32
    %c0_i32_1 = arith.constant 0 : i32
    return %c0_i32, %c0_i32_0 : i32, i32
  }
  func.func @transform_14(%arg0: i32) -> (i32, i32) {
    %c0_i32 = arith.constant 0 : i32
    %c0_i32_0 = arith.constant 0 : i32
    %c0_i32_1 = arith.constant 0 : i32
    return %c0_i32, %c0_i32_0 : i32, i32
  }
  func.func @transform_15(%arg0: i32) -> (i32, i32) {
    %c0_i32 = arith.constant 0 : i32
    %c0_i32_0 = arith.constant 0 : i32
    %c0_i32_1 = arith.constant 0 : i32
    return %c0_i32, %c0_i32_0 : i32, i32
  }
  func.func @transform_16(%arg0: i32) -> (i32, i32) {
    %c0_i32 = arith.constant 0 : i32
    %c0_i32_0 = arith.constant 0 : i32
    %c0_i32_1 = arith.constant 0 : i32
    return %c0_i32, %c0_i32_0 : i32, i32
  }
  func.func @transform_17(%arg0: i32) -> (i32, i32) {
    %c0_i32 = arith.constant 0 : i32
    %c0_i32_0 = arith.constant 0 : i32
    %c0_i32_1 = arith.constant 0 : i32
    return %c0_i32, %c0_i32_0 : i32, i32
  }
  func.func @transform_18(%arg0: i32) -> (i32, i32) {
    %c0_i32 = arith.constant 0 : i32
    %c0_i32_0 = arith.constant 0 : i32
    %c0_i32_1 = arith.constant 0 : i32
    return %c0_i32, %c0_i32_0 : i32, i32
  }
  func.func @transform_19(%arg0: i32) -> (i32, i32) {
    %c0_i32 = arith.constant 0 : i32
    %c0_i32_0 = arith.constant 0 : i32
    %c0_i32_1 = arith.constant 0 : i32
    return %c0_i32, %c0_i32_0 : i32, i32
  }
  func.func @transform_20(%arg0: i32) -> (i32, i32) {
    %c0_i32 = arith.constant 0 : i32
    %c0_i32_0 = arith.constant 0 : i32
    %c0_i32_1 = arith.constant 0 : i32
    return %c0_i32, %c0_i32_0 : i32, i32
  }
  func.func @transform_21(%arg0: i32) -> (i32, i32) {
    %c0_i32 = arith.constant 0 : i32
    %c0_i32_0 = arith.constant 0 : i32
    %c0_i32_1 = arith.constant 0 : i32
    return %c0_i32, %c0_i32_0 : i32, i32
  }
  func.func @transform_22(%arg0: i32) -> (i32, i32) {
    %c0_i32 = arith.constant 0 : i32
    %c0_i32_0 = arith.constant 0 : i32
    %c0_i32_1 = arith.constant 0 : i32
    return %c0_i32, %c0_i32_0 : i32, i32
  }
  func.func @transform_23(%arg0: i32) -> (i32, i32) {
    %c0_i32 = arith.constant 0 : i32
    %c0_i32_0 = arith.constant 0 : i32
    %c0_i32_1 = arith.constant 0 : i32
    return %c0_i32, %c0_i32_0 : i32, i32
  }
  func.func @transform_24(%arg0: i32) -> (i32, i32) {
    %c0_i32 = arith.constant 0 : i32
    %c0_i32_0 = arith.constant 0 : i32
    %c0_i32_1 = arith.constant 0 : i32
    return %c0_i32, %c0_i32_0 : i32, i32
  }
  func.func @transform_25(%arg0: i32) -> (i32, i32) {
    %c0_i32 = arith.constant 0 : i32
    %c0_i32_0 = arith.constant 0 : i32
    %c0_i32_1 = arith.constant 0 : i32
    return %c0_i32, %c0_i32_0 : i32, i32
  }
  func.func @transform_26(%arg0: i32) -> (i32, i32) {
    %c0_i32 = arith.constant 0 : i32
    %c0_i32_0 = arith.constant 0 : i32
    %c0_i32_1 = arith.constant 0 : i32
    return %c0_i32, %c0_i32_0 : i32, i32
  }
  func.func @transform_27(%arg0: i32) -> (i32, i32) {
    %c0_i32 = arith.constant 0 : i32
    %c0_i32_0 = arith.constant 0 : i32
    %c0_i32_1 = arith.constant 0 : i32
    return %c0_i32, %c0_i32_0 : i32, i32
  }
  func.func @transform_28(%arg0: i32) -> (i32, i32) {
    %c0_i32 = arith.constant 0 : i32
    %c0_i32_0 = arith.constant 0 : i32
    %c0_i32_1 = arith.constant 0 : i32
    return %c0_i32, %c0_i32_0 : i32, i32
  }
  func.func @transform_29(%arg0: i32) -> (i32, i32) {
    %c0_i32 = arith.constant 0 : i32
    %c0_i32_0 = arith.constant 0 : i32
    %c0_i32_1 = arith.constant 0 : i32
    return %c0_i32, %c0_i32_0 : i32, i32
  }
  func.func @transform_30(%arg0: i32) -> (i32, i32) {
    %c0_i32 = arith.constant 0 : i32
    %c0_i32_0 = arith.constant 0 : i32
    %c0_i32_1 = arith.constant 0 : i32
    return %c0_i32, %c0_i32_0 : i32, i32
  }
  func.func @transform_31(%arg0: i32) -> (i32, i32) {
    %c0_i32 = arith.constant 0 : i32
    %c0_i32_0 = arith.constant 0 : i32
    %c0_i32_1 = arith.constant 0 : i32
    return %c0_i32, %c0_i32_0 : i32, i32
  }
  func.func @transform_32(%arg0: i32) -> (i32, i32) {
    %c0_i32 = arith.constant 0 : i32
    %c0_i32_0 = arith.constant 0 : i32
    %c0_i32_1 = arith.constant 0 : i32
    return %c0_i32, %c0_i32_0 : i32, i32
  }
  func.func @transform_33(%arg0: i32) -> (i32, i32, i32) {
    %c0_i32 = arith.constant 0 : i32
    %c0_i32_0 = arith.constant 0 : i32
    %c0_i32_1 = arith.constant 0 : i32
    return %arg0, %c0_i32, %c0_i32_0 : i32, i32, i32
  }
}

</mosaic_0001>

<bundles_post_ra>
// kernel: rrdb_forward.1
= control target key start
LH: loop header
LB: loop body
LE: loop exit
PB: predicated region body
PF: predicated region fallthrough
CT: control target
= control target key end

     0   :  { %s6772_s6 = smov 1   ;;  %s6773_s10 = smov 2   ;;  %s9537_s0 = inlined_call_operand.smem [shape: u32[34], index: -1, kind: input, shape index: {}] }
   0x1   :  { %s6823_s5 = sld [smem:[%s9537_s0]]   ;;  %s6774_s14 = smov 3  }
   0x2   :  { %s6828_s9 = sld [smem:[%s9537_s0 + %s6772_s6]]   ;;  %s6775_s18 = smov 4  }
   0x3   :  { %s6833_s13 = sld [smem:[%s9537_s0 + %s6773_s10]]   ;;  %s6776_s22 = smov 5  }
   0x4   :  { %s6838_s17 = sld [smem:[%s9537_s0 + %s6774_s14]]   ;;  %s6777_s26 = smov 6  }
   0x5   :  { %s6843_s21 = sld [smem:[%s9537_s0 + %s6775_s18]]   ;;  %s6778_s30 = smov 7  }
   0x6   :  { %s6848_s25 = sld [smem:[%s9537_s0 + %s6776_s22]]   ;;  %s6779_s4 = smov 8  }
   0x7   :  { %s6853_s29 = sld [smem:[%s9537_s0 + %s6777_s26]]   ;;  %s6780_s10 = smov 9  }
   0x8   :  { %s6858_s3 = sld [smem:[%s9537_s0 + %s6778_s30]]   ;;  %s6781_s15 = smov 10  }
   0x9   :  { %s6863_s8 = sld [smem:[%s9537_s0 + %s6779_s4]]   ;;  %s6782_s20 = smov 11  }
   0xa   :  { %s6868_s14 = sld [smem:[%s9537_s0 + %s6780_s10]]   ;;  %s6783_s26 = smov 12  }
   0xb   :  { %s6873_s19 = sld [smem:[%s9537_s0 + %s6781_s15]]   ;;  %s6784_s1 = smov 13  }
   0xc   :  { %s6878_s24 = sld [smem:[%s9537_s0 + %s6782_s20]]   ;;  %s6785_s7 = smov 14  }
   0xd   :  { %s6883_s30 = sld [smem:[%s9537_s0 + %s6783_s26]]   ;;  %s6786_s15 = smov 15  }
   0xe   :  { %9714 = sst [smem:[#allocation4_spill]] %s6858_s3  ;;  %s6787_s22 = smov 16  }
   0xf   :  { %9715 = sst [smem:[#allocation5_spill]] %s6863_s8  ;;  %s6788_s28 = smov 17  }
  0x10   :  { %9716 = sst [smem:[#allocation6_spill]] %s6868_s14 }
  0x11   :  { %9717 = sst [smem:[#allocation7_spill]] %s6873_s19 }
  0x12   :  { %9718 = sst [smem:[#allocation8_spill]] %s6878_s24 }
  0x13   :  { %9719 = sst [smem:[#allocation9_spill]] %s6883_s30 }
  0x14   :  { %s6888_s6 = sld [smem:[%s9537_s0 + %s6784_s1]]  }
  0x15   :  { %s6893_s12 = sld [smem:[%s9537_s0 + %s6785_s7]]   ;;  %s6789_s7 = smov 18  }
  0x16   :  { %s6898_s20 = sld [smem:[%s9537_s0 + %s6786_s15]]   ;;  %s6790_s15 = smov 19  }
  0x17   :  { %s6903_s27 = sld [smem:[%s9537_s0 + %s6787_s22]]   ;;  %s6791_s22 = smov 20  }
  0x18   :  { %s6908_s4 = sld [smem:[%s9537_s0 + %s6788_s28]]   ;;  %s6792_s28 = smov 21  }
  0x1a   :  { %9720 = sst [smem:[#allocation10_spill]] %s6888_s6 }
  0x1b   :  { %9721 = sst [smem:[#allocation11_spill]] %s6893_s12 }
  0x1c   :  { %9722 = sst [smem:[#allocation12_spill]] %s6898_s20 }
  0x1d   :  { %9723 = sst [smem:[#allocation13_spill]] %s6903_s27 }
  0x1e   :  { %9724 = sst [smem:[#allocation14_spill]] %s6908_s4 }
  0x1f   :  { %s6913_s12 = sld [smem:[%s9537_s0 + %s6789_s7]]   ;;  %s6793_s7 = smov 22  }
  0x20   :  { %s6918_s20 = sld [smem:[%s9537_s0 + %s6790_s15]]   ;;  %s6794_s15 = smov 23  }
  0x21   :  { %s6923_s27 = sld [smem:[%s9537_s0 + %s6791_s22]]   ;;  %s6795_s22 = smov 24  }
  0x22   :  { %s6928_s4 = sld [smem:[%s9537_s0 + %s6792_s28]]   ;;  %s6796_s28 = smov 25  }
  0x23   :  { %s6933_s6 = sld [smem:[%s9537_s0 + %s6793_s7]]   ;;  %s6797_s7 = smov 26  }
  0x24   :  { %s6938_s30 = sld [smem:[%s9537_s0 + %s6794_s15]]   ;;  %s6798_s15 = smov 27  }
  0x25   :  { %s6943_s24 = sld [smem:[%s9537_s0 + %s6795_s22]]   ;;  %s6799_s22 = smov 28  }
  0x26   :  { %s6948_s19 = sld [smem:[%s9537_s0 + %s6796_s28]]   ;;  %s6800_s28 = smov 29  }
  0x27   :  { %s6953_s14 = sld [smem:[%s9537_s0 + %s6797_s7]]   ;;  %s6801_s7 = smov 30  }
  0x28   :  { %9725 = sst [smem:[#allocation15_spill]] %s6928_s4 }
  0x29   :  { %s6958_s8 = sld [smem:[%s9537_s0 + %s6798_s15]]   ;;  %s6802_s15 = smov 31  }
  0x2b   :  { %9726 = sst [smem:[#allocation16_spill]] %s6943_s24 }
  0x2c   :  { %9727 = sst [smem:[#allocation17_spill]] %s6948_s19 }
  0x2d   :  { %9728 = sst [smem:[#allocation18_spill]] %s6953_s14 }
  0x2e   :  { %s6963_s24 = sld [smem:[%s9537_s0 + %s6799_s22]]   ;;  %s6803_s22 = smov 32  }
  0x2f   :  { %9729 = sst [smem:[#allocation19_spill]] %s6958_s8 }
  0x30   :  { %s6968_s19 = sld [smem:[%s9537_s0 + %s6800_s28]]   ;;  %s6804_s28 = smov 33  }
  0x31   :  { %s6973_s14 = sld [smem:[%s9537_s0 + %s6801_s7]]   ;;  %s6990_s7 = smov 0  }
  0x32   :  { %s6978_s8 = sld [smem:[%s9537_s0 + %s6802_s15]]  }
  0x34   :  { %9730 = sst [smem:[#allocation20_spill]] %s6963_s24 }
  0x35   :  { %s6983_s24 = sld [smem:[%s9537_s0 + %s6803_s22]]  }
  0x36   :  { %9731 = sst [smem:[#allocation21_spill]] %s6968_s19 }
  0x37   :  { %s6988_s19 = sld [smem:[%s9537_s0 + %s6804_s28]]  }
  0x38 LB: > { %s9732_s3 = sld [smem:[#allocation4_spill]]  ;;  %s6059_s10 = sadd.s32 4294967295, %s6770_s7   ;;  %s6770_s7 = sphi %s6990_s7, %s77_s7  }
  0x39   : > { %p6063_p0 = scmp.ge.s32.totalorder %s6770_s7, 1  ;;  %p921_p1 = scmp.lt.s32.totalorder %s6770_s7, 3 }
  0x3b   : > { %p922_p2 = pnand %p6063_p0, %p921_p1 }
  0x3d   : > { %925 = sbr.rel (%p922_p2) target bundleno = 4646 (0x1226), region = 152 }
  0x42   : > { %v1019_v0 = vld [vmem:[%s6833_s13] sm:$0x3]  ;;  %vm1016_vm0 = vcmask 138240   ;;  %s9648_s0 = smov 15   ;;  %s9650_s11 = smov 17   ;;  %v9546_v4 = vmov 0.0  }
  0x43   : > { %v1018_v1 = vld [vmem:[%s6828_s9] sm:$0x3]  ;;  %v1028_v2 = vperm.slane %v1019_v0, 0  ;;  %1017 = vst.msk [vmem:[#allocation3 + $0x18] sm:$0xff] %vm1016_vm0, %v9546_v4  ;;  %s9668_s15 = smov 1   ;;  %v1029_v5 = vperm.slane %v1019_v0, 1 }
  0x44   : > { %v1080_v3 = vperm.slane %v1018_v1, 0  ;;  %1015 = vst [vmem:[#allocation3] sm:$0xff] %v9546_v4  ;;  %v1081_v6 = vperm.slane %v1018_v1, 1  ;;  %p1005_p3 = scmp.lt.s32.totalorder %s6059_s10, 1  ;;  %s9670_s16 = smov 127   ;;  %vm1103_vm1 = vcmask 121856  }
  0x45   : > { %1177 = vrot.lane.b32.xlu1 %v1028_v2, %s9648_s0  ;;  %s9663_s18 = smov 113   ;;  %s9665_s26 = smov 111   ;;  %vm1134_vm2 = vcmask 7168   ;;  %vm1117_vm3 = vcmask 1039360   ;;  %vm1086_vm4 = vcmask 924672   ;;  %vm1034_vm5 = vcmask 908288  }
  0x46   : > { %1225 = vrot.lane.b32.xlu0 %v1080_v3, %s9650_s11  ;;  %1148 = vrot.lane.b32.xlu2 %v1080_v3, %s9668_s15  ;;  %s9979_s10 = smov (!%p1005_p3, %s6059_s10), 1  ;;  %s9622_s28 = smov 112   ;;  %vm1215_vm6 = vcmask 916480   ;;  %vm1069_vm7 = vcmask 130048   ;;  %vm1276_vm8 = vcmask 588800   ;;  %vm1853_vm9 = vcmask 719872  }
  0x47   : > { %s9614_s22 = sshll.u32 %s9979_s10, 4  ;;  %s9661_s1 = smov 16   ;;  %vm2190_vm10 = vcmask 261120   ;;  %vm2585_vm11 = vcmask 850944  }
  0x48   : > { %s7018_s23 = scalar_lea.vmem %s6823_s5, %s9614_s22  ;;  %s9783_s4 = sld [smem:[#allocation15_spill]] }
  0x49   : > { %v7024_v7 = vld [vmem:[%s7018_s23 + $0x8] sm:$0xff]  ;;  %v7032_v10 = vld [vmem:[%s7018_s23] sm:$0xff]  ;;  %s9832_s2 = sld [smem:[#allocation5_spill]] }
  0x4a   : > { %v7026_v8 = vld [vmem:[#allocation3 + $0x18] sm:$0xff]  ;;  %v6158_v11 = vpack.i.bf16 %v7024_v7, %v7032_v10  ;;  %s9849_s22 = sld [smem:[#allocation7_spill]] }
  0x4b   : > { %v6153_v9 = vpack.i.bf16 %v7026_v8, %v7024_v7 }
  0x4d   : > { %1179 = vrot.lane.b32.xlu1 %v1029_v5, %s9648_s0 }
  0x4e   : > { %1227 = vrot.lane.b32.xlu0 %v1081_v6, %s9650_s11  ;;  %1150 = vrot.lane.b32.xlu2 %v1081_v6, %s9668_s15 }
  0x55   : > { %1115 = vrot.lane.b32.xlu1 %v1029_v5, %s9670_s16 }
  0x56   : > { %1113 = vrot.lane.b32.xlu0 %v1028_v2, %s9670_s16  ;;  %1082 = vrot.lane.b32.xlu2 %v1080_v3, %s9663_s18 }
  0x5d   : > { %1030 = vrot.lane.b32.xlu1 %v1028_v2, %s9665_s26 }
  0x5e   : > { %1084 = vrot.lane.b32.xlu0 %v1081_v6, %s9663_s18  ;;  %1032 = vrot.lane.b32.xlu2 %v1029_v5, %s9665_s26 }
  0x65   : > { %6154 = vrot.lane.b32.xlu1 %v6153_v9, %s9622_s28  ;;  %v1270_v9 = vld [vmem:[%s6913_s12] sm:$0xff] }
  0x66   : > { %1209 = vrot.lane.b32.xlu2 %v7032_v10, %s9622_s28 }
  0x6d   : > { %6159 = vrot.lane.b32.xlu1 %v6158_v11, %s9661_s1 }
  0xa0   : > { %v7039_v12 = vpop.permute.xlu2 %1148 }
  0xa1   : > { %9733 = vst [vmem:[#allocation22_spill] sm:$0xff] %v7039_v12  ;;  %v1156_v13 = vmul.f32 %v7039_v12, %v7032_v10 }
  0xa3   : > { %1162 = vrot.lane.b32.xlu0 %v1156_v13, %s9670_s16 }
  0xa8   : > { %v7051_v17 = vpop.permute.xlu2 %1150 }
  0xa9   : > { %9736 = vst [vmem:[#allocation25_spill] sm:$0xff] %v7051_v17  ;;  %v7089_v30 = vsel %vm1134_vm2, %v7039_v12, %v7051_v17  ;;  %v7102_v34 = vmul.f32 %v7026_v8, %v7051_v17 }
  0xaa   : > { %9742 = vst [vmem:[#allocation31_spill] sm:$0xff] %v7089_v30  ;;  %v1157_v33 = vmul.f32 %v7089_v30, %v7024_v7 }
  0xac   : > { %v6173_v37 = vpack.i.bf16 %v7102_v34, %v1157_v33 }
  0xb0   : > { %v7084_v29 = vpop.permute.xlu2 %1082 }
  0xb1   : > { %9741 = vst [vmem:[#allocation30_spill] sm:$0xff] %v7084_v29  ;;  %v7094_v31 = vmul.f32 0.0, %v7084_v29 }
  0xb7   : > { %v7044_v14 = vpop.permute.xlu1 %1177 }
  0xb8   : > { %9734 = vst [vmem:[#allocation23_spill] sm:$0xff] %v7044_v14  ;;  %v7046_v15 = vpop.permute.xlu0 %1225  ;;  %v1185_v18 = vmul.f32 %v7044_v14, %v7032_v10  ;;  %v7119_v40 = vpop.permute.xlu2 %1032 }
  0xb9   : > { %9735 = vst [vmem:[#allocation24_spill] sm:$0xff] %v7046_v15  ;;  %v1233_v16 = vmul.f32 %v7046_v15, %v7032_v10  ;;  %v1041_v50 = vmul.f32 %v7119_v40, %v7024_v7 }
  0xba   : > { %9746 = vst [vmem:[#allocation35_spill] sm:$0xff] %v7119_v40 }
  0xbb   : > { %1239 = vrot.lane.b32.xlu1 %v1233_v16, %s9665_s26  ;;  %v6814_v16 = vmov 0  }
  0xbc   : > { %6193 = vset.pattern.permute.xlu1 %v6814_v16  ;;  %6234 = vset.pattern.permute.xlu0 %v6814_v16 }
  0xbd   : > { %6315 = vset.pattern.permute.xlu2 %v6814_v16 }
  0xbf   : > { %v7055_v19 = vpop.permute.xlu1 %1179 }
  0xc0   : > { %9737 = vst [vmem:[#allocation26_spill] sm:$0xff] %v7055_v19  ;;  %v7057_v20 = vpop.permute.xlu0 %1227  ;;  %v7062_v21 = vsel %vm1103_vm1, %v7044_v14, %v7055_v19  ;;  %v7066_v22 = vmul.f32 %v7026_v8, %v7055_v19  ;;  %v1210_v56 = vpop.permute.xlu2 %1209 }
  0xc1   : > { %9738 = vst [vmem:[#allocation27_spill] sm:$0xff] %v7057_v20  ;;  %v7071_v23 = vsel %vm1016_vm0, %v7046_v15, %v7057_v20  ;;  %v7075_v24 = vmul.f32 %v7057_v20, %v7026_v8  ;;  %v1186_v25 = vmul.f32 %v7062_v21, %v7024_v7 }
  0xc2   : > { %9739 = vst [vmem:[#allocation28_spill] sm:$0xff] %v7062_v21  ;;  %v1234_v26 = vmul.f32 %v7071_v23, %v7024_v7 }
  0xc3   : > { %9740 = vst [vmem:[#allocation29_spill] sm:$0xff] %v7071_v23  ;;  %1191 = vrot.lane.b32.xlu1 %v1185_v18, %s9663_s18  ;;  %v6168_v27 = vpack.i.bf16 %v7066_v22, %v1186_v25 }
  0xc4   : > { %v6163_v28 = vpack.i.bf16 %v7075_v24, %v1234_v26 }
  0xc5   : > { %6169 = vrot.lane.b32.xlu2 %v6168_v27, %s9663_s18 }
  0xc6   : > { %6164 = vrot.lane.b32.xlu0 %v6163_v28, %s9665_s26 }
  0xc7   : > { %v7104_v35 = vpop.permute.xlu1 %1115 }
  0xc8   : > { %v7096_v32 = vpop.permute.xlu0 %1113  ;;  %9744 = vst [vmem:[#allocation33_spill] sm:$0xff] %v7104_v35  ;;  %v1124_v39 = vmul.f32 %v7104_v35, %v7024_v7 }
  0xc9   : > { %9743 = vst [vmem:[#allocation32_spill] sm:$0xff] %v7096_v32  ;;  %v7111_v36 = vsel %vm1117_vm3, %v7096_v32, %v7104_v35  ;;  %v7146_v52 = vmul.f32 0.0, %v7096_v32 }
  0xca   : > { %9745 = vst [vmem:[#allocation34_spill] sm:$0xff] %v7111_v36  ;;  %v1123_v38 = vmul.f32 %v7111_v36, %v7032_v10 }
  0xcb   : > { %1097 = vrot.lane.b32.xlu1 %v7094_v31, %s9648_s0 }
  0xcc   : > { %v6178_v45 = vpack.i.bf16 %v1124_v39, %v1123_v38 }
  0xce   : > { %6174 = vrot.lane.b32.xlu0 %v6173_v37, %s9670_s16 }
  0xcf   : > { %v7123_v42 = vpop.permute.xlu1 %1030 }
  0xd0   : > { %v7121_v41 = vpop.permute.xlu0 %1084  ;;  %9748 = vst [vmem:[#allocation37_spill] sm:$0xff] %v7123_v42  ;;  %v7137_v47 = vsel %vm1034_vm5, %v7123_v42, %v7119_v40  ;;  %v7152_v53 = vmul.f32 0.0, %v7123_v42 }
  0xd1   : > { %9747 = vst [vmem:[#allocation36_spill] sm:$0xff] %v7121_v41  ;;  %v7128_v43 = vsel %vm1086_vm4, %v7084_v29, %v7121_v41  ;;  %v1093_v44 = vmul.f32 %v7121_v41, %v7024_v7  ;;  %v1040_v49 = vmul.f32 %v7137_v47, %v7032_v10 }
  0xd2   : > { %9749 = vst [vmem:[#allocation38_spill] sm:$0xff] %v7128_v43  ;;  %v1092_v46 = vmul.f32 %v7128_v43, %v7032_v10 }
  0xd3   : > { %9750 = vst [vmem:[#allocation39_spill] sm:$0xff] %v7137_v47  ;;  %v6188_v51 = vpack.i.bf16 %v1041_v50, %v1040_v49  ;;  %1273 = vperm.xlu1 %6193, %v1270_v9  }
  0xd4   : > { %v6183_v48 = vpack.i.bf16 %v1093_v44, %v1092_v46 }
  0xd6   : > { %6179 = vrot.lane.b32.xlu0 %v6178_v45, %s9668_s15  ;;  %6184 = vrot.lane.b32.xlu2 %v6183_v48, %s9648_s0 }
  0xd7   : > { %v6155_v54 = vpop.permute.xlu1 %6154 }
  0xd8   : > { %v6157_v61 = vunpack.i.h.bf16 %v6155_v54  ;;  %v6156_v62 = vunpack.i.l.bf16 %v6155_v54 }
  0xda   : > { %v7170_v11 = vsel %vm1215_vm6, %v1210_v56, %v6156_v62  ;;  %v7173_v13 = vsel %vm1215_vm6, %v6156_v62, %v6157_v61 }
  0xdb   : > { %9752 = vst [vmem:[#allocation41_spill] sm:$0xff] %v7173_v13 }
  0xde   : > { %1128 = vrot.lane.b32.xlu0 %v7146_v52, %s9668_s15  ;;  %6189 = vrot.lane.b32.xlu2 %v6188_v51, %s9650_s11 }
  0xdf   : > { %v7158_v55 = vpop.permute.xlu1 %6159 }
  0xe0   : > { %v6162_v50 = vunpack.i.h.bf16 %v7158_v55  ;;  %v6161_v51 = vunpack.i.l.bf16 %v7158_v55  ;;  %v1251_v55 = vld [vmem:[%s6838_s17] sm:$0xff] }
  0xe6   : > { %1045 = vrot.lane.b32.xlu0 %v7152_v53, %s9650_s11  ;;  %1063 = vrot.lane.b32.xlu2 %v9546_v4, %s9661_s1 }
 0x115   : > { %v1163_v57 = vpop.permute.xlu0 %1162 }
 0x11f   : > { %v6170_v59 = vpop.permute.xlu2 %6169 }
 0x120   : > { %v6172_v1 = vunpack.i.h.bf16 %v6170_v59  ;;  %v6171_v2 = vunpack.i.l.bf16 %v6170_v59  ;;  %v7206_v59 = vsel %vm1069_vm7, %v6161_v51, %v6162_v50 }
 0x121   : > { %9757 = vst [vmem:[#allocation46_spill] sm:$0xff] %v7206_v59 }
 0x122   : > { %v7181_v26 = vsel %vm1086_vm4, %v6171_v2, %v6172_v1 }
 0x123   : > { %9753 = vst [vmem:[#allocation42_spill] sm:$0xff] %v7181_v26 }
 0x12d   : > { %v1240_v58 = vpop.permute.xlu1 %1239 }
 0x130   : > { %v6185_v18 = vpop.permute.xlu2 %6184 }
 0x131   : > { %v6187_v45 = vunpack.i.h.bf16 %v6185_v18  ;;  %v6186_v46 = vunpack.i.l.bf16 %v6185_v18 }
 0x135   : > { %v1192_v6 = vpop.permute.xlu1 %1191 }
 0x136   : > { %v7178_v25 = vsel %vm1086_vm4, %v1192_v6, %v6171_v2 }
 0x138   : > { %v6165_v60 = vpop.permute.xlu0 %6164  ;;  %v6190_v39 = vpop.permute.xlu2 %6189 }
 0x139   : > { %v6167_v63 = vunpack.i.h.bf16 %v6165_v60  ;;  %v6166_v0 = vunpack.i.l.bf16 %v6165_v60  ;;  %v6192_v56 = vunpack.i.h.bf16 %v6190_v39 }
 0x13b   : > { %v7161_v3 = vsel %vm1034_vm5, %v1240_v58, %v6166_v0  ;;  %v7164_v5 = vsel %vm1034_vm5, %v6166_v0, %v6167_v63  ;;  %v7202_v58 = vsel %vm1103_vm1, %v6186_v46, %v6187_v45 }
 0x13c   : > { %9751 = vst [vmem:[#allocation40_spill] sm:$0xff] %v7164_v5  ;;  %1287 = vmatpush.msra.mxu0 %v7161_v3  ;;  %1307 = vmatpush.msra.mxu1 %v7164_v5 }
 0x13d   : > { %9756 = vst [vmem:[#allocation45_spill] sm:$0xff] %v7202_v58  ;;  %v1098_v60 = vpop.permute.xlu1 %1097 }
 0x13e   : > { %1288 = vmatpush.msra.mxu0 %v7170_v11  ;;  %1308 = vmatpush.msra.mxu1 %v7173_v13  ;;  %v7219_v1 = vsel %vm1103_vm1, %v1098_v60, %v6186_v46 }
 0x140   : > { %v6175_v27 = vpop.permute.xlu0 %6174  ;;  %1289 = vmatpush.msra.mxu0 %v7178_v25  ;;  %1309 = vmatpush.msra.mxu1 %v7181_v26  ;;  %v1064_v0 = vpop.permute.xlu2 %1063 }
 0x141   : > { %v6177_v28 = vunpack.i.h.bf16 %v6175_v27  ;;  %v6176_v33 = vunpack.i.l.bf16 %v6175_v27  ;;  %v7224_v2 = vsel %vm1069_vm7, %v1064_v0, %v6161_v51 }
 0x142   : > { %9760 = vst [vmem:[#allocation49_spill] sm:$0xff] %v7224_v2 }
 0x143   : > { %v7186_v37 = vsel %vm1117_vm3, %v1163_v57, %v6176_v33  ;;  %v7189_v38 = vsel %vm1117_vm3, %v6176_v33, %v6177_v28  ;;  %v6191_v57 = vunpack.i.l.bf16 %v6190_v39 }
 0x144   : > { %9754 = vst [vmem:[#allocation43_spill] sm:$0xff] %v7189_v38  ;;  %1290 = vmatpush.msra.mxu0 %v7186_v37  ;;  %1310 = vmatpush.msra.mxu1 %v7189_v38 }
 0x145   : > { %v7214_v63 = vsel %vm1016_vm0, %v6191_v57, %v6192_v56  ;;  %v1274_v16 = vpop.permute.xlu1 %1273 }
 0x146   : > { %1311 = vmatpush.msra.mxu1 %v7024_v7  ;;  %1291 = vmatpush.msra.mxu0 %v7032_v10  ;;  %9759 = vst [vmem:[#allocation48_spill] sm:$0xff] %v7214_v63 }
 0x148   : > { %v6180_v44 = vpop.permute.xlu0 %6179 }
 0x149   : > { %v6182_v48 = vunpack.i.h.bf16 %v6180_v44  ;;  %v6181_v49 = vunpack.i.l.bf16 %v6180_v44 }
 0x14b   : > { %v7198_v54 = vsel %vm1134_vm2, %v6181_v49, %v6182_v48 }
 0x14c   : > { %9755 = vst [vmem:[#allocation44_spill] sm:$0xff] %v7198_v54  ;;  %1312 = vmatpush.msra.mxu1 %v7198_v54 }
 0x14e   : > { %1313 = vmatpush.msra.mxu1 %v7202_v58 }
 0x150   : > { %v1129_v61 = vpop.permute.xlu0 %1128  ;;  %1314 = vmatpush.msra.mxu1 %v7206_v59 }
 0x151   : > { %v7211_v62 = vsel %vm1134_vm2, %v1129_v61, %v6181_v49 }
 0x152   : > { %9758 = vst [vmem:[#allocation47_spill] sm:$0xff] %v7211_v62  ;;  %1292 = vmatpush.msra.mxu0 %v7211_v62  ;;  %1315 = vmatpush.msra.mxu1 %v7214_v63 }
 0x153   : > { %6069 = vmatmul.msk.f32.vlgmr.msra.gmra.mxu1 %vm1276_vm8, %v1251_v55 }
 0x154   : > { %1293 = vmatpush.msra.mxu0 %v7219_v1 }
 0x156   : > { %1294 = vmatpush.msra.mxu0 %v7224_v2 }
 0x158   : > { %v1046_v6 = vpop.permute.xlu0 %1045 }
 0x159   : > { %v7228_v9 = vsel %vm1016_vm0, %v1046_v6, %v6191_v57 }
 0x15a   : > { %9761 = vst [vmem:[#allocation50_spill] sm:$0xff] %v7228_v9  ;;  %1295 = vmatpush.msra.mxu0 %v7228_v9 }
 0x15b   : > { %6068 = vmatmul.msk.f32.vlgmr.msra.gmra.mxu0 %vm1276_vm8, %v1251_v55 }
 0x1d0   : > { %v1317_v18 = vpop.f32.mrf.mxu1 }
 0x1d1   : > { %v1318_v27 = vadd.f32 %v1317_v18, %v1274_v16 }
 0x1d3   : > { %v1321_v28 = vmul.f32 0.2, %v1318_v27 }
 0x1d5   : > { %v7232_v33 = vmax.f32 %v1318_v27, %v1321_v28 }
 0x1d7   : > { %9762 = vst [vmem:[#allocation51_spill] sm:$0xff] %v7232_v33  ;;  %v1415_v39 = vmul.f32 %v7232_v33, %v7089_v30  ;;  %v1391_v50 = vmul.f32 %v7232_v33, %v7104_v35  ;;  %v1370_v60 = vmul.f32 %v7232_v33, %v7121_v41  ;;  %v1436_v0 = vmul.f32 %v7232_v33, %v7062_v21 }
 0x1d8   : > { %v1297_v44 = vpop.f32.mrf.mxu0  ;;  %v1331_v18 = vmul.f32 %v7232_v33, %v7119_v40 }
 0x1d9   : > { %v1298_v45 = vadd.f32 %v1297_v44, %v1274_v16  ;;  %v6204_v46 = vpack.i.bf16 %v7102_v34, %v1415_v39  ;;  %v6199_v16 = vpack.i.bf16 %v7066_v22, %v1436_v0 }
 0x1db   : > { %v1320_v48 = vmul.f32 0.2, %v1298_v45  ;;  %6205 = vrot.lane.b32.xlu0 %v6204_v46, %s9670_s16 }
 0x1dd   : > { %v7238_v49 = vmax.f32 %v1298_v45, %v1320_v48  ;;  %v1475_v45 = vmul.f32 %v7232_v33, %v7071_v23 }
 0x1df   : > { %9763 = vst [vmem:[#allocation52_spill] sm:$0xff] %v7238_v49  ;;  %v6194_v51 = vpack.i.bf16 %v7232_v33, %v7238_v49  ;;  %v1390_v56 = vmul.f32 %v7238_v49, %v7111_v36  ;;  %v1369_v57 = vmul.f32 %v7238_v49, %v7128_v43  ;;  %v1330_v6 = vmul.f32 %v7238_v49, %v7137_v47 }
 0x1e0   : > { %v1414_v27 = vmul.f32 %v7238_v49, %v7039_v12  ;;  %v1435_v39 = vmul.f32 %v7238_v49, %v7044_v14  ;;  %v1474_v44 = vmul.f32 %v7238_v49, %v7046_v15 }
 0x1e1   : > { %6195 = vrot.lane.b32.xlu2 %v6194_v51, %s9661_s1  ;;  %v6209_v61 = vpack.i.bf16 %v1391_v50, %v1390_v56  ;;  %v6214_v55 = vpack.i.bf16 %v1370_v60, %v1369_v57  ;;  %v6219_v28 = vpack.i.bf16 %v1331_v18, %v1330_v6 }
 0x1e2   : > { %v6224_v46 = vpack.i.bf16 %v1475_v45, %v1474_v44 }
 0x1e3   : > { %6210 = vrot.lane.b32.xlu1 %v6209_v61, %s9668_s15  ;;  %6215 = vrot.lane.b32.xlu0 %v6214_v55, %s9648_s0 }
 0x1e9   : > { %6200 = vrot.lane.b32.xlu2 %v6199_v16, %s9663_s18 }
 0x1eb   : > { %1420 = vrot.lane.b32.xlu1 %v1414_v27, %s9670_s16  ;;  %6220 = vrot.lane.b32.xlu0 %v6219_v28, %s9650_s11 }
 0x1f1   : > { %1441 = vrot.lane.b32.xlu2 %v1435_v39, %s9663_s18 }
 0x1f3   : > { %1395 = vrot.lane.b32.xlu1 %v7146_v52, %s9668_s15  ;;  %1353 = vrot.lane.b32.xlu0 %v9546_v4, %s9661_s1 }
 0x1f9   : > { %1374 = vrot.lane.b32.xlu2 %v7094_v31, %s9648_s0 }
 0x1fb   : > { %1335 = vrot.lane.b32.xlu1 %v7152_v53, %s9650_s11  ;;  %6230 = vrot.lane.b32.xlu0 %v6194_v51, %s9622_s28 }
 0x201   : > { %6225 = vrot.lane.b32.xlu2 %v6224_v46, %s9665_s26 }
 0x203   : > { %1484 = vrot.lane.b32.xlu1 %v7075_v24, %s9665_s26 }
 0x209   : > { %1463 = vrot.lane.b32.xlu2 %v7026_v8, %s9622_s28 }
 0x23b   : > { %v7286_v48 = vpop.permute.xlu2 %6195 }
 0x243   : > { %v6201_v50 = vpop.permute.xlu2 %6200 }
 0x244   : > { %v6202_v56 = vunpack.i.l.bf16 %v6201_v50  ;;  %v6203_v32 = vunpack.i.h.bf16 %v6201_v50 }
 0x246   : > { %v7341_v50 = vsel %vm1086_vm4, %v6202_v56, %v6203_v32 }
 0x24b   : > { %v1442_v51 = vpop.permute.xlu2 %1441 }
 0x24c   : > { %v7289_v57 = vsel %vm1086_vm4, %v1442_v51, %v6202_v56 }
 0x24d   : > { %v6206_v60 = vpop.permute.xlu0 %6205  ;;  %1539 = vmatpush.msra.mxu2 %v7289_v57  ;;  %1857 = vmatpush.msrb.mxu1 %v7289_v57 }
 0x24e   : > { %v6207_v16 = vunpack.i.l.bf16 %v6206_v60 }
 0x253   : > { %v1375_v61 = vpop.permute.xlu2 %1374 }
 0x255   : > { %v7293_v55 = vpop.permute.xlu1 %6210  ;;  %v7295_v0 = vpop.permute.xlu0 %6215 }
 0x256   : > { %v6212_v46 = vunpack.i.l.bf16 %v7293_v55  ;;  %v6217_v51 = vunpack.i.l.bf16 %v7295_v0  ;;  %v6218_v32 = vunpack.i.h.bf16 %v7295_v0 }
 0x258   : > { %v7319_v42 = vsel %vm1103_vm1, %v1375_v61, %v6217_v51 }
 0x25b   : > { %v6226_v6 = vpop.permute.xlu2 %6225 }
 0x25c   : > { %v6228_v18 = vunpack.i.h.bf16 %v6226_v6  ;;  %v6227_v27 = vunpack.i.l.bf16 %v6226_v6 }
 0x25d   : > { %v1421_v28 = vpop.permute.xlu1 %1420  ;;  %v7297_v39 = vpop.permute.xlu0 %6220 }
 0x25e   : > { %v7300_v44 = vsel %vm1117_vm3, %v1421_v28, %v6207_v16  ;;  %v7303_v45 = vsel %vm1034_vm5, %v6227_v27, %v6228_v18  ;;  %v6197_v27 = vunpack.i.l.bf16 %v7286_v48 }
 0x25f   : > { %1540 = vmatpush.msra.mxu2 %v7300_v44  ;;  %1573 = vmatpush.msra.mxu3 %v7303_v45 }
 0x260   : > { %1858 = vmatpush.msrb.mxu1 %v7300_v44 }
 0x261   : > { %1541 = vmatpush.msra.mxu2 %v7238_v49 }
 0x262   : > { %1859 = vmatpush.msrb.mxu1 %v7238_v49  ;;  %v6208_v49 = vunpack.i.h.bf16 %v6206_v60 }
 0x263   : > { %v1464_v56 = vpop.permute.xlu2 %1463 }
 0x265   : > { %v1396_v6 = vpop.permute.xlu1 %1395  ;;  %v1354_v28 = vpop.permute.xlu0 %1353 }
 0x266   : > { %v7313_v4 = vsel %vm1134_vm2, %v1396_v6, %v6212_v46  ;;  %v7324_v29 = vsel %vm1069_vm7, %v1354_v28, %v6197_v27  ;;  %v6222_v6 = vunpack.i.l.bf16 %v7297_v39 }
 0x267   : > { %9764 = vst [vmem:[#allocation53_spill] sm:$0xff] %v7313_v4  ;;  %1542 = vmatpush.msra.mxu2 %v7313_v4  ;;  %1860 = vmatpush.msrb.mxu1 %v7313_v4 }
 0x268   : > { %9765 = vst [vmem:[#allocation54_spill] sm:$0xff] %v7324_v29 }
 0x269   : > { %1543 = vmatpush.msra.mxu2 %v7319_v42  ;;  %1861 = vmatpush.msrb.mxu1 %v7319_v42 }
 0x26b   : > { %1544 = vmatpush.msra.mxu2 %v7324_v29  ;;  %1862 = vmatpush.msrb.mxu1 %v7324_v29  ;;  %v1493_v29 = vld [vmem:[%s6843_s21 + $0x8] sm:$0xff] }
 0x26d   : > { %v1336_v20 = vpop.permute.xlu1 %1335  ;;  %v6231_v17 = vpop.permute.xlu0 %6230 }
 0x26e   : > { %v7330_v61 = vsel %vm1016_vm0, %v1336_v20, %v6222_v6  ;;  %v6233_v19 = vunpack.i.h.bf16 %v6231_v17  ;;  %v6232_v4 = vunpack.i.l.bf16 %v6231_v17  ;;  %v6213_v17 = vunpack.i.h.bf16 %v7293_v55 }
 0x26f   : > { %1545 = vmatpush.msra.mxu2 %v7330_v61  ;;  %1863 = vmatpush.msrb.mxu1 %v7330_v61  ;;  %v7348_v20 = vsel %vm1117_vm3, %v6207_v16, %v6208_v49  ;;  %v6198_v49 = vunpack.i.h.bf16 %v7286_v48  ;;  %v7376_v48 = vsel %vm1103_vm1, %v6217_v51, %v6218_v32  ;;  %v1791_v32 = vld [vmem:[%s6848_s25] sm:$0xff] }
 0x270   : > { %v7335_v28 = vsel %vm1215_vm6, %v6232_v4, %v6233_v19  ;;  %v1530_v4 = vld [vmem:[%s6918_s20] sm:$0xff]  ;;  %v7365_v0 = vsel %vm1134_vm2, %v6212_v46, %v6213_v17  ;;  %v7368_v16 = vsel %vm1215_vm6, %v6233_v19, %v1464_v56  ;;  %9767 = vst [vmem:[#allocation56_spill] sm:$0xff] %v7376_v48 }
 0x271   : > { %1546 = vmatpush.msra.mxu2 %v7161_v3  ;;  %1574 = vmatpush.msra.mxu3 %v7335_v28  ;;  %9766 = vst [vmem:[#allocation55_spill] sm:$0xff] %v7365_v0  ;;  %v7382_v19 = vsel %vm1069_vm7, %v6197_v27, %v6198_v49  ;;  %v1492_v46 = vld [vmem:[%s6843_s21] sm:$0xff] }
 0x272   : > { %1864 = vmatpush.msrb.mxu1 %v7161_v3  ;;  %6070 = vmatmul.msk.f32.vlgmr.msra.gmra.mxu3 %vm1069_vm7, %v1493_v29  ;;  %9768 = vst [vmem:[#allocation57_spill] sm:$0xff] %v7382_v19 }
 0x273   : > { %1579 = vmatpush.msrb.mxu3 %v7341_v50  ;;  %1547 = vmatpush.msra.mxu2 %v7170_v11 }
 0x274   : > { %1865 = vmatpush.msrb.mxu1 %v7170_v11  ;;  %1533 = vperm.xlu0 %6234, %v1530_v4  }
 0x275   : > { %1580 = vmatpush.msrb.mxu3 %v7348_v20  ;;  %v1485_v60 = vpop.permute.xlu1 %1484  ;;  %1548 = vmatpush.msra.mxu2 %v7178_v25 }
 0x276   : > { %v7357_v55 = vsel %vm1034_vm5, %v6228_v18, %v1485_v60  ;;  %1866 = vmatpush.msrb.mxu1 %v7178_v25  ;;  %v6223_v18 = vunpack.i.h.bf16 %v7297_v39 }
 0x277   : > { %1581 = vmatpush.msrb.mxu3 %v7232_v33  ;;  %1549 = vmatpush.msra.mxu2 %v7186_v37 }
 0x278   : > { %1613 = vmatpush.msrb.mxu0 %v7357_v55  ;;  %1867 = vmatpush.msrb.mxu1 %v7186_v37  ;;  %v7389_v39 = vsel %vm1016_vm0, %v6222_v6, %v6223_v18 }
 0x279   : > { %1582 = vmatpush.msrb.mxu3 %v7365_v0  ;;  %1550 = vmatpush.msra.mxu2 %v7032_v10  ;;  %9769 = vst [vmem:[#allocation58_spill] sm:$0xff] %v7389_v39 }
 0x27a   : > { %1614 = vmatpush.msrb.mxu0 %v7368_v16  ;;  %1868 = vmatpush.msrb.mxu1 %v7032_v10 }
 0x27b   : > { %1583 = vmatpush.msrb.mxu3 %v7376_v48  ;;  %1551 = vmatpush.msra.mxu2 %v7211_v62 }
 0x27c   : > { %6071 = vmatmul.msk.f32.vlgmr.msrb.gmra.mxu0 %vm1069_vm7, %v1493_v29  ;;  %1869 = vmatpush.msrb.mxu1 %v7211_v62 }
 0x27d   : > { %1584 = vmatpush.msrb.mxu3 %v7382_v19  ;;  %1552 = vmatpush.msra.mxu2 %v7219_v1 }
 0x27e   : > { %1870 = vmatpush.msrb.mxu1 %v7219_v1 }
 0x27f   : > { %1585 = vmatpush.msrb.mxu3 %v7389_v39  ;;  %1553 = vmatpush.msra.mxu2 %v7224_v2 }
 0x280   : > { %1871 = vmatpush.msrb.mxu1 %v7224_v2 }
 0x281   : > { %1586 = vmatpush.msrb.mxu3 %v7164_v5  ;;  %1554 = vmatpush.msra.mxu2 %v7228_v9 }
 0x282   : > { %1872 = vmatpush.msrb.mxu1 %v7228_v9  ;;  %1555 = vmatmul.f32.vlgmr.msra.gmra.mxu2 %v1492_v46 }
 0x283   : > { %1587 = vmatpush.msrb.mxu3 %v7173_v13  ;;  %1897 = vmatpush.msrb.mxu2 %v7341_v50 }
 0x284   : > { %1873 = vmatmul.f32.vlgmr.msrb.gmra.mxu1 %v1791_v32 }
 0x285   : > { %1588 = vmatpush.msrb.mxu3 %v7181_v26  ;;  %1898 = vmatpush.msrb.mxu2 %v7348_v20 }
 0x287   : > { %1589 = vmatpush.msrb.mxu3 %v7189_v38  ;;  %1899 = vmatpush.msrb.mxu2 %v7232_v33 }
 0x289   : > { %1590 = vmatpush.msrb.mxu3 %v7024_v7  ;;  %1900 = vmatpush.msrb.mxu2 %v7365_v0 }
 0x28b   : > { %1591 = vmatpush.msrb.mxu3 %v7198_v54  ;;  %1901 = vmatpush.msrb.mxu2 %v7376_v48 }
 0x28d   : > { %1592 = vmatpush.msrb.mxu3 %v7202_v58  ;;  %1902 = vmatpush.msrb.mxu2 %v7382_v19 }
 0x28f   : > { %1593 = vmatpush.msrb.mxu3 %v7206_v59  ;;  %1903 = vmatpush.msrb.mxu2 %v7389_v39 }
 0x291   : > { %1594 = vmatpush.msrb.mxu3 %v7214_v63  ;;  %1904 = vmatpush.msrb.mxu2 %v7164_v5 }
 0x292   : > { %1595 = vmatmul.f32.vlgmr.msrb.gmra.mxu3 %v1492_v46 }
 0x293   : > { %1905 = vmatpush.msrb.mxu2 %v7173_v13 }
 0x295   : > { %1906 = vmatpush.msrb.mxu2 %v7181_v26 }
 0x297   : > { %1907 = vmatpush.msrb.mxu2 %v7189_v38 }
 0x299   : > { %1908 = vmatpush.msrb.mxu2 %v7024_v7 }
 0x29b   : > { %1909 = vmatpush.msrb.mxu2 %v7198_v54 }
 0x29d   : > { %1910 = vmatpush.msrb.mxu2 %v7202_v58 }
 0x29f   : > { %1911 = vmatpush.msrb.mxu2 %v7206_v59 }
 0x2a1   : > { %1912 = vmatpush.msrb.mxu2 %v7214_v63 }
 0x2a2   : > { %1913 = vmatmul.f32.vlgmr.msrb.gmra.mxu2 %v1791_v32 }
 0x2a3   : > { %2254 = vmatpush.msra.mxu2 %v7341_v50 }
 0x2a5   : > { %2255 = vmatpush.msra.mxu2 %v7348_v20 }
 0x2a7   : > { %2256 = vmatpush.msra.mxu2 %v7232_v33 }
 0x2a9   : > { %2257 = vmatpush.msra.mxu2 %v7365_v0 }
 0x2ab   : > { %2258 = vmatpush.msra.mxu2 %v7376_v48 }
 0x2ad   : > { %2259 = vmatpush.msra.mxu2 %v7382_v19 }
 0x2af   : > { %2260 = vmatpush.msra.mxu2 %v7389_v39 }
 0x2b1   : > { %2261 = vmatpush.msra.mxu2 %v7164_v5 }
 0x2b3   : > { %2262 = vmatpush.msra.mxu2 %v7173_v13 }
 0x2b5   : > { %2263 = vmatpush.msra.mxu2 %v7181_v26 }
 0x2b7   : > { %2264 = vmatpush.msra.mxu2 %v7189_v38 }
 0x2b9   : > { %2265 = vmatpush.msra.mxu2 %v7024_v7 }
 0x2bb   : > { %2266 = vmatpush.msra.mxu2 %v7198_v54 }
 0x2bd   : > { %2267 = vmatpush.msra.mxu2 %v7202_v58 }
 0x2bf   : > { %2268 = vmatpush.msra.mxu2 %v7206_v59 }
 0x2c1   : > { %2269 = vmatpush.msra.mxu2 %v7214_v63 }
 0x2e6   : > { %v1534_v29 = vpop.permute.xlu0 %1533 }
 0x2f5   : > { %v1576_v27 = vpop.f32.mrf.mxu3 }
 0x2f9   : > { %v1616_v60 = vpop.f32.mrf.mxu0 }
 0x305   : > { %v1556_v51 = vpop.f32.mrf.mxu2 }
 0x306   : > { %v1557_v6 = vadd.f32 %v1556_v51, %v1534_v29 }
 0x308   : > { %v1577_v17 = vadd.f32 %v1576_v27, %v1557_v6 }
 0x30a   : > { %v1619_v4 = vmul.f32 0.2, %v1577_v17 }
 0x30c   : > { %v7440_v56 = vmax.f32 %v1577_v17, %v1619_v4 }
 0x30e   : > { %1758 = vrot.lane.b32.xlu1 %v7440_v56, %s9622_s28  ;;  %v1773_v32 = vmul.f32 %v7440_v56, %v7046_v15 }
 0x315   : > { %v1596_v7 = vpop.f32.mrf.mxu3 }
 0x316   : > { %v1597_v49 = vadd.f32 %v1596_v7, %v1534_v29 }
 0x318   : > { %v1617_v18 = vadd.f32 %v1616_v60, %v1597_v49  ;;  %v1689_v60 = vmul.f32 %v7440_v56, %v7111_v36 }
 0x31a   : > { %v1620_v46 = vmul.f32 0.2, %v1617_v18 }
 0x31c   : > { %v7444_v63 = vmax.f32 %v1617_v18, %v1620_v46  ;;  %v1734_v18 = vmul.f32 %v7440_v56, %v7044_v14  ;;  %v1668_v46 = vmul.f32 %v7440_v56, %v7128_v43 }
 0x31e   : > { %v6235_v51 = vpack.i.bf16 %v7026_v8, %v7444_v63  ;;  %v6240_v27 = vpack.i.bf16 %v7444_v63, %v7440_v56  ;;  %v1774_v6 = vmul.f32 %v7444_v63, %v7071_v23  ;;  %v1714_v29 = vmul.f32 %v7444_v63, %v7089_v30 }
 0x31f   : > { %v1735_v8 = vmul.f32 %v7444_v63, %v7062_v21 }
 0x320   : > { %6236 = vrot.lane.b32.xlu2 %v6235_v51, %s9622_s28  ;;  %6241 = vrot.lane.b32.xlu0 %v6240_v27, %s9661_s1  ;;  %v6245_v17 = vpack.i.bf16 %v7075_v24, %v1774_v6  ;;  %v6255_v4 = vpack.i.bf16 %v7102_v34, %v1714_v29  ;;  %v1690_v24 = vmul.f32 %v7444_v63, %v7104_v35  ;;  %v1847_v29 = vld [vmem:[%s6923_s27] sm:$0xff] }
 0x321   : > { %v6250_v7 = vpack.i.bf16 %v7066_v22, %v1735_v8  ;;  %v1669_v34 = vmul.f32 %v7444_v63, %v7121_v41  ;;  %v1630_v51 = vmul.f32 %v7444_v63, %v7119_v40  ;;  %v1713_v27 = vmul.f32 %v7440_v56, %v7039_v12 }
 0x322   : > { %6246 = vrot.lane.b32.xlu1 %v6245_v17, %s9665_s26  ;;  %v6260_v49 = vpack.i.bf16 %v1690_v24, %v1689_v60  ;;  %v1629_v6 = vmul.f32 %v7440_v56, %v7137_v47  ;;  %v9770_v8 = vmov 0.0  }
 0x323   : > { %v6265_v22 = vpack.i.bf16 %v1669_v34, %v1668_v46 }
 0x324   : > { %v6270_v17 = vpack.i.bf16 %v1630_v51, %v1629_v6 }
 0x328   : > { %6256 = vrot.lane.b32.xlu2 %v6255_v4, %s9670_s16  ;;  %1779 = vrot.lane.b32.xlu0 %v1773_v32, %s9665_s26 }
 0x32a   : > { %6251 = vrot.lane.b32.xlu1 %v6250_v7, %s9663_s18 }
 0x330   : > { %6261 = vrot.lane.b32.xlu2 %v6260_v49, %s9668_s15  ;;  %1740 = vrot.lane.b32.xlu0 %v1734_v18, %s9663_s18 }
 0x332   : > { %6266 = vrot.lane.b32.xlu1 %v6265_v22, %s9648_s0 }
 0x338   : > { %1719 = vrot.lane.b32.xlu2 %v1713_v27, %s9670_s16  ;;  %1673 = vrot.lane.b32.xlu0 %v7094_v31, %s9648_s0 }
 0x33a   : > { %6271 = vrot.lane.b32.xlu1 %v6270_v17, %s9650_s11 }
 0x340   : > { %1694 = vrot.lane.b32.xlu2 %v7146_v52, %s9668_s15  ;;  %1850 = vperm.xlu0 %6234, %v1847_v29  }
 0x342   : > { %1652 = vrot.lane.b32.xlu1 %v9770_v8, %s9661_s1 }
 0x348   : > { %1634 = vrot.lane.b32.xlu2 %v7152_v53, %s9650_s11  ;;  %1991 = vrot.lane.b32.xlu0 %v7094_v31, %s9648_s0 }
 0x350   : > { %2012 = vrot.lane.b32.xlu2 %v7146_v52, %s9668_s15 }
 0x37a   : > { %v6237_v4 = vpop.permute.xlu2 %6236 }
 0x37b   : > { %v6239_v49 = vunpack.i.h.bf16 %v6237_v4  ;;  %v6238_v18 = vunpack.i.l.bf16 %v6237_v4 }
 0x37d   : > { %v7508_v31 = vsel %vm1215_vm6, %v6238_v18, %v6239_v49 }
 0x380   : > { %v1759_v7 = vpop.permute.xlu1 %1758 }
 0x381   : > { %v7516_v29 = vsel %vm1215_vm6, %v1759_v7, %v6238_v18 }
 0x382   : > { %v6257_v32 = vpop.permute.xlu2 %6256 }
 0x383   : > { %v6259_v8 = vunpack.i.h.bf16 %v6257_v32  ;;  %v6258_v4 = vunpack.i.l.bf16 %v6257_v32 }
 0x38a   : > { %v6262_v24 = vpop.permute.xlu2 %6261 }
 0x38b   : > { %v6264_v59 = vunpack.i.h.bf16 %v6262_v24  ;;  %v6263_v58 = vunpack.i.l.bf16 %v6262_v24 }
 0x38d   : > { %v7534_v24 = vsel %vm1134_vm2, %v6263_v58, %v6264_v59 }
 0x392   : > { %v7501_v60 = vpop.permute.xlu0 %6241  ;;  %v1720_v6 = vpop.permute.xlu2 %1719 }
 0x393   : > { %v6244_v32 = vunpack.i.h.bf16 %v7501_v60  ;;  %v7538_v54 = vsel %vm1117_vm3, %v1720_v6, %v6258_v4 }
 0x394   : > { %v6247_v34 = vpop.permute.xlu1 %6246 }
 0x395   : > { %v6249_v46 = vunpack.i.h.bf16 %v6247_v34  ;;  %v6248_v22 = vunpack.i.l.bf16 %v6247_v34 }
 0x397   : > { %v7504_v51 = vsel %vm1034_vm5, %v6248_v22, %v6249_v46 }
 0x398   : > { %1922 = vmatpush.msra.mxu3 %v7504_v51 }
 0x39a   : > { %1923 = vmatpush.msra.mxu3 %v7508_v31  ;;  %v1780_v52 = vpop.permute.xlu0 %1779  ;;  %v1695_v38 = vpop.permute.xlu2 %1694 }
 0x39b   : > { %v7512_v27 = vsel %vm1034_vm5, %v1780_v52, %v6248_v22  ;;  %v7524_v22 = vsel %vm1117_vm3, %v6258_v4, %v6259_v8  ;;  %v7548_v59 = vsel %vm1134_vm2, %v1695_v38, %v6263_v58  ;;  %v1792_v38 = vld [vmem:[%s6848_s25 + $0x8] sm:$0xff] }
 0x39c   : > { %v6252_v17 = vpop.permute.xlu1 %6251  ;;  %1882 = vmatpush.msra.mxu0 %v7512_v27 }
 0x39d   : > { %v6254_v34 = vunpack.i.h.bf16 %v6252_v17  ;;  %v6253_v46 = vunpack.i.l.bf16 %v6252_v17  ;;  %v6243_v17 = vunpack.i.l.bf16 %v7501_v60 }
 0x39e   : > { %1883 = vmatpush.msra.mxu0 %v7516_v29 }
 0x39f   : > { %v7520_v49 = vsel %vm1086_vm4, %v6253_v46, %v6254_v34  ;;  %v7551_v60 = vsel %vm1069_vm7, %v6243_v17, %v6244_v32 }
 0x3a0   : > { %1924 = vmatpush.msra.mxu3 %v7520_v49 }
 0x3a2   : > { %1925 = vmatpush.msra.mxu3 %v7524_v22  ;;  %v1741_v7 = vpop.permute.xlu0 %1740 }
 0x3a3   : > { %v7528_v18 = vsel %vm1086_vm4, %v1741_v7, %v6253_v46 }
 0x3a4   : > { %1926 = vmatpush.msra.mxu3 %v7444_v63  ;;  %v6267_v52 = vpop.permute.xlu1 %6266  ;;  %1884 = vmatpush.msra.mxu0 %v7528_v18 }
 0x3a5   : > { %v6269_v8 = vunpack.i.h.bf16 %v6267_v52  ;;  %v6268_v34 = vunpack.i.l.bf16 %v6267_v52 }
 0x3a6   : > { %1885 = vmatpush.msra.mxu0 %v7538_v54  ;;  %1927 = vmatpush.msra.mxu3 %v7534_v24 }
 0x3a7   : > { %v7543_v46 = vsel %vm1103_vm1, %v6268_v34, %v6269_v8 }
 0x3a8   : > { %1886 = vmatpush.msra.mxu0 %v7440_v56  ;;  %1928 = vmatpush.msra.mxu3 %v7543_v46 }
 0x3aa   : > { %1887 = vmatpush.msra.mxu0 %v7548_v59  ;;  %v1674_v6 = vpop.permute.xlu0 %1673  ;;  %1929 = vmatpush.msra.mxu3 %v7551_v60 }
 0x3ab   : > { %v7556_v4 = vsel %vm1103_vm1, %v1674_v6, %v6268_v34  ;;  %v1635_v34 = vpop.permute.xlu2 %1634 }
 0x3ac   : > { %1888 = vmatpush.msra.mxu0 %v7556_v4  ;;  %v6272_v7 = vpop.permute.xlu1 %6271 }
 0x3ad   : > { %v6274_v52 = vunpack.i.h.bf16 %v6272_v7  ;;  %v6273_v8 = vunpack.i.l.bf16 %v6272_v7  ;;  %v9772_v7 = vld [vmem:[#allocation53_spill] sm:$0xff] }
 0x3af   : > { %v7560_v26 = vsel %vm1016_vm0, %v6273_v8, %v6274_v52  ;;  %v7572_v6 = vsel %vm1016_vm0, %v1635_v34, %v6273_v8  ;;  %v9773_v52 = vld [vmem:[#allocation54_spill] sm:$0xff]  ;;  %v1914_v8 = vpop.f32.mrf.mxu2 }
 0x3b0   : > { %1930 = vmatpush.msra.mxu3 %v7560_v26 }
 0x3b2   : > { %1931 = vmatpush.msra.mxu3 %v7357_v55 }
 0x3b4   : > { %v1653_v58 = vpop.permute.xlu1 %1652  ;;  %1932 = vmatpush.msra.mxu3 %v7368_v16 }
 0x3b5   : > { %6073 = vmatmul.msk.f32.vlgmr.msra.gmra.mxu3 %vm1853_vm9, %v1792_v38  ;;  %v7568_v32 = vsel %vm1069_vm7, %v1653_v58, %v6243_v17  ;;  %v9771_v17 = vld [vmem:[#allocation52_spill] sm:$0xff]  ;;  %v1874_v58 = vpop.f32.mrf.mxu1 }
 0x3b6   : > { %1889 = vmatpush.msra.mxu0 %v7568_v32 }
 0x3b8   : > { %1890 = vmatpush.msra.mxu0 %v7572_v6 }
 0x3ba   : > { %1891 = vmatpush.msra.mxu0 %v7303_v45 }
 0x3bc   : > { %1892 = vmatpush.msra.mxu0 %v7335_v28 }
 0x3bd   : > { %6072 = vmatmul.msk.f32.vlgmr.msra.gmra.mxu0 %vm1853_vm9, %v1792_v38  ;;  %v1851_v38 = vpop.permute.xlu0 %1850 }
 0x3be   : > { %2194 = vmatpush.msrb.mxu0 %v7289_v57  ;;  %v1915_v34 = vadd.f32 %v1914_v8, %v1851_v38  ;;  %v1875_v39 = vadd.f32 %v1874_v58, %v1851_v38 }
 0x3c0   : > { %2195 = vmatpush.msrb.mxu0 %v7300_v44 }
 0x3c2   : > { %2196 = vmatpush.msrb.mxu0 %v9771_v17 }
 0x3c4   : > { %2197 = vmatpush.msrb.mxu0 %v9772_v7 }
 0x3c6   : > { %2198 = vmatpush.msrb.mxu0 %v7319_v42 }
 0x3c8   : > { %2199 = vmatpush.msrb.mxu0 %v9773_v52 }
 0x3ca   : > { %2200 = vmatpush.msrb.mxu0 %v7330_v61 }
 0x3cc   : > { %2201 = vmatpush.msrb.mxu0 %v7161_v3 }
 0x3ce   : > { %2202 = vmatpush.msrb.mxu0 %v7170_v11 }
 0x3d0   : > { %2203 = vmatpush.msrb.mxu0 %v7178_v25 }
 0x3d2   : > { %2204 = vmatpush.msrb.mxu0 %v7186_v37 }
 0x3d4   : > { %2205 = vmatpush.msrb.mxu0 %v7032_v10 }
 0x3d6   : > { %2206 = vmatpush.msrb.mxu0 %v7211_v62 }
 0x3d8   : > { %2207 = vmatpush.msrb.mxu0 %v7219_v1 }
 0x3da   : > { %2208 = vmatpush.msrb.mxu0 %v7224_v2 }
 0x3dc   : > { %2209 = vmatpush.msrb.mxu0 %v7228_v9 }
 0x438   : > { %v1934_v13 = vpop.f32.mrf.mxu3 }
 0x439   : > { %v1935_v5 = vadd.f32 %v1934_v13, %v1915_v34 }
 0x43a   : > { %v1894_v19 = vpop.f32.mrf.mxu0 }
 0x43b   : > { %v1938_v48 = vmul.f32 0.2, %v1935_v5  ;;  %v1895_v0 = vadd.f32 %v1894_v19, %v1875_v39 }
 0x43d   : > { %v7594_v33 = vmax.f32 %v1935_v5, %v1938_v48  ;;  %v1937_v10 = vmul.f32 0.2, %v1895_v0 }
 0x43f   : > { %v7596_v62 = vmax.f32 %v1895_v0, %v1937_v10  ;;  %v2008_v2 = vmul.f32 %v7594_v33, %v7104_v35  ;;  %v1987_v5 = vmul.f32 %v7594_v33, %v7121_v41  ;;  %v2092_v39 = vmul.f32 %v7594_v33, %v7071_v23  ;;  %v2109_v35 = vld [vmem:[%s6853_s29] sm:$0xff] }
 0x440   : > { %v1948_v34 = vmul.f32 %v7594_v33, %v7119_v40  ;;  %2210 = vmatmul.f32.vlgmr.msrb.gmra.mxu0 %v2109_v35  ;;  %2270 = vmatmul.f32.vlgmr.msra.gmra.mxu2 %v2109_v35 }
 0x441   : > { %2214 = vmatpush.msra.mxu1 %v7596_v62  ;;  %v6275_v9 = vpack.i.bf16 %v7594_v33, %v7596_v62  ;;  %v2007_v13 = vmul.f32 %v7596_v62, %v7111_v36  ;;  %v1986_v8 = vmul.f32 %v7596_v62, %v7128_v43  ;;  %v2091_v19 = vmul.f32 %v7596_v62, %v7046_v15 }
 0x442   : > { %v1947_v38 = vmul.f32 %v7596_v62, %v7137_v47  ;;  %v2031_v10 = vmul.f32 %v7596_v62, %v7039_v12 }
 0x443   : > { %6276 = vrot.lane.b32.xlu0 %v6275_v9, %s9661_s1  ;;  %v6280_v0 = vpack.i.bf16 %v2008_v2, %v2007_v13  ;;  %v6285_v48 = vpack.i.bf16 %v1987_v5, %v1986_v8  ;;  %v6300_v58 = vpack.i.bf16 %v2092_v39, %v2091_v19  ;;  %v2032_v13 = vmul.f32 %v7594_v33, %v7089_v30  ;;  %v7638_v19 = vld [vmem:[#allocation3 + $0x18] sm:$0xff]  ;;  %v9775_v39 = vld [vmem:[#allocation26_spill] sm:$0xff] }
 0x444   : > { %v6290_v2 = vpack.i.bf16 %v1948_v34, %v1947_v38  ;;  %v2052_v8 = vmul.f32 %v7596_v62, %v7044_v14  ;;  %v7642_v38 = vmul.f32 %v7638_v19, %v9775_v39 }
 0x445   : > { %6281 = vrot.lane.b32.xlu1 %v6280_v0, %s9668_s15  ;;  %6286 = vrot.lane.b32.xlu2 %v6285_v48, %s9648_s0  ;;  %v6310_v5 = vpack.i.bf16 %v2032_v13, %v2031_v10  ;;  %v2053_v0 = vmul.f32 %v7594_v33, %v7062_v21  ;;  %v1992_v13 = vpop.permute.xlu0 %1991 }
 0x446   : > { %9776 = vst [vmem:[#allocation53_spill] sm:$0xff] %v7642_v38 }
 0x447   : > { %v6305_v48 = vpack.i.bf16 %v2053_v0, %v2052_v8 }
 0x44b   : > { %6301 = vrot.lane.b32.xlu0 %v6300_v58, %s9665_s26  ;;  %v9777_v58 = vld [vmem:[#allocation25_spill] sm:$0xff] }
 0x44c   : > { %v7651_v34 = vmul.f32 %v7638_v19, %v9777_v58 }
 0x44d   : > { %1952 = vrot.lane.b32.xlu2 %v7152_v53, %s9650_s11  ;;  %6291 = vrot.lane.b32.xlu1 %v6290_v2, %s9650_s11  ;;  %v7634_v53 = vld [vmem:[#allocation3] sm:$0xff]  ;;  %v9779_v2 = vld [vmem:[#allocation27_spill] sm:$0xff] }
 0x44e   : > { %9774 = vst [vmem:[#allocation52_spill] sm:$0xff] %v7634_v53  ;;  %v7657_v10 = vmul.f32 %v7638_v19, %v9779_v2 }
 0x44f   : > { %9778 = vst [vmem:[#allocation54_spill] sm:$0xff] %v7651_v34 }
 0x450   : > { %9780 = vst [vmem:[#allocation59_spill] sm:$0xff] %v7657_v10 }
 0x453   : > { %6311 = vrot.lane.b32.xlu0 %v6310_v5, %s9670_s16 }
 0x455   : > { %6306 = vrot.lane.b32.xlu2 %v6305_v48, %s9663_s18  ;;  %1970 = vrot.lane.b32.xlu1 %v7634_v53, %s9661_s1 }
 0x45b   : > { %2062 = vrot.lane.b32.xlu0 %v7642_v38, %s9663_s18 }
 0x45d   : > { %6296 = vrot.lane.b32.xlu1 %v6275_v9, %s9622_s28  ;;  %2080 = vrot.lane.b32.xlu2 %v7638_v19, %s9622_s28  ;;  %v2013_v9 = vpop.permute.xlu2 %2012 }
 0x463   : > { %2418 = vrot.lane.b32.xlu0 %v7651_v34, %s9670_s16 }
 0x465   : > { %2101 = vrot.lane.b32.xlu1 %v7657_v10, %s9665_s26 }
 0x46d   : > { %2041 = vrot.lane.b32.xlu1 %v7651_v34, %s9670_s16 }
 0x475   : > { %2478 = vrot.lane.b32.xlu1 %v7657_v10, %s9665_s26 }
 0x47d   : > { %2439 = vrot.lane.b32.xlu1 %v7642_v38, %s9663_s18 }
 0x49f   : > { %v7667_v8 = vpop.permute.xlu2 %6286 }
 0x4a0   : > { %v6288_v48 = vunpack.i.l.bf16 %v7667_v8 }
 0x4a2   : > { %v7677_v2 = vsel %vm1103_vm1, %v1992_v13, %v6288_v48 }
 0x4b5   : > { %v7669_v5 = vpop.permute.xlu0 %6276 }
 0x4b6   : > { %v6278_v12 = vunpack.i.l.bf16 %v7669_v5 }
 0x4b7   : > { %v6282_v0 = vpop.permute.xlu1 %6281 }
 0x4b8   : > { %v6283_v39 = vunpack.i.l.bf16 %v6282_v0  ;;  %v6284_v53 = vunpack.i.h.bf16 %v6282_v0 }
 0x4ba   : > { %v7673_v58 = vsel %vm1134_vm2, %v2013_v9, %v6283_v39  ;;  %v1953_v9 = vpop.permute.xlu2 %1952 }
 0x4bb   : > { %2215 = vmatpush.msra.mxu1 %v7673_v58 }
 0x4bd   : > { %2216 = vmatpush.msra.mxu1 %v7677_v2  ;;  %v6302_v34 = vpop.permute.xlu0 %6301 }
 0x4be   : > { %v6304_v10 = vunpack.i.h.bf16 %v6302_v34  ;;  %v6303_v38 = vunpack.i.l.bf16 %v6302_v34 }
 0x4bf   : > { %v7680_v40 = vpop.permute.xlu1 %6291 }
 0x4c0   : > { %v7684_v41 = vsel %vm1034_vm5, %v6303_v38, %v6304_v10  ;;  %v6293_v13 = vunpack.i.l.bf16 %v7680_v40 }
 0x4c1   : > { %9781 = vst [vmem:[#allocation60_spill] sm:$0xff] %v7684_v41  ;;  %2246 = vmatpush.msrb.mxu3 %v7684_v41 }
 0x4c2   : > { %v7694_v34 = vsel %vm1016_vm0, %v1953_v9, %v6293_v13  ;;  %v6307_v38 = vpop.permute.xlu2 %6306 }
 0x4c3   : > { %v6309_v21 = vunpack.i.h.bf16 %v6307_v38  ;;  %v6308_v14 = vunpack.i.l.bf16 %v6307_v38  ;;  %v6289_v38 = vunpack.i.h.bf16 %v7667_v8  ;;  %v6279_v8 = vunpack.i.h.bf16 %v7669_v5 }
 0x4c5   : > { %v6312_v35 = vpop.permute.xlu0 %6311  ;;  %v7706_v36 = vsel %vm1086_vm4, %v6308_v14, %v6309_v21 }
 0x4c6   : > { %v6313_v43 = vunpack.i.l.bf16 %v6312_v35  ;;  %9782 = vst [vmem:[#allocation61_spill] sm:$0xff] %v7706_v36 }
 0x4c7   : > { %v1971_v47 = vpop.permute.xlu1 %1970 }
 0x4c8   : > { %v7690_v30 = vsel %vm1069_vm7, %v1971_v47, %v6278_v12  ;;  %v6314_v47 = vunpack.i.h.bf16 %v6312_v35 }
 0x4c9   : > { %2217 = vmatpush.msra.mxu1 %v7690_v30 }
 0x4ca   : > { %v2081_v35 = vpop.permute.xlu2 %2080 }
 0x4cb   : > { %2218 = vmatpush.msra.mxu1 %v7694_v34 }
 0x4cd   : > { %2219 = vmatpush.msra.mxu1 %v7512_v27  ;;  %v2063_v0 = vpop.permute.xlu0 %2062 }
 0x4cf   : > { %v6297_v41 = vpop.permute.xlu1 %6296  ;;  %2220 = vmatpush.msra.mxu1 %v7516_v29 }
 0x4d0   : > { %v6299_v23 = vunpack.i.h.bf16 %v6297_v41  ;;  %v6298_v15 = vunpack.i.l.bf16 %v6297_v41  ;;  %v7711_v41 = vsel %vm1117_vm3, %v6313_v43, %v6314_v47  ;;  %v7723_v43 = vsel %vm1134_vm2, %v6283_v39, %v6284_v53 }
 0x4d1   : > { %2221 = vmatpush.msra.mxu1 %v7528_v18  ;;  %v6294_v53 = vunpack.i.h.bf16 %v7680_v40  ;;  %v7741_v39 = vsel %vm1086_vm4, %v6309_v21, %v2063_v0  ;;  %v2110_v40 = vld [vmem:[%s6853_s29 + $0x8] sm:$0xff] }
 0x4d2   : > { %v7701_v9 = vsel %vm1215_vm6, %v6298_v15, %v6299_v23 }
 0x4d3   : > { %2222 = vmatpush.msra.mxu1 %v7538_v54  ;;  %2247 = vmatpush.msrb.mxu3 %v7701_v9  ;;  %v7754_v21 = vsel %vm1016_vm0, %v6293_v13, %v6294_v53  ;;  %v9806_v53 = vld [vmem:[#allocation29_spill] sm:$0xff] }
 0x4d5   : > { %2223 = vmatpush.msra.mxu1 %v7440_v56  ;;  %2248 = vmatpush.msrb.mxu3 %v7706_v36  ;;  %v7728_v36 = vsel %vm1215_vm6, %v6299_v23, %v2081_v35  ;;  %v7748_v23 = vsel %vm1069_vm7, %v6278_v12, %v6279_v8  ;;  %v2184_v12 = vld [vmem:[%s9783_s4] sm:$0xff]  ;;  %v9805_v8 = vld [vmem:[#allocation24_spill] sm:$0xff]  ;;  %s9932_s4 = sld [smem:[#allocation12_spill]] }
 0x4d6   : > { %2187 = vperm.xlu2 %6315, %v2184_v12  }
 0x4d7   : > { %v2102_v15 = vpop.permute.xlu1 %2101  ;;  %2224 = vmatpush.msra.mxu1 %v7548_v59  ;;  %2249 = vmatpush.msrb.mxu3 %v7711_v41 }
 0x4d8   : > { %v7717_v14 = vsel %vm1034_vm5, %v6304_v10, %v2102_v15  ;;  %v7733_v10 = vsel %vm1103_vm1, %v6288_v48, %v6289_v38  ;;  %v7736_v15 = vld [vmem:[%s6853_s29 + $0x10] sm:$0xff] }
 0x4d9   : > { %2274 = vmatpush.msra.mxu3 %v7594_v33  ;;  %2225 = vmatpush.msra.mxu1 %v7556_v4 }
 0x4da   : > { %2306 = vmatpush.msra.mxu0 %v7717_v14  ;;  %6074 = vmatmul.msk.f32.vlgmr.msrb.gmra.mxu3 %vm2190_vm10, %v7736_v15 }
 0x4db   : > { %2275 = vmatpush.msra.mxu3 %v7723_v43  ;;  %2226 = vmatpush.msra.mxu1 %v7568_v32 }
 0x4dc   : > { %2307 = vmatpush.msra.mxu0 %v7728_v36 }
 0x4dd   : > { %2276 = vmatpush.msra.mxu3 %v7733_v10  ;;  %2227 = vmatpush.msra.mxu1 %v7572_v6 }
 0x4de   : > { %2308 = vmatpush.msra.mxu0 %v7741_v39  ;;  %2457 = vrot.lane.b32.xlu2 %v7638_v19, %s9622_s28 }
 0x4df   : > { %2277 = vmatpush.msra.mxu3 %v7748_v23  ;;  %v2042_v5 = vpop.permute.xlu1 %2041  ;;  %2228 = vmatpush.msra.mxu1 %v7303_v45 }
 0x4e0   : > { %v7757_v48 = vsel %vm1117_vm3, %v6314_v47, %v2042_v5  ;;  %v9807_v5 = vld [vmem:[#allocation23_spill] sm:$0xff] }
 0x4e1   : > { %2278 = vmatpush.msra.mxu3 %v7754_v21  ;;  %2229 = vmatpush.msra.mxu1 %v7335_v28 }
 0x4e2   : > { %2309 = vmatpush.msra.mxu0 %v7757_v48  ;;  %2230 = vmatmul.f32.vlgmr.msra.gmra.mxu1 %v2110_v40 }
 0x4e3   : > { %2279 = vmatpush.msra.mxu3 %v7504_v51  ;;  %2589 = vmatpush.msrb.mxu1 %v7289_v57  ;;  %v9792_v57 = vld [vmem:[#allocation40_spill] sm:$0xff] }
 0x4e4   : > { %2609 = vmatpush.msrb.mxu0 %v7596_v62  ;;  %v9790_v62 = vld [vmem:[#allocation57_spill] sm:$0xff] }
 0x4e5   : > { %2280 = vmatpush.msra.mxu3 %v7508_v31  ;;  %2590 = vmatpush.msrb.mxu1 %v7300_v44  ;;  %v9793_v44 = vld [vmem:[#allocation41_spill] sm:$0xff] }
 0x4e6   : > { %2610 = vmatpush.msrb.mxu0 %v7673_v58  ;;  %v2487_v58 = vld [vmem:[%s9732_s3 + $0x8] sm:$0xff] }
 0x4e7   : > { %2281 = vmatpush.msra.mxu3 %v7520_v49  ;;  %2591 = vmatpush.msrb.mxu1 %v9771_v17  ;;  %v2486_v17 = vld [vmem:[%s9732_s3] sm:$0xff] }
 0x4e8   : > { %2611 = vmatpush.msrb.mxu0 %v7677_v2  ;;  %v2271_v2 = vpop.f32.mrf.mxu2 }
 0x4e9   : > { %2282 = vmatpush.msra.mxu3 %v7524_v22  ;;  %2592 = vmatpush.msrb.mxu1 %v9772_v7 }
 0x4ea   : > { %2612 = vmatpush.msrb.mxu0 %v7690_v30  ;;  %v7800_v30 = vld [vmem:[%s7018_s23] sm:$0xff] }
 0x4eb   : > { %2283 = vmatpush.msra.mxu3 %v7444_v63  ;;  %2593 = vmatpush.msrb.mxu1 %v7319_v42  ;;  %v9784_v42 = vld [vmem:[#allocation47_spill] sm:$0xff] }
 0x4ec   : > { %2613 = vmatpush.msrb.mxu0 %v7694_v34 }
 0x4ed   : > { %2284 = vmatpush.msra.mxu3 %v7534_v24  ;;  %2594 = vmatpush.msrb.mxu1 %v9773_v52 }
 0x4ee   : > { %2614 = vmatpush.msrb.mxu0 %v7512_v27 }
 0x4ef   : > { %2285 = vmatpush.msra.mxu3 %v7543_v46  ;;  %2595 = vmatpush.msrb.mxu1 %v7330_v61  ;;  %v9795_v61 = vld [vmem:[#allocation43_spill] sm:$0xff] }
 0x4f0   : > { %2615 = vmatpush.msrb.mxu0 %v7516_v29 }
 0x4f1   : > { %2286 = vmatpush.msra.mxu3 %v7551_v60  ;;  %2596 = vmatpush.msrb.mxu1 %v7161_v3  ;;  %v9785_v3 = vld [vmem:[#allocation51_spill] sm:$0xff] }
 0x4f2   : > { %2616 = vmatpush.msrb.mxu0 %v7528_v18 }
 0x4f3   : > { %2287 = vmatpush.msra.mxu3 %v7560_v26  ;;  %2597 = vmatpush.msrb.mxu1 %v7170_v11  ;;  %v9786_v11 = vld [vmem:[#allocation55_spill] sm:$0xff] }
 0x4f4   : > { %2617 = vmatpush.msrb.mxu0 %v7538_v54  ;;  %v9789_v54 = vld [vmem:[#allocation50_spill] sm:$0xff] }
 0x4f5   : > { %2288 = vmatpush.msra.mxu3 %v7357_v55  ;;  %2598 = vmatpush.msrb.mxu1 %v7178_v25  ;;  %v9787_v25 = vld [vmem:[#allocation49_spill] sm:$0xff] }
 0x4f6   : > { %2618 = vmatpush.msrb.mxu0 %v7440_v56  ;;  %v9799_v56 = vld [vmem:[#allocation48_spill] sm:$0xff] }
 0x4f7   : > { %2289 = vmatpush.msra.mxu3 %v7368_v16  ;;  %2599 = vmatpush.msrb.mxu1 %v7186_v37  ;;  %v9788_v37 = vld [vmem:[#allocation56_spill] sm:$0xff] }
 0x4f8   : > { %2619 = vmatpush.msrb.mxu0 %v7548_v59  ;;  %2290 = vmatmul.f32.vlgmr.msra.gmra.mxu3 %v2110_v40  ;;  %v9801_v59 = vld [vmem:[#allocation52_spill] sm:$0xff] }
 0x4f9   : > { %2649 = vmatpush.msrb.mxu3 %v7341_v50  ;;  %2600 = vmatpush.msrb.mxu1 %v7800_v30  ;;  %v9797_v50 = vld [vmem:[#allocation45_spill] sm:$0xff] }
 0x4fa   : > { %2620 = vmatpush.msrb.mxu0 %v7556_v4  ;;  %v9803_v4 = vld [vmem:[#allocation30_spill] sm:$0xff] }
 0x4fb   : > { %2650 = vmatpush.msrb.mxu3 %v7348_v20  ;;  %2601 = vmatpush.msrb.mxu1 %v9784_v42  ;;  %v9798_v20 = vld [vmem:[#allocation46_spill] sm:$0xff] }
 0x4fc   : > { %2621 = vmatpush.msrb.mxu0 %v7568_v32  ;;  %v9804_v32 = vld [vmem:[#allocation38_spill] sm:$0xff] }
 0x4fd   : > { %2651 = vmatpush.msrb.mxu3 %v9785_v3  ;;  %2602 = vmatpush.msrb.mxu1 %v7219_v1  ;;  %v9791_v1 = vld [vmem:[#allocation58_spill] sm:$0xff] }
 0x4fe   : > { %2622 = vmatpush.msrb.mxu0 %v7572_v6 }
 0x4ff   : > { %2652 = vmatpush.msrb.mxu3 %v9786_v11  ;;  %2603 = vmatpush.msrb.mxu1 %v9787_v25  ;;  %v9809_v11 = vld [vmem:[#allocation31_spill] sm:$0xff] }
 0x500   : > { %2623 = vmatpush.msrb.mxu0 %v7303_v45  ;;  %v9794_v45 = vld [vmem:[#allocation42_spill] sm:$0xff] }
 0x501   : > { %6075 = vmatmul.msk.f32.vlgmr.msra.gmra.mxu0 %vm2190_vm10, %v7736_v15  ;;  %2653 = vmatpush.msrb.mxu3 %v9788_v37  ;;  %v9810_v37 = vld [vmem:[#allocation39_spill] sm:$0xff] }
 0x502   : > { %2604 = vmatpush.msrb.mxu1 %v9789_v54  ;;  %2624 = vmatpush.msrb.mxu0 %v7335_v28  ;;  %v9796_v28 = vld [vmem:[#allocation44_spill] sm:$0xff] }
 0x503   : > { %2654 = vmatpush.msrb.mxu3 %v9790_v62  ;;  %2605 = vmatmul.f32.vlgmr.msrb.gmra.mxu1 %v2486_v17 }
 0x504   : > { %2669 = vmatpush.msra.mxu1 %v7594_v33  ;;  %v7831_v33 = vld [vmem:[%s7018_s23 + $0x8] sm:$0xff] }
 0x505   : > { %2655 = vmatpush.msrb.mxu3 %v9791_v1  ;;  %v9811_v1 = vld [vmem:[#allocation22_spill] sm:$0xff] }
 0x506   : > { %2670 = vmatpush.msra.mxu1 %v7723_v43 }
 0x507   : > { %2656 = vmatpush.msrb.mxu3 %v9792_v57 }
 0x508   : > { %2671 = vmatpush.msra.mxu1 %v7733_v10 }
 0x509   : > { %2657 = vmatpush.msrb.mxu3 %v9793_v44  ;;  %2625 = vmatmul.f32.vlgmr.msrb.gmra.mxu0 %v2487_v58  ;;  %v9812_v44 = vld [vmem:[#allocation37_spill] sm:$0xff] }
 0x50a   : > { %2672 = vmatpush.msra.mxu1 %v7748_v23 }
 0x50b   : > { %2658 = vmatpush.msrb.mxu3 %v9794_v45  ;;  %v7893_v45 = vmul.f32 %v9801_v59, %v9812_v44 }
 0x50c   : > { %2673 = vmatpush.msra.mxu1 %v7754_v21  ;;  %v9808_v21 = vld [vmem:[#allocation28_spill] sm:$0xff] }
 0x50d   : > { %2659 = vmatpush.msrb.mxu3 %v9795_v61 }
 0x50e   : > { %2674 = vmatpush.msra.mxu1 %v7504_v51  ;;  %v2211_v51 = vpop.f32.mrf.mxu0 }
 0x50f   : > { %2660 = vmatpush.msrb.mxu3 %v7831_v33 }
 0x510   : > { %2675 = vmatpush.msra.mxu1 %v7508_v31 }
 0x511   : > { %2661 = vmatpush.msrb.mxu3 %v9796_v28 }
 0x512   : > { %2676 = vmatpush.msra.mxu1 %v7520_v49 }
 0x513   : > { %2662 = vmatpush.msrb.mxu3 %v9797_v50  ;;  %v9813_v50 = vld [vmem:[#allocation36_spill] sm:$0xff] }
 0x514   : > { %2677 = vmatpush.msra.mxu1 %v7524_v22 }
 0x515   : > { %2663 = vmatpush.msrb.mxu3 %v9798_v20 }
 0x516   : > { %2678 = vmatpush.msra.mxu1 %v7444_v63 }
 0x517   : > { %2664 = vmatpush.msrb.mxu3 %v9799_v56  ;;  %v9814_v56 = vld [vmem:[#allocation33_spill] sm:$0xff] }
 0x518   : > { %2679 = vmatpush.msra.mxu1 %v7534_v24  ;;  %2665 = vmatmul.f32.vlgmr.msrb.gmra.mxu3 %v2486_v17 }
 0x51a   : > { %2680 = vmatpush.msra.mxu1 %v7543_v46  ;;  %v9800_v46 = vld [vmem:[#allocation32_spill] sm:$0xff] }
 0x51c   : > { %2681 = vmatpush.msra.mxu1 %v7551_v60  ;;  %v7852_v60 = vmul.f32 %v9801_v59, %v9800_v46 }
 0x51e   : > { %2682 = vmatpush.msra.mxu1 %v7560_v26  ;;  %v9802_v26 = vld [vmem:[#allocation34_spill] sm:$0xff] }
 0x520   : > { %2683 = vmatpush.msra.mxu1 %v7357_v55 }
 0x522   : > { %2684 = vmatpush.msra.mxu1 %v7368_v16  ;;  %v7858_v16 = vmul.f32 %v9801_v59, %v9803_v4 }
 0x523   : > { %2685 = vmatmul.f32.vlgmr.msra.gmra.mxu1 %v2487_v58 }
 0x530   : > { %v2188_v31 = vpop.permute.xlu2 %2187 }
 0x531   : > { %v2212_v27 = vadd.f32 %v2211_v51, %v2188_v31  ;;  %v2272_v13 = vadd.f32 %v2271_v2, %v2188_v31  ;;  %v2579_v31 = vld [vmem:[%s6933_s6] sm:$0xff] }
 0x55d   : > { %v2251_v49 = vpop.f32.mrf.mxu3 }
 0x55f   : > { %v2231_v29 = vpop.f32.mrf.mxu1 }
 0x560   : > { %v2232_v63 = vadd.f32 %v2231_v29, %v2212_v27  ;;  %v9815_v27 = vld [vmem:[#allocation35_spill] sm:$0xff] }
 0x562   : > { %v2252_v22 = vadd.f32 %v2251_v49, %v2232_v63  ;;  %v9816_v63 = vld [vmem:[#allocation53_spill] sm:$0xff]  ;;  %v9817_v49 = vld [vmem:[#allocation59_spill] sm:$0xff] }
 0x564   : > { %v2314_v18 = vmul.f32 0.2, %v2252_v22 }
 0x566   : > { %v7848_v24 = vmax.f32 %v2252_v22, %v2314_v18  ;;  %v9818_v22 = vld [vmem:[#allocation54_spill] sm:$0xff]  ;;  %v2479_v18 = vpop.permute.xlu1 %2478 }
 0x568   : > { %v2384_v55 = vmul.f32 %v7848_v24, %v9802_v26  ;;  %v2363_v6 = vmul.f32 %v7848_v24, %v9804_v32  ;;  %v2468_v10 = vmul.f32 %v7848_v24, %v9805_v8  ;;  %v2429_v40 = vmul.f32 %v7848_v24, %v9807_v5 }
 0x569   : > { %v2324_v54 = vmul.f32 %v7848_v24, %v9810_v37  ;;  %v6331_v62 = vpack.i.bf16 %v7848_v24, %v9801_v59  ;;  %v2408_v57 = vmul.f32 %v7848_v24, %v9811_v1 }
 0x56a   : > { %v6316_v7 = vpack.i.bf16 %v2384_v55, %v7852_v60  ;;  %v6321_v52 = vpack.i.bf16 %v2363_v6, %v7858_v16  ;;  %v2458_v55 = vpop.permute.xlu2 %2457  ;;  %v2419_v6 = vpop.permute.xlu0 %2418 }
 0x56b   : > { %v6346_v28 = vpack.i.bf16 %v2324_v54, %v7893_v45 }
 0x56c   : > { %6317 = vrot.lane.b32.xlu0 %v6316_v7, %s9668_s15  ;;  %6322 = vrot.lane.b32.xlu2 %v6321_v52, %s9648_s0 }
 0x56e   : > { %v2440_v17 = vpop.permute.xlu1 %2439 }
 0x57b   : > { %v2291_v34 = vpop.f32.mrf.mxu3 }
 0x57c   : > { %v2292_v47 = vadd.f32 %v2291_v34, %v2272_v13 }
 0x57e   : > { %v2311_v38 = vpop.f32.mrf.mxu0 }
 0x57f   : > { %v2312_v35 = vadd.f32 %v2311_v38, %v2292_v47 }
 0x581   : > { %v2315_v0 = vmul.f32 0.2, %v2312_v35 }
 0x583   : > { %v7868_v43 = vmax.f32 %v2312_v35, %v2315_v0 }
 0x585   : > { %v6326_v15 = vpack.i.bf16 %v7868_v43, %v7848_v24  ;;  %v2469_v23 = vmul.f32 %v7868_v43, %v9806_v53  ;;  %v2430_v12 = vmul.f32 %v7868_v43, %v9808_v21  ;;  %v2409_v25 = vmul.f32 %v7868_v43, %v9809_v11 }
 0x586   : > { %v2364_v20 = vmul.f32 %v7868_v43, %v9813_v50  ;;  %v2385_v51 = vmul.f32 %v7868_v43, %v9814_v56  ;;  %v2325_v29 = vmul.f32 %v7868_v43, %v9815_v27 }
 0x587   : > { %6327 = vrot.lane.b32.xlu1 %v6326_v15, %s9622_s28  ;;  %v6336_v42 = vpack.i.bf16 %v2469_v23, %v2468_v10  ;;  %v6341_v3 = vpack.i.bf16 %v2430_v12, %v2429_v40  ;;  %v6351_v61 = vpack.i.bf16 %v2409_v25, %v2408_v57 }
 0x589   : > { %6337 = vrot.lane.b32.xlu0 %v6336_v42, %s9665_s26  ;;  %6342 = vrot.lane.b32.xlu2 %v6341_v3, %s9663_s18 }
 0x58f   : > { %6332 = vrot.lane.b32.xlu1 %v6331_v62, %s9661_s1 }
 0x591   : > { %6352 = vrot.lane.b32.xlu0 %v6351_v61, %s9670_s16  ;;  %6347 = vrot.lane.b32.xlu2 %v6346_v28, %s9650_s11 }
 0x597   : > { %2372 = vrot.lane.b32.xlu1 %v2364_v20, %s9648_s0 }
 0x599   : > { %2393 = vrot.lane.b32.xlu0 %v2385_v51, %s9668_s15  ;;  %2351 = vrot.lane.b32.xlu2 %v7868_v43, %s9661_s1 }
 0x59f   : > { %2582 = vperm.xlu1 %6193, %v2579_v31  }
 0x5a1   : > { %2333 = vrot.lane.b32.xlu0 %v2325_v29, %s9650_s11  ;;  %2852 = vrot.lane.b32.xlu2 %v7638_v19, %s9622_s28 }
 0x5a7   : > { %2834 = vrot.lane.b32.xlu1 %v9816_v63, %s9663_s18 }
 0x5a9   : > { %2873 = vrot.lane.b32.xlu0 %v9817_v49, %s9665_s26 }
 0x5b1   : > { %2813 = vrot.lane.b32.xlu0 %v9818_v22, %s9670_s16 }
 0x5c6   : > { %v6323_v7 = vpop.permute.xlu2 %6322 }
 0x5c7   : > { %v6325_v31 = vunpack.i.h.bf16 %v6323_v7  ;;  %v6324_v29 = vunpack.i.l.bf16 %v6323_v7 }
 0x5de   : > { %v6318_v52 = vpop.permute.xlu0 %6317 }
 0x5df   : > { %v6320_v61 = vunpack.i.h.bf16 %v6318_v52  ;;  %v6319_v28 = vunpack.i.l.bf16 %v6318_v52 }
 0x5e3   : > { %v6343_v2 = vpop.permute.xlu2 %6342 }
 0x5e4   : > { %v6345_v35 = vunpack.i.h.bf16 %v6343_v2  ;;  %v6344_v0 = vunpack.i.l.bf16 %v6343_v2 }
 0x5e6   : > { %v2441_v42 = vsel %vm1086_vm4, %v6344_v0, %v6345_v35  ;;  %v2442_v3 = vsel %vm1086_vm4, %v6345_v35, %v2440_v17  ;;  %v9820_v0 = vld [vmem:[#allocation61_spill] sm:$0xff] }
 0x5eb   : > { %v6348_v57 = vpop.permute.xlu2 %6347 }
 0x5ec   : > { %v6350_v52 = vunpack.i.h.bf16 %v6348_v57  ;;  %v6349_v2 = vunpack.i.l.bf16 %v6348_v57 }
 0x5f9   : > { %v6328_v58 = vpop.permute.xlu1 %6327 }
 0x5fa   : > { %v6330_v34 = vunpack.i.h.bf16 %v6328_v58  ;;  %v6329_v19 = vunpack.i.l.bf16 %v6328_v58 }
 0x5fb   : > { %v6338_v13 = vpop.permute.xlu0 %6337 }
 0x5fc   : > { %v6340_v47 = vunpack.i.h.bf16 %v6338_v13  ;;  %v6339_v38 = vunpack.i.l.bf16 %v6338_v13  ;;  %v2459_v23 = vsel %vm1215_vm6, %v6329_v19, %v6330_v34  ;;  %v2460_v40 = vsel %vm1215_vm6, %v6330_v34, %v2458_v55 }
 0x5fd   : > { %v2395_v55 = vsel %vm1134_vm2, %v6319_v28, %v6320_v61  ;;  %v2374_v13 = vsel %vm1103_vm1, %v6324_v29, %v6325_v31  ;;  %v2335_v34 = vsel %vm1016_vm0, %v6349_v2, %v6350_v52 }
 0x5fe   : > { %v2480_v10 = vsel %vm1034_vm5, %v6339_v38, %v6340_v47  ;;  %v2481_v15 = vsel %vm1034_vm5, %v6340_v47, %v2479_v18  ;;  %v9819_v38 = vld [vmem:[#allocation60_spill] sm:$0xff] }
 0x5ff   : > { %2632 = vmatpush.msrb.mxu2 %v2480_v10  ;;  %2692 = vmatpush.msra.mxu0 %v2481_v15  ;;  %v2488_v10 = vld [vmem:[%s9732_s3 + $0x10] sm:$0xff]  ;;  %v2666_v15 = vpop.f32.mrf.mxu3  ;;  %s9908_s3 = smov 1  }
 0x601   : > { %2633 = vmatpush.msrb.mxu2 %v2459_v23  ;;  %2693 = vmatpush.msra.mxu0 %v2460_v40  ;;  %v6333_v12 = vpop.permute.xlu1 %6332  ;;  %v2626_v40 = vpop.f32.mrf.mxu0 }
 0x602   : > { %v6335_v49 = vunpack.i.h.bf16 %v6333_v12  ;;  %v6334_v18 = vunpack.i.l.bf16 %v6333_v12 }
 0x603   : > { %v6353_v25 = vpop.permute.xlu0 %6352  ;;  %2634 = vmatpush.msrb.mxu2 %v2441_v42  ;;  %2694 = vmatpush.msra.mxu0 %v2442_v3 }
 0x604   : > { %v6355_v54 = vunpack.i.h.bf16 %v6353_v25  ;;  %v6354_v62 = vunpack.i.l.bf16 %v6353_v25  ;;  %v2353_v7 = vsel %vm1069_vm7, %v6334_v18, %v6335_v49 }
 0x606   : > { %v2420_v20 = vsel %vm1117_vm3, %v6354_v62, %v6355_v54  ;;  %v2421_v51 = vsel %vm1117_vm3, %v6355_v54, %v2419_v6 }
 0x607   : > { %2635 = vmatpush.msrb.mxu2 %v2420_v20  ;;  %2695 = vmatpush.msra.mxu0 %v2421_v51 }
 0x609   : > { %2636 = vmatpush.msrb.mxu2 %v7848_v24  ;;  %2696 = vmatpush.msra.mxu0 %v7868_v43  ;;  %v2373_v17 = vpop.permute.xlu1 %2372  ;;  %v2352_v43 = vpop.permute.xlu2 %2351 }
 0x60a   : > { %v2375_v24 = vsel %vm1103_vm1, %v6325_v31, %v2373_v17  ;;  %v2354_v19 = vsel %vm1069_vm7, %v6335_v49, %v2352_v43 }
 0x60b   : > { %v2394_v58 = vpop.permute.xlu0 %2393  ;;  %2637 = vmatpush.msrb.mxu2 %v2395_v55 }
 0x60c   : > { %v2396_v6 = vsel %vm1134_vm2, %v6320_v61, %v2394_v58 }
 0x60d   : > { %2638 = vmatpush.msrb.mxu2 %v2374_v13  ;;  %2697 = vmatpush.msra.mxu0 %v2396_v6 }
 0x60f   : > { %2639 = vmatpush.msrb.mxu2 %v2353_v7  ;;  %2698 = vmatpush.msra.mxu0 %v2375_v24 }
 0x611   : > { %2640 = vmatpush.msrb.mxu2 %v2335_v34  ;;  %2699 = vmatpush.msra.mxu0 %v2354_v19  ;;  %v2583_v23 = vpop.permute.xlu1 %2582  ;;  %v2900_v34 = vld [vmem:[%s6938_s30] sm:$0xff] }
 0x612   : > { %v2667_v12 = vadd.f32 %v2666_v15, %v2583_v23 }
 0x613   : > { %v2334_v47 = vpop.permute.xlu0 %2333  ;;  %2641 = vmatpush.msrb.mxu2 %v9819_v38 }
 0x614   : > { %v2336_v35 = vsel %vm1016_vm0, %v6350_v52, %v2334_v47  ;;  %v2853_v47 = vpop.permute.xlu2 %2852 }
 0x615   : > { %2642 = vmatpush.msrb.mxu2 %v7701_v9  ;;  %2700 = vmatpush.msra.mxu0 %v2336_v35  ;;  %v2606_v9 = vpop.f32.mrf.mxu1 }
 0x616   : > { %v2607_v42 = vadd.f32 %v2606_v9, %v2583_v23 }
 0x617   : > { %2643 = vmatpush.msrb.mxu2 %v9820_v0  ;;  %2701 = vmatpush.msra.mxu0 %v7717_v14 }
 0x619   : > { %2644 = vmatpush.msrb.mxu2 %v7711_v41  ;;  %2702 = vmatpush.msra.mxu0 %v7728_v36  ;;  %v2627_v41 = vadd.f32 %v2626_v40, %v2607_v42 }
 0x61a   : > { %6076 = vmatmul.msk.f32.vlgmr.msrb.gmra.mxu2 %vm2585_vm11, %v2488_v10 }
 0x61b   : > { %2703 = vmatpush.msra.mxu0 %v7741_v39  ;;  %v2874_v9 = vpop.permute.xlu0 %2873 }
 0x61d   : > { %2704 = vmatpush.msra.mxu0 %v7757_v48  ;;  %v2686_v14 = vpop.f32.mrf.mxu1 }
 0x61e   : > { %6077 = vmatmul.msk.f32.vlgmr.msra.gmra.mxu0 %vm2585_vm11, %v2488_v10  ;;  %v2687_v3 = vadd.f32 %v2686_v14, %v2667_v12 }
 0x623   : > { %v2814_v40 = vpop.permute.xlu0 %2813 }
 0x69b   : > { %v2706_v25 = vpop.f32.mrf.mxu0 }
 0x69c   : > { %v2707_v54 = vadd.f32 %v2706_v25, %v2687_v3 }
 0x69d   : > { %v2646_v36 = vpop.f32.mrf.mxu2 }
 0x69e   : > { %v2710_v62 = vmul.f32 0.2, %v2707_v54  ;;  %v2647_v57 = vadd.f32 %v2646_v36, %v2627_v41 }
 0x6a0   : > { %v7949_v39 = vadd.f32 %v7831_v33, %v2710_v62  ;;  %v2709_v48 = vmul.f32 0.2, %v2647_v57 }
 0x6a2   : > { %9821 = vst [vmem:[#allocation47_spill] sm:$0xff] %v7949_v39  ;;  %v7952_v61 = vadd.f32 %v7800_v30, %v2709_v48  ;;  %v2780_v28 = vmul.f32 %v7949_v39, %v9814_v56  ;;  %v2759_v20 = vmul.f32 %v7949_v39, %v9813_v50  ;;  %v2825_v33 = vmul.f32 %v7949_v39, %v9808_v21 }
 0x6a3   : > { %v2864_v29 = vmul.f32 %v7949_v39, %v9806_v53  ;;  %v2804_v2 = vmul.f32 %v7949_v39, %v9809_v11  ;;  %v2720_v19 = vmul.f32 %v7949_v39, %v9815_v27 }
 0x6a4   : > { %9822 = vst [vmem:[#allocation51_spill] sm:$0xff] %v7952_v61  ;;  %2788 = vrot.lane.b32.xlu2 %v2780_v28, %s9668_s15  ;;  %2767 = vrot.lane.b32.xlu1 %v2759_v20, %s9648_s0  ;;  %v2824_v51 = vmul.f32 %v7952_v61, %v9807_v5  ;;  %v2863_v30 = vmul.f32 %v7952_v61, %v9805_v8 }
 0x6a5   : > { %v6356_v18 = vpack.i.bf16 %v7949_v39, %v7952_v61  ;;  %v2758_v55 = vmul.f32 %v7952_v61, %v9804_v32  ;;  %v2803_v58 = vmul.f32 %v7952_v61, %v9811_v1  ;;  %v2779_v52 = vmul.f32 %v7952_v61, %v9802_v26 }
 0x6a6   : > { %v6366_v31 = vpack.i.bf16 %v2825_v33, %v2824_v51  ;;  %v6361_v49 = vpack.i.bf16 %v2864_v29, %v2863_v30  ;;  %v2719_v7 = vmul.f32 %v7952_v61, %v9810_v37  ;;  %v6376_v24 = vpack.i.bf16 %v7952_v61, %v9801_v59 }
 0x6a7   : > { %v6386_v17 = vpack.i.bf16 %v2758_v55, %v7858_v16  ;;  %v6371_v13 = vpack.i.bf16 %v2804_v2, %v2803_v58  ;;  %v6381_v6 = vpack.i.bf16 %v2779_v52, %v7852_v60 }
 0x6a8   : > { %6367 = vrot.lane.b32.xlu0 %v6366_v31, %s9663_s18  ;;  %v6391_v43 = vpack.i.bf16 %v2719_v7, %v7893_v45 }
 0x6ac   : > { %6362 = vrot.lane.b32.xlu2 %v6361_v49, %s9665_s26  ;;  %6357 = vrot.lane.b32.xlu1 %v6356_v18, %s9622_s28 }
 0x6b0   : > { %6387 = vrot.lane.b32.xlu0 %v6386_v17, %s9648_s0 }
 0x6b4   : > { %6372 = vrot.lane.b32.xlu2 %v6371_v13, %s9670_s16  ;;  %6382 = vrot.lane.b32.xlu1 %v6381_v6, %s9668_s15 }
 0x6b8   : > { %2746 = vrot.lane.b32.xlu0 %v7949_v39, %s9661_s1 }
 0x6bc   : > { %6377 = vrot.lane.b32.xlu2 %v6376_v24, %s9661_s1  ;;  %6392 = vrot.lane.b32.xlu1 %v6391_v43, %s9650_s11 }
 0x6c0   : > { %2903 = vperm.xlu0 %6234, %v2900_v34  }
 0x6c4   : > { %2728 = vrot.lane.b32.xlu2 %v2720_v19, %s9650_s11  ;;  %3074 = vrot.lane.b32.xlu1 %v9816_v63, %s9663_s18  ;;  %v2835_v63 = vpop.permute.xlu1 %2834 }
 0x6c8   : > { %3053 = vrot.lane.b32.xlu0 %v9818_v22, %s9670_s16 }
 0x6fe   : > { %v2789_v38 = vpop.permute.xlu2 %2788 }
 0x706   : > { %v6363_v35 = vpop.permute.xlu2 %6362 }
 0x707   : > { %v6365_v0 = vunpack.i.h.bf16 %v6363_v35  ;;  %v6364_v10 = vunpack.i.l.bf16 %v6363_v35 }
 0x709   : > { %v8004_v15 = vsel %vm1034_vm5, %v6364_v10, %v6365_v0  ;;  %v8007_v23 = vsel %vm1034_vm5, %v6365_v0, %v2874_v9  ;;  %v2881_v0 = vld [vmem:[%s9832_s2] sm:$0xff]  ;;  %s9838_s2 = sld [smem:[#allocation16_spill]] }
 0x70a   : > { %9823 = vst [vmem:[#allocation55_spill] sm:$0xff] %v8007_v23  ;;  %2916 = vmatpush.msra.mxu2 %v8004_v15  ;;  %2936 = vmatpush.msra.mxu3 %v8007_v23 }
 0x70e   : > { %v6373_v14 = vpop.permute.xlu2 %6372 }
 0x70f   : > { %v6375_v36 = vunpack.i.h.bf16 %v6373_v14  ;;  %v6374_v62 = vunpack.i.l.bf16 %v6373_v14 }
 0x711   : > { %v8028_v33 = vsel %vm1117_vm3, %v6374_v62, %v6375_v36  ;;  %v8031_v31 = vsel %vm1117_vm3, %v6375_v36, %v2814_v40 }
 0x712   : > { %9828 = vst [vmem:[#allocation58_spill] sm:$0xff] %v8028_v33 }
 0x713   : > { %9829 = vst [vmem:[#allocation40_spill] sm:$0xff] %v8031_v31 }
 0x716   : > { %v2768_v12 = vpop.permute.xlu1 %2767  ;;  %v6378_v30 = vpop.permute.xlu2 %6377 }
 0x717   : > { %v6380_v58 = vunpack.i.h.bf16 %v6378_v30  ;;  %v6379_v52 = vunpack.i.l.bf16 %v6378_v30 }
 0x719   : > { %v8057_v34 = vsel %vm1069_vm7, %v6379_v52, %v6380_v58 }
 0x71a   : > { %v6368_v22 = vpop.permute.xlu0 %6367 }
 0x71b   : > { %v6370_v3 = vunpack.i.h.bf16 %v6368_v22  ;;  %v6369_v25 = vunpack.i.l.bf16 %v6368_v22 }
 0x71d   : > { %v8020_v20 = vsel %vm1086_vm4, %v6369_v25, %v6370_v3  ;;  %v8023_v51 = vsel %vm1086_vm4, %v6370_v3, %v2835_v63 }
 0x71e   : > { %v6358_v42 = vpop.permute.xlu1 %6357  ;;  %9826 = vst [vmem:[#allocation50_spill] sm:$0xff] %v8020_v20  ;;  %v2729_v35 = vpop.permute.xlu2 %2728 }
 0x71f   : > { %v6360_v41 = vunpack.i.h.bf16 %v6358_v42  ;;  %v6359_v54 = vunpack.i.l.bf16 %v6358_v42  ;;  %9827 = vst [vmem:[#allocation57_spill] sm:$0xff] %v8023_v51 }
 0x721   : > { %v8012_v57 = vsel %vm1215_vm6, %v6359_v54, %v6360_v41  ;;  %v8015_v48 = vsel %vm1215_vm6, %v6360_v41, %v2853_v47 }
 0x722   : > { %9824 = vst [vmem:[#allocation49_spill] sm:$0xff] %v8012_v57  ;;  %2917 = vmatpush.msra.mxu2 %v8012_v57  ;;  %2937 = vmatpush.msra.mxu3 %v8015_v48  ;;  %v6388_v28 = vpop.permute.xlu0 %6387 }
 0x723   : > { %9825 = vst [vmem:[#allocation56_spill] sm:$0xff] %v8015_v48  ;;  %v6390_v49 = vunpack.i.h.bf16 %v6388_v28  ;;  %v6389_v18 = vunpack.i.l.bf16 %v6388_v28 }
 0x724   : > { %2918 = vmatpush.msra.mxu2 %v8020_v20  ;;  %2938 = vmatpush.msra.mxu3 %v8023_v51 }
 0x725   : > { %v8046_v7 = vsel %vm1103_vm1, %v6389_v18, %v6390_v49  ;;  %v8049_v24 = vsel %vm1103_vm1, %v6390_v49, %v2768_v12 }
 0x726   : > { %2919 = vmatpush.msra.mxu2 %v8028_v33  ;;  %2939 = vmatpush.msra.mxu3 %v8031_v31  ;;  %v6383_v29 = vpop.permute.xlu1 %6382  ;;  %9833 = vst [vmem:[#allocation43_spill] sm:$0xff] %v8046_v7 }
 0x727   : > { %v6385_v55 = vunpack.i.h.bf16 %v6383_v29  ;;  %v6384_v17 = vunpack.i.l.bf16 %v6383_v29  ;;  %9834 = vst [vmem:[#allocation44_spill] sm:$0xff] %v8049_v24 }
 0x728   : > { %2920 = vmatpush.msra.mxu2 %v7952_v61  ;;  %2940 = vmatpush.msra.mxu3 %v7949_v39 }
 0x729   : > { %v8038_v2 = vsel %vm1134_vm2, %v6384_v17, %v6385_v55  ;;  %v8041_v13 = vsel %vm1134_vm2, %v6385_v55, %v2789_v38 }
 0x72a   : > { %9830 = vst [vmem:[#allocation41_spill] sm:$0xff] %v8038_v2  ;;  %2921 = vmatpush.msra.mxu2 %v8038_v2  ;;  %2941 = vmatpush.msra.mxu3 %v8041_v13  ;;  %v2747_v6 = vpop.permute.xlu0 %2746 }
 0x72b   : > { %9831 = vst [vmem:[#allocation42_spill] sm:$0xff] %v8041_v13  ;;  %v8054_v43 = vsel %vm1069_vm7, %v6380_v58, %v2747_v6 }
 0x72c   : > { %2922 = vmatpush.msra.mxu2 %v8046_v7  ;;  %2942 = vmatpush.msra.mxu3 %v8049_v24  ;;  %9835 = vst [vmem:[#allocation45_spill] sm:$0xff] %v8054_v43 }
 0x72e   : > { %2923 = vmatpush.msra.mxu2 %v8057_v34  ;;  %2943 = vmatpush.msra.mxu3 %v8054_v43  ;;  %v6393_v19 = vpop.permute.xlu1 %6392 }
 0x72f   : > { %v6395_v47 = vunpack.i.h.bf16 %v6393_v19  ;;  %v6394_v38 = vunpack.i.l.bf16 %v6393_v19  ;;  %v8110_v19 = vld [vmem:[#allocation3 + $0x18] sm:$0xff] }
 0x731   : > { %v8063_v10 = vsel %vm1016_vm0, %v6394_v38, %v6395_v47  ;;  %v8066_v9 = vsel %vm1016_vm0, %v6395_v47, %v2729_v35  ;;  %v9839_v38 = vld [vmem:[#allocation27_spill] sm:$0xff] }
 0x732   : > { %9836 = vst [vmem:[#allocation46_spill] sm:$0xff] %v8066_v9  ;;  %2924 = vmatpush.msra.mxu2 %v8063_v10  ;;  %2944 = vmatpush.msra.mxu3 %v8066_v9  ;;  %v2904_v63 = vpop.permute.xlu0 %2903  ;;  %v8116_v35 = vmul.f32 %v8110_v19, %v9839_v38 }
 0x733   : > { %6078 = vmatmul.msk.f32.vlgmr.msra.gmra.mxu2 %vm1276_vm8, %v2881_v0  ;;  %6079 = vmatmul.msk.f32.vlgmr.msra.gmra.mxu3 %vm1276_vm8, %v2881_v0 }
 0x7b6   : > { %v2926_v40 = vpop.f32.mrf.mxu2  ;;  %v2946_v12 = vpop.f32.mrf.mxu3 }
 0x7b7   : > { %v2927_v22 = vadd.f32 %v2926_v40, %v2904_v63  ;;  %v2947_v14 = vadd.f32 %v2946_v12, %v2904_v63  ;;  %v9840_v40 = vld [vmem:[#allocation25_spill] sm:$0xff] }
 0x7b8   : > { %v8129_v12 = vmul.f32 %v8110_v19, %v9840_v40 }
 0x7b9   : > { %v2949_v42 = vmul.f32 0.2, %v2927_v22  ;;  %v2950_v3 = vmul.f32 0.2, %v2947_v14 }
 0x7bb   : > { %v8072_v25 = vmax.f32 %v2927_v22, %v2949_v42  ;;  %v8074_v41 = vmax.f32 %v2947_v14, %v2950_v3  ;;  %v3159_v22 = vld [vmem:[%s9838_s2] sm:$0xff]  ;;  %s9848_s2 = sld [smem:[#allocation6_spill]] }
 0x7bc   : > { %v9841_v14 = vld [vmem:[#allocation26_spill] sm:$0xff] }
 0x7bd   : > { %9837 = vst [vmem:[#allocation48_spill] sm:$0xff] %v8074_v41  ;;  %v3064_v54 = vmul.f32 %v8072_v25, %v9807_v5  ;;  %v3065_v36 = vmul.f32 %v8074_v41, %v9808_v21  ;;  %v3043_v62 = vmul.f32 %v8072_v25, %v9811_v1  ;;  %v3044_v28 = vmul.f32 %v8074_v41, %v9809_v11 }
 0x7be   : > { %v3019_v30 = vmul.f32 %v8072_v25, %v9802_v26  ;;  %v2998_v55 = vmul.f32 %v8072_v25, %v9804_v32  ;;  %v6401_v58 = vpack.i.bf16 %v8072_v25, %v9801_v59  ;;  %v3020_v52 = vmul.f32 %v8074_v41, %v9814_v56 }
 0x7bf   : > { %v6396_v29 = vpack.i.bf16 %v3065_v36, %v3064_v54  ;;  %v6406_v49 = vpack.i.bf16 %v3044_v28, %v3043_v62  ;;  %v2999_v6 = vmul.f32 %v8074_v41, %v9813_v50  ;;  %v2960_v59 = vmul.f32 %v8074_v41, %v9815_v27  ;;  %v3075_v54 = vpop.permute.xlu1 %3074  ;;  %v3054_v36 = vpop.permute.xlu0 %3053 }
 0x7c0   : > { %v6411_v18 = vpack.i.bf16 %v3019_v30, %v7852_v60  ;;  %v6416_v17 = vpack.i.bf16 %v2998_v55, %v7858_v16  ;;  %v2959_v60 = vmul.f32 %v8072_v25, %v9810_v37  ;;  %v3104_v47 = vmul.f32 %v8074_v41, %v9806_v53 }
 0x7c1   : > { %6397 = vrot.lane.b32.xlu1 %v6396_v29, %s9663_s18  ;;  %6407 = vrot.lane.b32.xlu2 %v6406_v49, %s9670_s16  ;;  %v3103_v0 = vmul.f32 %v8072_v25, %v9805_v8  ;;  %v6431_v63 = vpack.i.bf16 %v8110_v19, %v8074_v41  ;;  %v8141_v42 = vmul.f32 %v8110_v19, %v9841_v14 }
 0x7c2   : > { %6412 = vrot.lane.b32.xlu0 %v6411_v18, %s9668_s15  ;;  %v6421_v16 = vpack.i.bf16 %v2959_v60, %v7893_v45  ;;  %v6426_v45 = vpack.i.bf16 %v8116_v35, %v3104_v47 }
 0x7c9   : > { %6417 = vrot.lane.b32.xlu2 %v6416_v17, %s9648_s0  ;;  %6402 = vrot.lane.b32.xlu1 %v6401_v58, %s9661_s1 }
 0x7ca   : > { %3028 = vrot.lane.b32.xlu0 %v3020_v52, %s9668_s15 }
 0x7d1   : > { %3007 = vrot.lane.b32.xlu1 %v2999_v6, %s9648_s0  ;;  %6422 = vrot.lane.b32.xlu2 %v6421_v16, %s9650_s11 }
 0x7d2   : > { %2968 = vrot.lane.b32.xlu0 %v2960_v59, %s9650_s11 }
 0x7d9   : > { %6427 = vrot.lane.b32.xlu1 %v6426_v45, %s9665_s26  ;;  %2986 = vrot.lane.b32.xlu2 %v8074_v41, %s9661_s1 }
 0x7da   : > { %3109 = vrot.lane.b32.xlu0 %v3103_v0, %s9665_s26 }
 0x7e1   : > { %3088 = vrot.lane.b32.xlu1 %v8072_v25, %s9622_s28  ;;  %6432 = vrot.lane.b32.xlu2 %v6431_v63, %s9622_s28 }
 0x7e2   : > { %3352 = vrot.lane.b32.xlu0 %v8129_v12, %s9670_s16 }
 0x7e9   : > { %3412 = vrot.lane.b32.xlu1 %v8116_v35, %s9665_s26  ;;  %3162 = vperm.xlu2 %6315, %v3159_v22  }
 0x7f1   : > { %3373 = vrot.lane.b32.xlu1 %v8141_v42, %s9663_s18  ;;  %3391 = vrot.lane.b32.xlu2 %v8110_v19, %s9622_s28 }
 0x81b   : > { %v6408_v3 = vpop.permute.xlu2 %6407 }
 0x81c   : > { %v6410_v30 = vunpack.i.h.bf16 %v6408_v3  ;;  %v6409_v29 = vunpack.i.l.bf16 %v6408_v3 }
 0x81e   : > { %v8156_v16 = vsel %vm1117_vm3, %v6409_v29, %v6410_v30  ;;  %v8159_v59 = vsel %vm1117_vm3, %v6410_v30, %v3054_v36 }
 0x81f   : > { %9843 = vst [vmem:[#allocation34_spill] sm:$0xff] %v8159_v59 }
 0x823   : > { %v6418_v62 = vpop.permute.xlu2 %6417 }
 0x824   : > { %v6420_v47 = vunpack.i.h.bf16 %v6418_v62  ;;  %v6419_v45 = vunpack.i.l.bf16 %v6418_v62 }
 0x826   : > { %v8174_v62 = vsel %vm1103_vm1, %v6419_v45, %v6420_v47 }
 0x82b   : > { %v6423_v17 = vpop.permute.xlu2 %6422 }
 0x82c   : > { %v6424_v30 = vunpack.i.l.bf16 %v6423_v17 }
 0x833   : > { %v6398_v28 = vpop.permute.xlu1 %6397  ;;  %v2987_v29 = vpop.permute.xlu2 %2986 }
 0x834   : > { %v6400_v49 = vunpack.i.h.bf16 %v6398_v28  ;;  %v6399_v18 = vunpack.i.l.bf16 %v6398_v28  ;;  %v6413_v55 = vpop.permute.xlu0 %6412  ;;  %v6425_v28 = vunpack.i.h.bf16 %v6423_v17 }
 0x835   : > { %v6415_v60 = vunpack.i.h.bf16 %v6413_v55  ;;  %v6414_v6 = vunpack.i.l.bf16 %v6413_v55 }
 0x836   : > { %v8148_v58 = vsel %vm1086_vm4, %v6399_v18, %v6400_v49  ;;  %v8151_v52 = vsel %vm1086_vm4, %v6400_v49, %v3075_v54  ;;  %v8182_v18 = vsel %vm1016_vm0, %v6424_v30, %v6425_v28 }
 0x837   : > { %9842 = vst [vmem:[#allocation52_spill] sm:$0xff] %v8151_v52  ;;  %3168 = vmatpush.msrb.mxu2 %v8148_v58  ;;  %3208 = vmatpush.msrb.mxu1 %v8151_v52  ;;  %v8166_v54 = vsel %vm1134_vm2, %v6414_v6, %v6415_v60 }
 0x839   : > { %3169 = vmatpush.msrb.mxu2 %v8156_v16  ;;  %3209 = vmatpush.msrb.mxu1 %v8159_v59 }
 0x83b   : > { %3170 = vmatpush.msrb.mxu2 %v8072_v25  ;;  %3210 = vmatpush.msrb.mxu1 %v8074_v41  ;;  %v6403_v0 = vpop.permute.xlu1 %6402 }
 0x83c   : > { %v3029_v63 = vpop.permute.xlu0 %3028  ;;  %v6405_v22 = vunpack.i.h.bf16 %v6403_v0  ;;  %v6404_v3 = vunpack.i.l.bf16 %v6403_v0 }
 0x83d   : > { %v8169_v36 = vsel %vm1134_vm2, %v6415_v60, %v3029_v63  ;;  %3171 = vmatpush.msrb.mxu2 %v8166_v54 }
 0x83e   : > { %9844 = vst [vmem:[#allocation38_spill] sm:$0xff] %v8169_v36  ;;  %3211 = vmatpush.msrb.mxu1 %v8169_v36  ;;  %v8178_v49 = vsel %vm1069_vm7, %v6404_v3, %v6405_v22  ;;  %v8191_v6 = vsel %vm1069_vm7, %v6405_v22, %v2987_v29 }
 0x83f   : > { %3172 = vmatpush.msrb.mxu2 %v8174_v62  ;;  %9846 = vst [vmem:[#allocation29_spill] sm:$0xff] %v8191_v6 }
 0x841   : > { %3173 = vmatpush.msrb.mxu2 %v8178_v49 }
 0x843   : > { %v3008_v55 = vpop.permute.xlu1 %3007  ;;  %3174 = vmatpush.msrb.mxu2 %v8182_v18 }
 0x844   : > { %v2969_v17 = vpop.permute.xlu0 %2968  ;;  %v8186_v60 = vsel %vm1103_vm1, %v6420_v47, %v3008_v55  ;;  %v6433_v47 = vpop.permute.xlu2 %6432 }
 0x845   : > { %9845 = vst [vmem:[#allocation24_spill] sm:$0xff] %v8186_v60  ;;  %3175 = vmatpush.msrb.mxu2 %v8004_v15  ;;  %3212 = vmatpush.msrb.mxu1 %v8186_v60  ;;  %v8196_v45 = vsel %vm1016_vm0, %v6425_v28, %v2969_v17  ;;  %v6435_v3 = vunpack.i.h.bf16 %v6433_v47  ;;  %v6434_v30 = vunpack.i.l.bf16 %v6433_v47  ;;  %v3122_v17 = vld [vmem:[%s9848_s2 + $0x8] sm:$0xff] }
 0x846   : > { %9847 = vst [vmem:[#allocation23_spill] sm:$0xff] %v8196_v45 }
 0x847   : > { %3176 = vmatpush.msrb.mxu2 %v8012_v57  ;;  %3213 = vmatpush.msrb.mxu1 %v8191_v6  ;;  %v8217_v47 = vsel %vm1215_vm6, %v6434_v30, %v6435_v3  ;;  %v3420_v3 = vld [vmem:[%s9849_s22] sm:$0xff] }
 0x849   : > { %3177 = vmatpush.msrb.mxu2 %v8020_v20  ;;  %3214 = vmatpush.msrb.mxu1 %v8196_v45 }
 0x84b   : > { %v6428_v0 = vpop.permute.xlu1 %6427  ;;  %3178 = vmatpush.msrb.mxu2 %v8028_v33  ;;  %3215 = vmatpush.msrb.mxu1 %v8007_v23 }
 0x84c   : > { %v6430_v63 = vunpack.i.h.bf16 %v6428_v0  ;;  %v6429_v22 = vunpack.i.l.bf16 %v6428_v0  ;;  %v3110_v29 = vpop.permute.xlu0 %3109 }
 0x84d   : > { %3179 = vmatpush.msrb.mxu2 %v7952_v61  ;;  %3216 = vmatpush.msrb.mxu1 %v8015_v48 }
 0x84e   : > { %v8205_v28 = vsel %vm1034_vm5, %v3110_v29, %v6429_v22  ;;  %v8208_v55 = vsel %vm1034_vm5, %v6429_v22, %v6430_v63  ;;  %v3121_v63 = vld [vmem:[%s9848_s2] sm:$0xff]  ;;  %s9892_s2 = smov 17  }
 0x84f   : > { %3180 = vmatpush.msrb.mxu2 %v8038_v2  ;;  %3202 = vmatpush.msrb.mxu0 %v8205_v28 }
 0x850   : > { %3217 = vmatpush.msrb.mxu1 %v8023_v51  ;;  %3242 = vmatpush.msrb.mxu3 %v8208_v55 }
 0x851   : > { %3181 = vmatpush.msrb.mxu2 %v8046_v7 }
 0x852   : > { %3218 = vmatpush.msrb.mxu1 %v8031_v31  ;;  %3243 = vmatpush.msrb.mxu3 %v8217_v47 }
 0x853   : > { %v3089_v0 = vpop.permute.xlu1 %3088  ;;  %3182 = vmatpush.msrb.mxu2 %v8057_v34  ;;  %6081 = vmatmul.msk.f32.vlgmr.msrb.gmra.mxu3 %vm1069_vm7, %v3122_v17 }
 0x854   : > { %v8225_v22 = vsel %vm1215_vm6, %v3089_v0, %v6434_v30  ;;  %3219 = vmatpush.msrb.mxu1 %v7949_v39  ;;  %v3163_v30 = vpop.permute.xlu2 %3162 }
 0x855   : > { %3183 = vmatpush.msrb.mxu2 %v8063_v10  ;;  %3203 = vmatpush.msrb.mxu0 %v8225_v22 }
 0x856   : > { %3220 = vmatpush.msrb.mxu1 %v8041_v13  ;;  %3184 = vmatmul.f32.vlgmr.msrb.gmra.mxu2 %v3121_v63 }
 0x857   : > { %3485 = vmatpush.msra.mxu0 %v8148_v58  ;;  %3525 = vmatpush.msra.mxu2 %v8151_v52 }
 0x858   : > { %3221 = vmatpush.msrb.mxu1 %v8049_v24  ;;  %6080 = vmatmul.msk.f32.vlgmr.msrb.gmra.mxu0 %vm1069_vm7, %v3122_v17 }
 0x859   : > { %3486 = vmatpush.msra.mxu0 %v8156_v16  ;;  %3526 = vmatpush.msra.mxu2 %v8159_v59 }
 0x85a   : > { %3222 = vmatpush.msrb.mxu1 %v8054_v43 }
 0x85b   : > { %3487 = vmatpush.msra.mxu0 %v8072_v25  ;;  %3527 = vmatpush.msra.mxu2 %v8074_v41 }
 0x85c   : > { %3223 = vmatpush.msrb.mxu1 %v8066_v9 }
 0x85d   : > { %3224 = vmatmul.f32.vlgmr.msrb.gmra.mxu1 %v3121_v63  ;;  %3488 = vmatpush.msra.mxu0 %v8166_v54 }
 0x85e   : > { %3528 = vmatpush.msra.mxu2 %v8169_v36 }
 0x85f   : > { %3489 = vmatpush.msra.mxu0 %v8174_v62 }
 0x860   : > { %3529 = vmatpush.msra.mxu2 %v8186_v60 }
 0x861   : > { %3490 = vmatpush.msra.mxu0 %v8178_v49 }
 0x862   : > { %3530 = vmatpush.msra.mxu2 %v8191_v6 }
 0x863   : > { %3491 = vmatpush.msra.mxu0 %v8182_v18 }
 0x864   : > { %3531 = vmatpush.msra.mxu2 %v8196_v45 }
 0x865   : > { %3492 = vmatpush.msra.mxu0 %v8004_v15 }
 0x866   : > { %3532 = vmatpush.msra.mxu2 %v8007_v23 }
 0x867   : > { %3493 = vmatpush.msra.mxu0 %v8012_v57 }
 0x868   : > { %3533 = vmatpush.msra.mxu2 %v8015_v48 }
 0x869   : > { %3494 = vmatpush.msra.mxu0 %v8020_v20 }
 0x86a   : > { %3534 = vmatpush.msra.mxu2 %v8023_v51 }
 0x86b   : > { %3495 = vmatpush.msra.mxu0 %v8028_v33 }
 0x86c   : > { %3535 = vmatpush.msra.mxu2 %v8031_v31 }
 0x86d   : > { %3496 = vmatpush.msra.mxu0 %v7952_v61 }
 0x86e   : > { %3536 = vmatpush.msra.mxu2 %v7949_v39 }
 0x86f   : > { %3497 = vmatpush.msra.mxu0 %v8038_v2 }
 0x870   : > { %3537 = vmatpush.msra.mxu2 %v8041_v13 }
 0x871   : > { %3498 = vmatpush.msra.mxu0 %v8046_v7 }
 0x872   : > { %3538 = vmatpush.msra.mxu2 %v8049_v24 }
 0x873   : > { %3499 = vmatpush.msra.mxu0 %v8057_v34 }
 0x874   : > { %3539 = vmatpush.msra.mxu2 %v8054_v43 }
 0x875   : > { %3500 = vmatpush.msra.mxu0 %v8063_v10 }
 0x876   : > { %3540 = vmatpush.msra.mxu2 %v8066_v9  ;;  %3501 = vmatmul.f32.vlgmr.msra.gmra.mxu0 %v3420_v3 }
 0x877   : > { %3541 = vmatmul.f32.vlgmr.msra.gmra.mxu2 %v3420_v3 }
 0x878   : > { %3881 = vmatpush.msrb.mxu2 %v8151_v52 }
 0x87a   : > { %3882 = vmatpush.msrb.mxu2 %v8159_v59 }
 0x87c   : > { %3883 = vmatpush.msrb.mxu2 %v8074_v41 }
 0x87e   : > { %3884 = vmatpush.msrb.mxu2 %v8169_v36 }
 0x880   : > { %3885 = vmatpush.msrb.mxu2 %v8186_v60 }
 0x882   : > { %3886 = vmatpush.msrb.mxu2 %v8191_v6 }
 0x884   : > { %3887 = vmatpush.msrb.mxu2 %v8196_v45 }
 0x886   : > { %3888 = vmatpush.msrb.mxu2 %v8007_v23 }
 0x888   : > { %3889 = vmatpush.msrb.mxu2 %v8015_v48 }
 0x88a   : > { %3890 = vmatpush.msrb.mxu2 %v8023_v51 }
 0x88c   : > { %3891 = vmatpush.msrb.mxu2 %v8031_v31 }
 0x88e   : > { %3892 = vmatpush.msrb.mxu2 %v7949_v39 }
 0x890   : > { %3893 = vmatpush.msrb.mxu2 %v8041_v13 }
 0x892   : > { %3894 = vmatpush.msrb.mxu2 %v8049_v24 }
 0x894   : > { %3895 = vmatpush.msrb.mxu2 %v8054_v43 }
 0x896   : > { %3896 = vmatpush.msrb.mxu2 %v8066_v9 }
 0x8d5   : > { %v3205_v17 = vpop.f32.mrf.mxu0 }
 0x8d6   : > { %v3245_v14 = vpop.f32.mrf.mxu3 }
 0x8d9   : > { %v3185_v29 = vpop.f32.mrf.mxu2 }
 0x8da   : > { %v3186_v0 = vadd.f32 %v3185_v29, %v3163_v30  ;;  %v3225_v63 = vpop.f32.mrf.mxu1 }
 0x8db   : > { %v3226_v38 = vadd.f32 %v3225_v63, %v3163_v30 }
 0x8dc   : > { %v3206_v40 = vadd.f32 %v3205_v17, %v3186_v0  ;;  %v8307_v17 = vld [vmem:[#allocation3] sm:$0xff] }
 0x8dd   : > { %v3246_v39 = vadd.f32 %v3245_v14, %v3226_v38 }
 0x8de   : > { %v3248_v31 = vmul.f32 0.2, %v3206_v40 }
 0x8df   : > { %v3249_v13 = vmul.f32 0.2, %v3246_v39 }
 0x8e0   : > { %v8284_v51 = vmax.f32 %v3206_v40, %v3248_v31 }
 0x8e1   : > { %v8286_v24 = vmax.f32 %v3246_v39, %v3249_v13 }
 0x8e2   : > { %v3402_v9 = vmul.f32 %v8284_v51, %v9805_v8  ;;  %v3363_v3 = vmul.f32 %v8284_v51, %v9807_v5  ;;  %v3342_v13 = vmul.f32 %v8284_v51, %v9811_v1  ;;  %v3297_v14 = vmul.f32 %v8284_v51, %v9804_v32 }
 0x8e3   : > { %9850 = vst [vmem:[#allocation28_spill] sm:$0xff] %v8286_v24  ;;  %v6436_v29 = vpack.i.bf16 %v8286_v24, %v8284_v51  ;;  %v3403_v30 = vmul.f32 %v8286_v24, %v9806_v53  ;;  %v3364_v38 = vmul.f32 %v8286_v24, %v9808_v21  ;;  %v3343_v40 = vmul.f32 %v8286_v24, %v9809_v11 }
 0x8e4   : > { %v6441_v0 = vpack.i.bf16 %v8284_v51, %v8307_v17 }
 0x8e5   : > { %6437 = vrot.lane.b32.xlu1 %v6436_v29, %s9622_s28  ;;  %v6446_v31 = vpack.i.bf16 %v3403_v30, %v3402_v9  ;;  %v6451_v39 = vpack.i.bf16 %v3364_v38, %v3363_v3  ;;  %v8313_v9 = vmul.f32 %v8307_v17, %v9803_v4  ;;  %s9851_s28 = sld [smem:[#allocation17_spill]]  ;;  %v6456_v63 = vpack.i.bf16 %v3343_v40, %v3342_v13 }
 0x8e6   : > { %v3318_v29 = vmul.f32 %v8284_v51, %v9802_v26  ;;  %v3258_v30 = vmul.f32 %v8284_v51, %v9810_v37  ;;  %v3298_v38 = vmul.f32 %v8286_v24, %v9813_v50 }
 0x8e7   : > { %6447 = vrot.lane.b32.xlu0 %v6446_v31, %s9665_s26  ;;  %6452 = vrot.lane.b32.xlu2 %v6451_v39, %s9663_s18  ;;  %v6466_v3 = vpack.i.bf16 %v3297_v14, %v8313_v9  ;;  %v8327_v31 = vmul.f32 %v8307_v17, %v9800_v46  ;;  %v8331_v39 = vmul.f32 %v8307_v17, %v9812_v44 }
 0x8e9   : > { %9852 = vst [vmem:[#allocation31_spill] sm:$0xff] %v8331_v39  ;;  %v6461_v13 = vpack.i.bf16 %v3318_v29, %v8327_v31  ;;  %v6471_v40 = vpack.i.bf16 %v3258_v30, %v8331_v39  ;;  %v3392_v29 = vpop.permute.xlu2 %3391 }
 0x8eb   : > { %v3476_v14 = vld [vmem:[%s9851_s28] sm:$0xff]  ;;  %s9854_s28 = sld [smem:[#allocation8_spill]] }
 0x8ed   : > { %6442 = vrot.lane.b32.xlu1 %v6441_v0, %s9661_s1  ;;  %v3319_v0 = vmul.f32 %v8286_v24, %v9814_v56 }
 0x8ef   : > { %6457 = vrot.lane.b32.xlu0 %v6456_v63, %s9670_s16  ;;  %6467 = vrot.lane.b32.xlu2 %v6466_v3, %s9648_s0  ;;  %v3259_v63 = vmul.f32 %v8286_v24, %v9815_v27  ;;  %v3413_v3 = vpop.permute.xlu1 %3412 }
 0x8f5   : > { %3306 = vrot.lane.b32.xlu1 %v3298_v38, %s9648_s0  ;;  %v3353_v38 = vpop.permute.xlu0 %3352 }
 0x8f7   : > { %6462 = vrot.lane.b32.xlu0 %v6461_v13, %s9668_s15  ;;  %6472 = vrot.lane.b32.xlu2 %v6471_v40, %s9650_s11  ;;  %v3374_v30 = vpop.permute.xlu1 %3373 }
 0x8fd   : > { %3479 = vperm.xlu1 %6193, %v3476_v14  }
 0x8ff   : > { %3327 = vrot.lane.b32.xlu0 %v3319_v0, %s9668_s15  ;;  %3285 = vrot.lane.b32.xlu2 %v8286_v24, %s9661_s1 }
 0x907   : > { %3267 = vrot.lane.b32.xlu0 %v3259_v63, %s9650_s11 }
 0x941   : > { %v6453_v13 = vpop.permute.xlu2 %6452 }
 0x942   : > { %v6455_v0 = vunpack.i.h.bf16 %v6453_v13  ;;  %v6454_v48 = vunpack.i.l.bf16 %v6453_v13 }
 0x957   : > { %v6438_v40 = vpop.permute.xlu1 %6437 }
 0x958   : > { %v6440_v46 = vunpack.i.h.bf16 %v6438_v40  ;;  %v6439_v4 = vunpack.i.l.bf16 %v6438_v40 }
 0x959   : > { %v6448_v14 = vpop.permute.xlu0 %6447 }
 0x95a   : > { %v6450_v44 = vunpack.i.h.bf16 %v6448_v14  ;;  %v6449_v43 = vunpack.i.l.bf16 %v6448_v14  ;;  %v8356_v63 = vsel %vm1215_vm6, %v6439_v4, %v6440_v46  ;;  %v8359_v6 = vsel %vm1215_vm6, %v6440_v46, %v3392_v29 }
 0x95c   : > { %v8348_v23 = vsel %vm1034_vm5, %v6449_v43, %v6450_v44  ;;  %v8351_v45 = vsel %vm1034_vm5, %v6450_v44, %v3413_v3  ;;  %v8364_v43 = vsel %vm1086_vm4, %v6454_v48, %v6455_v0  ;;  %v8367_v44 = vsel %vm1086_vm4, %v6455_v0, %v3374_v30  ;;  %v6468_v3 = vpop.permute.xlu2 %6467 }
 0x95d   : > { %3510 = vmatpush.msra.mxu3 %v8348_v23  ;;  %3550 = vmatpush.msra.mxu1 %v8351_v45  ;;  %v6470_v14 = vunpack.i.h.bf16 %v6468_v3  ;;  %v6469_v0 = vunpack.i.l.bf16 %v6468_v3 }
 0x95f   : > { %3511 = vmatpush.msra.mxu3 %v8356_v63  ;;  %3551 = vmatpush.msra.mxu1 %v8359_v6  ;;  %v6443_v48 = vpop.permute.xlu1 %6442  ;;  %v8386_v52 = vsel %vm1103_vm1, %v6469_v0, %v6470_v14 }
 0x960   : > { %v6444_v41 = vunpack.i.l.bf16 %v6443_v48 }
 0x961   : > { %3512 = vmatpush.msra.mxu3 %v8364_v43  ;;  %3552 = vmatpush.msra.mxu1 %v8367_v44  ;;  %v6458_v4 = vpop.permute.xlu0 %6457 }
 0x962   : > { %v6460_v13 = vunpack.i.h.bf16 %v6458_v4  ;;  %v6459_v40 = vunpack.i.l.bf16 %v6458_v4 }
 0x964   : > { %v8372_v46 = vsel %vm1117_vm3, %v6459_v40, %v6460_v13  ;;  %v8375_v29 = vsel %vm1117_vm3, %v6460_v13, %v3353_v38  ;;  %v6473_v36 = vpop.permute.xlu2 %6472  ;;  %v6445_v40 = vunpack.i.h.bf16 %v6443_v48 }
 0x965   : > { %3513 = vmatpush.msra.mxu3 %v8372_v46  ;;  %3553 = vmatpush.msra.mxu1 %v8375_v29  ;;  %v6475_v13 = vunpack.i.h.bf16 %v6473_v36  ;;  %v6474_v59 = vunpack.i.l.bf16 %v6473_v36 }
 0x966   : > { %v8390_v3 = vsel %vm1069_vm7, %v6444_v41, %v6445_v40  ;;  %v3421_v41 = vld [vmem:[%s9849_s22 + $0x8] sm:$0xff] }
 0x967   : > { %3514 = vmatpush.msra.mxu3 %v8284_v51  ;;  %3554 = vmatpush.msra.mxu1 %v8286_v24  ;;  %9853 = vst [vmem:[#allocation53_spill] sm:$0xff] %v8390_v3  ;;  %v8394_v48 = vsel %vm1016_vm0, %v6474_v59, %v6475_v13 }
 0x969   : > { %v6463_v30 = vpop.permute.xlu0 %6462 }
 0x96a   : > { %v6465_v60 = vunpack.i.h.bf16 %v6463_v30  ;;  %v6464_v4 = vunpack.i.l.bf16 %v6463_v30  ;;  %v3307_v30 = vpop.permute.xlu1 %3306 }
 0x96b   : > { %v8402_v36 = vsel %vm1103_vm1, %v6470_v14, %v3307_v30 }
 0x96c   : > { %v8382_v38 = vsel %vm1134_vm2, %v6464_v4, %v6465_v60  ;;  %v3286_v0 = vpop.permute.xlu2 %3285 }
 0x96d   : > { %3515 = vmatpush.msra.mxu3 %v8382_v38 }
 0x96f   : > { %3516 = vmatpush.msra.mxu3 %v8386_v52 }
 0x971   : > { %v3328_v24 = vpop.permute.xlu0 %3327  ;;  %3517 = vmatpush.msra.mxu3 %v8390_v3  ;;  %v8408_v3 = vsel %vm1069_vm7, %v6445_v40, %v3286_v0  ;;  %v3542_v40 = vpop.f32.mrf.mxu2 }
 0x972   : > { %v8397_v4 = vsel %vm1134_vm2, %v6465_v60, %v3328_v24  ;;  %v3502_v60 = vpop.f32.mrf.mxu0  ;;  %v3480_v14 = vpop.permute.xlu1 %3479 }
 0x973   : > { %3518 = vmatpush.msra.mxu3 %v8394_v48  ;;  %3555 = vmatpush.msra.mxu1 %v8397_v4  ;;  %v3543_v0 = vadd.f32 %v3542_v40, %v3480_v14 }
 0x975   : > { %3519 = vmatpush.msra.mxu3 %v8205_v28  ;;  %3556 = vmatpush.msra.mxu1 %v8402_v36 }
 0x977   : > { %3520 = vmatpush.msra.mxu3 %v8225_v22  ;;  %3557 = vmatpush.msra.mxu1 %v8408_v3 }
 0x978   : > { %6082 = vmatmul.msk.f32.vlgmr.msra.gmra.mxu3 %vm1853_vm9, %v3421_v41 }
 0x979   : > { %3821 = vmatpush.msrb.mxu3 %v8148_v58  ;;  %v3268_v24 = vpop.permute.xlu0 %3267 }
 0x97a   : > { %v8415_v59 = vsel %vm1016_vm0, %v6475_v13, %v3268_v24  ;;  %v3503_v13 = vadd.f32 %v3502_v60, %v3480_v14  ;;  %v3737_v24 = vld [vmem:[%s9854_s28] sm:$0xff] }
 0x97b   : > { %3822 = vmatpush.msrb.mxu3 %v8156_v16  ;;  %3558 = vmatpush.msra.mxu1 %v8415_v59 }
 0x97c   : > { %3897 = vmatmul.f32.vlgmr.msrb.gmra.mxu2 %v3737_v24 }
 0x97d   : > { %3823 = vmatpush.msrb.mxu3 %v8072_v25  ;;  %3559 = vmatpush.msra.mxu1 %v8208_v55 }
 0x97f   : > { %3824 = vmatpush.msrb.mxu3 %v8166_v54  ;;  %3560 = vmatpush.msra.mxu1 %v8217_v47 }
 0x980   : > { %6083 = vmatmul.msk.f32.vlgmr.msra.gmra.mxu1 %vm1853_vm9, %v3421_v41 }
 0x981   : > { %3825 = vmatpush.msrb.mxu3 %v8174_v62 }
 0x983   : > { %3826 = vmatpush.msrb.mxu3 %v8178_v49 }
 0x985   : > { %3827 = vmatpush.msrb.mxu3 %v8182_v18 }
 0x987   : > { %3828 = vmatpush.msrb.mxu3 %v8004_v15 }
 0x989   : > { %3829 = vmatpush.msrb.mxu3 %v8012_v57 }
 0x98b   : > { %3830 = vmatpush.msrb.mxu3 %v8020_v20 }
 0x98d   : > { %3831 = vmatpush.msrb.mxu3 %v8028_v33 }
 0x98f   : > { %3832 = vmatpush.msrb.mxu3 %v7952_v61 }
 0x991   : > { %3833 = vmatpush.msrb.mxu3 %v8038_v2 }
 0x993   : > { %3834 = vmatpush.msrb.mxu3 %v8046_v7 }
 0x995   : > { %3835 = vmatpush.msrb.mxu3 %v8057_v34 }
 0x997   : > { %3836 = vmatpush.msrb.mxu3 %v8063_v10 }
 0x998   : > { %3837 = vmatmul.f32.vlgmr.msrb.gmra.mxu3 %v3737_v24 }
 0x9fb   : > { %v3522_v30 = vpop.f32.mrf.mxu3 }
 0x9fc   : > { %v3523_v41 = vadd.f32 %v3522_v30, %v3503_v13 }
 0x9fd   : > { %v3562_v20 = vpop.f32.mrf.mxu1 }
 0x9fe   : > { %v3565_v61 = vmul.f32 0.2, %v3523_v41  ;;  %v3563_v33 = vadd.f32 %v3562_v20, %v3543_v0 }
 0xa00   : > { %v8437_v2 = vmax.f32 %v3523_v41, %v3565_v61  ;;  %v3566_v7 = vmul.f32 0.2, %v3563_v33 }
 0xa02   : > { %v8439_v57 = vmax.f32 %v3563_v33, %v3566_v7  ;;  %3841 = vmatpush.msrb.mxu0 %v8437_v2  ;;  %v3614_v61 = vmul.f32 %v8437_v2, %v9804_v32  ;;  %v3635_v20 = vmul.f32 %v8437_v2, %v9802_v26  ;;  %v3719_v30 = vmul.f32 %v8437_v2, %v9805_v8 }
 0xa03   : > { %v3575_v0 = vmul.f32 %v8437_v2, %v9810_v37  ;;  %v6476_v24 = vpack.i.bf16 %v8437_v2, %v8307_v17 }
 0xa04   : > { %3901 = vmatpush.msrb.mxu1 %v8439_v57  ;;  %3602 = vrot.lane.b32.xlu1 %v8439_v57, %s9661_s1  ;;  %v3636_v60 = vmul.f32 %v8439_v57, %v9814_v56  ;;  %v3615_v14 = vmul.f32 %v8439_v57, %v9813_v50  ;;  %v6486_v33 = vpack.i.bf16 %v3614_v61, %v8313_v9 }
 0xa05   : > { %v3576_v7 = vmul.f32 %v8439_v57, %v9815_v27  ;;  %v6481_v40 = vpack.i.bf16 %v3635_v20, %v8327_v31  ;;  %v3720_v13 = vmul.f32 %v8439_v57, %v9806_v53  ;;  %v3659_v61 = vmul.f32 %v8437_v2, %v9811_v1 }
 0xa06   : > { %3644 = vrot.lane.b32.xlu0 %v3636_v60, %s9668_s15  ;;  %3623 = vrot.lane.b32.xlu2 %v3615_v14, %s9648_s0  ;;  %v6491_v60 = vpack.i.bf16 %v3575_v0, %v8331_v39  ;;  %v3660_v14 = vmul.f32 %v8439_v57, %v9809_v11  ;;  %v3681_v20 = vmul.f32 %v8439_v57, %v9808_v21  ;;  %v8494_v0 = vld [vmem:[#allocation3 + $0x18] sm:$0xff] }
 0xa07   : > { %v6501_v41 = vpack.i.bf16 %v3720_v13, %v3719_v30  ;;  %v6496_v13 = vpack.i.bf16 %v8439_v57, %v8437_v2  ;;  %9857 = vst [vmem:[#allocation59_spill] sm:$0xff] %v8494_v0 }
 0xa0c   : > { %6487 = vrot.lane.b32.xlu1 %v6486_v33, %s9648_s0  ;;  %s9855_s0 = sld [smem:[#allocation18_spill]]  ;;  %v6511_v33 = vpack.i.bf16 %v3660_v14, %v3659_v61 }
 0xa0e   : > { %3584 = vrot.lane.b32.xlu0 %v3576_v7, %s9650_s11  ;;  %6482 = vrot.lane.b32.xlu2 %v6481_v40, %s9668_s15  ;;  %v3680_v7 = vmul.f32 %v8437_v2, %v9807_v5 }
 0xa10   : > { %v6506_v40 = vpack.i.bf16 %v3681_v20, %v3680_v7 }
 0xa12   : > { %v3812_v30 = vld [vmem:[%s9855_s0] sm:$0xff]  ;;  %s9884_s0 = sld [smem:[#allocation9_spill]] }
 0xa14   : > { %6502 = vrot.lane.b32.xlu1 %v6501_v41, %s9665_s26 }
 0xa16   : > { %6477 = vrot.lane.b32.xlu0 %v6476_v24, %s9661_s1  ;;  %6492 = vrot.lane.b32.xlu2 %v6491_v60, %s9650_s11  ;;  %s9856_s11 = smov 112  }
 0xa1c   : > { %6512 = vrot.lane.b32.xlu1 %v6511_v33, %s9670_s16 }
 0xa1e   : > { %6507 = vrot.lane.b32.xlu0 %v6506_v40, %s9663_s18  ;;  %6497 = vrot.lane.b32.xlu2 %v6496_v13, %s9856_s11 }
 0xa24   : > { %3690 = vrot.lane.b32.xlu1 %v8141_v42, %s9663_s18 }
 0xa26   : > { %3708 = vrot.lane.b32.xlu0 %v8110_v19, %s9856_s11  ;;  %3729 = vrot.lane.b32.xlu2 %v8116_v35, %s9665_s26 }
 0xa2c   : > { %4084 = vrot.lane.b32.xlu1 %v8494_v0, %s9856_s11 }
 0xa2e   : > { %3815 = vperm.xlu0 %6234, %v3812_v30   ;;  %3669 = vrot.lane.b32.xlu2 %v8129_v12, %s9670_s16 }
 0xa36   : > { %4066 = vrot.lane.b32.xlu0 %v8141_v42, %s9663_s18  ;;  %4105 = vrot.lane.b32.xlu2 %v8116_v35, %s9665_s26 }
 0xa3e   : > { %4045 = vrot.lane.b32.xlu2 %v8129_v12, %s9670_s16 }
 0xa60   : > { %v3624_v19 = vpop.permute.xlu2 %3623 }
 0xa68   : > { %v6483_v41 = vpop.permute.xlu2 %6482 }
 0xa69   : > { %v6485_v24 = vunpack.i.h.bf16 %v6483_v41  ;;  %v6484_v60 = vunpack.i.l.bf16 %v6483_v41 }
 0xa6b   : > { %v8507_v14 = vsel %vm1134_vm2, %v6484_v60, %v6485_v24 }
 0xa6c   : > { %3842 = vmatpush.msrb.mxu0 %v8507_v14 }
 0xa70   : > { %v6493_v42 = vpop.permute.xlu2 %6492 }
 0xa71   : > { %v6495_v39 = vunpack.i.h.bf16 %v6493_v42 }
 0xa76   : > { %v3603_v61 = vpop.permute.xlu1 %3602 }
 0xa78   : > { %v3645_v20 = vpop.permute.xlu0 %3644  ;;  %v6498_v41 = vpop.permute.xlu2 %6497 }
 0xa79   : > { %v8511_v33 = vsel %vm1134_vm2, %v6485_v24, %v3645_v20  ;;  %v6500_v60 = vunpack.i.h.bf16 %v6498_v41  ;;  %v6499_v20 = vunpack.i.l.bf16 %v6498_v41 }
 0xa7a   : > { %3902 = vmatpush.msrb.mxu1 %v8511_v33 }
 0xa7e   : > { %v6488_v35 = vpop.permute.xlu1 %6487 }
 0xa7f   : > { %v6490_v7 = vunpack.i.h.bf16 %v6488_v35  ;;  %v6489_v12 = vunpack.i.l.bf16 %v6488_v35  ;;  %v6494_v35 = vunpack.i.l.bf16 %v6493_v42 }
 0xa80   : > { %v3585_v40 = vpop.permute.xlu0 %3584 }
 0xa81   : > { %v8515_v13 = vsel %vm1103_vm1, %v6489_v12, %v6490_v7  ;;  %v8518_v30 = vsel %vm1103_vm1, %v6490_v7, %v3624_v19  ;;  %v8530_v7 = vsel %vm1215_vm6, %v6499_v20, %v6500_v60  ;;  %v8540_v42 = vsel %vm1016_vm0, %v6495_v39, %v3585_v40 }
 0xa82   : > { %3843 = vmatpush.msrb.mxu0 %v8515_v13  ;;  %3903 = vmatpush.msrb.mxu1 %v8518_v30  ;;  %9858 = vst [vmem:[#allocation54_spill] sm:$0xff] %v8530_v7 }
 0xa86   : > { %v6503_v24 = vpop.permute.xlu1 %6502 }
 0xa87   : > { %v6505_v0 = vunpack.i.h.bf16 %v6503_v24  ;;  %v6504_v27 = vunpack.i.l.bf16 %v6503_v24 }
 0xa88   : > { %v6478_v56 = vpop.permute.xlu0 %6477 }
 0xa89   : > { %v6480_v37 = vunpack.i.h.bf16 %v6478_v56  ;;  %v6479_v50 = vunpack.i.l.bf16 %v6478_v56  ;;  %v8523_v12 = vsel %vm1034_vm5, %v6504_v27, %v6505_v0  ;;  %v3586_v56 = vsel %vm1016_vm0, %v6494_v35, %v6495_v39  ;;  %v3739_v35 = vld [vmem:[%s9854_s28 + $0x10] sm:$0xff] }
 0xa8a   : > { %3873 = vmatpush.msra.mxu3 %v8523_v12 }
 0xa8b   : > { %v8527_v19 = vsel %vm1069_vm7, %v6479_v50, %v6480_v37  ;;  %v8533_v41 = vsel %vm1069_vm7, %v6480_v37, %v3603_v61 }
 0xa8c   : > { %3844 = vmatpush.msrb.mxu0 %v8527_v19  ;;  %3874 = vmatpush.msra.mxu3 %v8530_v7  ;;  %v3730_v7 = vpop.permute.xlu2 %3729 }
 0xa8d   : > { %3904 = vmatpush.msrb.mxu1 %v8533_v41 }
 0xa8e   : > { %v6513_v27 = vpop.permute.xlu1 %6512  ;;  %3845 = vmatpush.msrb.mxu0 %v3586_v56 }
 0xa8f   : > { %3905 = vmatpush.msrb.mxu1 %v8540_v42  ;;  %v6515_v37 = vunpack.i.h.bf16 %v6513_v27  ;;  %v6514_v61 = vunpack.i.l.bf16 %v6513_v27  ;;  %v8560_v27 = vsel %vm1034_vm5, %v6505_v0, %v3730_v7 }
 0xa90   : > { %v6508_v50 = vpop.permute.xlu0 %6507  ;;  %3846 = vmatpush.msrb.mxu0 %v8348_v23 }
 0xa91   : > { %v6510_v24 = vunpack.i.h.bf16 %v6508_v50  ;;  %v6509_v20 = vunpack.i.l.bf16 %v6508_v50  ;;  %3906 = vmatpush.msrb.mxu1 %v8351_v45  ;;  %v8554_v40 = vsel %vm1117_vm3, %v6514_v61, %v6515_v37  ;;  %v9860_v61 = vld [vmem:[#allocation28_spill] sm:$0xff] }
 0xa92   : > { %3847 = vmatpush.msrb.mxu0 %v8356_v63 }
 0xa93   : > { %3907 = vmatpush.msrb.mxu1 %v8359_v6  ;;  %v8548_v39 = vsel %vm1086_vm4, %v6509_v20, %v6510_v24 }
 0xa94   : > { %9859 = vst [vmem:[#allocation60_spill] sm:$0xff] %v8548_v39  ;;  %3848 = vmatpush.msrb.mxu0 %v8364_v43  ;;  %3875 = vmatpush.msra.mxu3 %v8548_v39  ;;  %v3670_v7 = vpop.permute.xlu2 %3669 }
 0xa95   : > { %3908 = vmatpush.msrb.mxu1 %v8367_v44 }
 0xa96   : > { %3849 = vmatpush.msrb.mxu0 %v8372_v46  ;;  %3876 = vmatpush.msra.mxu3 %v8554_v40  ;;  %v3691_v50 = vpop.permute.xlu1 %3690 }
 0xa97   : > { %3909 = vmatpush.msrb.mxu1 %v8375_v29  ;;  %6084 = vmatmul.msk.f32.vlgmr.msra.gmra.mxu3 %vm2190_vm10, %v3739_v35  ;;  %v8574_v0 = vsel %vm1086_vm4, %v6510_v24, %v3691_v50  ;;  %v9883_v24 = vld [vmem:[#allocation46_spill] sm:$0xff] }
 0xa98   : > { %3933 = vmatpush.msrb.mxu3 %v8560_v27  ;;  %v3709_v20 = vpop.permute.xlu0 %3708  ;;  %3850 = vmatpush.msrb.mxu0 %v8284_v51 }
 0xa99   : > { %3910 = vmatpush.msrb.mxu1 %v9860_v61  ;;  %v8568_v39 = vsel %vm1215_vm6, %v6500_v60, %v3709_v20  ;;  %v8580_v60 = vsel %vm1117_vm3, %v6515_v37, %v3670_v7  ;;  %v9861_v20 = vld [vmem:[#allocation53_spill] sm:$0xff]  ;;  %v3738_v37 = vld [vmem:[%s9854_s28 + $0x8] sm:$0xff] }
 0xa9a   : > { %3851 = vmatpush.msrb.mxu0 %v8382_v38  ;;  %3934 = vmatpush.msrb.mxu3 %v8568_v39 }
 0xa9b   : > { %3911 = vmatpush.msrb.mxu1 %v8397_v4 }
 0xa9c   : > { %3852 = vmatpush.msrb.mxu0 %v8386_v52  ;;  %3935 = vmatpush.msrb.mxu3 %v8574_v0 }
 0xa9d   : > { %3912 = vmatpush.msrb.mxu1 %v8402_v36 }
 0xa9e   : > { %3853 = vmatpush.msrb.mxu0 %v9861_v20  ;;  %3936 = vmatpush.msrb.mxu3 %v8580_v60 }
 0xa9f   : > { %3913 = vmatpush.msrb.mxu1 %v8408_v3  ;;  %6085 = vmatmul.msk.f32.vlgmr.msrb.gmra.mxu3 %vm2190_vm10, %v3739_v35 }
 0xaa0   : > { %4235 = vmatpush.msra.mxu3 %v8437_v2  ;;  %3854 = vmatpush.msrb.mxu0 %v8394_v48  ;;  %v9862_v2 = vld [vmem:[#allocation52_spill] sm:$0xff] }
 0xaa1   : > { %3914 = vmatpush.msrb.mxu1 %v8415_v59 }
 0xaa2   : > { %4236 = vmatpush.msra.mxu3 %v8507_v14  ;;  %3855 = vmatpush.msrb.mxu0 %v8205_v28  ;;  %v9863_v14 = vld [vmem:[#allocation34_spill] sm:$0xff] }
 0xaa3   : > { %3915 = vmatpush.msrb.mxu1 %v8208_v55 }
 0xaa4   : > { %4237 = vmatpush.msra.mxu3 %v8515_v13  ;;  %3856 = vmatpush.msrb.mxu0 %v8225_v22  ;;  %v9864_v13 = vld [vmem:[#allocation48_spill] sm:$0xff] }
 0xaa5   : > { %3916 = vmatpush.msrb.mxu1 %v8217_v47  ;;  %3857 = vmatmul.f32.vlgmr.msrb.gmra.mxu0 %v3738_v37 }
 0xaa6   : > { %3917 = vmatmul.f32.vlgmr.msrb.gmra.mxu1 %v3738_v37  ;;  %4215 = vmatpush.msra.mxu0 %v8148_v58  ;;  %v9865_v58 = vld [vmem:[#allocation38_spill] sm:$0xff] }
 0xaa7   : > { %4238 = vmatpush.msra.mxu3 %v8527_v19  ;;  %4275 = vmatpush.msra.mxu1 %v9862_v2  ;;  %v9880_v19 = vld [vmem:[#allocation43_spill] sm:$0xff] }
 0xaa8   : > { %4216 = vmatpush.msra.mxu0 %v8156_v16  ;;  %v9866_v16 = vld [vmem:[#allocation24_spill] sm:$0xff] }
 0xaa9   : > { %4239 = vmatpush.msra.mxu3 %v3586_v56  ;;  %4276 = vmatpush.msra.mxu1 %v9863_v14  ;;  %v9881_v56 = vld [vmem:[#allocation44_spill] sm:$0xff] }
 0xaaa   : > { %4217 = vmatpush.msra.mxu0 %v8072_v25  ;;  %v9867_v25 = vld [vmem:[#allocation29_spill] sm:$0xff] }
 0xaab   : > { %4240 = vmatpush.msra.mxu3 %v8348_v23  ;;  %4277 = vmatpush.msra.mxu1 %v9864_v13  ;;  %v9868_v23 = vld [vmem:[#allocation23_spill] sm:$0xff] }
 0xaac   : > { %4218 = vmatpush.msra.mxu0 %v8166_v54  ;;  %v9869_v54 = vld [vmem:[#allocation55_spill] sm:$0xff] }
 0xaad   : > { %4241 = vmatpush.msra.mxu3 %v8356_v63  ;;  %4278 = vmatpush.msra.mxu1 %v9865_v58  ;;  %v9872_v63 = vld [vmem:[#allocation50_spill] sm:$0xff] }
 0xaae   : > { %4219 = vmatpush.msra.mxu0 %v8174_v62  ;;  %v9870_v62 = vld [vmem:[#allocation49_spill] sm:$0xff] }
 0xaaf   : > { %4242 = vmatpush.msra.mxu3 %v8364_v43  ;;  %4279 = vmatpush.msra.mxu1 %v9866_v16  ;;  %v9876_v43 = vld [vmem:[#allocation51_spill] sm:$0xff] }
 0xab0   : > { %4220 = vmatpush.msra.mxu0 %v8178_v49  ;;  %v9871_v49 = vld [vmem:[#allocation56_spill] sm:$0xff] }
 0xab1   : > { %4243 = vmatpush.msra.mxu3 %v8372_v46  ;;  %4280 = vmatpush.msra.mxu1 %v9867_v25  ;;  %v9877_v46 = vld [vmem:[#allocation47_spill] sm:$0xff] }
 0xab2   : > { %4221 = vmatpush.msra.mxu0 %v8182_v18  ;;  %v9873_v18 = vld [vmem:[#allocation57_spill] sm:$0xff] }
 0xab3   : > { %4244 = vmatpush.msra.mxu3 %v8284_v51  ;;  %4281 = vmatpush.msra.mxu1 %v9868_v23  ;;  %v9874_v51 = vld [vmem:[#allocation58_spill] sm:$0xff] }
 0xab4   : > { %4222 = vmatpush.msra.mxu0 %v8004_v15  ;;  %v9875_v15 = vld [vmem:[#allocation40_spill] sm:$0xff] }
 0xab5   : > { %4245 = vmatpush.msra.mxu3 %v8382_v38  ;;  %4282 = vmatpush.msra.mxu1 %v9869_v54  ;;  %v9879_v38 = vld [vmem:[#allocation42_spill] sm:$0xff] }
 0xab6   : > { %4223 = vmatpush.msra.mxu0 %v9870_v62 }
 0xab7   : > { %4246 = vmatpush.msra.mxu3 %v8386_v52  ;;  %4283 = vmatpush.msra.mxu1 %v9871_v49  ;;  %v9878_v52 = vld [vmem:[#allocation41_spill] sm:$0xff]  ;;  %v9887_v49 = vld [vmem:[#allocation36_spill] sm:$0xff] }
 0xab8   : > { %4224 = vmatpush.msra.mxu0 %v9872_v63 }
 0xab9   : > { %4247 = vmatpush.msra.mxu3 %v9861_v20  ;;  %4284 = vmatpush.msra.mxu1 %v9873_v18  ;;  %v9889_v18 = vld [vmem:[#allocation39_spill] sm:$0xff] }
 0xaba   : > { %4225 = vmatpush.msra.mxu0 %v9874_v51 }
 0xabb   : > { %4248 = vmatpush.msra.mxu3 %v8394_v48  ;;  %4285 = vmatpush.msra.mxu1 %v9875_v15  ;;  %v9882_v48 = vld [vmem:[#allocation45_spill] sm:$0xff] }
 0xabc   : > { %4226 = vmatpush.msra.mxu0 %v9876_v43  ;;  %v9890_v15 = vld [vmem:[#allocation33_spill] sm:$0xff] }
 0xabd   : > { %4249 = vmatpush.msra.mxu3 %v8205_v28  ;;  %4286 = vmatpush.msra.mxu1 %v9877_v46  ;;  %v3898_v28 = vpop.f32.mrf.mxu2 }
 0xabe   : > { %4227 = vmatpush.msra.mxu0 %v9878_v52 }
 0xabf   : > { %4250 = vmatpush.msra.mxu3 %v8225_v22  ;;  %4287 = vmatpush.msra.mxu1 %v9879_v38  ;;  %v9891_v38 = vld [vmem:[#allocation31_spill] sm:$0xff] }
 0xac0   : > { %4228 = vmatpush.msra.mxu0 %v9880_v19 }
 0xac1   : > { %4288 = vmatpush.msra.mxu1 %v9881_v56 }
 0xac2   : > { %4229 = vmatpush.msra.mxu0 %v8057_v34  ;;  %v4114_v34 = vld [vmem:[%s9884_s0 + $0x8] sm:$0xff] }
 0xac3   : > { %4289 = vmatpush.msra.mxu1 %v9882_v48  ;;  %4251 = vmatmul.f32.vlgmr.msra.gmra.mxu3 %v4114_v34  ;;  %v9893_v48 = vld [vmem:[#allocation35_spill] sm:$0xff] }
 0xac4   : > { %4230 = vmatpush.msra.mxu0 %v8063_v10  ;;  %v3838_v10 = vpop.f32.mrf.mxu3 }
 0xac5   : > { %4290 = vmatpush.msra.mxu1 %v9883_v24 }
 0xac6   : > { %4295 = vmatpush.msrb.mxu0 %v8439_v57  ;;  %v4113_v57 = vld [vmem:[%s9884_s0] sm:$0xff] }
 0xac7   : > { %4231 = vmatmul.f32.vlgmr.msra.gmra.mxu0 %v4113_v57  ;;  %4291 = vmatmul.f32.vlgmr.msra.gmra.mxu1 %v4113_v57  ;;  %v9894_v57 = vld [vmem:[#allocation25_spill] sm:$0xff] }
 0xac8   : > { %4296 = vmatpush.msrb.mxu0 %v8511_v33 }
 0xaca   : > { %4297 = vmatpush.msrb.mxu0 %v8518_v30 }
 0xacc   : > { %4298 = vmatpush.msrb.mxu0 %v8533_v41 }
 0xace   : > { %4299 = vmatpush.msrb.mxu0 %v8540_v42 }
 0xad0   : > { %4300 = vmatpush.msrb.mxu0 %v8351_v45  ;;  %v3816_v45 = vpop.permute.xlu0 %3815 }
 0xad1   : > { %v3839_v22 = vadd.f32 %v3838_v10, %v3816_v45 }
 0xad2   : > { %4301 = vmatpush.msrb.mxu0 %v8359_v6 }
 0xad4   : > { %4302 = vmatpush.msrb.mxu0 %v8367_v44  ;;  %v3899_v44 = vadd.f32 %v3898_v28, %v3816_v45  ;;  %v9898_v28 = vld [vmem:[#allocation26_spill] sm:$0xff] }
 0xad6   : > { %4303 = vmatpush.msrb.mxu0 %v8375_v29 }
 0xad8   : > { %4304 = vmatpush.msrb.mxu0 %v9860_v61 }
 0xada   : > { %4305 = vmatpush.msrb.mxu0 %v8397_v4 }
 0xadc   : > { %4306 = vmatpush.msrb.mxu0 %v8402_v36 }
 0xade   : > { %4307 = vmatpush.msrb.mxu0 %v8408_v3 }
 0xae0   : > { %4308 = vmatpush.msrb.mxu0 %v8415_v59 }
 0xae2   : > { %4309 = vmatpush.msrb.mxu0 %v8208_v55 }
 0xae4   : > { %4310 = vmatpush.msrb.mxu0 %v8217_v47 }
 0xae5   : > { %4311 = vmatmul.f32.vlgmr.msrb.gmra.mxu0 %v4114_v34  ;;  %v9895_v34 = vld [vmem:[#allocation59_spill] sm:$0xff] }
 0xae6   : > { %v8708_v10 = vmul.f32 %v9895_v34, %v9894_v57 }
 0xb1a   : > { %v3878_v6 = vpop.f32.mrf.mxu3 }
 0xb22   : > { %v3858_v29 = vpop.f32.mrf.mxu0  ;;  %v3938_v36 = vpop.f32.mrf.mxu3 }
 0xb23   : > { %v3859_v3 = vadd.f32 %v3858_v29, %v3839_v22  ;;  %v3918_v4 = vpop.f32.mrf.mxu1  ;;  %v8723_v22 = vmul.f32 %v9895_v34, %v9898_v28  ;;  %v4085_v29 = vpop.permute.xlu1 %4084 }
 0xb24   : > { %v3919_v59 = vadd.f32 %v3918_v4, %v3899_v44  ;;  %v4106_v44 = vpop.permute.xlu2 %4105 }
 0xb25   : > { %v3879_v55 = vadd.f32 %v3878_v6, %v3859_v3  ;;  %v9896_v6 = vld [vmem:[#allocation27_spill] sm:$0xff]  ;;  %v4067_v3 = vpop.permute.xlu0 %4066 }
 0xb26   : > { %v3939_v33 = vadd.f32 %v3938_v36, %v3919_v59  ;;  %v8717_v45 = vmul.f32 %v9895_v34, %v9896_v6 }
 0xb27   : > { %v3941_v47 = vmul.f32 0.2, %v3879_v55 }
 0xb28   : > { %v3942_v30 = vmul.f32 0.2, %v3939_v33 }
 0xb29   : > { %v8658_v41 = vmax.f32 %v3879_v55, %v3941_v47 }
 0xb2a   : > { %v8660_v42 = vmax.f32 %v3939_v33, %v3942_v30 }
 0xb2b   : > { %v6521_v35 = vpack.i.bf16 %v8658_v41, %v8307_v17  ;;  %v4056_v50 = vmul.f32 %v8658_v41, %v9807_v5  ;;  %v4095_v37 = vmul.f32 %v8658_v41, %v9805_v8  ;;  %v4011_v14 = vmul.f32 %v8658_v41, %v9802_v26 }
 0xb2c   : > { %v6516_v61 = vpack.i.bf16 %v8660_v42, %v8658_v41  ;;  %v4057_v7 = vmul.f32 %v8660_v42, %v9808_v21  ;;  %v4096_v2 = vmul.f32 %v8660_v42, %v9806_v53  ;;  %v3990_v13 = vmul.f32 %v8658_v41, %v9804_v32  ;;  %v4046_v4 = vpop.permute.xlu2 %4045 }
 0xb2d   : > { %6522 = vrot.lane.b32.xlu1 %v6521_v35, %s9661_s1  ;;  %v6541_v16 = vpack.i.bf16 %v4011_v14, %v8327_v31  ;;  %s9885_s1 = sld [smem:[#allocation19_spill]]  ;;  %v4035_v23 = vmul.f32 %v8658_v41, %v9811_v1  ;;  %v4036_v54 = vmul.f32 %v8660_v42, %v9809_v11  ;;  %v3991_v63 = vmul.f32 %v8660_v42, %v9887_v49 }
 0xb2e   : > { %6517 = vrot.lane.b32.xlu0 %v6516_v61, %s9856_s11  ;;  %v6531_v20 = vpack.i.bf16 %v4057_v7, %v4056_v50  ;;  %v6526_v58 = vpack.i.bf16 %v4096_v2, %v4095_v37  ;;  %v6546_v25 = vpack.i.bf16 %v3990_v13, %v8313_v9  ;;  %v3951_v51 = vmul.f32 %v8658_v41, %v9889_v18 }
 0xb2f   : > { %v6536_v62 = vpack.i.bf16 %v4036_v54, %v4035_v23  ;;  %v4012_v52 = vmul.f32 %v8660_v42, %v9890_v15  ;;  %v3952_v24 = vmul.f32 %v8660_v42, %v9893_v48 }
 0xb30   : > { %6532 = vrot.lane.b32.xlu2 %v6531_v20, %s9663_s18  ;;  %s9886_s18 = smov 15   ;;  %v6551_v19 = vpack.i.bf16 %v3951_v51, %v9891_v38 }
 0xb33   : > { %v4206_v56 = vld [vmem:[%s9885_s1] sm:$0xff]  ;;  %s9897_s1 = smov 111  }
 0xb35   : > { %6527 = vrot.lane.b32.xlu1 %v6526_v58, %s9665_s26  ;;  %s9888_s26 = smov 16  }
 0xb36   : > { %6542 = vrot.lane.b32.xlu0 %v6541_v16, %s9668_s15 }
 0xb38   : > { %6547 = vrot.lane.b32.xlu2 %v6546_v25, %s9886_s18 }
 0xb3d   : > { %6537 = vrot.lane.b32.xlu1 %v6536_v62, %s9670_s16 }
 0xb3e   : > { %3999 = vrot.lane.b32.xlu0 %v3991_v63, %s9886_s18 }
 0xb40   : > { %3978 = vrot.lane.b32.xlu2 %v8660_v42, %s9888_s26 }
 0xb45   : > { %4020 = vrot.lane.b32.xlu1 %v4012_v52, %s9668_s15  ;;  %s9899_s15 = smov 113  }
 0xb46   : > { %6552 = vrot.lane.b32.xlu0 %v6551_v19, %s9892_s2 }
 0xb48   : > { %4209 = vperm.xlu2 %6315, %v4206_v56  }
 0xb4d   : > { %3960 = vrot.lane.b32.xlu1 %v3952_v24, %s9892_s2 }
 0xb4e   : > { %4439 = vrot.lane.b32.xlu0 %v8708_v10, %s9670_s16  ;;  %s9904_s16 = sld [smem:[#allocation20_spill]] }
 0xb50   : > { %4478 = vrot.lane.b32.xlu2 %v9895_v34, %s9856_s11 }
 0xb55   : > { %4499 = vrot.lane.b32.xlu1 %v8717_v45, %s9897_s1 }
 0xb5d   : > { %4460 = vrot.lane.b32.xlu1 %v8723_v22, %s9899_s15 }
 0xb8a   : > { %v6533_v55 = vpop.permute.xlu2 %6532 }
 0xb8b   : > { %v6535_v7 = vunpack.i.h.bf16 %v6533_v55  ;;  %v6534_v20 = vunpack.i.l.bf16 %v6533_v55 }
 0xb8d   : > { %v4068_v58 = vsel %vm1086_vm4, %v6534_v20, %v6535_v7  ;;  %v4069_v16 = vsel %vm1086_vm4, %v6535_v7, %v4067_v3  ;;  %v9900_v20 = vld [vmem:[#allocation54_spill] sm:$0xff] }
 0xb92   : > { %v6548_v63 = vpop.permute.xlu2 %6547 }
 0xb93   : > { %v6550_v56 = vunpack.i.h.bf16 %v6548_v63  ;;  %v6549_v24 = vunpack.i.l.bf16 %v6548_v63 }
 0xb9f   : > { %v6523_v36 = vpop.permute.xlu1 %6522 }
 0xba0   : > { %v6518_v59 = vpop.permute.xlu0 %6517 }
 0xba1   : > { %v6520_v47 = vunpack.i.h.bf16 %v6518_v59  ;;  %v6519_v30 = vunpack.i.l.bf16 %v6518_v59 }
 0xba3   : > { %v4086_v14 = vsel %vm1215_vm6, %v6519_v30, %v6520_v47  ;;  %v4087_v13 = vsel %vm1215_vm6, %v6520_v47, %v4085_v29  ;;  %v6524_v29 = vunpack.i.l.bf16 %v6523_v36 }
 0xba7   : > { %v6528_v33 = vpop.permute.xlu1 %6527 }
 0xba8   : > { %v6543_v35 = vpop.permute.xlu0 %6542  ;;  %v6530_v50 = vunpack.i.h.bf16 %v6528_v33  ;;  %v6529_v61 = vunpack.i.l.bf16 %v6528_v33  ;;  %v4001_v33 = vsel %vm1103_vm1, %v6549_v24, %v6550_v56 }
 0xba9   : > { %v6545_v51 = vunpack.i.h.bf16 %v6543_v35  ;;  %v6544_v52 = vunpack.i.l.bf16 %v6543_v35 }
 0xbaa   : > { %v4107_v37 = vsel %vm1034_vm5, %v6529_v61, %v6530_v50  ;;  %v4108_v2 = vsel %vm1034_vm5, %v6530_v50, %v4106_v44  ;;  %v6525_v44 = vunpack.i.h.bf16 %v6523_v36 }
 0xbab   : > { %4258 = vmatpush.msra.mxu2 %v4107_v37  ;;  %4318 = vmatpush.msrb.mxu3 %v4108_v2  ;;  %v4022_v3 = vsel %vm1134_vm2, %v6544_v52, %v6545_v51  ;;  %v9901_v37 = vld [vmem:[#allocation60_spill] sm:$0xff] }
 0xbac   : > { %v3980_v35 = vsel %vm1069_vm7, %v6524_v29, %v6525_v44  ;;  %v4115_v2 = vld [vmem:[%s9884_s0 + $0x10] sm:$0xff]  ;;  %s9905_s0 = smov 127  }
 0xbad   : > { %4259 = vmatpush.msra.mxu2 %v4086_v14  ;;  %4319 = vmatpush.msrb.mxu3 %v4087_v13 }
 0xbaf   : > { %v6538_v25 = vpop.permute.xlu1 %6537  ;;  %4260 = vmatpush.msra.mxu2 %v4068_v58  ;;  %4320 = vmatpush.msrb.mxu3 %v4069_v16  ;;  %v4292_v58 = vpop.f32.mrf.mxu1 }
 0xbb0   : > { %v4000_v23 = vpop.permute.xlu0 %3999  ;;  %v6540_v54 = vunpack.i.h.bf16 %v6538_v25  ;;  %v6539_v62 = vunpack.i.l.bf16 %v6538_v25  ;;  %v4252_v16 = vpop.f32.mrf.mxu3 }
 0xbb2   : > { %v4047_v38 = vsel %vm1117_vm3, %v6539_v62, %v6540_v54  ;;  %v4048_v19 = vsel %vm1117_vm3, %v6540_v54, %v4046_v4 }
 0xbb3   : > { %4261 = vmatpush.msra.mxu2 %v4047_v38  ;;  %4321 = vmatpush.msrb.mxu3 %v4048_v19 }
 0xbb5   : > { %4262 = vmatpush.msra.mxu2 %v8658_v41  ;;  %4322 = vmatpush.msrb.mxu3 %v8660_v42  ;;  %v4002_v41 = vsel %vm1103_vm1, %v6550_v56, %v4000_v23  ;;  %v3979_v42 = vpop.permute.xlu2 %3978 }
 0xbb6   : > { %v3981_v50 = vsel %vm1069_vm7, %v6525_v44, %v3979_v42 }
 0xbb7   : > { %v4021_v59 = vpop.permute.xlu1 %4020  ;;  %4263 = vmatpush.msra.mxu2 %v4022_v3 }
 0xbb8   : > { %v6553_v55 = vpop.permute.xlu0 %6552  ;;  %v4023_v47 = vsel %vm1134_vm2, %v6545_v51, %v4021_v59 }
 0xbb9   : > { %v6555_v4 = vunpack.i.h.bf16 %v6553_v55  ;;  %v6554_v30 = vunpack.i.l.bf16 %v6553_v55  ;;  %4264 = vmatpush.msra.mxu2 %v4001_v33  ;;  %4323 = vmatpush.msrb.mxu3 %v4023_v47 }
 0xbbb   : > { %4265 = vmatpush.msra.mxu2 %v3980_v35  ;;  %4324 = vmatpush.msrb.mxu3 %v4002_v41  ;;  %v3962_v36 = vsel %vm1016_vm0, %v6554_v30, %v6555_v4  ;;  %v8793_v35 = vld [vmem:[#allocation3] sm:$0xff]  ;;  %v9906_v41 = vld [vmem:[#allocation37_spill] sm:$0xff] }
 0xbbc   : > { %v8797_v42 = vmul.f32 %v8793_v35, %v9906_v41 }
 0xbbd   : > { %4266 = vmatpush.msra.mxu2 %v3962_v36  ;;  %4325 = vmatpush.msrb.mxu3 %v3981_v50  ;;  %v4210_v14 = vpop.permute.xlu2 %4209 }
 0xbbe   : > { %v4293_v25 = vadd.f32 %v4292_v58, %v4210_v14  ;;  %9907 = vst [vmem:[#allocation53_spill] sm:$0xff] %v8797_v42 }
 0xbbf   : > { %v3961_v61 = vpop.permute.xlu1 %3960  ;;  %4267 = vmatpush.msra.mxu2 %v8523_v12  ;;  %v4232_v12 = vpop.f32.mrf.mxu0 }
 0xbc0   : > { %v3963_v7 = vsel %vm1016_vm0, %v6555_v4, %v3961_v61  ;;  %v4233_v13 = vadd.f32 %v4232_v12, %v4210_v14  ;;  %v4526_v61 = vld [vmem:[%s9904_s16] sm:$0xff]  ;;  %v4440_v14 = vpop.permute.xlu0 %4439  ;;  %s9914_s16 = sld [smem:[#allocation10_spill]] }
 0xbc1   : > { %4268 = vmatpush.msra.mxu2 %v9900_v20  ;;  %4326 = vmatpush.msrb.mxu3 %v3963_v7 }
 0xbc3   : > { %4269 = vmatpush.msra.mxu2 %v9901_v37  ;;  %4327 = vmatpush.msrb.mxu3 %v8560_v27  ;;  %v4253_v27 = vadd.f32 %v4252_v16, %v4233_v13 }
 0xbc5   : > { %4270 = vmatpush.msra.mxu2 %v8554_v40  ;;  %4328 = vmatpush.msrb.mxu3 %v8568_v39 }
 0xbc6   : > { %6086 = vmatmul.msk.f32.vlgmr.msra.gmra.mxu2 %vm2585_vm11, %v4115_v2 }
 0xbc7   : > { %4329 = vmatpush.msrb.mxu3 %v8574_v0  ;;  %v4312_v23 = vpop.f32.mrf.mxu0  ;;  %v4500_v37 = vpop.permute.xlu1 %4499 }
 0xbc8   : > { %v4313_v62 = vadd.f32 %v4312_v23, %v4293_v25 }
 0xbc9   : > { %4330 = vmatpush.msrb.mxu3 %v8580_v60 }
 0xbca   : > { %6087 = vmatmul.msk.f32.vlgmr.msrb.gmra.mxu3 %vm2585_vm11, %v4115_v2  ;;  %v4479_v2 = vpop.permute.xlu2 %4478 }
 0xbcf   : > { %v4461_v12 = vpop.permute.xlu1 %4460 }
 0xc49   : > { %v4272_v54 = vpop.f32.mrf.mxu2 }
 0xc4a   : > { %v4273_v40 = vadd.f32 %v4272_v54, %v4253_v27 }
 0xc4c   : > { %v4335_v39 = vmul.f32 0.2, %v4273_v40 }
 0xc4d   : > { %v4332_v63 = vpop.f32.mrf.mxu3 }
 0xc4e   : > { %v4333_v51 = vadd.f32 %v4332_v63, %v4313_v62  ;;  %v8757_v0 = vadd.f32 %v4335_v39, %v9876_v43 }
 0xc50   : > { %9902 = vst [vmem:[#allocation61_spill] sm:$0xff] %v8757_v0  ;;  %v4336_v60 = vmul.f32 0.2, %v4333_v51  ;;  %v4489_v38 = vmul.f32 %v8757_v0, %v9805_v8  ;;  %v4450_v24 = vmul.f32 %v8757_v0, %v9807_v5  ;;  %v4384_v3 = vmul.f32 %v8757_v0, %v9804_v32 }
 0xc51   : > { %v6561_v59 = vpack.i.bf16 %v8757_v0, %v8307_v17  ;;  %v4429_v55 = vmul.f32 %v8757_v0, %v9811_v1  ;;  %v4405_v4 = vmul.f32 %v8757_v0, %v9802_v26  ;;  %v4345_v30 = vmul.f32 %v8757_v0, %v9889_v18 }
 0xc52   : > { %v8760_v52 = vadd.f32 %v4336_v60, %v9877_v46  ;;  %v6586_v47 = vpack.i.bf16 %v4384_v3, %v8313_v9 }
 0xc53   : > { %v6581_v36 = vpack.i.bf16 %v4405_v4, %v8327_v31  ;;  %v6591_v50 = vpack.i.bf16 %v4345_v30, %v8797_v42 }
 0xc54   : > { %9903 = vst [vmem:[#allocation28_spill] sm:$0xff] %v8760_v52  ;;  %v6556_v19 = vpack.i.bf16 %v8760_v52, %v8757_v0  ;;  %v4490_v56 = vmul.f32 %v8760_v52, %v9806_v53  ;;  %v4451_v43 = vmul.f32 %v8760_v52, %v9808_v21  ;;  %v4430_v29 = vmul.f32 %v8760_v52, %v9809_v11 }
 0xc55   : > { %v4385_v17 = vmul.f32 %v8760_v52, %v9887_v49  ;;  %v4406_v7 = vmul.f32 %v8760_v52, %v9890_v15  ;;  %v4346_v20 = vmul.f32 %v8760_v52, %v9893_v48 }
 0xc56   : > { %6557 = vrot.lane.b32.xlu1 %v6556_v19, %s9856_s11  ;;  %v6566_v44 = vpack.i.bf16 %v4490_v56, %v4489_v38  ;;  %v6571_v46 = vpack.i.bf16 %v4451_v43, %v4450_v24  ;;  %v6576_v33 = vpack.i.bf16 %v4430_v29, %v4429_v55 }
 0xc58   : > { %6567 = vrot.lane.b32.xlu0 %v6566_v44, %s9897_s1  ;;  %6572 = vrot.lane.b32.xlu2 %v6571_v46, %s9899_s15 }
 0xc5e   : > { %6562 = vrot.lane.b32.xlu1 %v6561_v59, %s9888_s26 }
 0xc60   : > { %6577 = vrot.lane.b32.xlu0 %v6576_v33, %s9905_s0  ;;  %6587 = vrot.lane.b32.xlu2 %v6586_v47, %s9886_s18 }
 0xc66   : > { %4393 = vrot.lane.b32.xlu1 %v4385_v17, %s9886_s18 }
 0xc68   : > { %6582 = vrot.lane.b32.xlu0 %v6581_v36, %s9908_s3  ;;  %6592 = vrot.lane.b32.xlu2 %v6591_v50, %s9892_s2 }
 0xc6e   : > { %4529 = vperm.xlu1 %6193, %v4526_v61  }
 0xc70   : > { %4414 = vrot.lane.b32.xlu0 %v4406_v7, %s9908_s3  ;;  %4372 = vrot.lane.b32.xlu2 %v8760_v52, %s9888_s26 }
 0xc78   : > { %4354 = vrot.lane.b32.xlu0 %v4346_v20, %s9892_s2 }
 0xcb2   : > { %v6573_v13 = vpop.permute.xlu2 %6572 }
 0xcb3   : > { %v6575_v40 = vunpack.i.h.bf16 %v6573_v13  ;;  %v6574_v62 = vunpack.i.l.bf16 %v6573_v13 }
 0xcb5   : > { %v8830_v38 = vsel %vm1086_vm4, %v6574_v62, %v6575_v40  ;;  %v8833_v19 = vsel %vm1086_vm4, %v6575_v40, %v4461_v12  ;;  %v4507_v12 = vld [vmem:[%s9914_s16] sm:$0xff]  ;;  %s9922_s16 = sld [smem:[#allocation21_spill]] }
 0xcb6   : > { %9911 = vst [vmem:[#allocation48_spill] sm:$0xff] %v8833_v19 }
 0xcba   : > { %v6588_v56 = vpop.permute.xlu2 %6587 }
 0xcbb   : > { %v6590_v55 = vunpack.i.h.bf16 %v6588_v56  ;;  %v6589_v33 = vunpack.i.l.bf16 %v6588_v56 }
 0xcbd   : > { %v8852_v7 = vsel %vm1103_vm1, %v6589_v33, %v6590_v55 }
 0xcbe   : > { %9916 = vst [vmem:[#allocation23_spill] sm:$0xff] %v8852_v7 }
 0xcc2   : > { %v6593_v30 = vpop.permute.xlu2 %6592 }
 0xcc3   : > { %v6595_v50 = vunpack.i.h.bf16 %v6593_v30  ;;  %v6594_v61 = vunpack.i.l.bf16 %v6593_v30 }
 0xcc5   : > { %v8864_v13 = vsel %vm1016_vm0, %v6594_v61, %v6595_v50 }
 0xcc8   : > { %v6558_v58 = vpop.permute.xlu1 %6557 }
 0xcc9   : > { %v6560_v25 = vunpack.i.h.bf16 %v6558_v58  ;;  %v6559_v27 = vunpack.i.l.bf16 %v6558_v58 }
 0xcca   : > { %v6568_v16 = vpop.permute.xlu0 %6567 }
 0xccb   : > { %v6570_v23 = vunpack.i.h.bf16 %v6568_v16  ;;  %v6569_v54 = vunpack.i.l.bf16 %v6568_v16  ;;  %v8822_v51 = vsel %vm1215_vm6, %v6559_v27, %v6560_v25  ;;  %v8825_v60 = vsel %vm1215_vm6, %v6560_v25, %v4479_v2  ;;  %v4373_v16 = vpop.permute.xlu2 %4372 }
 0xccc   : > { %9910 = vst [vmem:[#allocation34_spill] sm:$0xff] %v8825_v60 }
 0xccd   : > { %v8814_v39 = vsel %vm1034_vm5, %v6569_v54, %v6570_v23  ;;  %v8817_v63 = vsel %vm1034_vm5, %v6570_v23, %v4500_v37 }
 0xcce   : > { %9909 = vst [vmem:[#allocation52_spill] sm:$0xff] %v8817_v63  ;;  %4542 = vmatpush.msrb.mxu2 %v8814_v39  ;;  %4562 = vmatpush.msrb.mxu1 %v8817_v63 }
 0xcd0   : > { %4543 = vmatpush.msrb.mxu2 %v8822_v51  ;;  %4563 = vmatpush.msrb.mxu1 %v8825_v60  ;;  %v6563_v3 = vpop.permute.xlu1 %6562 }
 0xcd1   : > { %v6565_v17 = vunpack.i.h.bf16 %v6563_v3  ;;  %v6564_v41 = vunpack.i.l.bf16 %v6563_v3 }
 0xcd2   : > { %4544 = vmatpush.msrb.mxu2 %v8830_v38  ;;  %4564 = vmatpush.msrb.mxu1 %v8833_v19  ;;  %v6578_v24 = vpop.permute.xlu0 %6577 }
 0xcd3   : > { %v6580_v43 = vunpack.i.h.bf16 %v6578_v24  ;;  %v6579_v44 = vunpack.i.l.bf16 %v6578_v24  ;;  %v8856_v20 = vsel %vm1069_vm7, %v6564_v41, %v6565_v17  ;;  %v8874_v25 = vsel %vm1069_vm7, %v6565_v17, %v4373_v16 }
 0xcd4   : > { %9919 = vst [vmem:[#allocation56_spill] sm:$0xff] %v8874_v25 }
 0xcd5   : > { %v8838_v46 = vsel %vm1117_vm3, %v6579_v44, %v6580_v43  ;;  %v8841_v29 = vsel %vm1117_vm3, %v6580_v43, %v4440_v14 }
 0xcd6   : > { %9912 = vst [vmem:[#allocation38_spill] sm:$0xff] %v8838_v46  ;;  %4545 = vmatpush.msrb.mxu2 %v8838_v46  ;;  %4565 = vmatpush.msrb.mxu1 %v8841_v29 }
 0xcd7   : > { %9913 = vst [vmem:[#allocation24_spill] sm:$0xff] %v8841_v29 }
 0xcd8   : > { %4546 = vmatpush.msrb.mxu2 %v8757_v0  ;;  %4566 = vmatpush.msrb.mxu1 %v8760_v52  ;;  %v4394_v37 = vpop.permute.xlu1 %4393 }
 0xcd9   : > { %v8869_v58 = vsel %vm1103_vm1, %v6590_v55, %v4394_v37 }
 0xcda   : > { %v6583_v59 = vpop.permute.xlu0 %6582  ;;  %9918 = vst [vmem:[#allocation49_spill] sm:$0xff] %v8869_v58 }
 0xcdb   : > { %v6585_v47 = vunpack.i.h.bf16 %v6583_v59  ;;  %v6584_v4 = vunpack.i.l.bf16 %v6583_v59 }
 0xcdd   : > { %v8848_v36 = vsel %vm1134_vm2, %v6584_v4, %v6585_v47 }
 0xcde   : > { %9915 = vst [vmem:[#allocation29_spill] sm:$0xff] %v8848_v36  ;;  %4547 = vmatpush.msrb.mxu2 %v8848_v36 }
 0xce0   : > { %4548 = vmatpush.msrb.mxu2 %v8852_v7  ;;  %v4530_v54 = vpop.permute.xlu1 %4529 }
 0xce2   : > { %v4415_v2 = vpop.permute.xlu0 %4414  ;;  %4549 = vmatpush.msrb.mxu2 %v8856_v20 }
 0xce3   : > { %v8861_v14 = vsel %vm1134_vm2, %v6585_v47, %v4415_v2 }
 0xce4   : > { %9917 = vst [vmem:[#allocation55_spill] sm:$0xff] %v8861_v14  ;;  %4550 = vmatpush.msrb.mxu2 %v8864_v13  ;;  %4567 = vmatpush.msrb.mxu1 %v8861_v14 }
 0xce5   : > { %6088 = vmatmul.msk.f32.vlgmr.msrb.gmra.mxu2 %vm1276_vm8, %v4507_v12 }
 0xce6   : > { %4568 = vmatpush.msrb.mxu1 %v8869_v58 }
 0xce8   : > { %4569 = vmatpush.msrb.mxu1 %v8874_v25 }
 0xcea   : > { %v4355_v27 = vpop.permute.xlu0 %4354 }
 0xceb   : > { %v8878_v23 = vsel %vm1016_vm0, %v6595_v50, %v4355_v27 }
 0xcec   : > { %9920 = vst [vmem:[#allocation50_spill] sm:$0xff] %v8878_v23  ;;  %4570 = vmatpush.msrb.mxu1 %v8878_v23 }
 0xced   : > { %6089 = vmatmul.msk.f32.vlgmr.msrb.gmra.mxu1 %vm1276_vm8, %v4507_v12 }
 0xd68   : > { %v4552_v40 = vpop.f32.mrf.mxu2 }
 0xd69   : > { %v4553_v62 = vadd.f32 %v4552_v40, %v4530_v54 }
 0xd6a   : > { %v4572_v56 = vpop.f32.mrf.mxu1 }
 0xd6b   : > { %v4575_v24 = vmul.f32 0.2, %v4553_v62  ;;  %v4573_v43 = vadd.f32 %v4572_v56, %v4530_v54 }
 0xd6d   : > { %v8882_v44 = vmax.f32 %v4553_v62, %v4575_v24  ;;  %v4576_v3 = vmul.f32 0.2, %v4573_v43 }
 0xd6f   : > { %v8884_v59 = vmax.f32 %v4573_v43, %v4576_v3  ;;  %v4645_v55 = vmul.f32 %v8882_v44, %v9802_v26  ;;  %v4690_v33 = vmul.f32 %v8882_v44, %v9807_v5  ;;  %v4669_v30 = vmul.f32 %v8882_v44, %v9811_v1  ;;  %v4785_v3 = vld [vmem:[%s9922_s16] sm:$0xff]  ;;  %s9927_s16 = sld [smem:[#allocation11_spill]] }
 0xd70   : > { %v4585_v61 = vmul.f32 %v8882_v44, %v9889_v18  ;;  %v4624_v37 = vmul.f32 %v8882_v44, %v9804_v32  ;;  %v6606_v16 = vpack.i.bf16 %v8882_v44, %v8793_v35  ;;  %v4729_v24 = vmul.f32 %v8882_v44, %v9805_v8 }
 0xd71   : > { %9921 = vst [vmem:[#allocation57_spill] sm:$0xff] %v8884_v59  ;;  %v6611_v47 = vpack.i.bf16 %v4645_v55, %v8327_v31  ;;  %v4691_v4 = vmul.f32 %v8884_v59, %v9808_v21  ;;  %v4670_v17 = vmul.f32 %v8884_v59, %v9809_v11  ;;  %v4646_v27 = vmul.f32 %v8884_v59, %v9890_v15  ;;  %v8941_v55 = vld [vmem:[#allocation3 + $0x18] sm:$0xff] }
 0xd72   : > { %v6621_v2 = vpack.i.bf16 %v4585_v61, %v8797_v42  ;;  %v6616_v12 = vpack.i.bf16 %v4624_v37, %v8313_v9  ;;  %v4586_v54 = vmul.f32 %v8884_v59, %v9893_v48  ;;  %v4625_v40 = vmul.f32 %v8884_v59, %v9887_v49 }
 0xd73   : > { %6612 = vrot.lane.b32.xlu1 %v6611_v47, %s9908_s3  ;;  %v6596_v41 = vpack.i.bf16 %v4691_v4, %v4690_v33  ;;  %v6601_v50 = vpack.i.bf16 %v4670_v17, %v4669_v30  ;;  %v4730_v62 = vmul.f32 %v8884_v59, %v9806_v53  ;;  %v6626_v56 = vpack.i.bf16 %v8884_v59, %v8882_v44 }
 0xd75   : > { %6597 = vrot.lane.b32.xlu2 %v6596_v41, %s9899_s15  ;;  %6602 = vrot.lane.b32.xlu0 %v6601_v50, %s9905_s0  ;;  %v6631_v43 = vpack.i.bf16 %v4730_v62, %v4729_v24 }
 0xd7b   : > { %6622 = vrot.lane.b32.xlu1 %v6621_v2, %s9892_s2 }
 0xd7d   : > { %6617 = vrot.lane.b32.xlu2 %v6616_v12, %s9886_s18  ;;  %6607 = vrot.lane.b32.xlu0 %v6606_v16, %s9888_s26 }
 0xd83   : > { %4654 = vrot.lane.b32.xlu1 %v4646_v27, %s9908_s3 }
 0xd85   : > { %4700 = vrot.lane.b32.xlu2 %v8723_v22, %s9899_s15  ;;  %4679 = vrot.lane.b32.xlu0 %v8708_v10, %s9905_s0 }
 0xd8b   : > { %4594 = vrot.lane.b32.xlu1 %v4586_v54, %s9892_s2 }
 0xd8d   : > { %4633 = vrot.lane.b32.xlu2 %v4625_v40, %s9886_s18  ;;  %4612 = vrot.lane.b32.xlu0 %v8884_v59, %s9888_s26 }
 0xd93   : > { %6627 = vrot.lane.b32.xlu1 %v6626_v56, %s9856_s11 }
 0xd95   : > { %6632 = vrot.lane.b32.xlu2 %v6631_v43, %s9897_s1  ;;  %4739 = vrot.lane.b32.xlu0 %v8717_v45, %s9897_s1 }
 0xd9b   : > { %4978 = vrot.lane.b32.xlu1 %v8708_v10, %s9905_s0 }
 0xd9d   : > { %4718 = vrot.lane.b32.xlu2 %v9895_v34, %s9856_s11  ;;  %4788 = vperm.xlu0 %6234, %v4785_v3  }
 0xda5   : > { %5038 = vrot.lane.b32.xlu2 %v8717_v45, %s9897_s1  ;;  %5017 = vrot.lane.b32.xlu0 %v8941_v55, %s9856_s11 }
 0xdad   : > { %4999 = vrot.lane.b32.xlu2 %v8723_v22, %s9899_s15 }
 0xdcf   : > { %v6598_v33 = vpop.permute.xlu2 %6597 }
 0xdd0   : > { %v6600_v47 = vunpack.i.h.bf16 %v6598_v33  ;;  %v6599_v4 = vunpack.i.l.bf16 %v6598_v33 }
 0xdd2   : > { %v8950_v10 = vsel %vm1086_vm4, %v6599_v4, %v6600_v47 }
 0xdd3   : > { %4794 = vmatpush.msra.mxu3 %v8950_v10  ;;  %5111 = vmatpush.msra.mxu1 %v8950_v10 }
 0xdd7   : > { %v6618_v34 = vpop.permute.xlu2 %6617 }
 0xdd8   : > { %v6620_v12 = vunpack.i.h.bf16 %v6618_v34  ;;  %v6619_v16 = vunpack.i.l.bf16 %v6618_v34 }
 0xdda   : > { %v8971_v62 = vsel %vm1103_vm1, %v6619_v16, %v6620_v12 }
 0xddf   : > { %v4701_v30 = vpop.permute.xlu2 %4700 }
 0xde0   : > { %v8955_v45 = vsel %vm1086_vm4, %v6600_v47, %v4701_v30 }
 0xde1   : > { %9923 = vst [vmem:[#allocation58_spill] sm:$0xff] %v8955_v45  ;;  %4834 = vmatpush.msra.mxu0 %v8955_v45 }
 0xde5   : > { %v6613_v17 = vpop.permute.xlu1 %6612 }
 0xde6   : > { %v6615_v61 = vunpack.i.h.bf16 %v6613_v17  ;;  %v6614_v37 = vunpack.i.l.bf16 %v6613_v17 }
 0xde7   : > { %v6603_v41 = vpop.permute.xlu0 %6602  ;;  %v4634_v34 = vpop.permute.xlu2 %4633 }
 0xde8   : > { %v6605_v22 = vunpack.i.h.bf16 %v6603_v41  ;;  %v6604_v50 = vunpack.i.l.bf16 %v6603_v41  ;;  %v8966_v54 = vsel %vm1134_vm2, %v6614_v37, %v6615_v61 }
 0xdea   : > { %v8959_v2 = vsel %vm1117_vm3, %v6604_v50, %v6605_v22 }
 0xdeb   : > { %4795 = vmatpush.msra.mxu3 %v8959_v2  ;;  %5112 = vmatpush.msra.mxu1 %v8959_v2 }
 0xded   : > { %4796 = vmatpush.msra.mxu3 %v8882_v44  ;;  %5113 = vmatpush.msra.mxu1 %v8882_v44  ;;  %v6623_v27 = vpop.permute.xlu1 %6622 }
 0xdee   : > { %v6625_v56 = vunpack.i.h.bf16 %v6623_v27  ;;  %v6624_v24 = vunpack.i.l.bf16 %v6623_v27 }
 0xdef   : > { %4797 = vmatpush.msra.mxu3 %v8966_v54  ;;  %5114 = vmatpush.msra.mxu1 %v8966_v54  ;;  %v6608_v40 = vpop.permute.xlu0 %6607 }
 0xdf0   : > { %v6610_v43 = vunpack.i.h.bf16 %v6608_v40  ;;  %v6609_v3 = vunpack.i.l.bf16 %v6608_v40  ;;  %v8981_v47 = vsel %vm1016_vm0, %v6624_v24, %v6625_v56 }
 0xdf1   : > { %4798 = vmatpush.msra.mxu3 %v8971_v62  ;;  %5115 = vmatpush.msra.mxu1 %v8971_v62 }
 0xdf2   : > { %v8976_v33 = vsel %vm1069_vm7, %v6609_v3, %v6610_v43 }
 0xdf3   : > { %4799 = vmatpush.msra.mxu3 %v8976_v33  ;;  %5116 = vmatpush.msra.mxu1 %v8976_v33 }
 0xdf5   : > { %v4655_v4 = vpop.permute.xlu1 %4654  ;;  %4800 = vmatpush.msra.mxu3 %v8981_v47  ;;  %5117 = vmatpush.msra.mxu1 %v8981_v47 }
 0xdf6   : > { %v8996_v41 = vsel %vm1134_vm2, %v6615_v61, %v4655_v4  ;;  %v6633_v61 = vpop.permute.xlu2 %6632 }
 0xdf7   : > { %v4680_v30 = vpop.permute.xlu0 %4679  ;;  %4801 = vmatpush.msra.mxu3 %v8814_v39  ;;  %5118 = vmatpush.msra.mxu1 %v8814_v39  ;;  %9925 = vst [vmem:[#allocation51_spill] sm:$0xff] %v8996_v41  ;;  %v6635_v27 = vunpack.i.h.bf16 %v6633_v61  ;;  %v6634_v40 = vunpack.i.l.bf16 %v6633_v61 }
 0xdf8   : > { %v8988_v17 = vsel %vm1117_vm3, %v6605_v22, %v4680_v30  ;;  %v9002_v22 = vsel %vm1103_vm1, %v6620_v12, %v4634_v34 }
 0xdf9   : > { %9924 = vst [vmem:[#allocation40_spill] sm:$0xff] %v8988_v17  ;;  %4802 = vmatpush.msra.mxu3 %v8822_v51  ;;  %4835 = vmatpush.msra.mxu0 %v8988_v17  ;;  %v9031_v30 = vsel %vm1034_vm5, %v6634_v40, %v6635_v27  ;;  %v5046_v40 = vld [vmem:[%s9932_s4] sm:$0xff] }
 0xdfa   : > { %5119 = vmatpush.msra.mxu1 %v8822_v51  ;;  %9926 = vst [vmem:[#allocation47_spill] sm:$0xff] %v9002_v22 }
 0xdfb   : > { %4803 = vmatpush.msra.mxu3 %v8830_v38  ;;  %4836 = vmatpush.msra.mxu0 %v8884_v59 }
 0xdfc   : > { %5120 = vmatpush.msra.mxu1 %v8830_v38 }
 0xdfd   : > { %4837 = vmatpush.msra.mxu0 %v8996_v41  ;;  %v4595_v50 = vpop.permute.xlu1 %4594  ;;  %4804 = vmatpush.msra.mxu3 %v8838_v46 }
 0xdfe   : > { %5121 = vmatpush.msra.mxu1 %v8838_v46  ;;  %v9014_v12 = vsel %vm1016_vm0, %v6625_v56, %v4595_v50 }
 0xdff   : > { %v4613_v37 = vpop.permute.xlu0 %4612  ;;  %4805 = vmatpush.msra.mxu3 %v8757_v0  ;;  %4838 = vmatpush.msra.mxu0 %v9002_v22  ;;  %9929 = vst [vmem:[#allocation42_spill] sm:$0xff] %v9014_v12 }
 0xe00   : > { %v9008_v16 = vsel %vm1069_vm7, %v6610_v43, %v4613_v37  ;;  %5122 = vmatpush.msra.mxu1 %v8757_v0  ;;  %v4747_v43 = vld [vmem:[%s9927_s16] sm:$0xff]  ;;  %v4719_v37 = vpop.permute.xlu2 %4718 }
 0xe01   : > { %9928 = vst [vmem:[#allocation41_spill] sm:$0xff] %v9008_v16  ;;  %4806 = vmatpush.msra.mxu3 %v8848_v36  ;;  %4839 = vmatpush.msra.mxu0 %v9008_v16 }
 0xe02   : > { %5123 = vmatpush.msra.mxu1 %v8848_v36 }
 0xe03   : > { %4807 = vmatpush.msra.mxu3 %v8852_v7  ;;  %4840 = vmatpush.msra.mxu0 %v9014_v12 }
 0xe04   : > { %5124 = vmatpush.msra.mxu1 %v8852_v7 }
 0xe05   : > { %v6628_v24 = vpop.permute.xlu1 %6627  ;;  %4808 = vmatpush.msra.mxu3 %v8856_v20  ;;  %4841 = vmatpush.msra.mxu0 %v8817_v63 }
 0xe06   : > { %v6630_v3 = vunpack.i.h.bf16 %v6628_v24  ;;  %v6629_v4 = vunpack.i.l.bf16 %v6628_v24  ;;  %5125 = vmatpush.msra.mxu1 %v8856_v20 }
 0xe07   : > { %v4740_v56 = vpop.permute.xlu0 %4739  ;;  %4809 = vmatpush.msra.mxu3 %v8864_v13  ;;  %4842 = vmatpush.msra.mxu0 %v8825_v60 }
 0xe08   : > { %v9027_v34 = vsel %vm1034_vm5, %v6635_v27, %v4740_v56  ;;  %5126 = vmatpush.msra.mxu1 %v8864_v13  ;;  %4810 = vmatmul.f32.vlgmr.msra.gmra.mxu3 %v4747_v43  ;;  %v9034_v50 = vsel %vm1215_vm6, %v6629_v4, %v6630_v3  ;;  %v9042_v61 = vsel %vm1215_vm6, %v6630_v3, %v4719_v37  ;;  %v4748_v27 = vld [vmem:[%s9927_s16 + $0x8] sm:$0xff] }
 0xe09   : > { %9930 = vst [vmem:[#allocation43_spill] sm:$0xff] %v9027_v34  ;;  %4828 = vmatpush.msrb.mxu3 %v9031_v30  ;;  %4843 = vmatpush.msra.mxu0 %v8833_v19 }
 0xe0a   : > { %4868 = vmatpush.msra.mxu2 %v9027_v34  ;;  %9931 = vst [vmem:[#allocation44_spill] sm:$0xff] %v9042_v61  ;;  %5127 = vmatmul.f32.vlgmr.msra.gmra.mxu1 %v5046_v40 }
 0xe0b   : > { %4829 = vmatpush.msrb.mxu3 %v9034_v50  ;;  %4844 = vmatpush.msra.mxu0 %v8841_v29 }
 0xe0c   : > { %4869 = vmatpush.msra.mxu2 %v9042_v61 }
 0xe0d   : > { %5151 = vmatpush.msra.mxu3 %v8955_v45  ;;  %4845 = vmatpush.msra.mxu0 %v8760_v52 }
 0xe0e   : > { %6091 = vmatmul.msk.f32.vlgmr.msra.gmra.mxu2 %vm1069_vm7, %v4748_v27 }
 0xe0f   : > { %5152 = vmatpush.msra.mxu3 %v8988_v17  ;;  %4846 = vmatpush.msra.mxu0 %v8861_v14 }
 0xe10   : > { %6090 = vmatmul.msk.f32.vlgmr.msrb.gmra.mxu3 %vm1069_vm7, %v4748_v27 }
 0xe11   : > { %5153 = vmatpush.msra.mxu3 %v8884_v59  ;;  %4847 = vmatpush.msra.mxu0 %v8869_v58 }
 0xe13   : > { %5154 = vmatpush.msra.mxu3 %v8996_v41  ;;  %4848 = vmatpush.msra.mxu0 %v8874_v25 }
 0xe15   : > { %5155 = vmatpush.msra.mxu3 %v9002_v22  ;;  %4849 = vmatpush.msra.mxu0 %v8878_v23 }
 0xe16   : > { %4850 = vmatmul.f32.vlgmr.msra.gmra.mxu0 %v4747_v43  ;;  %v4789_v43 = vpop.permute.xlu0 %4788 }
 0xe17   : > { %5156 = vmatpush.msra.mxu3 %v9008_v16 }
 0xe19   : > { %5157 = vmatpush.msra.mxu3 %v9014_v12 }
 0xe1b   : > { %5158 = vmatpush.msra.mxu3 %v8817_v63 }
 0xe1d   : > { %5159 = vmatpush.msra.mxu3 %v8825_v60 }
 0xe1f   : > { %5160 = vmatpush.msra.mxu3 %v8833_v19 }
 0xe21   : > { %5161 = vmatpush.msra.mxu3 %v8841_v29 }
 0xe23   : > { %5162 = vmatpush.msra.mxu3 %v8760_v52 }
 0xe25   : > { %5163 = vmatpush.msra.mxu3 %v8861_v14 }
 0xe27   : > { %5164 = vmatpush.msra.mxu3 %v8869_v58 }
 0xe29   : > { %5165 = vmatpush.msra.mxu3 %v8874_v25 }
 0xe2b   : > { %5166 = vmatpush.msra.mxu3 %v8878_v23 }
 0xe2c   : > { %5167 = vmatmul.f32.vlgmr.msra.gmra.mxu3 %v5046_v40 }
 0xe2d   : > { %5507 = vmatpush.msrb.mxu3 %v8955_v45 }
 0xe2f   : > { %5508 = vmatpush.msrb.mxu3 %v8988_v17 }
 0xe31   : > { %5509 = vmatpush.msrb.mxu3 %v8884_v59 }
 0xe33   : > { %5510 = vmatpush.msrb.mxu3 %v8996_v41 }
 0xe35   : > { %5511 = vmatpush.msrb.mxu3 %v9002_v22 }
 0xe37   : > { %5512 = vmatpush.msrb.mxu3 %v9008_v16 }
 0xe39   : > { %5513 = vmatpush.msrb.mxu3 %v9014_v12 }
 0xe3b   : > { %5514 = vmatpush.msrb.mxu3 %v8817_v63 }
 0xe3d   : > { %5515 = vmatpush.msrb.mxu3 %v8825_v60 }
 0xe3f   : > { %5516 = vmatpush.msrb.mxu3 %v8833_v19 }
 0xe41   : > { %5517 = vmatpush.msrb.mxu3 %v8841_v29 }
 0xe43   : > { %5518 = vmatpush.msrb.mxu3 %v8760_v52 }
 0xe45   : > { %5519 = vmatpush.msrb.mxu3 %v8861_v14 }
 0xe47   : > { %5520 = vmatpush.msrb.mxu3 %v8869_v58 }
 0xe49   : > { %5521 = vmatpush.msrb.mxu3 %v8874_v25 }
 0xe4b   : > { %5522 = vmatpush.msrb.mxu3 %v8878_v23 }
 0xe8b   : > { %v4811_v24 = vpop.f32.mrf.mxu3 }
 0xe8c   : > { %v4812_v3 = vadd.f32 %v4811_v24, %v4789_v43 }
 0xe91   : > { %v4871_v56 = vpop.f32.mrf.mxu2 }
 0xe93   : > { %v4851_v4 = vpop.f32.mrf.mxu0  ;;  %v4831_v37 = vpop.f32.mrf.mxu3 }
 0xe94   : > { %v4852_v27 = vadd.f32 %v4851_v4, %v4789_v43  ;;  %v4832_v29 = vadd.f32 %v4831_v37, %v4812_v3 }
 0xe96   : > { %v4872_v52 = vadd.f32 %v4871_v56, %v4852_v27  ;;  %v4874_v19 = vmul.f32 0.2, %v4832_v29 }
 0xe98   : > { %v4875_v14 = vmul.f32 0.2, %v4872_v52  ;;  %v9086_v60 = vmax.f32 %v4832_v29, %v4874_v19 }
 0xe9a   : > { %v9088_v58 = vmax.f32 %v4872_v52, %v4875_v14  ;;  %v5028_v23 = vmul.f32 %v9086_v60, %v9805_v8  ;;  %v4989_v43 = vmul.f32 %v9086_v60, %v9807_v5  ;;  %v4923_v14 = vmul.f32 %v9086_v60, %v9804_v32 }
 0xe9b   : > { %v6641_v4 = vpack.i.bf16 %v9086_v60, %v8793_v35  ;;  %v4968_v56 = vmul.f32 %v9086_v60, %v9811_v1  ;;  %v4944_v27 = vmul.f32 %v9086_v60, %v9802_v26 }
 0xe9c   : > { %v6636_v40 = vpack.i.bf16 %v9088_v58, %v9086_v60  ;;  %v5029_v24 = vmul.f32 %v9088_v58, %v9806_v53  ;;  %v4990_v3 = vmul.f32 %v9088_v58, %v9808_v21  ;;  %v4969_v29 = vmul.f32 %v9088_v58, %v9809_v11 }
 0xe9d   : > { %v6666_v37 = vpack.i.bf16 %v4923_v14, %v8313_v9  ;;  %v5102_v9 = vld [vmem:[%s6973_s14] sm:$0xff]  ;;  %v4979_v14 = vpop.permute.xlu1 %4978 }
 0xe9e   : > { %6637 = vrot.lane.b32.xlu2 %v6636_v40, %s9856_s11  ;;  %v6646_v19 = vpack.i.bf16 %v5029_v24, %v5028_v23  ;;  %v6651_v52 = vpack.i.bf16 %v4990_v3, %v4989_v43  ;;  %v6656_v23 = vpack.i.bf16 %v4969_v29, %v4968_v56  ;;  %v4884_v40 = vmul.f32 %v9086_v60, %v9889_v18 }
 0xe9f   : > { %v4924_v24 = vmul.f32 %v9088_v58, %v9887_v49  ;;  %v6661_v43 = vpack.i.bf16 %v4944_v27, %v8327_v31  ;;  %v5039_v31 = vpop.permute.xlu2 %5038 }
 0xea0   : > { %6647 = vrot.lane.b32.xlu1 %v6646_v19, %s9897_s1  ;;  %6652 = vrot.lane.b32.xlu0 %v6651_v52, %s9899_s15  ;;  %v6671_v3 = vpack.i.bf16 %v4884_v40, %v8797_v42  ;;  %v4945_v19 = vmul.f32 %v9088_v58, %v9890_v15  ;;  %v4885_v52 = vmul.f32 %v9088_v58, %v9893_v48 }
 0xea6   : > { %6642 = vrot.lane.b32.xlu2 %v6641_v4, %s9888_s26  ;;  %v5018_v4 = vpop.permute.xlu0 %5017 }
 0xea7   : > { %v5000_v29 = vpop.permute.xlu2 %4999 }
 0xea8   : > { %6657 = vrot.lane.b32.xlu1 %v6656_v23, %s9905_s0  ;;  %6667 = vrot.lane.b32.xlu0 %v6666_v37, %s9886_s18 }
 0xeae   : > { %4932 = vrot.lane.b32.xlu2 %v4924_v24, %s9886_s18 }
 0xeb0   : > { %6662 = vrot.lane.b32.xlu1 %v6661_v43, %s9908_s3  ;;  %6672 = vrot.lane.b32.xlu0 %v6671_v3, %s9892_s2 }
 0xeb6   : > { %5105 = vperm.xlu2 %6315, %v5102_v9  }
 0xeb8   : > { %4953 = vrot.lane.b32.xlu1 %v4945_v19, %s9908_s3  ;;  %4911 = vrot.lane.b32.xlu0 %v9088_v58, %s9888_s26 }
 0xec0   : > { %4893 = vrot.lane.b32.xlu1 %v4885_v52, %s9892_s2 }
 0xef8   : > { %v6638_v56 = vpop.permute.xlu2 %6637 }
 0xef9   : > { %v6640_v27 = vunpack.i.h.bf16 %v6638_v56  ;;  %v6639_v40 = vunpack.i.l.bf16 %v6638_v56 }
 0xefb   : > { %v9144_v52 = vsel %vm1215_vm6, %v6639_v40, %v6640_v27  ;;  %v9147_v63 = vsel %vm1215_vm6, %v6640_v27, %v5018_v4 }
 0xf12   : > { %v6648_v23 = vpop.permute.xlu1 %6647  ;;  %v6653_v37 = vpop.permute.xlu0 %6652 }
 0xf13   : > { %v6650_v24 = vunpack.i.h.bf16 %v6648_v23  ;;  %v6649_v43 = vunpack.i.l.bf16 %v6648_v23  ;;  %v6655_v3 = vunpack.i.h.bf16 %v6653_v37  ;;  %v6654_v9 = vunpack.i.l.bf16 %v6653_v37 }
 0xf15   : > { %v9136_v19 = vsel %vm1034_vm5, %v6649_v43, %v6650_v24  ;;  %v9139_v25 = vsel %vm1034_vm5, %v6650_v24, %v5039_v31  ;;  %v9152_v56 = vsel %vm1086_vm4, %v6654_v9, %v6655_v3  ;;  %v9155_v31 = vsel %vm1086_vm4, %v6655_v3, %v5000_v29  ;;  %v6643_v29 = vpop.permute.xlu2 %6642 }
 0xf16   : > { %5136 = vmatpush.msrb.mxu2 %v9136_v19  ;;  %5176 = vmatpush.msrb.mxu0 %v9139_v25  ;;  %v6644_v22 = vunpack.i.l.bf16 %v6643_v29 }
 0xf18   : > { %5137 = vmatpush.msrb.mxu2 %v9144_v52  ;;  %5177 = vmatpush.msrb.mxu0 %v9147_v63 }
 0xf1a   : > { %5138 = vmatpush.msrb.mxu2 %v9152_v56  ;;  %5178 = vmatpush.msrb.mxu0 %v9155_v31  ;;  %v6658_v23 = vpop.permute.xlu1 %6657  ;;  %v6668_v37 = vpop.permute.xlu0 %6667 }
 0xf1b   : > { %v6660_v40 = vunpack.i.h.bf16 %v6658_v23  ;;  %v6659_v24 = vunpack.i.l.bf16 %v6658_v23  ;;  %v6670_v9 = vunpack.i.h.bf16 %v6668_v37  ;;  %v6669_v12 = vunpack.i.l.bf16 %v6668_v37 }
 0xf1d   : > { %v9160_v4 = vsel %vm1117_vm3, %v6659_v24, %v6660_v40  ;;  %v9163_v27 = vsel %vm1117_vm3, %v6660_v40, %v4979_v14  ;;  %v6645_v24 = vunpack.i.h.bf16 %v6643_v29  ;;  %v9174_v59 = vsel %vm1103_vm1, %v6669_v12, %v6670_v9 }
 0xf1e   : > { %5139 = vmatpush.msrb.mxu2 %v9160_v4  ;;  %5179 = vmatpush.msrb.mxu0 %v9163_v27 }
 0xf1f   : > { %v9178_v17 = vsel %vm1069_vm7, %v6644_v22, %v6645_v24  ;;  %v5047_v22 = vld [vmem:[%s9932_s4 + $0x8] sm:$0xff]  ;;  %s9933_s4 = sld [smem:[#allocation13_spill]] }
 0xf20   : > { %5140 = vmatpush.msrb.mxu2 %v9086_v60  ;;  %5180 = vmatpush.msrb.mxu0 %v9088_v58 }
 0xf22   : > { %v6663_v43 = vpop.permute.xlu1 %6662  ;;  %v6673_v3 = vpop.permute.xlu0 %6672 }
 0xf23   : > { %v6665_v23 = vunpack.i.h.bf16 %v6663_v43  ;;  %v6664_v16 = vunpack.i.l.bf16 %v6663_v43  ;;  %v6675_v40 = vunpack.i.h.bf16 %v6673_v3  ;;  %v6674_v41 = vunpack.i.l.bf16 %v6673_v3  ;;  %v4933_v43 = vpop.permute.xlu2 %4932 }
 0xf24   : > { %v9190_v12 = vsel %vm1103_vm1, %v6670_v9, %v4933_v43 }
 0xf25   : > { %v9170_v14 = vsel %vm1134_vm2, %v6664_v16, %v6665_v23  ;;  %v9182_v29 = vsel %vm1016_vm0, %v6674_v41, %v6675_v40 }
 0xf26   : > { %5141 = vmatpush.msrb.mxu2 %v9170_v14 }
 0xf28   : > { %5142 = vmatpush.msrb.mxu2 %v9174_v59 }
 0xf2a   : > { %v4954_v37 = vpop.permute.xlu1 %4953  ;;  %5143 = vmatpush.msrb.mxu2 %v9178_v17  ;;  %v4912_v45 = vpop.permute.xlu0 %4911 }
 0xf2b   : > { %v9185_v16 = vsel %vm1134_vm2, %v6665_v23, %v4954_v37  ;;  %v9196_v41 = vsel %vm1069_vm7, %v6645_v24, %v4912_v45  ;;  %v5128_v45 = vpop.f32.mrf.mxu1  ;;  %v5106_v23 = vpop.permute.xlu2 %5105 }
 0xf2c   : > { %5144 = vmatpush.msrb.mxu2 %v9182_v29  ;;  %5181 = vmatpush.msrb.mxu0 %v9185_v16  ;;  %v5168_v24 = vpop.f32.mrf.mxu3 }
 0xf2d   : > { %v5169_v43 = vadd.f32 %v5168_v24, %v5106_v23 }
 0xf2e   : > { %5145 = vmatpush.msrb.mxu2 %v9031_v30  ;;  %5182 = vmatpush.msrb.mxu0 %v9190_v12 }
 0xf30   : > { %5146 = vmatpush.msrb.mxu2 %v9034_v50  ;;  %5183 = vmatpush.msrb.mxu0 %v9196_v41 }
 0xf31   : > { %6092 = vmatmul.msk.f32.vlgmr.msrb.gmra.mxu2 %vm1853_vm9, %v5047_v22 }
 0xf32   : > { %5447 = vmatpush.msra.mxu2 %v8950_v10  ;;  %v4894_v3 = vpop.permute.xlu1 %4893 }
 0xf33   : > { %v9203_v9 = vsel %vm1016_vm0, %v6675_v40, %v4894_v3  ;;  %v5129_v40 = vadd.f32 %v5128_v45, %v5106_v23  ;;  %v5363_v3 = vld [vmem:[%s9933_s4] sm:$0xff] }
 0xf34   : > { %5448 = vmatpush.msra.mxu2 %v8959_v2  ;;  %5184 = vmatpush.msrb.mxu0 %v9203_v9 }
 0xf35   : > { %5523 = vmatmul.f32.vlgmr.msrb.gmra.mxu3 %v5363_v3 }
 0xf36   : > { %5449 = vmatpush.msra.mxu2 %v8882_v44  ;;  %5185 = vmatpush.msrb.mxu0 %v9027_v34 }
 0xf38   : > { %5450 = vmatpush.msra.mxu2 %v8966_v54  ;;  %5186 = vmatpush.msrb.mxu0 %v9042_v61 }
 0xf39   : > { %6093 = vmatmul.msk.f32.vlgmr.msrb.gmra.mxu0 %vm1853_vm9, %v5047_v22 }
 0xf3a   : > { %5451 = vmatpush.msra.mxu2 %v8971_v62 }
 0xf3c   : > { %5452 = vmatpush.msra.mxu2 %v8976_v33 }
 0xf3e   : > { %5453 = vmatpush.msra.mxu2 %v8981_v47 }
 0xf40   : > { %5454 = vmatpush.msra.mxu2 %v8814_v39 }
 0xf42   : > { %5455 = vmatpush.msra.mxu2 %v8822_v51 }
 0xf44   : > { %5456 = vmatpush.msra.mxu2 %v8830_v38 }
 0xf46   : > { %5457 = vmatpush.msra.mxu2 %v8838_v46 }
 0xf48   : > { %5458 = vmatpush.msra.mxu2 %v8757_v0 }
 0xf4a   : > { %5459 = vmatpush.msra.mxu2 %v8848_v36 }
 0xf4c   : > { %5460 = vmatpush.msra.mxu2 %v8852_v7 }
 0xf4e   : > { %5461 = vmatpush.msra.mxu2 %v8856_v20 }
 0xf50   : > { %5462 = vmatpush.msra.mxu2 %v8864_v13 }
 0xf51   : > { %5463 = vmatmul.f32.vlgmr.msra.gmra.mxu2 %v5363_v3 }
 0xfb4   : > { %v5148_v37 = vpop.f32.mrf.mxu2 }
 0xfb5   : > { %v5149_v22 = vadd.f32 %v5148_v37, %v5129_v40  ;;  %v9936_v40 = vld [vmem:[#allocation32_spill] sm:$0xff] }
 0xfb6   : > { %v5188_v61 = vpop.f32.mrf.mxu0  ;;  %v9249_v37 = vmul.f32 %v8793_v35, %v9936_v40 }
 0xfb7   : > { %v5191_v0 = vmul.f32 0.2, %v5149_v22  ;;  %v5189_v46 = vadd.f32 %v5188_v61, %v5169_v43 }
 0xfb8   : > { %9937 = vst [vmem:[#allocation46_spill] sm:$0xff] %v9249_v37 }
 0xfb9   : > { %v9225_v36 = vmax.f32 %v5149_v22, %v5191_v0  ;;  %v5192_v7 = vmul.f32 0.2, %v5189_v46 }
 0xfbb   : > { %v9227_v34 = vmax.f32 %v5189_v46, %v5192_v7  ;;  %5467 = vmatpush.msrb.mxu1 %v9225_v36  ;;  %v5240_v0 = vmul.f32 %v9225_v36, %v9804_v32  ;;  %v9934_v46 = vld [vmem:[#allocation30_spill] sm:$0xff]  ;;  %v5261_v61 = vmul.f32 %v9225_v36, %v9802_v26  ;;  %v5201_v3 = vmul.f32 %v9225_v36, %v9889_v18 }
 0xfbc   : > { %v9242_v7 = vmul.f32 %v8793_v35, %v9934_v46 }
 0xfbd   : > { %5228 = vrot.lane.b32.xlu2 %v9227_v34, %s9888_s26  ;;  %v5262_v45 = vmul.f32 %v9227_v34, %v9890_v15  ;;  %v5241_v23 = vmul.f32 %v9227_v34, %v9887_v49  ;;  %v5202_v43 = vmul.f32 %v9227_v34, %v9893_v48  ;;  %v6681_v22 = vpack.i.bf16 %v5261_v61, %v9249_v37  ;;  %v5365_v37 = vld [vmem:[%s9933_s4 + $0x10] sm:$0xff] }
 0xfbe   : > { %9935 = vst [vmem:[#allocation45_spill] sm:$0xff] %v9242_v7  ;;  %v6686_v24 = vpack.i.bf16 %v5240_v0, %v9242_v7  ;;  %v6691_v0 = vpack.i.bf16 %v5201_v3, %v8797_v42  ;;  %v5346_v46 = vmul.f32 %v9227_v34, %v9806_v53  ;;  %v5345_v61 = vmul.f32 %v9225_v36, %v9805_v8 }
 0xfbf   : > { %5270 = vrot.lane.b32.xlu1 %v5262_v45, %s9908_s3  ;;  %5249 = vrot.lane.b32.xlu0 %v5241_v23, %s9886_s18  ;;  %v5347_v45 = vmul.f32 %v8941_v55, %v9896_v6  ;;  %v6676_v23 = vpack.i.bf16 %v9225_v36, %v8793_v35  ;;  %v5307_v6 = vmul.f32 %v9227_v34, %v9808_v21 }
 0xfc0   : > { %v5306_v35 = vmul.f32 %v9225_v36, %v9807_v5  ;;  %v5308_v3 = vmul.f32 %v8941_v55, %v9898_v28 }
 0xfc2   : > { %v6706_v40 = vpack.i.bf16 %v5307_v6, %v5306_v35 }
 0xfc5   : > { %6687 = vrot.lane.b32.xlu2 %v6686_v24, %s9886_s18  ;;  %v6701_v24 = vpack.i.bf16 %v5346_v46, %v5345_v61  ;;  %v5438_v46 = vld [vmem:[%s6978_s8] sm:$0xff]  ;;  %v5287_v61 = vmul.f32 %v8941_v55, %v9894_v57 }
 0xfc7   : > { %5210 = vrot.lane.b32.xlu1 %v5202_v43, %s9892_s2  ;;  %6682 = vrot.lane.b32.xlu0 %v6681_v22, %s9908_s3  ;;  %v6696_v43 = vpack.i.bf16 %v9227_v34, %v9225_v36  ;;  %v5286_v22 = vmul.f32 %v9227_v34, %v9809_v11 }
 0xfcd   : > { %5355 = vrot.lane.b32.xlu2 %v5347_v45, %s9897_s1 }
 0xfcf   : > { %6677 = vrot.lane.b32.xlu1 %v6676_v23, %s9888_s26  ;;  %6692 = vrot.lane.b32.xlu0 %v6691_v0, %s9892_s2  ;;  %v5285_v23 = vmul.f32 %v9225_v36, %v9811_v1 }
 0xfd1   : > { %v6711_v0 = vpack.i.bf16 %v5286_v22, %v5285_v23 }
 0xfd5   : > { %6702 = vrot.lane.b32.xlu2 %v6701_v24, %s9897_s1 }
 0xfd7   : > { %6707 = vrot.lane.b32.xlu1 %v6706_v40, %s9899_s15  ;;  %6697 = vrot.lane.b32.xlu0 %v6696_v43, %s9856_s11 }
 0xfdd   : > { %5316 = vrot.lane.b32.xlu2 %v5308_v3, %s9899_s15 }
 0xfdf   : > { %5334 = vrot.lane.b32.xlu1 %v8941_v55, %s9856_s11  ;;  %6712 = vrot.lane.b32.xlu0 %v6711_v0, %s9905_s0 }
 0xfe5   : > { %5710 = vrot.lane.b32.xlu2 %v8941_v55, %s9856_s11 }
 0xfe7   : > { %5441 = vperm.xlu1 %6193, %v5438_v46   ;;  %5295 = vrot.lane.b32.xlu0 %v5287_v61, %s9905_s0 }
 0xfef   : > { %5692 = vrot.lane.b32.xlu1 %v5308_v3, %s9899_s15  ;;  %5731 = vrot.lane.b32.xlu0 %v5347_v45, %s9897_s1 }
 0xff7   : > { %5671 = vrot.lane.b32.xlu0 %v5287_v61, %s9905_s0 }
0x1017   : > { %v9299_v28 = vpop.permute.xlu2 %5228 }
0x101f   : > { %v9301_v6 = vpop.permute.xlu2 %6687 }
0x1020   : > { %v6690_v0 = vunpack.i.h.bf16 %v9301_v6  ;;  %v6689_v46 = vunpack.i.l.bf16 %v9301_v6 }
0x1027   : > { %v5356_v24 = vpop.permute.xlu2 %5355 }
0x102f   : > { %v6703_v35 = vpop.permute.xlu2 %6702 }
0x1030   : > { %v6705_v40 = vunpack.i.h.bf16 %v6703_v35  ;;  %v6704_v57 = vunpack.i.l.bf16 %v6703_v35 }
0x1031   : > { %v5271_v43 = vpop.permute.xlu1 %5270  ;;  %v5250_v22 = vpop.permute.xlu0 %5249 }
0x1032   : > { %v9304_v55 = vsel %vm1034_vm5, %v6704_v57, %v6705_v40  ;;  %v9307_v23 = vsel %vm1034_vm5, %v6705_v40, %v5356_v24  ;;  %v9320_v24 = vsel %vm1103_vm1, %v6689_v46, %v6690_v0 }
0x1033   : > { %9938 = vst [vmem:[#allocation31_spill] sm:$0xff] %v9304_v55  ;;  %5499 = vmatpush.msra.mxu0 %v9304_v55  ;;  %5559 = vmatpush.msrb.mxu2 %v9307_v23 }
0x1034   : > { %9939 = vst [vmem:[#allocation25_spill] sm:$0xff] %v9307_v23 }
0x1039   : > { %v9311_v45 = vpop.permute.xlu1 %5210  ;;  %v6683_v3 = vpop.permute.xlu0 %6682 }
0x103a   : > { %v6685_v61 = vunpack.i.h.bf16 %v6683_v3  ;;  %v6684_v35 = vunpack.i.l.bf16 %v6683_v3 }
0x103c   : > { %v9316_v48 = vsel %vm1134_vm2, %v6684_v35, %v6685_v61 }
0x103d   : > { %5468 = vmatpush.msrb.mxu1 %v9316_v48 }
0x103f   : > { %5469 = vmatpush.msrb.mxu1 %v9320_v24 }
0x1041   : > { %v6678_v40 = vpop.permute.xlu1 %6677  ;;  %v6693_v57 = vpop.permute.xlu0 %6692 }
0x1042   : > { %v6680_v23 = vunpack.i.h.bf16 %v6678_v40  ;;  %v6679_v55 = vunpack.i.l.bf16 %v6678_v40  ;;  %v6695_v42 = vunpack.i.h.bf16 %v6693_v57  ;;  %v6694_v18 = vunpack.i.l.bf16 %v6693_v57 }
0x1044   : > { %v5230_v6 = vsel %vm1069_vm7, %v6679_v55, %v6680_v23  ;;  %v5212_v3 = vsel %vm1016_vm0, %v6694_v18, %v6695_v42 }
0x1045   : > { %5470 = vmatpush.msrb.mxu1 %v5230_v6 }
0x1047   : > { %5471 = vmatpush.msrb.mxu1 %v5212_v3 }
0x1049   : > { %v6708_v35 = vpop.permute.xlu1 %6707  ;;  %v6698_v15 = vpop.permute.xlu0 %6697  ;;  %5472 = vmatpush.msrb.mxu1 %v9136_v19 }
0x104a   : > { %v6710_v46 = vunpack.i.h.bf16 %v6708_v35  ;;  %v6709_v49 = vunpack.i.l.bf16 %v6708_v35  ;;  %v6700_v7 = vunpack.i.h.bf16 %v6698_v15  ;;  %v6699_v1 = vunpack.i.l.bf16 %v6698_v15 }
0x104b   : > { %5473 = vmatpush.msrb.mxu1 %v9144_v52 }
0x104c   : > { %v9328_v40 = vsel %vm1215_vm6, %v6699_v1, %v6700_v7  ;;  %v9333_v18 = vsel %vm1086_vm4, %v6709_v49, %v6710_v46 }
0x104d   : > { %9940 = vst [vmem:[#allocation59_spill] sm:$0xff] %v9328_v40  ;;  %5474 = vmatpush.msrb.mxu1 %v9152_v56  ;;  %5500 = vmatpush.msra.mxu0 %v9328_v40  ;;  %v5317_v40 = vpop.permute.xlu2 %5316 }
0x104e   : > { %9941 = vst [vmem:[#allocation27_spill] sm:$0xff] %v9333_v18 }
0x104f   : > { %5475 = vmatpush.msrb.mxu1 %v9160_v4  ;;  %5501 = vmatpush.msra.mxu0 %v9333_v18  ;;  %v9350_v18 = vsel %vm1086_vm4, %v6710_v46, %v5317_v40 }
0x1051   : > { %v5335_v55 = vpop.permute.xlu1 %5334  ;;  %v6713_v57 = vpop.permute.xlu0 %6712  ;;  %5476 = vmatpush.msrb.mxu1 %v9086_v60 }
0x1052   : > { %v6715_v15 = vunpack.i.h.bf16 %v6713_v57  ;;  %v6714_v35 = vunpack.i.l.bf16 %v6713_v57  ;;  %v9339_v1 = vsel %vm1215_vm6, %v6700_v7, %v5335_v55  ;;  %v9356_v7 = vsel %vm1134_vm2, %v6685_v61, %v5271_v43  ;;  %v5364_v61 = vld [vmem:[%s9933_s4 + $0x8] sm:$0xff]  ;;  %s9964_s4 = sld [smem:[#allocation14_spill]] }
0x1053   : > { %5477 = vmatpush.msrb.mxu1 %v9170_v14  ;;  %5560 = vmatpush.msrb.mxu2 %v9339_v1  ;;  %v9362_v57 = vsel %vm1103_vm1, %v6690_v0, %v5250_v22  ;;  %v5231_v43 = vsel %vm1069_vm7, %v6680_v23, %v9299_v28  ;;  %v5213_v22 = vsel %vm1016_vm0, %v6695_v42, %v9311_v45  ;;  %v9943_v42 = vld [vmem:[#allocation38_spill] sm:$0xff] }
0x1054   : > { %v9344_v49 = vsel %vm1117_vm3, %v6714_v35, %v6715_v15 }
0x1055   : > { %5478 = vmatpush.msrb.mxu1 %v9174_v59  ;;  %5502 = vmatpush.msra.mxu0 %v9344_v49 }
0x1056   : > { %5561 = vmatpush.msrb.mxu2 %v9350_v18  ;;  %6094 = vmatmul.msk.f32.vlgmr.msra.gmra.mxu0 %vm2190_vm10, %v5365_v37 }
0x1057   : > { %5527 = vmatpush.msrb.mxu0 %v9227_v34  ;;  %5479 = vmatpush.msrb.mxu1 %v9178_v17 }
0x1059   : > { %5528 = vmatpush.msrb.mxu0 %v9356_v7  ;;  %v5296_v55 = vpop.permute.xlu0 %5295  ;;  %5480 = vmatpush.msrb.mxu1 %v9182_v29 }
0x105a   : > { %v9366_v46 = vsel %vm1117_vm3, %v6715_v15, %v5296_v55 }
0x105b   : > { %5529 = vmatpush.msrb.mxu0 %v9362_v57  ;;  %5481 = vmatpush.msrb.mxu1 %v9031_v30 }
0x105c   : > { %5562 = vmatpush.msrb.mxu2 %v9366_v46 }
0x105d   : > { %5530 = vmatpush.msrb.mxu0 %v5231_v43  ;;  %5482 = vmatpush.msrb.mxu1 %v9034_v50 }
0x105e   : > { %5861 = vmatpush.msra.mxu2 %v9225_v36  ;;  %5483 = vmatmul.f32.vlgmr.msrb.gmra.mxu1 %v5364_v61  ;;  %v9945_v36 = vld [vmem:[#allocation61_spill] sm:$0xff] }
0x105f   : > { %6095 = vmatmul.msk.f32.vlgmr.msrb.gmra.mxu2 %vm2190_vm10, %v5365_v37  ;;  %5531 = vmatpush.msrb.mxu0 %v5213_v22 }
0x1060   : > { %5841 = vmatpush.msra.mxu1 %v8950_v10  ;;  %5862 = vmatpush.msra.mxu2 %v9316_v48  ;;  %v9942_v48 = vld [vmem:[#allocation43_spill] sm:$0xff] }
0x1061   : > { %5532 = vmatpush.msrb.mxu0 %v9139_v25  ;;  %v9951_v10 = vld [vmem:[#allocation51_spill] sm:$0xff] }
0x1062   : > { %5842 = vmatpush.msra.mxu1 %v8959_v2  ;;  %5863 = vmatpush.msra.mxu2 %v9320_v24  ;;  %v9952_v2 = vld [vmem:[#allocation47_spill] sm:$0xff] }
0x1063   : > { %5533 = vmatpush.msrb.mxu0 %v9147_v63 }
0x1064   : > { %5843 = vmatpush.msra.mxu1 %v8882_v44  ;;  %5864 = vmatpush.msra.mxu2 %v5230_v6  ;;  %v9949_v44 = vld [vmem:[#allocation23_spill] sm:$0xff] }
0x1065   : > { %5534 = vmatpush.msrb.mxu0 %v9155_v31 }
0x1066   : > { %5844 = vmatpush.msra.mxu1 %v8966_v54  ;;  %5865 = vmatpush.msra.mxu2 %v5212_v3  ;;  %v9953_v54 = vld [vmem:[#allocation41_spill] sm:$0xff] }
0x1067   : > { %5535 = vmatpush.msrb.mxu0 %v9163_v27 }
0x1068   : > { %5845 = vmatpush.msra.mxu1 %v8971_v62  ;;  %5866 = vmatpush.msra.mxu2 %v9136_v19  ;;  %v9954_v62 = vld [vmem:[#allocation42_spill] sm:$0xff] }
0x1069   : > { %5536 = vmatpush.msrb.mxu0 %v9088_v58 }
0x106a   : > { %5846 = vmatpush.msra.mxu1 %v8976_v33  ;;  %5867 = vmatpush.msra.mxu2 %v9144_v52  ;;  %v9956_v33 = vld [vmem:[#allocation34_spill] sm:$0xff] }
0x106b   : > { %5537 = vmatpush.msrb.mxu0 %v9185_v16 }
0x106c   : > { %5847 = vmatpush.msra.mxu1 %v8981_v47  ;;  %5868 = vmatpush.msra.mxu2 %v9152_v56  ;;  %v9958_v47 = vld [vmem:[#allocation24_spill] sm:$0xff] }
0x106d   : > { %5538 = vmatpush.msrb.mxu0 %v9190_v12 }
0x106e   : > { %5848 = vmatpush.msra.mxu1 %v8814_v39  ;;  %5869 = vmatpush.msra.mxu2 %v9160_v4  ;;  %v9944_v39 = vld [vmem:[#allocation44_spill] sm:$0xff] }
0x106f   : > { %5539 = vmatpush.msrb.mxu0 %v9196_v41 }
0x1070   : > { %5849 = vmatpush.msra.mxu1 %v8822_v51  ;;  %5870 = vmatpush.msra.mxu2 %v9086_v60  ;;  %v9946_v51 = vld [vmem:[#allocation58_spill] sm:$0xff]  ;;  %v9947_v60 = vld [vmem:[#allocation29_spill] sm:$0xff] }
0x1071   : > { %5540 = vmatpush.msrb.mxu0 %v9203_v9 }
0x1072   : > { %5850 = vmatpush.msra.mxu1 %v8830_v38  ;;  %5871 = vmatpush.msra.mxu2 %v9170_v14  ;;  %v9948_v38 = vld [vmem:[#allocation40_spill] sm:$0xff] }
0x1073   : > { %5541 = vmatpush.msrb.mxu0 %v9942_v48 }
0x1074   : > { %5851 = vmatpush.msra.mxu1 %v9943_v42  ;;  %5872 = vmatpush.msra.mxu2 %v9174_v59  ;;  %v9950_v59 = vld [vmem:[#allocation57_spill] sm:$0xff] }
0x1075   : > { %5542 = vmatpush.msrb.mxu0 %v9944_v39 }
0x1076   : > { %5852 = vmatpush.msra.mxu1 %v9945_v36  ;;  %5873 = vmatpush.msra.mxu2 %v9178_v17  ;;  %v9959_v17 = vld [vmem:[#allocation28_spill] sm:$0xff] }
0x1077   : > { %5543 = vmatmul.f32.vlgmr.msrb.gmra.mxu0 %v5364_v61  ;;  %v9966_v61 = vld [vmem:[#allocation22_spill] sm:$0xff] }
0x1078   : > { %5901 = vmatpush.msra.mxu0 %v9946_v51  ;;  %5853 = vmatpush.msra.mxu1 %v9947_v60  ;;  %v9970_v60 = vld [vmem:[#allocation39_spill] sm:$0xff] }
0x1079   : > { %5874 = vmatpush.msra.mxu2 %v9182_v29  ;;  %v6761_v29 = vld [vmem:[#allocation3] sm:$0xff] }
0x107a   : > { %5902 = vmatpush.msra.mxu0 %v9948_v38  ;;  %5854 = vmatpush.msra.mxu1 %v9949_v44  ;;  %v9971_v44 = vld [vmem:[#allocation53_spill] sm:$0xff] }
0x107b   : > { %5875 = vmatpush.msra.mxu2 %v9031_v30  ;;  %v9961_v30 = vld [vmem:[#allocation49_spill] sm:$0xff] }
0x107c   : > { %5903 = vmatpush.msra.mxu0 %v9950_v59  ;;  %5855 = vmatpush.msra.mxu1 %v8856_v20  ;;  %v9955_v20 = vld [vmem:[#allocation52_spill] sm:$0xff] }
0x107d   : > { %5876 = vmatpush.msra.mxu2 %v9034_v50  ;;  %v5442_v50 = vpop.permute.xlu1 %5441 }
0x107e   : > { %5904 = vmatpush.msra.mxu0 %v9951_v10  ;;  %5856 = vmatpush.msra.mxu1 %v8864_v13  ;;  %v9957_v13 = vld [vmem:[#allocation48_spill] sm:$0xff]  ;;  %v5832_v10 = vld [vmem:[%s6983_s24] sm:$0xff] }
0x1080   : > { %5921 = vmatpush.msrb.mxu1 %v9227_v34  ;;  %5905 = vmatpush.msra.mxu0 %v9952_v2  ;;  %v9960_v34 = vld [vmem:[#allocation55_spill] sm:$0xff] }
0x1081   : > { %v9972_v2 = vld [vmem:[#allocation35_spill] sm:$0xff] }
0x1082   : > { %5922 = vmatpush.msrb.mxu1 %v9356_v7  ;;  %5906 = vmatpush.msra.mxu0 %v9953_v54 }
0x1084   : > { %5923 = vmatpush.msrb.mxu1 %v9362_v57  ;;  %5907 = vmatpush.msra.mxu0 %v9954_v62  ;;  %v5711_v62 = vpop.permute.xlu2 %5710 }
0x1086   : > { %5924 = vmatpush.msrb.mxu1 %v5231_v43  ;;  %5908 = vmatpush.msra.mxu0 %v9955_v20  ;;  %v9965_v43 = vld [vmem:[#allocation46_spill] sm:$0xff] }
0x1088   : > { %5925 = vmatpush.msrb.mxu1 %v5213_v22  ;;  %5909 = vmatpush.msra.mxu0 %v9956_v33 }
0x108a   : > { %5926 = vmatpush.msrb.mxu1 %v9139_v25  ;;  %5910 = vmatpush.msra.mxu0 %v9957_v13  ;;  %v9962_v25 = vld [vmem:[#allocation56_spill] sm:$0xff] }
0x108c   : > { %5927 = vmatpush.msrb.mxu1 %v9147_v63  ;;  %5911 = vmatpush.msra.mxu0 %v9958_v47  ;;  %v9963_v63 = vld [vmem:[#allocation50_spill] sm:$0xff] }
0x108e   : > { %5928 = vmatpush.msrb.mxu1 %v9155_v31  ;;  %5912 = vmatpush.msra.mxu0 %v9959_v17 }
0x1090   : > { %5929 = vmatpush.msrb.mxu1 %v9163_v27  ;;  %5913 = vmatpush.msra.mxu0 %v9960_v34  ;;  %v5732_v34 = vpop.permute.xlu0 %5731 }
0x1092   : > { %5930 = vmatpush.msrb.mxu1 %v9088_v58  ;;  %5914 = vmatpush.msra.mxu0 %v9961_v30  ;;  %v5464_v58 = vpop.f32.mrf.mxu2 }
0x1093   : > { %v5465_v19 = vadd.f32 %v5464_v58, %v5442_v50 }
0x1094   : > { %5931 = vmatpush.msrb.mxu1 %v9185_v16  ;;  %5915 = vmatpush.msra.mxu0 %v9962_v25 }
0x1096   : > { %5932 = vmatpush.msrb.mxu1 %v9190_v12  ;;  %5916 = vmatpush.msra.mxu0 %v9963_v63  ;;  %v5739_v12 = vld [vmem:[%s9964_s4] sm:$0xff]  ;;  %v5693_v63 = vpop.permute.xlu1 %5692 }
0x1097   : > { %5857 = vmatmul.f32.vlgmr.msra.gmra.mxu1 %v5739_v12  ;;  %5917 = vmatmul.f32.vlgmr.msra.gmra.mxu0 %v5739_v12 }
0x1098   : > { %5933 = vmatpush.msrb.mxu1 %v9196_v41  ;;  %v5740_v41 = vld [vmem:[%s9964_s4 + $0x8] sm:$0xff]  ;;  %v5672_v58 = vpop.permute.xlu0 %5671 }
0x1099   : > { %5877 = vmatmul.f32.vlgmr.msra.gmra.mxu2 %v5740_v41 }
0x109a   : > { %5934 = vmatpush.msrb.mxu1 %v9203_v9  ;;  %v5524_v9 = vpop.f32.mrf.mxu3 }
0x109b   : > { %v5525_v37 = vadd.f32 %v5524_v9, %v5442_v50 }
0x109c   : > { %5935 = vmatpush.msrb.mxu1 %v9942_v48  ;;  %v9967_v48 = vld [vmem:[#allocation45_spill] sm:$0xff] }
0x109e   : > { %5936 = vmatpush.msrb.mxu1 %v9944_v39 }
0x109f   : > { %5937 = vmatmul.f32.vlgmr.msrb.gmra.mxu1 %v5740_v41 }
0x10d3   : > { %v5504_v56 = vpop.f32.mrf.mxu0 }
0x10db   : > { %v5484_v52 = vpop.f32.mrf.mxu1 }
0x10dc   : > { %v5485_v31 = vadd.f32 %v5484_v52, %v5465_v19 }
0x10de   : > { %v5505_v4 = vadd.f32 %v5504_v56, %v5485_v31 }
0x10e0   : > { %v5567_v27 = vmul.f32 0.2, %v5505_v4 }
0x10e2   : > { %v9448_v14 = vmax.f32 %v5505_v4, %v5567_v27  ;;  %v5564_v23 = vpop.f32.mrf.mxu2 }
0x10e4   : > { %v6721_v16 = vpack.i.bf16 %v9448_v14, %v6761_v29  ;;  %v5682_v3 = vmul.f32 %v9448_v14, %v9807_v5  ;;  %v5721_v35 = vmul.f32 %v9448_v14, %v9805_v8  ;;  %v5637_v5 = vmul.f32 %v9448_v14, %v9802_v26  ;;  %v9968_v26 = vld [vmem:[#allocation36_spill] sm:$0xff] }
0x10e5   : > { %v5661_v22 = vmul.f32 %v9448_v14, %v9966_v61  ;;  %v5577_v38 = vmul.f32 %v9448_v14, %v9970_v60  ;;  %v9976_v60 = vld [vmem:[#allocation27_spill] sm:$0xff] }
0x10e6   : > { %6722 = vrot.lane.b32.xlu2 %v6721_v16, %s9888_s26 }
0x10e7   : > { %v6751_v59 = vpack.i.bf16 %v5577_v38, %v9971_v44  ;;  %v5741_v38 = vld [vmem:[%s9964_s4 + $0x10] sm:$0xff] }
0x10f4   : > { %v5544_v28 = vpop.f32.mrf.mxu0 }
0x10f5   : > { %v5545_v45 = vadd.f32 %v5544_v28, %v5525_v37 }
0x10f7   : > { %v5565_v0 = vadd.f32 %v5564_v23, %v5545_v45 }
0x10f9   : > { %v5568_v24 = vmul.f32 0.2, %v5565_v0 }
0x10fb   : > { %v9454_v6 = vmax.f32 %v5565_v0, %v5568_v24 }
0x10fd   : > { %v6716_v40 = vpack.i.bf16 %v9454_v6, %v9448_v14  ;;  %v5683_v15 = vmul.f32 %v9454_v6, %v9808_v21  ;;  %v5722_v7 = vmul.f32 %v9454_v6, %v9806_v53  ;;  %v5616_v21 = vmul.f32 %v9448_v14, %v9804_v32 }
0x10fe   : > { %v5662_v8 = vmul.f32 %v9454_v6, %v9809_v11  ;;  %v6741_v53 = vpack.i.bf16 %v5637_v5, %v9965_v43  ;;  %v5617_v32 = vmul.f32 %v9454_v6, %v9968_v26  ;;  %v9969_v11 = vld [vmem:[#allocation33_spill] sm:$0xff]  ;;  %v5578_v54 = vmul.f32 %v9454_v6, %v9972_v2 }
0x10ff   : > { %6717 = vrot.lane.b32.xlu1 %v6716_v40, %s9856_s11  ;;  %v6731_v55 = vpack.i.bf16 %v5683_v15, %v5682_v3  ;;  %v6726_v57 = vpack.i.bf16 %v5722_v7, %v5721_v35  ;;  %v6746_v42 = vpack.i.bf16 %v5616_v21, %v9967_v48  ;;  %v5638_v51 = vmul.f32 %v9454_v6, %v9969_v11  ;;  %v9974_v11 = vld [vmem:[#allocation25_spill] sm:$0xff] }
0x1100   : > { %v6736_v39 = vpack.i.bf16 %v5662_v8, %v5661_v22 }
0x1101   : > { %6732 = vrot.lane.b32.xlu0 %v6731_v55, %s9899_s15  ;;  %6727 = vrot.lane.b32.xlu2 %v6726_v57, %s9897_s1 }
0x1107   : > { %6742 = vrot.lane.b32.xlu1 %v6741_v53, %s9908_s3 }
0x1109   : > { %6747 = vrot.lane.b32.xlu0 %v6746_v42, %s9886_s18  ;;  %6737 = vrot.lane.b32.xlu2 %v6736_v39, %s9905_s0 }
0x110f   : > { %5625 = vrot.lane.b32.xlu1 %v5617_v32, %s9886_s18  ;;  %v9973_v32 = vld [vmem:[#allocation31_spill] sm:$0xff] }
0x1111   : > { %5604 = vrot.lane.b32.xlu0 %v9454_v6, %s9888_s26  ;;  %5646 = vrot.lane.b32.xlu2 %v5638_v51, %s9908_s3  ;;  %v9975_v51 = vld [vmem:[#allocation59_spill] sm:$0xff]  ;;  %s9977_s3 = sshll.u32 %s9979_s10, 4 }
0x1112   : > { %s1014_s11 = scalar_lea.vmem %s6988_s19, %s9977_s3 }
0x1114   : > { %v5858_v44 = vpop.f32.mrf.mxu1 }
0x1117   : > { %6752 = vrot.lane.b32.xlu1 %v6751_v59, %s9892_s2  ;;  %v5918_v59 = vpop.f32.mrf.mxu0 }
0x1119   : > { %5835 = vperm.xlu0 %6234, %v5832_v10   ;;  %5586 = vrot.lane.b32.xlu2 %v5578_v54, %s9892_s2 }
0x111c   : > { %v5878_v2 = vpop.f32.mrf.mxu2 }
0x1140   : > { %v6723_v20 = vpop.permute.xlu2 %6722 }
0x1141   : > { %v6725_v3 = vunpack.i.h.bf16 %v6723_v20  ;;  %v6724_v40 = vunpack.i.l.bf16 %v6723_v20 }
0x1143   : > { %v5606_v8 = vsel %vm1069_vm7, %v6724_v40, %v6725_v3 }
0x115b   : > { %v6728_v33 = vpop.permute.xlu2 %6727 }
0x115c   : > { %v6730_v13 = vunpack.i.h.bf16 %v6728_v33  ;;  %v6729_v47 = vunpack.i.l.bf16 %v6728_v33 }
0x115e   : > { %v5733_v30 = vsel %vm1034_vm5, %v6729_v47, %v6730_v13  ;;  %v5734_v25 = vsel %vm1034_vm5, %v6730_v13, %v5732_v34 }
0x115f   : > { %5884 = vmatpush.msra.mxu3 %v5733_v30  ;;  %5944 = vmatpush.msrb.mxu2 %v5734_v25 }
0x1163   : > { %v6738_v50 = vpop.permute.xlu2 %6737 }
0x1164   : > { %v6740_v31 = vunpack.i.h.bf16 %v6738_v50  ;;  %v6739_v4 = vunpack.i.l.bf16 %v6738_v50  ;;  %v6762_v50 = vld [vmem:[%s7018_s23] sm:$0xff] }
0x1166   : > { %v5673_v28 = vsel %vm1117_vm3, %v6739_v4, %v6740_v31  ;;  %v5674_v23 = vsel %vm1117_vm3, %v6740_v31, %v5672_v58 }
0x116b   : > { %v5647_v15 = vpop.permute.xlu2 %5646 }
0x1171   : > { %v6718_v19 = vpop.permute.xlu1 %6717 }
0x1172   : > { %v6720_v52 = vunpack.i.h.bf16 %v6718_v19  ;;  %v6719_v56 = vunpack.i.l.bf16 %v6718_v19 }
0x1173   : > { %v6733_v27 = vpop.permute.xlu0 %6732  ;;  %v5587_v42 = vpop.permute.xlu2 %5586 }
0x1174   : > { %v6735_v29 = vunpack.i.h.bf16 %v6733_v27  ;;  %v6734_v16 = vunpack.i.l.bf16 %v6733_v27  ;;  %v5712_v12 = vsel %vm1215_vm6, %v6719_v56, %v6720_v52  ;;  %v5713_v41 = vsel %vm1215_vm6, %v6720_v52, %v5711_v62  ;;  %v5938_v62 = vpop.f32.mrf.mxu1  ;;  %v6763_v52 = vld [vmem:[%s7018_s23 + $0x8] sm:$0xff] }
0x1175   : > { %5885 = vmatpush.msra.mxu3 %v5712_v12  ;;  %5945 = vmatpush.msrb.mxu2 %v5713_v41 }
0x1176   : > { %v5694_v9 = vsel %vm1086_vm4, %v6734_v16, %v6735_v29  ;;  %v5695_v37 = vsel %vm1086_vm4, %v6735_v29, %v5693_v63 }
0x1177   : > { %5886 = vmatpush.msra.mxu3 %v5694_v9  ;;  %5946 = vmatpush.msrb.mxu2 %v5695_v37 }
0x1179   : > { %v6743_v45 = vpop.permute.xlu1 %6742  ;;  %5887 = vmatpush.msra.mxu3 %v5673_v28  ;;  %5947 = vmatpush.msrb.mxu2 %v5674_v23 }
0x117a   : > { %v6745_v0 = vunpack.i.h.bf16 %v6743_v45  ;;  %v6744_v24 = vunpack.i.l.bf16 %v6743_v45 }
0x117b   : > { %v6748_v35 = vpop.permute.xlu0 %6747  ;;  %5888 = vmatpush.msra.mxu3 %v9448_v14  ;;  %5948 = vmatpush.msrb.mxu2 %v9454_v6 }
0x117c   : > { %v6750_v7 = vunpack.i.h.bf16 %v6748_v35  ;;  %v6749_v55 = vunpack.i.l.bf16 %v6748_v35  ;;  %v5648_v57 = vsel %vm1134_vm2, %v6744_v24, %v6745_v0  ;;  %v5649_v5 = vsel %vm1134_vm2, %v6745_v0, %v5647_v15 }
0x117d   : > { %5889 = vmatpush.msra.mxu3 %v5648_v57  ;;  %5949 = vmatpush.msrb.mxu2 %v5649_v5 }
0x117e   : > { %v5627_v21 = vsel %vm1103_vm1, %v6749_v55, %v6750_v7 }
0x117f   : > { %5890 = vmatpush.msra.mxu3 %v5627_v21 }
0x1181   : > { %v5626_v43 = vpop.permute.xlu1 %5625  ;;  %5891 = vmatpush.msra.mxu3 %v5606_v8 }
0x1182   : > { %v5628_v53 = vsel %vm1103_vm1, %v6750_v7, %v5626_v43 }
0x1183   : > { %v5605_v14 = vpop.permute.xlu0 %5604  ;;  %5950 = vmatpush.msrb.mxu2 %v5628_v53 }
0x1184   : > { %v5607_v6 = vsel %vm1069_vm7, %v6725_v3, %v5605_v14 }
0x1185   : > { %5951 = vmatpush.msrb.mxu2 %v5607_v6 }
0x1189   : > { %v6753_v61 = vpop.permute.xlu1 %6752 }
0x118a   : > { %v6755_v22 = vunpack.i.h.bf16 %v6753_v61  ;;  %v6754_v48 = vunpack.i.l.bf16 %v6753_v61 }
0x118b   : > { %v5836_v10 = vpop.permute.xlu0 %5835 }
0x118c   : > { %v5588_v39 = vsel %vm1016_vm0, %v6754_v48, %v6755_v22  ;;  %v5589_v26 = vsel %vm1016_vm0, %v6755_v22, %v5587_v42  ;;  %v5919_v54 = vadd.f32 %v5918_v59, %v5836_v10 }
0x118d   : > { %5892 = vmatpush.msra.mxu3 %v5588_v39  ;;  %5952 = vmatpush.msrb.mxu2 %v5589_v26 }
0x118e   : > { %v5939_v20 = vadd.f32 %v5938_v62, %v5919_v54 }
0x118f   : > { %5893 = vmatpush.msra.mxu3 %v9973_v32  ;;  %5953 = vmatpush.msrb.mxu2 %v9974_v11 }
0x1191   : > { %5894 = vmatpush.msra.mxu3 %v9975_v51  ;;  %5954 = vmatpush.msrb.mxu2 %v9339_v1  ;;  %v5859_v1 = vadd.f32 %v5858_v44, %v5836_v10 }
0x1193   : > { %5895 = vmatpush.msra.mxu3 %v9976_v60  ;;  %5955 = vmatpush.msrb.mxu2 %v9350_v18  ;;  %v5879_v18 = vadd.f32 %v5878_v2, %v5859_v1 }
0x1195   : > { %5896 = vmatpush.msra.mxu3 %v9344_v49  ;;  %5956 = vmatpush.msrb.mxu2 %v9366_v46 }
0x1196   : > { %6096 = vmatmul.msk.f32.vlgmr.msra.gmra.mxu3 %vm2585_vm11, %v5741_v38  ;;  %6097 = vmatmul.msk.f32.vlgmr.msrb.gmra.mxu2 %vm2585_vm11, %v5741_v38 }
0x1219   : > { %v5898_v49 = vpop.f32.mrf.mxu3  ;;  %v5958_v33 = vpop.f32.mrf.mxu2 }
0x121a   : > { %v5899_v46 = vadd.f32 %v5898_v49, %v5879_v18  ;;  %v5959_v13 = vadd.f32 %v5958_v33, %v5939_v20 }
0x121c   : > { %v5961_v47 = vmul.f32 0.2, %v5899_v46  ;;  %v5962_v34 = vmul.f32 0.2, %v5959_v13 }
0x121e   : > { %v5963_v30 = vadd.f32 %v5961_v47, %v9945_v36  ;;  %v5964_v25 = vadd.f32 %v5962_v34, %v9959_v17 }
0x1220   : > { %v5965_v63 = vmul.f32 0.2, %v5963_v30  ;;  %v5966_v58 = vmul.f32 0.2, %v5964_v25 }
0x1222   : > { %v5967_v19 = vadd.f32 %v6762_v50, %v5965_v63  ;;  %v5968_v56 = vadd.f32 %v6763_v52, %v5966_v58 }
0x1224   : > { %5969 = vst [vmem:[%s1014_s11] sm:$0xff] %v5967_v19 }
0x1225   : > { %5970 = vst [vmem:[%s1014_s11 + $0x8] sm:$0xff] %v5968_v56 }
0x1226 PF: > { %s77_s7 = sadd.s32 1, %s6770_s7  }
0x1227   : > { %p74_p4 = scmp.ge.s32.totalorder %s77_s7, 4  }
0x1229   :  { %76 = sbr.rel (!%p74_p4) target bundleno = 56 (0x38), region = 215 }

</bundles_post_ra>
